<compile_context>
chip_gen: v6e
topology: v6e:2x2x1
jax: 0.10.0
libtpu: 0.0.40
codegen_flags: <defaults>
</compile_context>

<pallas_src>
import functools

import jax
import jax.numpy as jnp
from jax.experimental import pallas as pl
from jax.experimental.pallas import tpu as pltpu

EPS = 1e-5
# Safe on all generations: <= physical VMEM on v7x (64 MiB) and well under
# v5e/v6e's 128 MiB; actual per-kernel usage here is far smaller.
VMEM_LIMIT = 64 * 1024 * 1024


# ----------------------------------------------------------------------------
# Kernel 1: fused multi-input matmul
#   out = [relu]( sum_j x_j @ w[j] + shift [+ residual] )
# Covers: 1x1 convs (+folded BN), the 5-way conv_cat (concat never built),
# the fused theta/phi/g projection, and W_z with the residual add fused in.
# ----------------------------------------------------------------------------
def _make_fused_linear_kernel(n_in, relu, has_res):
    def kernel(*refs):
        x_refs = refs[:n_in]
        w_ref = refs[n_in]
        shift_ref = refs[n_in + 1]
        res_ref = refs[n_in + 2] if has_res else None
        o_ref = refs[-1]
        y = shift_ref[...].astype(jnp.float32)              # (1, N) broadcasts
        for j in range(n_in):
            y = y + jnp.dot(x_refs[j][...], w_ref[j],
                            preferred_element_type=jnp.float32)
        if has_res:
            y = y + res_ref[...].astype(jnp.float32)
        if relu:
            y = jnp.maximum(y, 0.0)
        o_ref[...] = y.astype(o_ref.dtype)
    return kernel


def fused_linear(xs, w, shift, *, relu=True, residual=None,
                 out_dtype=jnp.bfloat16, tm=512):
    """[relu](sum_j xs[j] @ w[j] + shift [+ residual]).

    xs: list of (M, C) bf16 arrays; w: (len(xs), C, N) bf16 with the BN scale
    already folded in; shift: (N,) f32; residual: optional (M, N).
    """
    n_in = len(xs)
    M, C = xs[0].shape
    N = w.shape[-1]
    tm = min(tm, M)
    grid = (pl.cdiv(M, tm),)
    in_specs = [pl.BlockSpec((tm, C), lambda i: (i, 0)) for _ in range(n_in)]
    in_specs += [
        pl.BlockSpec((n_in, C, N), lambda i: (0, 0, 0)),    # weights (resident)
        pl.BlockSpec((1, N), lambda i: (0, 0)),             # shift
    ]
    args = list(xs) + [w, shift.reshape(1, N)]
    if residual is not None:
        in_specs.append(pl.BlockSpec((tm, N), lambda i: (i, 0)))
        args.append(residual)
    return pl.pallas_call(
        _make_fused_linear_kernel(n_in, relu, residual is not None),
        out_shape=jax.ShapeDtypeStruct((M, N), out_dtype),
        grid_spec=pltpu.PrefetchScalarGridSpec(
            num_scalar_prefetch=0,
            grid=grid,
            in_specs=in_specs,
            out_specs=pl.BlockSpec((tm, N), lambda i: (i, 0)),
        ),
        compiler_params=pltpu.CompilerParams(
            dimension_semantics=("parallel",),
            vmem_limit_bytes=VMEM_LIMIT,
        ),
    )(*args)


# ----------------------------------------------------------------------------
# Kernel 2: dilated 3x3 conv + folded BN + ReLU as 9 shifted matmuls.
# Grid (B, H-tiles, 3): the last axis is the kernel-row tap (arbitrary,
# accumulated into a f32 VMEM scratch); the 3 kernel-column taps are static
# in-kernel slices of the width-padded block. No im2col is ever materialized.
# ----------------------------------------------------------------------------
def _dilated_conv_kernel(x_ref, w_ref, shift_ref, o_ref, acc_ref, *, d, w_out):
    ki = pl.program_id(2)

    @pl.when(ki == 0)
    def _():
        acc_ref[...] = jnp.zeros_like(acc_ref)

    xs = x_ref[0]                              # (th, W + 2d, Cin) bf16
    th = xs.shape[0]
    cin = xs.shape[-1]
    acc = acc_ref[...]
    for kj in range(3):                        # static column taps
        xsl = xs[:, kj * d: kj * d + w_out, :].reshape(th * w_out, cin)
        acc = acc + jnp.dot(xsl, w_ref[kj], preferred_element_type=jnp.float32)
    acc_ref[...] = acc

    @pl.when(ki == pl.num_programs(2) - 1)
    def _():
        out = jnp.maximum(acc + shift_ref[...], 0.0)
        o_ref[0] = out.reshape(th, w_out, -1).astype(o_ref.dtype)


def dilated_conv3x3(x, w, shift, d, out_dtype=jnp.bfloat16):
    """3x3 conv, dilation=d, padding=d (same-size) + folded BN + ReLU.

    x: (B, H, W, Cin) bf16; w: (9, Cin, Cout) bf16 (taps raster-ordered,
    BN scale folded); shift: (Cout,) f32. Row-tile size == d so per-tap row
    offsets are block indices (no Element offsets, no im2col).
    Note: W should be a multiple of 8 for cheap in-kernel reshapes.
    """
    B, H, W, Cin = x.shape
    Cout = w.shape[-1]
    th = d
    n_h = pl.cdiv(H, th)
    Hp = n_h * th                              # output rows padded to tile size
    # Padded input has (n_h + 2) * d rows and W + 2d cols: all blocks in-bounds.
    xp = jnp.pad(x, ((0, 0), (d, Hp - H + d), (d, d), (0, 0)))
    Wp = W + 2 * d
    out = pl.pallas_call(
        functools.partial(_dilated_conv_kernel, d=d, w_out=W),
        out_shape=jax.ShapeDtypeStruct((B, Hp, W, Cout), out_dtype),
        grid_spec=pltpu.PrefetchScalarGridSpec(
            num_scalar_prefetch=0,
            grid=(B, n_h, 3),
            in_specs=[
                pl.BlockSpec((1, th, Wp, Cin),
                             lambda b, i, ki: (b, i + ki, 0, 0)),
                pl.BlockSpec((3, Cin, Cout), lambda b, i, ki: (ki, 0, 0)),
                pl.BlockSpec((1, Cout), lambda b, i, ki: (0, 0)),
            ],
            out_specs=pl.BlockSpec((1, th, W, Cout),
                                   lambda b, i, ki: (b, i, 0, 0)),
            scratch_shapes=[pltpu.VMEM((th * W, Cout), jnp.float32)],
        ),
        compiler_params=pltpu.CompilerParams(
            dimension_semantics=("parallel", "parallel", "arbitrary"),
            vmem_limit_bytes=VMEM_LIMIT,
        ),
    )(xp, w, shift.reshape(1, Cout))
    return out[:, :H]


# ----------------------------------------------------------------------------
# Kernel 3: embedded-Gaussian non-local attention, flash-style (online softmax)
# tiled over key blocks; the (N, N) score matrix is never materialized.
# theta/phi/g arrive concatenated on the channel dim of a single tensor.
# ----------------------------------------------------------------------------
def _nonlocal_flash_kernel(q_ref, kv_ref, o_ref, m_sc, l_sc, acc_sc, *, inter):
    kv_i = pl.program_id(2)

    @pl.when(kv_i == 0)
    def _():
        m_sc[...] = jnp.full_like(m_sc, -jnp.inf)
        l_sc[...] = jnp.zeros_like(l_sc)
        acc_sc[...] = jnp.zeros_like(acc_sc)

    q = q_ref[0]                               # (tq, 3*inter) bf16
    kv = kv_ref[0]                             # (tkv, 3*inter) bf16
    th = q[:, :inter]                          # theta
    ph = kv[:, inter:2 * inter]                # phi
    gv = kv[:, 2 * inter:3 * inter]            # g
    s = jax.lax.dot_general(th, ph, (((1,), (1,)), ((), ())),
                            preferred_element_type=jnp.float32)  # (tq, tkv)
    m_prev = m_sc[...]
    m_new = jnp.maximum(m_prev, jnp.max(s, axis=-1, keepdims=True))
    alpha = jnp.exp(m_prev - m_new)
    p = jnp.exp(s - m_new)
    l_sc[...] = alpha * l_sc[...] + jnp.sum(p, axis=-1, keepdims=True)
    acc_sc[...] = alpha * acc_sc[...] + jnp.dot(
        p.astype(gv.dtype), gv, preferred_element_type=jnp.float32)
    m_sc[...] = m_new

    @pl.when(kv_i == pl.num_programs(2) - 1)
    def _():
        inv_l = pl.reciprocal(l_sc[...], approx=True)
        o_ref[0] = (acc_sc[...] * inv_l).astype(o_ref.dtype)


def nonlocal_attention(tpg, inter):
    """softmax(theta @ phi^T) @ g with theta/phi/g packed as (B, N, 3*inter)."""
    B, N, C3 = tpg.shape
    tq = tkv = 128 if N % 128 == 0 else N      # key tiles must divide N exactly
    grid = (B, N // tq, N // tkv)
    return pl.pallas_call(
        functools.partial(_nonlocal_flash_kernel, inter=inter),
        out_shape=jax.ShapeDtypeStruct((B, N, inter), jnp.bfloat16),
        grid_spec=pltpu.PrefetchScalarGridSpec(
            num_scalar_prefetch=0,
            grid=grid,
            in_specs=[
                pl.BlockSpec((1, tq, C3), lambda b, qi, ki: (b, qi, 0)),
                pl.BlockSpec((1, tkv, C3), lambda b, qi, ki: (b, ki, 0)),
            ],
            out_specs=pl.BlockSpec((1, tq, inter), lambda b, qi, ki: (b, qi, 0)),
            scratch_shapes=[pltpu.VMEM((tq, 1), jnp.float32),
                            pltpu.VMEM((tq, 1), jnp.float32),
                            pltpu.VMEM((tq, inter), jnp.float32)],
        ),
        compiler_params=pltpu.CompilerParams(
            dimension_semantics=("parallel", "parallel", "arbitrary"),
            vmem_limit_bytes=VMEM_LIMIT,
        ),
    )(tpg, tpg)


# ----------------------------------------------------------------------------
# Plain-JAX glue (tiny pooling matrices / nearest resize / layout)
# ----------------------------------------------------------------------------
def adaptive_pool_matrix(in_size, out_size):
    """Averaging matrix (out, in) matching nn.AdaptiveAvgPool2d bins."""
    rows = []
    for i in range(out_size):
        start = (i * in_size) // out_size
        end = -((-(i + 1) * in_size) // out_size)
        row = jnp.zeros((in_size,), jnp.float32).at[start:end].set(
            1.0 / (end - start))
        rows.append(row)
    return jnp.stack(rows)


def nearest_resize(x, H, W):
    """(B,h,w,C) -> (B,H,W,C), PyTorch F.interpolate(mode='nearest') indexing."""
    B, h, w, C = x.shape
    hi = (jnp.arange(H) * h) // H
    wi = (jnp.arange(W) * w) // W
    return x[:, hi][:, :, wi]


# ----------------------------------------------------------------------------
# Deterministic parameter init. BN is folded: scale goes into the weights
# (host-side), so kernels only add a shift. Weights stored in bf16.
# ----------------------------------------------------------------------------
def _fold_bn(w2d, b, gamma, beta, mean, var):
    scale = gamma / jnp.sqrt(var + EPS)
    return w2d * scale[None, :], (b - mean) * scale + beta


def init_conv_bn(key, cin, cout, ksize=1, chunks=1):
    kw, kb, kg, kbe, km, kv = jax.random.split(key, 6)
    fan = cin * ksize * ksize
    w = jax.random.normal(kw, (ksize * ksize * cin, cout), jnp.float32)
    w = w / jnp.sqrt(fan)
    b = 0.1 * jax.random.normal(kb, (cout,), jnp.float32)
    gamma = 1.0 + 0.1 * jax.random.normal(kg, (cout,), jnp.float32)
    beta = 0.1 * jax.random.normal(kbe, (cout,), jnp.float32)
    mean = 0.1 * jax.random.normal(km, (cout,), jnp.float32)
    var = 1.0 + 0.1 * jnp.abs(jax.random.normal(kv, (cout,), jnp.float32))
    w, shift = _fold_bn(w, b, gamma, beta, mean, var)
    if ksize == 3:
        w = w.reshape(9, cin, cout)            # tap-major: (ki*3 + kj, Cin, Cout)
    else:
        w = w.reshape(chunks, cin // chunks, cout)
    return {"w": w.astype(jnp.bfloat16), "shift": shift}


def init_conv(key, cin, cout):
    kw, kb = jax.random.split(key, 2)
    w = jax.random.normal(kw, (1, cin, cout), jnp.float32) / jnp.sqrt(cin)
    b = 0.1 * jax.random.normal(kb, (cout,), jnp.float32)
    return {"w": w.astype(jnp.bfloat16), "shift": b}


def init_aspp_params(key, dim_in, dim_out):
    inter = int(dim_out * 0.5)
    ks = jax.random.split(key, 10)
    theta = init_conv(ks[6], dim_out, inter)
    phi = init_conv(ks[7], dim_out, inter)
    g = init_conv(ks[8], dim_out, inter)
    # theta/phi/g fused into one wide projection: read `aspp` once.
    tpg = {"w": jnp.concatenate([theta["w"], phi["w"], g["w"]], axis=-1),
           "shift": jnp.concatenate([theta["shift"], phi["shift"], g["shift"]])}
    return {
        "b1": init_conv_bn(ks[0], dim_in, dim_out, 1),
        "b2": init_conv_bn(ks[1], dim_in, dim_out, 3),
        "b3": init_conv_bn(ks[2], dim_in, dim_out, 3),
        "b4": init_conv_bn(ks[3], dim_in, dim_out, 3),
        "b5": init_conv_bn(ks[4], dim_in, dim_out, 1),
        "cat": init_conv_bn(ks[5], dim_out * 5, dim_out, 1, chunks=5),
        "tpg": tpg,
        "wz": init_conv(ks[9], inter, dim_out),
    }


# ----------------------------------------------------------------------------
# ASPP forward (NCHW in / NCHW out, matching the PyTorch module)
# ----------------------------------------------------------------------------
def aspp_forward(x_nchw, params, rate=1):
    x_f32 = jnp.transpose(x_nchw, (0, 2, 3, 1)).astype(jnp.float32)   # NHWC
    B, H, W, Cin = x_f32.shape
    x = x_f32.astype(jnp.bfloat16)
    dim_out = params["b1"]["w"].shape[-1]
    inter = params["wz"]["w"].shape[1]
    M = B * H * W
    flat = x.reshape(M, Cin)

    # branch 1: 1x1 conv + folded BN + ReLU
    b1 = fused_linear([flat], params["b1"]["w"], params["b1"]["shift"])

    # branches 2-4: dilated 3x3 conv + folded BN + ReLU (no im2col)
    b2 = dilated_conv3x3(x, params["b2"]["w"], params["b2"]["shift"], 6 * rate)
    b3 = dilated_conv3x3(x, params["b3"]["w"], params["b3"]["shift"], 12 * rate)
    b4 = dilated_conv3x3(x, params["b4"]["w"], params["b4"]["shift"], 18 * rate)

    # branch 5: adaptive avg pool 7x7 -> 1x1 conv + BN + ReLU -> nearest resize
    Ah = adaptive_pool_matrix(H, 7)
    Aw = adaptive_pool_matrix(W, 7)
    pooled = jnp.einsum("ph,bhwc,qw->bpqc", Ah, x_f32, Aw)            # (B,7,7,C)
    g5 = fused_linear([pooled.astype(jnp.bfloat16).reshape(-1, Cin)],
                      params["b5"]["w"], params["b5"]["shift"])
    g5 = nearest_resize(g5.reshape(B, 7, 7, dim_out), H, W)

    # conv_cat as 5 accumulated matmuls -- the (B,H,W,5*dim_out) concat is
    # never materialized in HBM. Channel order matches torch.cat dim=1.
    cat_in = [b1,
              b2.reshape(M, dim_out), b3.reshape(M, dim_out),
              b4.reshape(M, dim_out), g5.reshape(M, dim_out)]
    aspp = fused_linear(cat_in, params["cat"]["w"], params["cat"]["shift"])

    # non-local embedded-Gaussian block:
    # fused theta/phi/g projection -> flash attention -> W_z (+ fused residual)
    tpg = fused_linear([aspp], params["tpg"]["w"], params["tpg"]["shift"],
                       relu=False)                                    # (M, 3I)
    y = nonlocal_attention(tpg.reshape(B, H * W, 3 * inter), inter)   # (B,HW,I)
    out = fused_linear([y.reshape(M, inter)], params["wz"]["w"],
                       params["wz"]["shift"], relu=False,
                       residual=aspp, out_dtype=jnp.float32)          # (M, C)
    return jnp.transpose(out.reshape(B, H, W, dim_out), (0, 3, 1, 2))  # NCHW


if __name__ == "__main__":
    key = jax.random.PRNGKey(0)
    kx, kp = jax.random.split(key)
    dim_in, dim_out = 4, 8
    B, H, W = 2, 16, 16
    x = jax.random.normal(kx, (B, dim_in, H, W), jnp.float32)
    params = init_aspp_params(kp, dim_in, dim_out)

    fwd = jax.jit(functools.partial(aspp_forward, rate=1))
    out = fwd(x, params)
    jax.block_until_ready(out)
    assert out.shape == (B, dim_out, H, W), out.shape
    assert jnp.all(jnp.isfinite(out))
    print("KERNEL_OK")
</pallas_src>

<mosaic_0001>
module attributes {stable_mosaic.version = 11 : i64} {
  func.func @_dilated_conv_kernel(%arg0: i32, %arg1: i32, %arg2: i32, %arg3: memref<1x18x52x4xbf16, #tpu.memory_space<vmem>>, %arg4: memref<3x4x8xbf16, #tpu.memory_space<vmem>>, %arg5: memref<1x8xf32, #tpu.memory_space<vmem>>, %arg6: memref<1x18x16x8xbf16, #tpu.memory_space<vmem>>, %arg7: memref<288x8xf32, #tpu.memory_space<vmem>>) attributes {dimension_semantics = [#tpu.dimension_semantics<parallel>, #tpu.dimension_semantics<parallel>, #tpu.dimension_semantics<arbitrary>], iteration_bounds = array<i64: 2, 1, 3>, scalar_prefetch = 0 : i64, scratch_operands = 1 : i64, tpu.core_type = #tpu.core_type<tc>, window_params = [{transform_indices = @transform_0, window_bounds = array<i64: 1, 18, 52, 4>}, {transform_indices = @transform_1, window_bounds = array<i64: 3, 4, 8>}, {pipeline_mode = #tpu.pipeline_mode<synchronous>, transform_indices = @transform_2, window_bounds = array<i64: 1, 8>}, {transform_indices = @transform_3, window_bounds = array<i64: 1, 18, 16, 8>}]} {
    %c0_i32 = arith.constant 0 : i32
    %0 = arith.cmpi eq, %arg2, %c0_i32 : i32
    %1 = arith.extui %0 : i1 to i32
    %c0_i32_0 = arith.constant 0 : i32
    %2 = arith.cmpi ne, %1, %c0_i32_0 : i32
    scf.if %2 {
      %cst_18 = arith.constant 0.000000e+00 : f32
      %28 = vector.broadcast %cst_18 : f32 to vector<288x8xf32>
      %c0_19 = arith.constant 0 : index
      %c0_20 = arith.constant 0 : index
      %29 = vector.load %arg7[%c0_19, %c0_20] : memref<288x8xf32, #tpu.memory_space<vmem>>, vector<288x8xf32>
      tpu.vector_store %arg7[%c0_19, %c0_20], %28 {strides = array<i32>} : memref<288x8xf32, #tpu.memory_space<vmem>>, vector<288x8xf32>,
    } else {
    }
    %c0 = arith.constant 0 : index
    %c0_1 = arith.constant 0 : index
    %c0_2 = arith.constant 0 : index
    %c0_3 = arith.constant 0 : index
    %3 = vector.load %arg3[%c0, %c0_1, %c0_2, %c0_3] : memref<1x18x52x4xbf16, #tpu.memory_space<vmem>>, vector<1x18x52x4xbf16>
    %4 = vector.shape_cast %3 : vector<1x18x52x4xbf16> to vector<18x52x4xbf16>
    %c0_4 = arith.constant 0 : index
    %c0_5 = arith.constant 0 : index
    %5 = vector.load %arg7[%c0_4, %c0_5] : memref<288x8xf32, #tpu.memory_space<vmem>>, vector<288x8xf32>
    %6 = vector.extract_strided_slice %4 {offsets = [0, 0, 0], sizes = [18, 16, 4], strides = [1, 1, 1]} : vector<18x52x4xbf16> to vector<18x16x4xbf16>
    %7 = vector.shape_cast %6 : vector<18x16x4xbf16> to vector<288x4xbf16>
    %c0_6 = arith.constant 0 : index
    %c0_7 = arith.constant 0 : index
    %c0_8 = arith.constant 0 : index
    %8 = vector.load %arg4[%c0_6, %c0_7, %c0_8] : memref<3x4x8xbf16, #tpu.memory_space<vmem>>, vector<1x4x8xbf16>
    %9 = vector.shape_cast %8 : vector<1x4x8xbf16> to vector<4x8xbf16>
    %cst = arith.constant dense<0.000000e+00> : vector<288x8xf32>
    %10 = tpu.matmul %7, %9, %cst {dimension_numbers = #tpu.dot_dimension_numbers<[1], [0], [0], [1], [0, 0, 1, 1], [], []>} : vector<288x4xbf16>, vector<4x8xbf16>, vector<288x8xf32> -> vector<288x8xf32>
    %11 = arith.addf %5, %10 : vector<288x8xf32>
    %12 = vector.extract_strided_slice %4 {offsets = [0, 18, 0], sizes = [18, 16, 4], strides = [1, 1, 1]} : vector<18x52x4xbf16> to vector<18x16x4xbf16>
    %13 = vector.shape_cast %12 : vector<18x16x4xbf16> to vector<288x4xbf16>
    %c1 = arith.constant 1 : index
    %c0_9 = arith.constant 0 : index
    %c0_10 = arith.constant 0 : index
    %14 = vector.load %arg4[%c1, %c0_9, %c0_10] : memref<3x4x8xbf16, #tpu.memory_space<vmem>>, vector<1x4x8xbf16>
    %15 = vector.shape_cast %14 : vector<1x4x8xbf16> to vector<4x8xbf16>
    %cst_11 = arith.constant dense<0.000000e+00> : vector<288x8xf32>
    %16 = tpu.matmul %13, %15, %cst_11 {dimension_numbers = #tpu.dot_dimension_numbers<[1], [0], [0], [1], [0, 0, 1, 1], [], []>} : vector<288x4xbf16>, vector<4x8xbf16>, vector<288x8xf32> -> vector<288x8xf32>
    %17 = arith.addf %11, %16 : vector<288x8xf32>
    %18 = vector.extract_strided_slice %4 {offsets = [0, 36, 0], sizes = [18, 16, 4], strides = [1, 1, 1]} : vector<18x52x4xbf16> to vector<18x16x4xbf16>
    %19 = vector.shape_cast %18 : vector<18x16x4xbf16> to vector<288x4xbf16>
    %c2 = arith.constant 2 : index
    %c0_12 = arith.constant 0 : index
    %c0_13 = arith.constant 0 : index
    %20 = vector.load %arg4[%c2, %c0_12, %c0_13] : memref<3x4x8xbf16, #tpu.memory_space<vmem>>, vector<1x4x8xbf16>
    %21 = vector.shape_cast %20 : vector<1x4x8xbf16> to vector<4x8xbf16>
    %cst_14 = arith.constant dense<0.000000e+00> : vector<288x8xf32>
    %22 = tpu.matmul %19, %21, %cst_14 {dimension_numbers = #tpu.dot_dimension_numbers<[1], [0], [0], [1], [0, 0, 1, 1], [], []>} : vector<288x4xbf16>, vector<4x8xbf16>, vector<288x8xf32> -> vector<288x8xf32>
    %23 = arith.addf %17, %22 : vector<288x8xf32>
    %c0_15 = arith.constant 0 : index
    %c0_16 = arith.constant 0 : index
    %24 = vector.load %arg7[%c0_15, %c0_16] : memref<288x8xf32, #tpu.memory_space<vmem>>, vector<288x8xf32>
    tpu.vector_store %arg7[%c0_15, %c0_16], %23 {strides = array<i32>} : memref<288x8xf32, #tpu.memory_space<vmem>>, vector<288x8xf32>,
    %c2_i32 = arith.constant 2 : i32
    %25 = arith.cmpi eq, %arg2, %c2_i32 : i32
    %26 = arith.extui %25 : i1 to i32
    %c0_i32_17 = arith.constant 0 : i32
    %27 = arith.cmpi ne, %26, %c0_i32_17 : i32
    scf.if %27 {
      %c0_18 = arith.constant 0 : index
      %c0_19 = arith.constant 0 : index
      %28 = vector.load %arg5[%c0_18, %c0_19] : memref<1x8xf32, #tpu.memory_space<vmem>>, vector<1x8xf32>
      %29 = vector.broadcast %28 : vector<1x8xf32> to vector<288x8xf32>
      %30 = arith.addf %23, %29 : vector<288x8xf32>
      %cst_20 = arith.constant 0.000000e+00 : f32
      %31 = vector.broadcast %cst_20 : f32 to vector<288x8xf32>
      %32 = arith.maximumf %30, %31 : vector<288x8xf32>
      %33 = vector.shape_cast %32 : vector<288x8xf32> to vector<18x16x8xf32>
      %34 = arith.truncf %33 : vector<18x16x8xf32> to vector<18x16x8xbf16>
      %c0_21 = arith.constant 0 : index
      %c0_22 = arith.constant 0 : index
      %c0_23 = arith.constant 0 : index
      %c0_24 = arith.constant 0 : index
      %35 = vector.load %arg6[%c0_21, %c0_22, %c0_23, %c0_24] : memref<1x18x16x8xbf16, #tpu.memory_space<vmem>>, vector<1x18x16x8xbf16>
      %36 = vector.shape_cast %35 : vector<1x18x16x8xbf16> to vector<18x16x8xbf16>
      %37 = vector.shape_cast %34 : vector<18x16x8xbf16> to vector<1x18x16x8xbf16>
      tpu.vector_store %arg6[%c0_21, %c0_22, %c0_23, %c0_24], %37 {strides = array<i32>} : memref<1x18x16x8xbf16, #tpu.memory_space<vmem>>, vector<1x18x16x8xbf16>,
    } else {
    }
    return
  }
  func.func @transform_0(%arg0: i32, %arg1: i32, %arg2: i32) -> (i32, i32, i32, i32) {
    %0 = arith.addi %arg1, %arg2 : i32
    %c0_i32 = arith.constant 0 : i32
    %c0_i32_0 = arith.constant 0 : i32
    %c0_i32_1 = arith.constant 0 : i32
    return %arg0, %0, %c0_i32, %c0_i32_0 : i32, i32, i32, i32
  }
  func.func @transform_1(%arg0: i32, %arg1: i32, %arg2: i32) -> (i32, i32, i32) {
    %c0_i32 = arith.constant 0 : i32
    %c0_i32_0 = arith.constant 0 : i32
    %c0_i32_1 = arith.constant 0 : i32
    return %arg2, %c0_i32, %c0_i32_0 : i32, i32, i32
  }
  func.func @transform_2(%arg0: i32, %arg1: i32, %arg2: i32) -> (i32, i32) {
    %c0_i32 = arith.constant 0 : i32
    %c0_i32_0 = arith.constant 0 : i32
    %c0_i32_1 = arith.constant 0 : i32
    return %c0_i32, %c0_i32_0 : i32, i32
  }
  func.func @transform_3(%arg0: i32, %arg1: i32, %arg2: i32) -> (i32, i32, i32, i32) {
    %c0_i32 = arith.constant 0 : i32
    %c0_i32_0 = arith.constant 0 : i32
    %c0_i32_1 = arith.constant 0 : i32
    return %arg0, %arg1, %c0_i32, %c0_i32_0 : i32, i32, i32, i32
  }
}

module attributes {stable_mosaic.version = 11 : i64} {
  func.func @_dilated_conv_kernel(%arg0: i32, %arg1: i32, %arg2: i32, %arg3: memref<1x12x40x4xbf16, #tpu.memory_space<vmem>>, %arg4: memref<3x4x8xbf16, #tpu.memory_space<vmem>>, %arg5: memref<1x8xf32, #tpu.memory_space<vmem>>, %arg6: memref<1x12x16x8xbf16, #tpu.memory_space<vmem>>, %arg7: memref<192x8xf32, #tpu.memory_space<vmem>>) attributes {dimension_semantics = [#tpu.dimension_semantics<parallel>, #tpu.dimension_semantics<parallel>, #tpu.dimension_semantics<arbitrary>], iteration_bounds = array<i64: 2, 2, 3>, scalar_prefetch = 0 : i64, scratch_operands = 1 : i64, tpu.core_type = #tpu.core_type<tc>, window_params = [{transform_indices = @transform_0, window_bounds = array<i64: 1, 12, 40, 4>}, {transform_indices = @transform_1, window_bounds = array<i64: 3, 4, 8>}, {pipeline_mode = #tpu.pipeline_mode<synchronous>, transform_indices = @transform_2, window_bounds = array<i64: 1, 8>}, {transform_indices = @transform_3, window_bounds = array<i64: 1, 12, 16, 8>}]} {
    %c0_i32 = arith.constant 0 : i32
    %0 = arith.cmpi eq, %arg2, %c0_i32 : i32
    %1 = arith.extui %0 : i1 to i32
    %c0_i32_0 = arith.constant 0 : i32
    %2 = arith.cmpi ne, %1, %c0_i32_0 : i32
    scf.if %2 {
      %cst_18 = arith.constant 0.000000e+00 : f32
      %28 = vector.broadcast %cst_18 : f32 to vector<192x8xf32>
      %c0_19 = arith.constant 0 : index
      %c0_20 = arith.constant 0 : index
      %29 = vector.load %arg7[%c0_19, %c0_20] : memref<192x8xf32, #tpu.memory_space<vmem>>, vector<192x8xf32>
      tpu.vector_store %arg7[%c0_19, %c0_20], %28 {strides = array<i32>} : memref<192x8xf32, #tpu.memory_space<vmem>>, vector<192x8xf32>,
    } else {
    }
    %c0 = arith.constant 0 : index
    %c0_1 = arith.constant 0 : index
    %c0_2 = arith.constant 0 : index
    %c0_3 = arith.constant 0 : index
    %3 = vector.load %arg3[%c0, %c0_1, %c0_2, %c0_3] : memref<1x12x40x4xbf16, #tpu.memory_space<vmem>>, vector<1x12x40x4xbf16>
    %4 = vector.shape_cast %3 : vector<1x12x40x4xbf16> to vector<12x40x4xbf16>
    %c0_4 = arith.constant 0 : index
    %c0_5 = arith.constant 0 : index
    %5 = vector.load %arg7[%c0_4, %c0_5] : memref<192x8xf32, #tpu.memory_space<vmem>>, vector<192x8xf32>
    %6 = vector.extract_strided_slice %4 {offsets = [0, 0, 0], sizes = [12, 16, 4], strides = [1, 1, 1]} : vector<12x40x4xbf16> to vector<12x16x4xbf16>
    %7 = vector.shape_cast %6 : vector<12x16x4xbf16> to vector<192x4xbf16>
    %c0_6 = arith.constant 0 : index
    %c0_7 = arith.constant 0 : index
    %c0_8 = arith.constant 0 : index
    %8 = vector.load %arg4[%c0_6, %c0_7, %c0_8] : memref<3x4x8xbf16, #tpu.memory_space<vmem>>, vector<1x4x8xbf16>
    %9 = vector.shape_cast %8 : vector<1x4x8xbf16> to vector<4x8xbf16>
    %cst = arith.constant dense<0.000000e+00> : vector<192x8xf32>
    %10 = tpu.matmul %7, %9, %cst {dimension_numbers = #tpu.dot_dimension_numbers<[1], [0], [0], [1], [0, 0, 1, 1], [], []>} : vector<192x4xbf16>, vector<4x8xbf16>, vector<192x8xf32> -> vector<192x8xf32>
    %11 = arith.addf %5, %10 : vector<192x8xf32>
    %12 = vector.extract_strided_slice %4 {offsets = [0, 12, 0], sizes = [12, 16, 4], strides = [1, 1, 1]} : vector<12x40x4xbf16> to vector<12x16x4xbf16>
    %13 = vector.shape_cast %12 : vector<12x16x4xbf16> to vector<192x4xbf16>
    %c1 = arith.constant 1 : index
    %c0_9 = arith.constant 0 : index
    %c0_10 = arith.constant 0 : index
    %14 = vector.load %arg4[%c1, %c0_9, %c0_10] : memref<3x4x8xbf16, #tpu.memory_space<vmem>>, vector<1x4x8xbf16>
    %15 = vector.shape_cast %14 : vector<1x4x8xbf16> to vector<4x8xbf16>
    %cst_11 = arith.constant dense<0.000000e+00> : vector<192x8xf32>
    %16 = tpu.matmul %13, %15, %cst_11 {dimension_numbers = #tpu.dot_dimension_numbers<[1], [0], [0], [1], [0, 0, 1, 1], [], []>} : vector<192x4xbf16>, vector<4x8xbf16>, vector<192x8xf32> -> vector<192x8xf32>
    %17 = arith.addf %11, %16 : vector<192x8xf32>
    %18 = vector.extract_strided_slice %4 {offsets = [0, 24, 0], sizes = [12, 16, 4], strides = [1, 1, 1]} : vector<12x40x4xbf16> to vector<12x16x4xbf16>
    %19 = vector.shape_cast %18 : vector<12x16x4xbf16> to vector<192x4xbf16>
    %c2 = arith.constant 2 : index
    %c0_12 = arith.constant 0 : index
    %c0_13 = arith.constant 0 : index
    %20 = vector.load %arg4[%c2, %c0_12, %c0_13] : memref<3x4x8xbf16, #tpu.memory_space<vmem>>, vector<1x4x8xbf16>
    %21 = vector.shape_cast %20 : vector<1x4x8xbf16> to vector<4x8xbf16>
    %cst_14 = arith.constant dense<0.000000e+00> : vector<192x8xf32>
    %22 = tpu.matmul %19, %21, %cst_14 {dimension_numbers = #tpu.dot_dimension_numbers<[1], [0], [0], [1], [0, 0, 1, 1], [], []>} : vector<192x4xbf16>, vector<4x8xbf16>, vector<192x8xf32> -> vector<192x8xf32>
    %23 = arith.addf %17, %22 : vector<192x8xf32>
    %c0_15 = arith.constant 0 : index
    %c0_16 = arith.constant 0 : index
    %24 = vector.load %arg7[%c0_15, %c0_16] : memref<192x8xf32, #tpu.memory_space<vmem>>, vector<192x8xf32>
    tpu.vector_store %arg7[%c0_15, %c0_16], %23 {strides = array<i32>} : memref<192x8xf32, #tpu.memory_space<vmem>>, vector<192x8xf32>,
    %c2_i32 = arith.constant 2 : i32
    %25 = arith.cmpi eq, %arg2, %c2_i32 : i32
    %26 = arith.extui %25 : i1 to i32
    %c0_i32_17 = arith.constant 0 : i32
    %27 = arith.cmpi ne, %26, %c0_i32_17 : i32
    scf.if %27 {
      %c0_18 = arith.constant 0 : index
      %c0_19 = arith.constant 0 : index
      %28 = vector.load %arg5[%c0_18, %c0_19] : memref<1x8xf32, #tpu.memory_space<vmem>>, vector<1x8xf32>
      %29 = vector.broadcast %28 : vector<1x8xf32> to vector<192x8xf32>
      %30 = arith.addf %23, %29 : vector<192x8xf32>
      %cst_20 = arith.constant 0.000000e+00 : f32
      %31 = vector.broadcast %cst_20 : f32 to vector<192x8xf32>
      %32 = arith.maximumf %30, %31 : vector<192x8xf32>
      %33 = vector.shape_cast %32 : vector<192x8xf32> to vector<12x16x8xf32>
      %34 = arith.truncf %33 : vector<12x16x8xf32> to vector<12x16x8xbf16>
      %c0_21 = arith.constant 0 : index
      %c0_22 = arith.constant 0 : index
      %c0_23 = arith.constant 0 : index
      %c0_24 = arith.constant 0 : index
      %35 = vector.load %arg6[%c0_21, %c0_22, %c0_23, %c0_24] : memref<1x12x16x8xbf16, #tpu.memory_space<vmem>>, vector<1x12x16x8xbf16>
      %36 = vector.shape_cast %35 : vector<1x12x16x8xbf16> to vector<12x16x8xbf16>
      %37 = vector.shape_cast %34 : vector<12x16x8xbf16> to vector<1x12x16x8xbf16>
      tpu.vector_store %arg6[%c0_21, %c0_22, %c0_23, %c0_24], %37 {strides = array<i32>} : memref<1x12x16x8xbf16, #tpu.memory_space<vmem>>, vector<1x12x16x8xbf16>,
    } else {
    }
    return
  }
  func.func @transform_0(%arg0: i32, %arg1: i32, %arg2: i32) -> (i32, i32, i32, i32) {
    %0 = arith.addi %arg1, %arg2 : i32
    %c0_i32 = arith.constant 0 : i32
    %c0_i32_0 = arith.constant 0 : i32
    %c0_i32_1 = arith.constant 0 : i32
    return %arg0, %0, %c0_i32, %c0_i32_0 : i32, i32, i32, i32
  }
  func.func @transform_1(%arg0: i32, %arg1: i32, %arg2: i32) -> (i32, i32, i32) {
    %c0_i32 = arith.constant 0 : i32
    %c0_i32_0 = arith.constant 0 : i32
    %c0_i32_1 = arith.constant 0 : i32
    return %arg2, %c0_i32, %c0_i32_0 : i32, i32, i32
  }
  func.func @transform_2(%arg0: i32, %arg1: i32, %arg2: i32) -> (i32, i32) {
    %c0_i32 = arith.constant 0 : i32
    %c0_i32_0 = arith.constant 0 : i32
    %c0_i32_1 = arith.constant 0 : i32
    return %c0_i32, %c0_i32_0 : i32, i32
  }
  func.func @transform_3(%arg0: i32, %arg1: i32, %arg2: i32) -> (i32, i32, i32, i32) {
    %c0_i32 = arith.constant 0 : i32
    %c0_i32_0 = arith.constant 0 : i32
    %c0_i32_1 = arith.constant 0 : i32
    return %arg0, %arg1, %c0_i32, %c0_i32_0 : i32, i32, i32, i32
  }
}

module attributes {stable_mosaic.version = 11 : i64} {
  func.func @_dilated_conv_kernel(%arg0: i32, %arg1: i32, %arg2: i32, %arg3: memref<1x6x28x4xbf16, #tpu.memory_space<vmem>>, %arg4: memref<3x4x8xbf16, #tpu.memory_space<vmem>>, %arg5: memref<1x8xf32, #tpu.memory_space<vmem>>, %arg6: memref<1x6x16x8xbf16, #tpu.memory_space<vmem>>, %arg7: memref<96x8xf32, #tpu.memory_space<vmem>>) attributes {dimension_semantics = [#tpu.dimension_semantics<parallel>, #tpu.dimension_semantics<parallel>, #tpu.dimension_semantics<arbitrary>], iteration_bounds = array<i64: 2, 3, 3>, scalar_prefetch = 0 : i64, scratch_operands = 1 : i64, tpu.core_type = #tpu.core_type<tc>, window_params = [{transform_indices = @transform_0, window_bounds = array<i64: 1, 6, 28, 4>}, {transform_indices = @transform_1, window_bounds = array<i64: 3, 4, 8>}, {pipeline_mode = #tpu.pipeline_mode<synchronous>, transform_indices = @transform_2, window_bounds = array<i64: 1, 8>}, {transform_indices = @transform_3, window_bounds = array<i64: 1, 6, 16, 8>}]} {
    %c0_i32 = arith.constant 0 : i32
    %0 = arith.cmpi eq, %arg2, %c0_i32 : i32
    %1 = arith.extui %0 : i1 to i32
    %c0_i32_0 = arith.constant 0 : i32
    %2 = arith.cmpi ne, %1, %c0_i32_0 : i32
    scf.if %2 {
      %cst_18 = arith.constant 0.000000e+00 : f32
      %28 = vector.broadcast %cst_18 : f32 to vector<96x8xf32>
      %c0_19 = arith.constant 0 : index
      %c0_20 = arith.constant 0 : index
      %29 = vector.load %arg7[%c0_19, %c0_20] : memref<96x8xf32, #tpu.memory_space<vmem>>, vector<96x8xf32>
      tpu.vector_store %arg7[%c0_19, %c0_20], %28 {strides = array<i32>} : memref<96x8xf32, #tpu.memory_space<vmem>>, vector<96x8xf32>,
    } else {
    }
    %c0 = arith.constant 0 : index
    %c0_1 = arith.constant 0 : index
    %c0_2 = arith.constant 0 : index
    %c0_3 = arith.constant 0 : index
    %3 = vector.load %arg3[%c0, %c0_1, %c0_2, %c0_3] : memref<1x6x28x4xbf16, #tpu.memory_space<vmem>>, vector<1x6x28x4xbf16>
    %4 = vector.shape_cast %3 : vector<1x6x28x4xbf16> to vector<6x28x4xbf16>
    %c0_4 = arith.constant 0 : index
    %c0_5 = arith.constant 0 : index
    %5 = vector.load %arg7[%c0_4, %c0_5] : memref<96x8xf32, #tpu.memory_space<vmem>>, vector<96x8xf32>
    %6 = vector.extract_strided_slice %4 {offsets = [0, 0, 0], sizes = [6, 16, 4], strides = [1, 1, 1]} : vector<6x28x4xbf16> to vector<6x16x4xbf16>
    %7 = vector.shape_cast %6 : vector<6x16x4xbf16> to vector<96x4xbf16>
    %c0_6 = arith.constant 0 : index
    %c0_7 = arith.constant 0 : index
    %c0_8 = arith.constant 0 : index
    %8 = vector.load %arg4[%c0_6, %c0_7, %c0_8] : memref<3x4x8xbf16, #tpu.memory_space<vmem>>, vector<1x4x8xbf16>
    %9 = vector.shape_cast %8 : vector<1x4x8xbf16> to vector<4x8xbf16>
    %cst = arith.constant dense<0.000000e+00> : vector<96x8xf32>
    %10 = tpu.matmul %7, %9, %cst {dimension_numbers = #tpu.dot_dimension_numbers<[1], [0], [0], [1], [0, 0, 1, 1], [], []>} : vector<96x4xbf16>, vector<4x8xbf16>, vector<96x8xf32> -> vector<96x8xf32>
    %11 = arith.addf %5, %10 : vector<96x8xf32>
    %12 = vector.extract_strided_slice %4 {offsets = [0, 6, 0], sizes = [6, 16, 4], strides = [1, 1, 1]} : vector<6x28x4xbf16> to vector<6x16x4xbf16>
    %13 = vector.shape_cast %12 : vector<6x16x4xbf16> to vector<96x4xbf16>
    %c1 = arith.constant 1 : index
    %c0_9 = arith.constant 0 : index
    %c0_10 = arith.constant 0 : index
    %14 = vector.load %arg4[%c1, %c0_9, %c0_10] : memref<3x4x8xbf16, #tpu.memory_space<vmem>>, vector<1x4x8xbf16>
    %15 = vector.shape_cast %14 : vector<1x4x8xbf16> to vector<4x8xbf16>
    %cst_11 = arith.constant dense<0.000000e+00> : vector<96x8xf32>
    %16 = tpu.matmul %13, %15, %cst_11 {dimension_numbers = #tpu.dot_dimension_numbers<[1], [0], [0], [1], [0, 0, 1, 1], [], []>} : vector<96x4xbf16>, vector<4x8xbf16>, vector<96x8xf32> -> vector<96x8xf32>
    %17 = arith.addf %11, %16 : vector<96x8xf32>
    %18 = vector.extract_strided_slice %4 {offsets = [0, 12, 0], sizes = [6, 16, 4], strides = [1, 1, 1]} : vector<6x28x4xbf16> to vector<6x16x4xbf16>
    %19 = vector.shape_cast %18 : vector<6x16x4xbf16> to vector<96x4xbf16>
    %c2 = arith.constant 2 : index
    %c0_12 = arith.constant 0 : index
    %c0_13 = arith.constant 0 : index
    %20 = vector.load %arg4[%c2, %c0_12, %c0_13] : memref<3x4x8xbf16, #tpu.memory_space<vmem>>, vector<1x4x8xbf16>
    %21 = vector.shape_cast %20 : vector<1x4x8xbf16> to vector<4x8xbf16>
    %cst_14 = arith.constant dense<0.000000e+00> : vector<96x8xf32>
    %22 = tpu.matmul %19, %21, %cst_14 {dimension_numbers = #tpu.dot_dimension_numbers<[1], [0], [0], [1], [0, 0, 1, 1], [], []>} : vector<96x4xbf16>, vector<4x8xbf16>, vector<96x8xf32> -> vector<96x8xf32>
    %23 = arith.addf %17, %22 : vector<96x8xf32>
    %c0_15 = arith.constant 0 : index
    %c0_16 = arith.constant 0 : index
    %24 = vector.load %arg7[%c0_15, %c0_16] : memref<96x8xf32, #tpu.memory_space<vmem>>, vector<96x8xf32>
    tpu.vector_store %arg7[%c0_15, %c0_16], %23 {strides = array<i32>} : memref<96x8xf32, #tpu.memory_space<vmem>>, vector<96x8xf32>,
    %c2_i32 = arith.constant 2 : i32
    %25 = arith.cmpi eq, %arg2, %c2_i32 : i32
    %26 = arith.extui %25 : i1 to i32
    %c0_i32_17 = arith.constant 0 : i32
    %27 = arith.cmpi ne, %26, %c0_i32_17 : i32
    scf.if %27 {
      %c0_18 = arith.constant 0 : index
      %c0_19 = arith.constant 0 : index
      %28 = vector.load %arg5[%c0_18, %c0_19] : memref<1x8xf32, #tpu.memory_space<vmem>>, vector<1x8xf32>
      %29 = vector.broadcast %28 : vector<1x8xf32> to vector<96x8xf32>
      %30 = arith.addf %23, %29 : vector<96x8xf32>
      %cst_20 = arith.constant 0.000000e+00 : f32
      %31 = vector.broadcast %cst_20 : f32 to vector<96x8xf32>
      %32 = arith.maximumf %30, %31 : vector<96x8xf32>
      %33 = vector.shape_cast %32 : vector<96x8xf32> to vector<6x16x8xf32>
      %34 = arith.truncf %33 : vector<6x16x8xf32> to vector<6x16x8xbf16>
      %c0_21 = arith.constant 0 : index
      %c0_22 = arith.constant 0 : index
      %c0_23 = arith.constant 0 : index
      %c0_24 = arith.constant 0 : index
      %35 = vector.load %arg6[%c0_21, %c0_22, %c0_23, %c0_24] : memref<1x6x16x8xbf16, #tpu.memory_space<vmem>>, vector<1x6x16x8xbf16>
      %36 = vector.shape_cast %35 : vector<1x6x16x8xbf16> to vector<6x16x8xbf16>
      %37 = vector.shape_cast %34 : vector<6x16x8xbf16> to vector<1x6x16x8xbf16>
      tpu.vector_store %arg6[%c0_21, %c0_22, %c0_23, %c0_24], %37 {strides = array<i32>} : memref<1x6x16x8xbf16, #tpu.memory_space<vmem>>, vector<1x6x16x8xbf16>,
    } else {
    }
    return
  }
  func.func @transform_0(%arg0: i32, %arg1: i32, %arg2: i32) -> (i32, i32, i32, i32) {
    %0 = arith.addi %arg1, %arg2 : i32
    %c0_i32 = arith.constant 0 : i32
    %c0_i32_0 = arith.constant 0 : i32
    %c0_i32_1 = arith.constant 0 : i32
    return %arg0, %0, %c0_i32, %c0_i32_0 : i32, i32, i32, i32
  }
  func.func @transform_1(%arg0: i32, %arg1: i32, %arg2: i32) -> (i32, i32, i32) {
    %c0_i32 = arith.constant 0 : i32
    %c0_i32_0 = arith.constant 0 : i32
    %c0_i32_1 = arith.constant 0 : i32
    return %arg2, %c0_i32, %c0_i32_0 : i32, i32, i32
  }
  func.func @transform_2(%arg0: i32, %arg1: i32, %arg2: i32) -> (i32, i32) {
    %c0_i32 = arith.constant 0 : i32
    %c0_i32_0 = arith.constant 0 : i32
    %c0_i32_1 = arith.constant 0 : i32
    return %c0_i32, %c0_i32_0 : i32, i32
  }
  func.func @transform_3(%arg0: i32, %arg1: i32, %arg2: i32) -> (i32, i32, i32, i32) {
    %c0_i32 = arith.constant 0 : i32
    %c0_i32_0 = arith.constant 0 : i32
    %c0_i32_1 = arith.constant 0 : i32
    return %arg0, %arg1, %c0_i32, %c0_i32_0 : i32, i32, i32, i32
  }
}

module attributes {stable_mosaic.version = 11 : i64} {
  func.func @kernel(%arg0: i32, %arg1: memref<512x4xbf16, #tpu.memory_space<vmem>>, %arg2: memref<1x4x8xbf16, #tpu.memory_space<vmem>>, %arg3: memref<1x8xf32, #tpu.memory_space<vmem>>, %arg4: memref<512x8xbf16, #tpu.memory_space<vmem>>) attributes {dimension_semantics = [#tpu.dimension_semantics<parallel>], iteration_bounds = array<i64: 1>, scalar_prefetch = 0 : i64, scratch_operands = 0 : i64, tpu.core_type = #tpu.core_type<tc>, window_params = [{transform_indices = @transform_0, window_bounds = array<i64: 512, 4>}, {pipeline_mode = #tpu.pipeline_mode<synchronous>, transform_indices = @transform_1, window_bounds = array<i64: 1, 4, 8>}, {pipeline_mode = #tpu.pipeline_mode<synchronous>, transform_indices = @transform_2, window_bounds = array<i64: 1, 8>}, {transform_indices = @transform_3, window_bounds = array<i64: 512, 8>}]} {
    %c0 = arith.constant 0 : index
    %c0_0 = arith.constant 0 : index
    %0 = vector.load %arg3[%c0, %c0_0] : memref<1x8xf32, #tpu.memory_space<vmem>>, vector<1x8xf32>
    %c0_1 = arith.constant 0 : index
    %c0_2 = arith.constant 0 : index
    %1 = vector.load %arg1[%c0_1, %c0_2] : memref<512x4xbf16, #tpu.memory_space<vmem>>, vector<512x4xbf16>
    %c0_3 = arith.constant 0 : index
    %c0_4 = arith.constant 0 : index
    %c0_5 = arith.constant 0 : index
    %2 = vector.load %arg2[%c0_3, %c0_4, %c0_5] : memref<1x4x8xbf16, #tpu.memory_space<vmem>>, vector<1x4x8xbf16>
    %3 = vector.shape_cast %2 : vector<1x4x8xbf16> to vector<4x8xbf16>
    %cst = arith.constant dense<0.000000e+00> : vector<512x8xf32>
    %4 = tpu.matmul %1, %3, %cst {dimension_numbers = #tpu.dot_dimension_numbers<[1], [0], [0], [1], [0, 0, 1, 1], [], []>} : vector<512x4xbf16>, vector<4x8xbf16>, vector<512x8xf32> -> vector<512x8xf32>
    %5 = vector.broadcast %0 : vector<1x8xf32> to vector<512x8xf32>
    %6 = arith.addf %5, %4 : vector<512x8xf32>
    %cst_6 = arith.constant 0.000000e+00 : f32
    %7 = vector.broadcast %cst_6 : f32 to vector<512x8xf32>
    %8 = arith.maximumf %6, %7 : vector<512x8xf32>
    %9 = arith.truncf %8 : vector<512x8xf32> to vector<512x8xbf16>
    %c0_7 = arith.constant 0 : index
    %c0_8 = arith.constant 0 : index
    %10 = vector.load %arg4[%c0_7, %c0_8] : memref<512x8xbf16, #tpu.memory_space<vmem>>, vector<512x8xbf16>
    tpu.vector_store %arg4[%c0_7, %c0_8], %9 {strides = array<i32>} : memref<512x8xbf16, #tpu.memory_space<vmem>>, vector<512x8xbf16>,
    return
  }
  func.func @transform_0(%arg0: i32) -> (i32, i32) {
    %c0_i32 = arith.constant 0 : i32
    %c0_i32_0 = arith.constant 0 : i32
    return %arg0, %c0_i32 : i32, i32
  }
  func.func @transform_1(%arg0: i32) -> (i32, i32, i32) {
    %c0_i32 = arith.constant 0 : i32
    %c0_i32_0 = arith.constant 0 : i32
    %c0_i32_1 = arith.constant 0 : i32
    %c0_i32_2 = arith.constant 0 : i32
    return %c0_i32, %c0_i32_0, %c0_i32_1 : i32, i32, i32
  }
  func.func @transform_2(%arg0: i32) -> (i32, i32) {
    %c0_i32 = arith.constant 0 : i32
    %c0_i32_0 = arith.constant 0 : i32
    %c0_i32_1 = arith.constant 0 : i32
    return %c0_i32, %c0_i32_0 : i32, i32
  }
  func.func @transform_3(%arg0: i32) -> (i32, i32) {
    %c0_i32 = arith.constant 0 : i32
    %c0_i32_0 = arith.constant 0 : i32
    return %arg0, %c0_i32 : i32, i32
  }
}

module attributes {stable_mosaic.version = 11 : i64} {
  func.func @kernel(%arg0: i32, %arg1: memref<98x4xbf16, #tpu.memory_space<vmem>>, %arg2: memref<1x4x8xbf16, #tpu.memory_space<vmem>>, %arg3: memref<1x8xf32, #tpu.memory_space<vmem>>, %arg4: memref<98x8xbf16, #tpu.memory_space<vmem>>) attributes {dimension_semantics = [#tpu.dimension_semantics<parallel>], iteration_bounds = array<i64: 1>, scalar_prefetch = 0 : i64, scratch_operands = 0 : i64, tpu.core_type = #tpu.core_type<tc>, window_params = [{transform_indices = @transform_0, window_bounds = array<i64: 98, 4>}, {pipeline_mode = #tpu.pipeline_mode<synchronous>, transform_indices = @transform_1, window_bounds = array<i64: 1, 4, 8>}, {pipeline_mode = #tpu.pipeline_mode<synchronous>, transform_indices = @transform_2, window_bounds = array<i64: 1, 8>}, {transform_indices = @transform_3, window_bounds = array<i64: 98, 8>}]} {
    %c0 = arith.constant 0 : index
    %c0_0 = arith.constant 0 : index
    %0 = vector.load %arg3[%c0, %c0_0] : memref<1x8xf32, #tpu.memory_space<vmem>>, vector<1x8xf32>
    %c0_1 = arith.constant 0 : index
    %c0_2 = arith.constant 0 : index
    %1 = vector.load %arg1[%c0_1, %c0_2] : memref<98x4xbf16, #tpu.memory_space<vmem>>, vector<98x4xbf16>
    %c0_3 = arith.constant 0 : index
    %c0_4 = arith.constant 0 : index
    %c0_5 = arith.constant 0 : index
    %2 = vector.load %arg2[%c0_3, %c0_4, %c0_5] : memref<1x4x8xbf16, #tpu.memory_space<vmem>>, vector<1x4x8xbf16>
    %3 = vector.shape_cast %2 : vector<1x4x8xbf16> to vector<4x8xbf16>
    %cst = arith.constant dense<0.000000e+00> : vector<98x8xf32>
    %4 = tpu.matmul %1, %3, %cst {dimension_numbers = #tpu.dot_dimension_numbers<[1], [0], [0], [1], [0, 0, 1, 1], [], []>} : vector<98x4xbf16>, vector<4x8xbf16>, vector<98x8xf32> -> vector<98x8xf32>
    %5 = vector.broadcast %0 : vector<1x8xf32> to vector<98x8xf32>
    %6 = arith.addf %5, %4 : vector<98x8xf32>
    %cst_6 = arith.constant 0.000000e+00 : f32
    %7 = vector.broadcast %cst_6 : f32 to vector<98x8xf32>
    %8 = arith.maximumf %6, %7 : vector<98x8xf32>
    %9 = arith.truncf %8 : vector<98x8xf32> to vector<98x8xbf16>
    %c0_7 = arith.constant 0 : index
    %c0_8 = arith.constant 0 : index
    %10 = vector.load %arg4[%c0_7, %c0_8] : memref<98x8xbf16, #tpu.memory_space<vmem>>, vector<98x8xbf16>
    tpu.vector_store %arg4[%c0_7, %c0_8], %9 {strides = array<i32>} : memref<98x8xbf16, #tpu.memory_space<vmem>>, vector<98x8xbf16>,
    return
  }
  func.func @transform_0(%arg0: i32) -> (i32, i32) {
    %c0_i32 = arith.constant 0 : i32
    %c0_i32_0 = arith.constant 0 : i32
    return %arg0, %c0_i32 : i32, i32
  }
  func.func @transform_1(%arg0: i32) -> (i32, i32, i32) {
    %c0_i32 = arith.constant 0 : i32
    %c0_i32_0 = arith.constant 0 : i32
    %c0_i32_1 = arith.constant 0 : i32
    %c0_i32_2 = arith.constant 0 : i32
    return %c0_i32, %c0_i32_0, %c0_i32_1 : i32, i32, i32
  }
  func.func @transform_2(%arg0: i32) -> (i32, i32) {
    %c0_i32 = arith.constant 0 : i32
    %c0_i32_0 = arith.constant 0 : i32
    %c0_i32_1 = arith.constant 0 : i32
    return %c0_i32, %c0_i32_0 : i32, i32
  }
  func.func @transform_3(%arg0: i32) -> (i32, i32) {
    %c0_i32 = arith.constant 0 : i32
    %c0_i32_0 = arith.constant 0 : i32
    return %arg0, %c0_i32 : i32, i32
  }
}

module attributes {stable_mosaic.version = 11 : i64} {
  func.func @kernel(%arg0: i32, %arg1: memref<512x8xbf16, #tpu.memory_space<vmem>>, %arg2: memref<512x8xbf16, #tpu.memory_space<vmem>>, %arg3: memref<512x8xbf16, #tpu.memory_space<vmem>>, %arg4: memref<512x8xbf16, #tpu.memory_space<vmem>>, %arg5: memref<512x8xbf16, #tpu.memory_space<vmem>>, %arg6: memref<5x8x8xbf16, #tpu.memory_space<vmem>>, %arg7: memref<1x8xf32, #tpu.memory_space<vmem>>, %arg8: memref<512x8xbf16, #tpu.memory_space<vmem>>) attributes {dimension_semantics = [#tpu.dimension_semantics<parallel>], iteration_bounds = array<i64: 1>, scalar_prefetch = 0 : i64, scratch_operands = 0 : i64, tpu.core_type = #tpu.core_type<tc>, window_params = [{transform_indices = @transform_0, window_bounds = array<i64: 512, 8>}, {transform_indices = @transform_1, window_bounds = array<i64: 512, 8>}, {transform_indices = @transform_2, window_bounds = array<i64: 512, 8>}, {transform_indices = @transform_3, window_bounds = array<i64: 512, 8>}, {transform_indices = @transform_4, window_bounds = array<i64: 512, 8>}, {pipeline_mode = #tpu.pipeline_mode<synchronous>, transform_indices = @transform_5, window_bounds = array<i64: 5, 8, 8>}, {pipeline_mode = #tpu.pipeline_mode<synchronous>, transform_indices = @transform_6, window_bounds = array<i64: 1, 8>}, {transform_indices = @transform_7, window_bounds = array<i64: 512, 8>}]} {
    %c0 = arith.constant 0 : index
    %c0_0 = arith.constant 0 : index
    %0 = vector.load %arg7[%c0, %c0_0] : memref<1x8xf32, #tpu.memory_space<vmem>>, vector<1x8xf32>
    %c0_1 = arith.constant 0 : index
    %c0_2 = arith.constant 0 : index
    %1 = vector.load %arg1[%c0_1, %c0_2] : memref<512x8xbf16, #tpu.memory_space<vmem>>, vector<512x8xbf16>
    %c0_3 = arith.constant 0 : index
    %c0_4 = arith.constant 0 : index
    %c0_5 = arith.constant 0 : index
    %2 = vector.load %arg6[%c0_3, %c0_4, %c0_5] : memref<5x8x8xbf16, #tpu.memory_space<vmem>>, vector<1x8x8xbf16>
    %3 = vector.shape_cast %2 : vector<1x8x8xbf16> to vector<8x8xbf16>
    %cst = arith.constant dense<0.000000e+00> : vector<512x8xf32>
    %4 = tpu.matmul %1, %3, %cst {dimension_numbers = #tpu.dot_dimension_numbers<[1], [0], [0], [1], [0, 0, 1, 1], [], []>} : vector<512x8xbf16>, vector<8x8xbf16>, vector<512x8xf32> -> vector<512x8xf32>
    %5 = vector.broadcast %0 : vector<1x8xf32> to vector<512x8xf32>
    %6 = arith.addf %5, %4 : vector<512x8xf32>
    %c0_6 = arith.constant 0 : index
    %c0_7 = arith.constant 0 : index
    %7 = vector.load %arg2[%c0_6, %c0_7] : memref<512x8xbf16, #tpu.memory_space<vmem>>, vector<512x8xbf16>
    %c1 = arith.constant 1 : index
    %c0_8 = arith.constant 0 : index
    %c0_9 = arith.constant 0 : index
    %8 = vector.load %arg6[%c1, %c0_8, %c0_9] : memref<5x8x8xbf16, #tpu.memory_space<vmem>>, vector<1x8x8xbf16>
    %9 = vector.shape_cast %8 : vector<1x8x8xbf16> to vector<8x8xbf16>
    %cst_10 = arith.constant dense<0.000000e+00> : vector<512x8xf32>
    %10 = tpu.matmul %7, %9, %cst_10 {dimension_numbers = #tpu.dot_dimension_numbers<[1], [0], [0], [1], [0, 0, 1, 1], [], []>} : vector<512x8xbf16>, vector<8x8xbf16>, vector<512x8xf32> -> vector<512x8xf32>
    %11 = arith.addf %6, %10 : vector<512x8xf32>
    %c0_11 = arith.constant 0 : index
    %c0_12 = arith.constant 0 : index
    %12 = vector.load %arg3[%c0_11, %c0_12] : memref<512x8xbf16, #tpu.memory_space<vmem>>, vector<512x8xbf16>
    %c2 = arith.constant 2 : index
    %c0_13 = arith.constant 0 : index
    %c0_14 = arith.constant 0 : index
    %13 = vector.load %arg6[%c2, %c0_13, %c0_14] : memref<5x8x8xbf16, #tpu.memory_space<vmem>>, vector<1x8x8xbf16>
    %14 = vector.shape_cast %13 : vector<1x8x8xbf16> to vector<8x8xbf16>
    %cst_15 = arith.constant dense<0.000000e+00> : vector<512x8xf32>
    %15 = tpu.matmul %12, %14, %cst_15 {dimension_numbers = #tpu.dot_dimension_numbers<[1], [0], [0], [1], [0, 0, 1, 1], [], []>} : vector<512x8xbf16>, vector<8x8xbf16>, vector<512x8xf32> -> vector<512x8xf32>
    %16 = arith.addf %11, %15 : vector<512x8xf32>
    %c0_16 = arith.constant 0 : index
    %c0_17 = arith.constant 0 : index
    %17 = vector.load %arg4[%c0_16, %c0_17] : memref<512x8xbf16, #tpu.memory_space<vmem>>, vector<512x8xbf16>
    %c3 = arith.constant 3 : index
    %c0_18 = arith.constant 0 : index
    %c0_19 = arith.constant 0 : index
    %18 = vector.load %arg6[%c3, %c0_18, %c0_19] : memref<5x8x8xbf16, #tpu.memory_space<vmem>>, vector<1x8x8xbf16>
    %19 = vector.shape_cast %18 : vector<1x8x8xbf16> to vector<8x8xbf16>
    %cst_20 = arith.constant dense<0.000000e+00> : vector<512x8xf32>
    %20 = tpu.matmul %17, %19, %cst_20 {dimension_numbers = #tpu.dot_dimension_numbers<[1], [0], [0], [1], [0, 0, 1, 1], [], []>} : vector<512x8xbf16>, vector<8x8xbf16>, vector<512x8xf32> -> vector<512x8xf32>
    %21 = arith.addf %16, %20 : vector<512x8xf32>
    %c0_21 = arith.constant 0 : index
    %c0_22 = arith.constant 0 : index
    %22 = vector.load %arg5[%c0_21, %c0_22] : memref<512x8xbf16, #tpu.memory_space<vmem>>, vector<512x8xbf16>
    %c4 = arith.constant 4 : index
    %c0_23 = arith.constant 0 : index
    %c0_24 = arith.constant 0 : index
    %23 = vector.load %arg6[%c4, %c0_23, %c0_24] : memref<5x8x8xbf16, #tpu.memory_space<vmem>>, vector<1x8x8xbf16>
    %24 = vector.shape_cast %23 : vector<1x8x8xbf16> to vector<8x8xbf16>
    %cst_25 = arith.constant dense<0.000000e+00> : vector<512x8xf32>
    %25 = tpu.matmul %22, %24, %cst_25 {dimension_numbers = #tpu.dot_dimension_numbers<[1], [0], [0], [1], [0, 0, 1, 1], [], []>} : vector<512x8xbf16>, vector<8x8xbf16>, vector<512x8xf32> -> vector<512x8xf32>
    %26 = arith.addf %21, %25 : vector<512x8xf32>
    %cst_26 = arith.constant 0.000000e+00 : f32
    %27 = vector.broadcast %cst_26 : f32 to vector<512x8xf32>
    %28 = arith.maximumf %26, %27 : vector<512x8xf32>
    %29 = arith.truncf %28 : vector<512x8xf32> to vector<512x8xbf16>
    %c0_27 = arith.constant 0 : index
    %c0_28 = arith.constant 0 : index
    %30 = vector.load %arg8[%c0_27, %c0_28] : memref<512x8xbf16, #tpu.memory_space<vmem>>, vector<512x8xbf16>
    tpu.vector_store %arg8[%c0_27, %c0_28], %29 {strides = array<i32>} : memref<512x8xbf16, #tpu.memory_space<vmem>>, vector<512x8xbf16>,
    return
  }
  func.func @transform_0(%arg0: i32) -> (i32, i32) {
    %c0_i32 = arith.constant 0 : i32
    %c0_i32_0 = arith.constant 0 : i32
    return %arg0, %c0_i32 : i32, i32
  }
  func.func @transform_1(%arg0: i32) -> (i32, i32) {
    %c0_i32 = arith.constant 0 : i32
    %c0_i32_0 = arith.constant 0 : i32
    return %arg0, %c0_i32 : i32, i32
  }
  func.func @transform_2(%arg0: i32) -> (i32, i32) {
    %c0_i32 = arith.constant 0 : i32
    %c0_i32_0 = arith.constant 0 : i32
    return %arg0, %c0_i32 : i32, i32
  }
  func.func @transform_3(%arg0: i32) -> (i32, i32) {
    %c0_i32 = arith.constant 0 : i32
    %c0_i32_0 = arith.constant 0 : i32
    return %arg0, %c0_i32 : i32, i32
  }
  func.func @transform_4(%arg0: i32) -> (i32, i32) {
    %c0_i32 = arith.constant 0 : i32
    %c0_i32_0 = arith.constant 0 : i32
    return %arg0, %c0_i32 : i32, i32
  }
  func.func @transform_5(%arg0: i32) -> (i32, i32, i32) {
    %c0_i32 = arith.constant 0 : i32
    %c0_i32_0 = arith.constant 0 : i32
    %c0_i32_1 = arith.constant 0 : i32
    %c0_i32_2 = arith.constant 0 : i32
    return %c0_i32, %c0_i32_0, %c0_i32_1 : i32, i32, i32
  }
  func.func @transform_6(%arg0: i32) -> (i32, i32) {
    %c0_i32 = arith.constant 0 : i32
    %c0_i32_0 = arith.constant 0 : i32
    %c0_i32_1 = arith.constant 0 : i32
    return %c0_i32, %c0_i32_0 : i32, i32
  }
  func.func @transform_7(%arg0: i32) -> (i32, i32) {
    %c0_i32 = arith.constant 0 : i32
    %c0_i32_0 = arith.constant 0 : i32
    return %arg0, %c0_i32 : i32, i32
  }
}

module attributes {stable_mosaic.version = 11 : i64} {
  func.func @kernel(%arg0: i32, %arg1: memref<512x8xbf16, #tpu.memory_space<vmem>>, %arg2: memref<1x8x12xbf16, #tpu.memory_space<vmem>>, %arg3: memref<1x12xf32, #tpu.memory_space<vmem>>, %arg4: memref<512x12xbf16, #tpu.memory_space<vmem>>) attributes {dimension_semantics = [#tpu.dimension_semantics<parallel>], iteration_bounds = array<i64: 1>, scalar_prefetch = 0 : i64, scratch_operands = 0 : i64, tpu.core_type = #tpu.core_type<tc>, window_params = [{transform_indices = @transform_0, window_bounds = array<i64: 512, 8>}, {pipeline_mode = #tpu.pipeline_mode<synchronous>, transform_indices = @transform_1, window_bounds = array<i64: 1, 8, 12>}, {pipeline_mode = #tpu.pipeline_mode<synchronous>, transform_indices = @transform_2, window_bounds = array<i64: 1, 12>}, {transform_indices = @transform_3, window_bounds = array<i64: 512, 12>}]} {
    %c0 = arith.constant 0 : index
    %c0_0 = arith.constant 0 : index
    %0 = vector.load %arg3[%c0, %c0_0] : memref<1x12xf32, #tpu.memory_space<vmem>>, vector<1x12xf32>
    %c0_1 = arith.constant 0 : index
    %c0_2 = arith.constant 0 : index
    %1 = vector.load %arg1[%c0_1, %c0_2] : memref<512x8xbf16, #tpu.memory_space<vmem>>, vector<512x8xbf16>
    %c0_3 = arith.constant 0 : index
    %c0_4 = arith.constant 0 : index
    %c0_5 = arith.constant 0 : index
    %2 = vector.load %arg2[%c0_3, %c0_4, %c0_5] : memref<1x8x12xbf16, #tpu.memory_space<vmem>>, vector<1x8x12xbf16>
    %3 = vector.shape_cast %2 : vector<1x8x12xbf16> to vector<8x12xbf16>
    %cst = arith.constant dense<0.000000e+00> : vector<512x12xf32>
    %4 = tpu.matmul %1, %3, %cst {dimension_numbers = #tpu.dot_dimension_numbers<[1], [0], [0], [1], [0, 0, 1, 1], [], []>} : vector<512x8xbf16>, vector<8x12xbf16>, vector<512x12xf32> -> vector<512x12xf32>
    %5 = vector.broadcast %0 : vector<1x12xf32> to vector<512x12xf32>
    %6 = arith.addf %5, %4 : vector<512x12xf32>
    %7 = arith.truncf %6 : vector<512x12xf32> to vector<512x12xbf16>
    %c0_6 = arith.constant 0 : index
    %c0_7 = arith.constant 0 : index
    %8 = vector.load %arg4[%c0_6, %c0_7] : memref<512x12xbf16, #tpu.memory_space<vmem>>, vector<512x12xbf16>
    tpu.vector_store %arg4[%c0_6, %c0_7], %7 {strides = array<i32>} : memref<512x12xbf16, #tpu.memory_space<vmem>>, vector<512x12xbf16>,
    return
  }
  func.func @transform_0(%arg0: i32) -> (i32, i32) {
    %c0_i32 = arith.constant 0 : i32
    %c0_i32_0 = arith.constant 0 : i32
    return %arg0, %c0_i32 : i32, i32
  }
  func.func @transform_1(%arg0: i32) -> (i32, i32, i32) {
    %c0_i32 = arith.constant 0 : i32
    %c0_i32_0 = arith.constant 0 : i32
    %c0_i32_1 = arith.constant 0 : i32
    %c0_i32_2 = arith.constant 0 : i32
    return %c0_i32, %c0_i32_0, %c0_i32_1 : i32, i32, i32
  }
  func.func @transform_2(%arg0: i32) -> (i32, i32) {
    %c0_i32 = arith.constant 0 : i32
    %c0_i32_0 = arith.constant 0 : i32
    %c0_i32_1 = arith.constant 0 : i32
    return %c0_i32, %c0_i32_0 : i32, i32
  }
  func.func @transform_3(%arg0: i32) -> (i32, i32) {
    %c0_i32 = arith.constant 0 : i32
    %c0_i32_0 = arith.constant 0 : i32
    return %arg0, %c0_i32 : i32, i32
  }
}

module attributes {stable_mosaic.version = 11 : i64} {
  func.func @_nonlocal_flash_kernel(%arg0: i32, %arg1: i32, %arg2: i32, %arg3: memref<1x128x12xbf16, #tpu.memory_space<vmem>>, %arg4: memref<1x128x12xbf16, #tpu.memory_space<vmem>>, %arg5: memref<1x128x4xbf16, #tpu.memory_space<vmem>>, %arg6: memref<128x1xf32, #tpu.memory_space<vmem>>, %arg7: memref<128x1xf32, #tpu.memory_space<vmem>>, %arg8: memref<128x4xf32, #tpu.memory_space<vmem>>) attributes {dimension_semantics = [#tpu.dimension_semantics<parallel>, #tpu.dimension_semantics<parallel>, #tpu.dimension_semantics<arbitrary>], iteration_bounds = array<i64: 2, 2, 2>, scalar_prefetch = 0 : i64, scratch_operands = 3 : i64, tpu.core_type = #tpu.core_type<tc>, window_params = [{transform_indices = @transform_0, window_bounds = array<i64: 1, 128, 12>}, {transform_indices = @transform_1, window_bounds = array<i64: 1, 128, 12>}, {transform_indices = @transform_2, window_bounds = array<i64: 1, 128, 4>}]} {
    %c0_i32 = arith.constant 0 : i32
    %0 = arith.cmpi eq, %arg2, %c0_i32 : i32
    %1 = arith.extui %0 : i1 to i32
    %c0_i32_0 = arith.constant 0 : i32
    %2 = arith.cmpi ne, %1, %c0_i32_0 : i32
    scf.if %2 {
      %cst_22 = arith.constant 0xFF800000 : f32
      %37 = vector.broadcast %cst_22 : f32 to vector<128x1xf32>
      %c0_23 = arith.constant 0 : index
      %c0_24 = arith.constant 0 : index
      %38 = vector.load %arg6[%c0_23, %c0_24] : memref<128x1xf32, #tpu.memory_space<vmem>>, vector<128x1xf32>
      tpu.vector_store %arg6[%c0_23, %c0_24], %37 {strides = array<i32>} : memref<128x1xf32, #tpu.memory_space<vmem>>, vector<128x1xf32>,
      %cst_25 = arith.constant 0.000000e+00 : f32
      %39 = vector.broadcast %cst_25 : f32 to vector<128x1xf32>
      %c0_26 = arith.constant 0 : index
      %c0_27 = arith.constant 0 : index
      %40 = vector.load %arg7[%c0_26, %c0_27] : memref<128x1xf32, #tpu.memory_space<vmem>>, vector<128x1xf32>
      tpu.vector_store %arg7[%c0_26, %c0_27], %39 {strides = array<i32>} : memref<128x1xf32, #tpu.memory_space<vmem>>, vector<128x1xf32>,
      %cst_28 = arith.constant 0.000000e+00 : f32
      %41 = vector.broadcast %cst_28 : f32 to vector<128x4xf32>
      %c0_29 = arith.constant 0 : index
      %c0_30 = arith.constant 0 : index
      %42 = vector.load %arg8[%c0_29, %c0_30] : memref<128x4xf32, #tpu.memory_space<vmem>>, vector<128x4xf32>
      tpu.vector_store %arg8[%c0_29, %c0_30], %41 {strides = array<i32>} : memref<128x4xf32, #tpu.memory_space<vmem>>, vector<128x4xf32>,
    } else {
    }
    %c0 = arith.constant 0 : index
    %c0_1 = arith.constant 0 : index
    %c0_2 = arith.constant 0 : index
    %3 = vector.load %arg3[%c0, %c0_1, %c0_2] : memref<1x128x12xbf16, #tpu.memory_space<vmem>>, vector<1x128x12xbf16>
    %4 = vector.shape_cast %3 : vector<1x128x12xbf16> to vector<128x12xbf16>
    %c0_3 = arith.constant 0 : index
    %c0_4 = arith.constant 0 : index
    %c0_5 = arith.constant 0 : index
    %5 = vector.load %arg4[%c0_3, %c0_4, %c0_5] : memref<1x128x12xbf16, #tpu.memory_space<vmem>>, vector<1x128x12xbf16>
    %6 = vector.shape_cast %5 : vector<1x128x12xbf16> to vector<128x12xbf16>
    %7 = vector.extract_strided_slice %4 {offsets = [0, 0], sizes = [128, 4], strides = [1, 1]} : vector<128x12xbf16> to vector<128x4xbf16>
    %8 = vector.extract_strided_slice %6 {offsets = [0, 4], sizes = [128, 4], strides = [1, 1]} : vector<128x12xbf16> to vector<128x4xbf16>
    %9 = vector.extract_strided_slice %6 {offsets = [0, 8], sizes = [128, 4], strides = [1, 1]} : vector<128x12xbf16> to vector<128x4xbf16>
    %cst = arith.constant dense<0.000000e+00> : vector<128x128xf32>
    %10 = tpu.matmul %7, %8, %cst {dimension_numbers = #tpu.dot_dimension_numbers<[1], [1], [0], [0], [0, 0, 1, 0], [], []>} : vector<128x4xbf16>, vector<128x4xbf16>, vector<128x128xf32> -> vector<128x128xf32>
    %c0_6 = arith.constant 0 : index
    %c0_7 = arith.constant 0 : index
    %11 = vector.load %arg6[%c0_6, %c0_7] : memref<128x1xf32, #tpu.memory_space<vmem>>, vector<128x1xf32>
    %cst_8 = arith.constant dense<0xFF800000> : vector<128xf32>
    %12 = vector.multi_reduction <maximumf>, %10, %cst_8 [1] : vector<128x128xf32> to vector<128xf32>
    %13 = vector.shape_cast %12 : vector<128xf32> to vector<128x1xf32>
    %14 = arith.maximumf %11, %13 : vector<128x1xf32>
    %15 = arith.subf %11, %14 : vector<128x1xf32>
    %16 = math.exp %15 : vector<128x1xf32>
    %17 = vector.broadcast %14 : vector<128x1xf32> to vector<128x128xf32>
    %18 = arith.subf %10, %17 : vector<128x128xf32>
    %19 = math.exp %18 : vector<128x128xf32>
    %c0_9 = arith.constant 0 : index
    %c0_10 = arith.constant 0 : index
    %20 = vector.load %arg7[%c0_9, %c0_10] : memref<128x1xf32, #tpu.memory_space<vmem>>, vector<128x1xf32>
    %21 = arith.mulf %16, %20 : vector<128x1xf32>
    %cst_11 = arith.constant dense<0.000000e+00> : vector<128xf32>
    %22 = vector.multi_reduction <add>, %19, %cst_11 [1] : vector<128x128xf32> to vector<128xf32>
    %23 = vector.shape_cast %22 : vector<128xf32> to vector<128x1xf32>
    %24 = arith.addf %21, %23 : vector<128x1xf32>
    %c0_12 = arith.constant 0 : index
    %c0_13 = arith.constant 0 : index
    %25 = vector.load %arg7[%c0_12, %c0_13] : memref<128x1xf32, #tpu.memory_space<vmem>>, vector<128x1xf32>
    tpu.vector_store %arg7[%c0_12, %c0_13], %24 {strides = array<i32>} : memref<128x1xf32, #tpu.memory_space<vmem>>, vector<128x1xf32>,
    %c0_14 = arith.constant 0 : index
    %c0_15 = arith.constant 0 : index
    %26 = vector.load %arg8[%c0_14, %c0_15] : memref<128x4xf32, #tpu.memory_space<vmem>>, vector<128x4xf32>
    %27 = vector.broadcast %16 : vector<128x1xf32> to vector<128x4xf32>
    %28 = arith.mulf %27, %26 : vector<128x4xf32>
    %29 = arith.truncf %19 : vector<128x128xf32> to vector<128x128xbf16>
    %cst_16 = arith.constant dense<0.000000e+00> : vector<128x4xf32>
    %30 = tpu.matmul %29, %9, %cst_16 {dimension_numbers = #tpu.dot_dimension_numbers<[1], [0], [0], [1], [0, 0, 1, 1], [], []>} : vector<128x128xbf16>, vector<128x4xbf16>, vector<128x4xf32> -> vector<128x4xf32>
    %31 = arith.addf %28, %30 : vector<128x4xf32>
    %c0_17 = arith.constant 0 : index
    %c0_18 = arith.constant 0 : index
    %32 = vector.load %arg8[%c0_17, %c0_18] : memref<128x4xf32, #tpu.memory_space<vmem>>, vector<128x4xf32>
    tpu.vector_store %arg8[%c0_17, %c0_18], %31 {strides = array<i32>} : memref<128x4xf32, #tpu.memory_space<vmem>>, vector<128x4xf32>,
    %c0_19 = arith.constant 0 : index
    %c0_20 = arith.constant 0 : index
    %33 = vector.load %arg6[%c0_19, %c0_20] : memref<128x1xf32, #tpu.memory_space<vmem>>, vector<128x1xf32>
    tpu.vector_store %arg6[%c0_19, %c0_20], %14 {strides = array<i32>} : memref<128x1xf32, #tpu.memory_space<vmem>>, vector<128x1xf32>,
    %c1_i32 = arith.constant 1 : i32
    %34 = arith.cmpi eq, %arg2, %c1_i32 : i32
    %35 = arith.extui %34 : i1 to i32
    %c0_i32_21 = arith.constant 0 : i32
    %36 = arith.cmpi ne, %35, %c0_i32_21 : i32
    scf.if %36 {
      %c0_22 = arith.constant 0 : index
      %c0_23 = arith.constant 0 : index
      %37 = vector.load %arg7[%c0_22, %c0_23] : memref<128x1xf32, #tpu.memory_space<vmem>>, vector<128x1xf32>
      %38 = tpu.reciprocal %37 {approx = true} : vector<128x1xf32> -> vector<128x1xf32>
      %c0_24 = arith.constant 0 : index
      %c0_25 = arith.constant 0 : index
      %39 = vector.load %arg8[%c0_24, %c0_25] : memref<128x4xf32, #tpu.memory_space<vmem>>, vector<128x4xf32>
      %40 = vector.broadcast %38 : vector<128x1xf32> to vector<128x4xf32>
      %41 = arith.mulf %39, %40 : vector<128x4xf32>
      %42 = arith.truncf %41 : vector<128x4xf32> to vector<128x4xbf16>
      %c0_26 = arith.constant 0 : index
      %c0_27 = arith.constant 0 : index
      %c0_28 = arith.constant 0 : index
      %43 = vector.load %arg5[%c0_26, %c0_27, %c0_28] : memref<1x128x4xbf16, #tpu.memory_space<vmem>>, vector<1x128x4xbf16>
      %44 = vector.shape_cast %43 : vector<1x128x4xbf16> to vector<128x4xbf16>
      %45 = vector.shape_cast %42 : vector<128x4xbf16> to vector<1x128x4xbf16>
      tpu.vector_store %arg5[%c0_26, %c0_27, %c0_28], %45 {strides = array<i32>} : memref<1x128x4xbf16, #tpu.memory_space<vmem>>, vector<1x128x4xbf16>,
    } else {
    }
    return
  }
  func.func @transform_0(%arg0: i32, %arg1: i32, %arg2: i32) -> (i32, i32, i32) {
    %c0_i32 = arith.constant 0 : i32
    %c0_i32_0 = arith.constant 0 : i32
    return %arg0, %arg1, %c0_i32 : i32, i32, i32
  }
  func.func @transform_1(%arg0: i32, %arg1: i32, %arg2: i32) -> (i32, i32, i32) {
    %c0_i32 = arith.constant 0 : i32
    %c0_i32_0 = arith.constant 0 : i32
    return %arg0, %arg2, %c0_i32 : i32, i32, i32
  }
  func.func @transform_2(%arg0: i32, %arg1: i32, %arg2: i32) -> (i32, i32, i32) {
    %c0_i32 = arith.constant 0 : i32
    %c0_i32_0 = arith.constant 0 : i32
    return %arg0, %arg1, %c0_i32 : i32, i32, i32
  }
}

module attributes {stable_mosaic.version = 11 : i64} {
  func.func @kernel(%arg0: i32, %arg1: memref<512x4xbf16, #tpu.memory_space<vmem>>, %arg2: memref<1x4x8xbf16, #tpu.memory_space<vmem>>, %arg3: memref<1x8xf32, #tpu.memory_space<vmem>>, %arg4: memref<512x8xbf16, #tpu.memory_space<vmem>>, %arg5: memref<512x8xf32, #tpu.memory_space<vmem>>) attributes {dimension_semantics = [#tpu.dimension_semantics<parallel>], iteration_bounds = array<i64: 1>, scalar_prefetch = 0 : i64, scratch_operands = 0 : i64, tpu.core_type = #tpu.core_type<tc>, window_params = [{transform_indices = @transform_0, window_bounds = array<i64: 512, 4>}, {pipeline_mode = #tpu.pipeline_mode<synchronous>, transform_indices = @transform_1, window_bounds = array<i64: 1, 4, 8>}, {pipeline_mode = #tpu.pipeline_mode<synchronous>, transform_indices = @transform_2, window_bounds = array<i64: 1, 8>}, {transform_indices = @transform_3, window_bounds = array<i64: 512, 8>}, {transform_indices = @transform_4, window_bounds = array<i64: 512, 8>}]} {
    %c0 = arith.constant 0 : index
    %c0_0 = arith.constant 0 : index
    %0 = vector.load %arg3[%c0, %c0_0] : memref<1x8xf32, #tpu.memory_space<vmem>>, vector<1x8xf32>
    %c0_1 = arith.constant 0 : index
    %c0_2 = arith.constant 0 : index
    %1 = vector.load %arg1[%c0_1, %c0_2] : memref<512x4xbf16, #tpu.memory_space<vmem>>, vector<512x4xbf16>
    %c0_3 = arith.constant 0 : index
    %c0_4 = arith.constant 0 : index
    %c0_5 = arith.constant 0 : index
    %2 = vector.load %arg2[%c0_3, %c0_4, %c0_5] : memref<1x4x8xbf16, #tpu.memory_space<vmem>>, vector<1x4x8xbf16>
    %3 = vector.shape_cast %2 : vector<1x4x8xbf16> to vector<4x8xbf16>
    %cst = arith.constant dense<0.000000e+00> : vector<512x8xf32>
    %4 = tpu.matmul %1, %3, %cst {dimension_numbers = #tpu.dot_dimension_numbers<[1], [0], [0], [1], [0, 0, 1, 1], [], []>} : vector<512x4xbf16>, vector<4x8xbf16>, vector<512x8xf32> -> vector<512x8xf32>
    %5 = vector.broadcast %0 : vector<1x8xf32> to vector<512x8xf32>
    %6 = arith.addf %5, %4 : vector<512x8xf32>
    %c0_6 = arith.constant 0 : index
    %c0_7 = arith.constant 0 : index
    %7 = vector.load %arg4[%c0_6, %c0_7] : memref<512x8xbf16, #tpu.memory_space<vmem>>, vector<512x8xbf16>
    %8 = arith.extf %7 : vector<512x8xbf16> to vector<512x8xf32>
    %9 = arith.addf %6, %8 : vector<512x8xf32>
    %c0_8 = arith.constant 0 : index
    %c0_9 = arith.constant 0 : index
    %10 = vector.load %arg5[%c0_8, %c0_9] : memref<512x8xf32, #tpu.memory_space<vmem>>, vector<512x8xf32>
    tpu.vector_store %arg5[%c0_8, %c0_9], %9 {strides = array<i32>} : memref<512x8xf32, #tpu.memory_space<vmem>>, vector<512x8xf32>,
    return
  }
  func.func @transform_0(%arg0: i32) -> (i32, i32) {
    %c0_i32 = arith.constant 0 : i32
    %c0_i32_0 = arith.constant 0 : i32
    return %arg0, %c0_i32 : i32, i32
  }
  func.func @transform_1(%arg0: i32) -> (i32, i32, i32) {
    %c0_i32 = arith.constant 0 : i32
    %c0_i32_0 = arith.constant 0 : i32
    %c0_i32_1 = arith.constant 0 : i32
    %c0_i32_2 = arith.constant 0 : i32
    return %c0_i32, %c0_i32_0, %c0_i32_1 : i32, i32, i32
  }
  func.func @transform_2(%arg0: i32) -> (i32, i32) {
    %c0_i32 = arith.constant 0 : i32
    %c0_i32_0 = arith.constant 0 : i32
    %c0_i32_1 = arith.constant 0 : i32
    return %c0_i32, %c0_i32_0 : i32, i32
  }
  func.func @transform_3(%arg0: i32) -> (i32, i32) {
    %c0_i32 = arith.constant 0 : i32
    %c0_i32_0 = arith.constant 0 : i32
    return %arg0, %c0_i32 : i32, i32
  }
  func.func @transform_4(%arg0: i32) -> (i32, i32) {
    %c0_i32 = arith.constant 0 : i32
    %c0_i32_0 = arith.constant 0 : i32
    return %arg0, %c0_i32 : i32, i32
  }
}

</mosaic_0001>

<bundles_post_ra>
// kernel: aspp_forward.12
= control target key start
LH: loop header
LB: loop body
LE: loop exit
PB: predicated region body
PF: predicated region fallthrough
CT: control target
= control target key end

     0   :  { %s2764_s12 = smov 0   ;;  %s2766_s13 = smov 0   ;;  %s3651_s0 = inlined_call_operand.vmem [shape: bf16[2,54,52,4], index: 0, kind: input, shape index: {}]   ;;  %s3652_s1 = inlined_call_operand.vmem [shape: bf16[9,4,8], index: 1, kind: input, shape index: {}]   ;;  %s3653_s2 = inlined_call_operand.vmem [shape: f32[1,8], index: 2, kind: input, shape index: {}]   ;;  %s3654_s3 = inlined_call_operand.vmem [shape: bf16[2,18,16,8], index: 3, kind: output, shape index: {}]  }
   0x1   :  { %s2768_s14 = smov 0   ;;  %s2770_s15 = smov 0  }
   0x2   :  { %s2772_s16 = smov 0  }
   0x3 LB: > { %s25_s17 = sadd.s32 1, %s2733_s14  ;;  %s32_s18 = sadd.s32 1, %s2737_s15  ;;  %s2741_s16 = sphi %s2772_s16, %s13_s16   ;;  %s2737_s15 = sphi %s2770_s15, %s3662_s15   ;;  %s2733_s14 = sphi %s2768_s14, %s3661_s14   ;;  %s2729_s13 = sphi %s2766_s13, %s3660_s13   ;;  %s2725_s12 = sphi %s2764_s12, %s3659_s12  }
   0x4   : > { %p26_p0 = scmp.ge.s32.totalorder %s25_s17, 3  ;;  %p2237_p1 = scmp.ge.s32.totalorder %s2741_s16, 1 }
   0x5   : > { %p181_p2 = scmp.lt.s32.totalorder %s2741_s16, 7 }
   0x6   : > { %s3664_s17 = smov (%p26_p0, %s25_s17), 0  ;;  %s3666_s18 = smov (!%p26_p0, %s32_s18), %s2737_s15 }
   0x7   : > { %p182_p3 = pnand %p2237_p1, %p181_p2  ;;  %p34_p4 = scmp.ge.s32.totalorder %s3666_s18, 2 }
   0x8   : > { %s222_s19 = smul.u32 (!%p182_p3), 18, %s2725_s12  ;;  %p223_p5 = scmp.lt.s32.totalorder (!%p182_p3), %s2729_s13, 1 }
   0x9   : > { %s3668_s18 = smov (%p34_p4, %s3666_s18), 0  ;;  %185 = sbr.rel (%p182_p3) target bundleno = 386 (0x182), region = 32 }
   0xa   : > { %s234_s20 = smul.u32 (!%p182_p3), 3, %s2725_s12  ;;  %p225_p6 = scmp.lt.s32.totalorder (!%p182_p3), %s222_s19, 53 }
   0xb   : > { %p2241_p8 = scmp.ne.s32.totalorder (!%p182_p3), %s2725_s12, 0 }
   0xc   : > { %p235_p7 = scmp.lt.s32.totalorder (!%p182_p3), %s234_s20, 8 }
   0xe   : > { %s3670_s13 = smov (!%p223_p5, %s2729_s13), 1  ;;  %s3672_s19 = smov (!%p225_p6, %s222_s19), 53 }
   0xf   : > { %s2642_s21 = smul.u32 378, %s3670_s13  ;;  %s3674_s20 = smov (!%p235_p7, %s234_s20), 8 }
  0x10   : > { %s2641_s22 = smul.u32 7, %s3672_s19  ;;  %s2239_s23 = sshll.u32 %s3674_s20, 1 }
  0x11   : > { %s2643_s24 = smul.u32 144, %s3670_s13  ;;  %s2801_s28 = scalar_lea.vmem %s3652_s1, %s2239_s23 }
  0x12   : > { %s229_s25 = sadd.s32 %s2642_s21, %s2641_s22  ;;  %255 = sbr.rel (%p2241_p8) target bundleno = 42 (0x2a), region = 36 }
  0x13   : > { %s2238_s29 = sshll.u32 %s229_s25, 2  ;;  %s2806_s5 = scalar_lea.vmem %s3654_s3, %s2643_s24 }
  0x14   : > { %s2811_s8 = scalar_lea.vmem %s3651_s0, %s2238_s29 }
  0x17   : > { %vm256_vm0 = vcmask 64512   ;;  %v2743_v0 = vmov 0.0  }
  0x18   : > { %257 = vst.msk [vmem:[#allocation2] sm:$0xff] %vm256_vm0, %v2743_v0  ;;  %258 = vst.msk [vmem:[#allocation2 + $0x8] sm:$0xff] %vm256_vm0, %v2743_v0 }
  0x19   : > { %259 = vst.msk [vmem:[#allocation2 + $0x10] sm:$0xff] %vm256_vm0, %v2743_v0  ;;  %260 = vst.msk [vmem:[#allocation2 + $0x18] sm:$0xff] %vm256_vm0, %v2743_v0 }
  0x1a   : > { %261 = vst.msk [vmem:[#allocation2 + $0x20] sm:$0xff] %vm256_vm0, %v2743_v0  ;;  %262 = vst.msk [vmem:[#allocation2 + $0x28] sm:$0xff] %vm256_vm0, %v2743_v0 }
  0x1b   : > { %263 = vst.msk [vmem:[#allocation2 + $0x30] sm:$0xff] %vm256_vm0, %v2743_v0  ;;  %264 = vst.msk [vmem:[#allocation2 + $0x38] sm:$0xff] %vm256_vm0, %v2743_v0 }
  0x1c   : > { %265 = vst.msk [vmem:[#allocation2 + $0x40] sm:$0xff] %vm256_vm0, %v2743_v0  ;;  %266 = vst.msk [vmem:[#allocation2 + $0x48] sm:$0xff] %vm256_vm0, %v2743_v0 }
  0x1d   : > { %267 = vst.msk [vmem:[#allocation2 + $0x50] sm:$0xff] %vm256_vm0, %v2743_v0  ;;  %268 = vst.msk [vmem:[#allocation2 + $0x58] sm:$0xff] %vm256_vm0, %v2743_v0 }
  0x1e   : > { %269 = vst.msk [vmem:[#allocation2 + $0x60] sm:$0xff] %vm256_vm0, %v2743_v0  ;;  %270 = vst.msk [vmem:[#allocation2 + $0x68] sm:$0xff] %vm256_vm0, %v2743_v0 }
  0x1f   : > { %271 = vst.msk [vmem:[#allocation2 + $0x70] sm:$0xff] %vm256_vm0, %v2743_v0  ;;  %272 = vst.msk [vmem:[#allocation2 + $0x78] sm:$0xff] %vm256_vm0, %v2743_v0 }
  0x20   : > { %273 = vst.msk [vmem:[#allocation2 + $0x80] sm:$0xff] %vm256_vm0, %v2743_v0  ;;  %274 = vst.msk [vmem:[#allocation2 + $0x88] sm:$0xff] %vm256_vm0, %v2743_v0 }
  0x21   : > { %275 = vst.msk [vmem:[#allocation2 + $0x90] sm:$0xff] %vm256_vm0, %v2743_v0  ;;  %276 = vst.msk [vmem:[#allocation2 + $0x98] sm:$0xff] %vm256_vm0, %v2743_v0 }
  0x22   : > { %277 = vst.msk [vmem:[#allocation2 + $0xa0] sm:$0xff] %vm256_vm0, %v2743_v0  ;;  %278 = vst.msk [vmem:[#allocation2 + $0xa8] sm:$0xff] %vm256_vm0, %v2743_v0 }
  0x23   : > { %279 = vst.msk [vmem:[#allocation2 + $0xb0] sm:$0xff] %vm256_vm0, %v2743_v0  ;;  %280 = vst.msk [vmem:[#allocation2 + $0xb8] sm:$0xff] %vm256_vm0, %v2743_v0 }
  0x24   : > { %281 = vst.msk [vmem:[#allocation2 + $0xc0] sm:$0xff] %vm256_vm0, %v2743_v0  ;;  %282 = vst.msk [vmem:[#allocation2 + $0xc8] sm:$0xff] %vm256_vm0, %v2743_v0 }
  0x25   : > { %283 = vst.msk [vmem:[#allocation2 + $0xd0] sm:$0xff] %vm256_vm0, %v2743_v0  ;;  %284 = vst.msk [vmem:[#allocation2 + $0xd8] sm:$0xff] %vm256_vm0, %v2743_v0 }
  0x26   : > { %285 = vst.msk [vmem:[#allocation2 + $0xe0] sm:$0xff] %vm256_vm0, %v2743_v0  ;;  %286 = vst.msk [vmem:[#allocation2 + $0xe8] sm:$0xff] %vm256_vm0, %v2743_v0 }
  0x27   : > { %287 = vst.msk [vmem:[#allocation2 + $0xf0] sm:$0xff] %vm256_vm0, %v2743_v0  ;;  %288 = vst.msk [vmem:[#allocation2 + $0xf8] sm:$0xff] %vm256_vm0, %v2743_v0 }
  0x28   : > { %289 = vst.msk [vmem:[#allocation2 + $0x100] sm:$0xff] %vm256_vm0, %v2743_v0  ;;  %290 = vst.msk [vmem:[#allocation2 + $0x108] sm:$0xff] %vm256_vm0, %v2743_v0 }
  0x29   : > { %291 = vst.msk [vmem:[#allocation2 + $0x110] sm:$0xff] %vm256_vm0, %v2743_v0  ;;  %292 = vst.msk [vmem:[#allocation2 + $0x118] sm:$0xff] %vm256_vm0, %v2743_v0 }
  0x2a PF: > { %v455_v1 = vld [vmem:[%s2801_s28] sm:$0x3]  ;;  %vm601_vm1 = vcmask 1041408   ;;  %vm546_vm2 = vcmask 31744   ;;  %v2686_v4 = vld [vmem:[%s2811_s8 + $0x118] sm:$0xff]   ;;  %v2690_v11 = vld [vmem:[%s2811_s8 + $0x150] sm:$0xff]  }
  0x2b   : > { %2637 = vmatprep.subr.msk.bf16.mxu0 %vm601_vm1, %v455_v1  ;;  %2638 = vmatprep.subr.msk.bf16.mxu1 %vm601_vm1, %v455_v1  ;;  %v603_v2 = vsel %vm601_vm1, %v455_v1, 0  ;;  %v2685_v3 = vld [vmem:[%s2811_s8] sm:$0xff]   ;;  %v2688_v6 = vld [vmem:[%s2811_s8 + $0x134] sm:$0xff]   ;;  %v2692_v14 = vld [vmem:[%s2811_s8 + $0x16c] sm:$0xff]   ;;  %vm872_vm3 = vcmask 1042432   ;;  %vm873_vm4 = vcmask 1046532  }
  0x2c   : > { %2522 = vmatpush3.bf16.msra.mxu0 %v603_v2  ;;  %2636 = vmatpush3.bf16.msra.mxu1 %v603_v2  ;;  %v2687_v5 = vld [vmem:[%s2811_s8 + $0x1c] sm:$0xff]   ;;  %v2351_v7 = vld [vmem:[%s2801_s28 + $0x4] sm:$0x3]  ;;  %v2691_v13 = vld [vmem:[%s2811_s8 + $0x54] sm:$0xff]   ;;  %vm1364_vm6 = vcmask 1045508   ;;  %vm1818_vm8 = vcmask 64512  }
  0x2d   : > { %2523 = vmatprep.mubr.msk.bf16.mxu0 %vm546_vm2, %v2685_v3  ;;  %2543 = vmatprep.mubr.msk.bf16.mxu1 %vm546_vm2, %v2686_v4  ;;  %v2296_v8 = vld [vmem:[%s2801_s28 + $0x2] sm:$0x3]  ;;  %v1603_v9 = vsel %vm601_vm1, %v2351_v7, 0  ;;  %v2689_v10 = vld [vmem:[%s2811_s8 + $0x38] sm:$0xff]   ;;  %v2693_v15 = vld [vmem:[%s2811_s8 + $0x70] sm:$0xff]   ;;  %p2388_p9 = scmp.ne.s32.totalorder %s2725_s12, 2 }
  0x2e   : > { %2640 = vmatprep.subr.msk.bf16.mxu0 %vm601_vm1, %v2351_v7  ;;  %2639 = vmatprep.subr.msk.bf16.mxu1 %vm601_vm1, %v2296_v8  ;;  %v1112_v12 = vsel %vm601_vm1, %v2296_v8, 0  ;;  %v2694_v16 = vld [vmem:[%s2811_s8 + $0x188] sm:$0xff]   ;;  %v2698_v21 = vld [vmem:[%s2811_s8 + $0x1c0] sm:$0xff]   ;;  %v297_v23 = vld [vmem:[%s2811_s8 + $0x10] sm:$0xf] }
  0x2f   : > { %2524 = vmatmul.mubr.msk.bf16.vlgmr.msra.gmra.mxu0 %vm546_vm2, %v2687_v5  ;;  %2544 = vmatmul.mubr.msk.bf16.vlgmr.msra.gmra.mxu1 %vm546_vm2, %v2688_v6  ;;  %v2695_v17 = vld [vmem:[%s2811_s8 + $0x8c] sm:$0xff]   ;;  %v2696_v18 = vld [vmem:[%s2811_s8 + $0x1a4] sm:$0xff]   ;;  %v880_v26 = vrot.slane %v297_v23, 5  ;;  %vm2888_vm5 = vmor %vm872_vm3, %vm873_vm4  ;;  %v2333_v43 = vrot.slane %v297_v23, 10 }
  0x30   : > { %2598 = vmatpush3.bf16.msra.mxu0 %v1603_v9  ;;  %2527 = vmatprep.mubr.msk.bf16.mxu0 %vm546_vm2, %v2689_v10  ;;  %v2697_v19 = vld [vmem:[%s2811_s8 + $0xa8] sm:$0xff]   ;;  %v302_v28 = vld [vmem:[%s2811_s8 + $0x24] sm:$0xf]  ;;  %v309_v34 = vld [vmem:[%s2811_s8 + $0x40] sm:$0xf] }
  0x31   : > { %2560 = vmatpush3.bf16.msra.mxu1 %v1112_v12  ;;  %2547 = vmatprep.mubr.msk.bf16.mxu1 %vm546_vm2, %v2690_v11  ;;  %v295_v20 = vld [vmem:[%s2811_s8 + $0x8] sm:$0xf]  ;;  %v296_v22 = vld [vmem:[%s2811_s8 + $0xc] sm:$0xf]  ;;  %v310_v35 = vld [vmem:[%s2811_s8 + $0x44] sm:$0xf] }
  0x32   : > { %v2278_v24 = vrot.slane %v295_v20, 9  ;;  %v877_v25 = vrot.slane %v296_v22, 5  ;;  %v303_v29 = vld [vmem:[%s2811_s8 + $0x28] sm:$0xf]  ;;  %v2897_v31 = vld [vmem:[%s2811_s8 + $0x2c] sm:$0xf]  ;;  %vm2924_vm7 = vmor %vm601_vm1, %vm1364_vm6 }
  0x33   : > { %v884_v32 = vrot.slane %v303_v29, 5  ;;  %v2699_v33 = vld [vmem:[%s2811_s8 + $0xc4] sm:$0xff]   ;;  %v2700_v36 = vld [vmem:[%s2811_s8 + $0x1dc] sm:$0xff]   ;;  %v2279_v40 = vrot.slane %v302_v28, 9  ;;  %v298_v42 = vld [vmem:[%s2811_s8 + $0x14] sm:$0xf] }
  0x34   : > { %v879_v30 = vrot.slane %v877_v25, 4  ;;  %v2701_v37 = vld [vmem:[%s2811_s8 + $0xe0] sm:$0xff]   ;;  %v878_v38 = vsel %vm2888_vm5, %v2278_v24, %v877_v25  ;;  %v2910_v41 = vld [vmem:[%s2811_s8 + $0x48] sm:$0xf]  ;;  %v887_v45 = vrot.slane %v2897_v31, 5  ;;  %v891_v46 = vrot.slane %v310_v35, 5 }
  0x35   : > { %v886_v44 = vrot.slane %v884_v32, 4  ;;  %v299_v47 = vld [vmem:[%s2811_s8 + $0x18] sm:$0x3]  ;;  %v1368_v48 = vrot.slane %v298_v42, 6  ;;  %v2280_v49 = vrot.slane %v309_v34, 9  ;;  %v894_v50 = vrot.slane %v2910_v41, 5 }
  0x36   : > { %v881_v39 = vsel %vm2888_vm5, %v879_v30, %v880_v26  ;;  %v316_v51 = vld [vmem:[%s2811_s8 + $0x5c] sm:$0xf]  ;;  %v317_v52 = vld [vmem:[%s2811_s8 + $0x60] sm:$0xf]  ;;  %v893_v54 = vrot.slane %v891_v46, 4  ;;  %v1371_v55 = vrot.slane %v299_v47, 6  ;;  %v885_v2 = vsel %vm2888_vm5, %v2279_v40, %v884_v32 }
  0x37   : > { %2528 = vmatmul.mubr.msk.bf16.gmra.mxu0 %vm546_vm2, %v2691_v13  ;;  %2548 = vmatmul.mubr.msk.bf16.gmra.mxu1 %vm546_vm2, %v2692_v14  ;;  %v2297_v53 = vcombine.low %v878_v38, %v881_v39  ;;  %v2919_v56 = vld [vmem:[%s2811_s8 + $0x64] sm:$0xf]  ;;  %v305_v57 = vld [vmem:[%s2811_s8 + $0x30] sm:$0xf]  ;;  %v1370_v59 = vrot.slane %v1368_v48, 4  ;;  %v898_v60 = vrot.slane %v317_v52, 5  ;;  %v888_v3 = vsel %vm2888_vm5, %v886_v44, %v887_v45 }
  0x38   : > { %2531 = vmatprep.mubr.msk.bf16.mxu0 %vm546_vm2, %v2693_v15  ;;  %2551 = vmatprep.mubr.msk.bf16.mxu1 %vm546_vm2, %v2694_v16  ;;  %v2334_v61 = vrot.slane %v2897_v31, 10  ;;  %v2281_v62 = vrot.slane %v316_v51, 9  ;;  %v306_v63 = vld [vmem:[%s2811_s8 + $0x34] sm:$0x3]  ;;  %v1375_v0 = vrot.slane %v305_v57, 6  ;;  %v901_v5 = vrot.slane %v2919_v56, 5 }
  0x39   : > { %v324_v1 = vld [vmem:[%s2811_s8 + $0x7c] sm:$0xf]  ;;  %v900_v4 = vrot.slane %v898_v60, 4  ;;  %v312_v6 = vld [vmem:[%s2811_s8 + $0x4c] sm:$0xf]  ;;  %v892_v7 = vsel %vm2888_vm5, %v2280_v49, %v891_v46  ;;  %v895_v8 = vsel %vm2888_vm5, %v893_v54, %v894_v50  ;;  %v1369_v9 = vsel %vm2924_vm7, %v2333_v43, %v1368_v48 }
  0x3a   : > { %v1372_v10 = vsel %vm2924_vm7, %v1370_v59, %v1371_v55  ;;  %v323_v11 = vld [vmem:[%s2811_s8 + $0x78] sm:$0xf]  ;;  %v313_v12 = vld [vmem:[%s2811_s8 + $0x50] sm:$0x3]  ;;  %v1377_v13 = vrot.slane %v1375_v0, 4  ;;  %v1378_v14 = vrot.slane %v306_v63, 6  ;;  %v2957_v20 = vsel %vm2888_vm5, %v2281_v62, %v898_v60 }
  0x3b   : > { %v2952_v15 = vld [vmem:[%s2811_s8 + $0x80] sm:$0xf]  ;;  %v905_v16 = vrot.slane %v324_v1, 5  ;;  %v331_v22 = vld [vmem:[%s2811_s8 + $0x98] sm:$0xf]  ;;  %v2352_v24 = vcombine.low %v1369_v9, %v1372_v10  ;;  %v2964_v25 = vsel %vm2888_vm5, %v900_v4, %v901_v5  ;;  %v2282_v26 = vrot.slane %v323_v11, 9 }
  0x3c   : > { %v319_v23 = vld [vmem:[%s2811_s8 + $0x68] sm:$0xf]  ;;  %v1385_v28 = vrot.slane %v313_v12, 6  ;;  %v330_v29 = vld [vmem:[%s2811_s8 + $0x94] sm:$0xf]  ;;  %v2299_v30 = vcombine.low %v892_v7, %v895_v8  ;;  %v1376_v31 = vsel %vm2924_vm7, %v2334_v61, %v1375_v0  ;;  %v908_v32 = vrot.slane %v2952_v15, 5 }
  0x3d   : > { %v2971_v34 = vld [vmem:[%s2811_s8 + $0x9c] sm:$0xf]  ;;  %v338_v35 = vld [vmem:[%s2811_s8 + $0xb4] sm:$0xf]  ;;  %v912_v38 = vrot.slane %v331_v22, 5  ;;  %v1389_v39 = vrot.slane %v319_v23, 6  ;;  %v2300_v40 = vcombine.low %v2957_v20, %v2964_v25  ;;  %v906_v51 = vsel %vm2888_vm5, %v2282_v26, %v905_v16 }
  0x3e   : > { %v320_v42 = vld [vmem:[%s2811_s8 + $0x6c] sm:$0x3]  ;;  %v326_v43 = vld [vmem:[%s2811_s8 + $0x84] sm:$0xf]  ;;  %v915_v46 = vrot.slane %v2971_v34, 5  ;;  %v919_v49 = vrot.slane %v338_v35, 5 }
  0x3f   : > { %2532 = vmatmul.mubr.msk.bf16.gmra.mxu0 %vm546_vm2, %v2695_v17  ;;  %2552 = vmatmul.mubr.msk.bf16.gmra.mxu1 %vm546_vm2, %v2696_v18  ;;  %v1382_v17 = vrot.slane %v312_v6, 6  ;;  %v2702_v18 = vld [vmem:[%s2811_s8 + $0xfc] sm:$0xff]   ;;  %v337_v47 = vld [vmem:[%s2811_s8 + $0xb0] sm:$0xf]  ;;  %v2990_v48 = vld [vmem:[%s2811_s8 + $0xb8] sm:$0xf] }
  0x40   : > { %2535 = vmatprep.mubr.msk.bf16.mxu0 %vm546_vm2, %v2697_v19  ;;  %2555 = vmatprep.mubr.msk.bf16.mxu1 %vm546_vm2, %v2698_v21  ;;  %v2298_v19 = vcombine.low %v885_v2, %v888_v3  ;;  %v2335_v21 = vrot.slane %v2910_v41, 10  ;;  %v2283_v41 = vrot.slane %v330_v29, 9  ;;  %v2336_v52 = vrot.slane %v2919_v56, 10  ;;  %v345_v55 = vld [vmem:[%s2811_s8 + $0xd0] sm:$0xf] }
  0x41   : > { %v1396_v54 = vrot.slane %v326_v43, 6  ;;  %v914_v59 = vrot.slane %v912_v38, 4  ;;  %v1391_v60 = vrot.slane %v1389_v39, 4  ;;  %v1392_v61 = vrot.slane %v320_v42, 6  ;;  %v333_v62 = vld [vmem:[%s2811_s8 + $0xa0] sm:$0xf] }
  0x42   : > { %v1383_v44 = vsel %vm2924_vm7, %v2335_v21, %v1382_v17  ;;  %v2284_v0 = vrot.slane %v337_v47, 9  ;;  %v922_v1 = vrot.slane %v2990_v48, 5  ;;  %v2337_v56 = vrot.slane %v2952_v15, 10  ;;  %v344_v5 = vld [vmem:[%s2811_s8 + $0xcc] sm:$0xf] }
  0x43   : > { %v921_v2 = vrot.slane %v919_v49, 4  ;;  %v1398_v3 = vrot.slane %v1396_v54, 4  ;;  %v926_v6 = vrot.slane %v345_v55, 5  ;;  %v3005_v8 = vld [vmem:[%s2811_s8 + $0xd4] sm:$0xf]  ;;  %v1403_v9 = vrot.slane %v333_v62, 6 }
  0x44   : > { %v913_v10 = vsel %vm2888_vm5, %v2283_v41, %v912_v38  ;;  %v916_v11 = vsel %vm2888_vm5, %v914_v59, %v915_v46  ;;  %v1390_v12 = vsel %vm2924_vm7, %v2336_v52, %v1389_v39  ;;  %v352_v15 = vld [vmem:[%s2811_s8 + $0xec] sm:$0xf]  ;;  %v2338_v20 = vrot.slane %v2971_v34, 10  ;;  %v351_v25 = vld [vmem:[%s2811_s8 + $0xe8] sm:$0xf] }
  0x45   : > { %v923_v21 = vsel %vm2888_vm5, %v921_v2, %v922_v1  ;;  %v928_v23 = vrot.slane %v926_v6, 4  ;;  %v1405_v26 = vrot.slane %v1403_v9, 4  ;;  %v3034_v29 = vld [vmem:[%s2811_s8 + $0xf0] sm:$0xf]  ;;  %v341_v34 = vld [vmem:[%s2811_s8 + $0xc0] sm:$0x3] }
  0x46   : > { %v1404_v38 = vsel %vm2924_vm7, %v2338_v20, %v1403_v9  ;;  %v359_v39 = vld [vmem:[%s2811_s8 + $0x108] sm:$0xf]  ;;  %v2286_v42 = vrot.slane %v351_v25, 9  ;;  %v936_v43 = vrot.slane %v3034_v29, 5  ;;  %v358_v52 = vld [vmem:[%s2811_s8 + $0x104] sm:$0xf] }
  0x47   : > { %2536 = vmatmul.mubr.msk.bf16.gmra.mxu0 %vm546_vm2, %v2699_v33  ;;  %2556 = vmatmul.mubr.msk.bf16.gmra.mxu1 %vm546_vm2, %v2700_v36  ;;  %v1384_v33 = vrot.slane %v1382_v17, 4  ;;  %v1379_v36 = vsel %vm2924_vm7, %v1377_v13, %v1378_v14  ;;  %v1393_v13 = vsel %vm2924_vm7, %v1391_v60, %v1392_v61  ;;  %v334_v14 = vld [vmem:[%s2811_s8 + $0xa4] sm:$0x3]  ;;  %v920_v17 = vsel %vm2888_vm5, %v2284_v0, %v919_v49  ;;  %v3068_v0 = vld [vmem:[%s2811_s8 + $0x128] sm:$0xf] }
  0x48   : > { %2539 = vmatprep.mubr.msk.bf16.mxu0 %vm546_vm2, %v2701_v37  ;;  %2561 = vmatprep.mubr.msk.bf16.mxu1 %vm546_vm2, %v2297_v53  ;;  %v907_v37 = vrot.slane %v905_v16, 4  ;;  %v2353_v50 = vcombine.low %v1376_v31, %v1379_v36  ;;  %v327_v53 = vld [vmem:[%s2811_s8 + $0x88] sm:$0x3]  ;;  %v340_v16 = vld [vmem:[%s2811_s8 + $0xbc] sm:$0xf]  ;;  %v2303_v35 = vcombine.low %v920_v17, %v923_v21  ;;  %v2340_v9 = vrot.slane %v3005_v8, 10 }
  0x49   : > { %v1386_v45 = vsel %vm2924_vm7, %v1384_v33, %v1385_v28  ;;  %v1399_v4 = vrot.slane %v327_v53, 6  ;;  %v1406_v28 = vrot.slane %v334_v14, 6  ;;  %v1410_v31 = vrot.slane %v340_v16, 6  ;;  %v3055_v53 = vld [vmem:[%s2811_s8 + $0x10c] sm:$0xf] }
  0x4a   : > { %v909_v57 = vsel %vm2888_vm5, %v907_v37, %v908_v32  ;;  %v2354_v63 = vcombine.low %v1383_v44, %v1386_v45  ;;  %v2302_v32 = vcombine.low %v913_v10, %v916_v11  ;;  %v2355_v33 = vcombine.low %v1390_v12, %v1393_v13  ;;  %v366_v45 = vld [vmem:[%s2811_s8 + $0x124] sm:$0xf] }
  0x4b   : > { %v2301_v7 = vcombine.low %v906_v51, %v909_v57  ;;  %v1400_v22 = vsel %vm2924_vm7, %v1398_v3, %v1399_v4  ;;  %v2339_v44 = vrot.slane %v2990_v48, 10  ;;  %v1407_v46 = vsel %vm2924_vm7, %v1405_v26, %v1406_v28  ;;  %v354_v51 = vld [vmem:[%s2811_s8 + $0xf4] sm:$0xf]  ;;  %v348_v48 = vld [vmem:[%s2811_s8 + $0xdc] sm:$0x3] }
  0x4c   : > { %v1412_v49 = vrot.slane %v1410_v31, 4  ;;  %v947_v59 = vrot.slane %v366_v45, 5  ;;  %v2357_v60 = vcombine.low %v1404_v38, %v1407_v46  ;;  %v1424_v1 = vrot.slane %v354_v51, 6  ;;  %v380_v28 = vld [vmem:[%s2811_s8 + $0x15c] sm:$0xf] }
  0x4d   : > { %v1411_v62 = vsel %vm2924_vm7, %v2339_v44, %v1410_v31  ;;  %v2287_v3 = vrot.slane %v358_v52, 9  ;;  %v943_v4 = vrot.slane %v3055_v53, 5  ;;  %v1420_v11 = vrot.slane %v348_v48, 6  ;;  %v369_v46 = vld [vmem:[%s2811_s8 + $0x130] sm:$0x3] }
  0x4e   : > { %v949_v13 = vrot.slane %v947_v59, 4  ;;  %v950_v14 = vrot.slane %v3068_v0, 5  ;;  %v1426_v17 = vrot.slane %v1424_v1, 4  ;;  %v387_v52 = vld [vmem:[%s2811_s8 + $0x178] sm:$0xf] }
  0x4f   : > { %2540 = vmatmul.mubr.msk.bf16.gmra.mxu0 %vm546_vm2, %v2702_v18  ;;  %2562 = vmatmul.mubr.msk.bf16.vlgmr.msra.gmra.mxu1 %vm546_vm2, %v2298_v19  ;;  %v1397_v18 = vsel %vm2924_vm7, %v2337_v56, %v1396_v54  ;;  %v2285_v19 = vrot.slane %v344_v5, 9  ;;  %v940_v54 = vrot.slane %v359_v39, 5  ;;  %v355_v5 = vld [vmem:[%s2811_s8 + $0xf8] sm:$0x3] }
  0x50   : > { %2599 = vmatprep.mubr.msk.bf16.mxu0 %vm546_vm2, %v2352_v24  ;;  %2565 = vmatprep.mubr.msk.bf16.mxu1 %vm546_vm2, %v2299_v30  ;;  %v929_v24 = vrot.slane %v3005_v8, 5  ;;  %v933_v30 = vrot.slane %v352_v15, 5  ;;  %v2356_v36 = vcombine.low %v1397_v18, %v1400_v22  ;;  %v2341_v15 = vrot.slane %v3034_v29, 10  ;;  %v3083_v22 = vld [vmem:[%s2811_s8 + $0x144] sm:$0xf] }
  0x51   : > { %v3039_v37 = vsel %vm2888_vm5, %v2285_v19, %v926_v6  ;;  %v373_v6 = vld [vmem:[%s2811_s8 + $0x140] sm:$0xf]  ;;  %v1427_v18 = vrot.slane %v355_v5, 6  ;;  %v372_v19 = vld [vmem:[%s2811_s8 + $0x13c] sm:$0xf]  ;;  %v941_v8 = vsel %vm2888_vm5, %v2287_v3, %v940_v54  ;;  %v951_v31 = vsel %vm2888_vm5, %v949_v13, %v950_v14 }
  0x52   : > { %v930_v41 = vsel %vm2888_vm5, %v928_v23, %v929_v24  ;;  %v935_v47 = vrot.slane %v933_v30, 4  ;;  %v934_v61 = vsel %vm2888_vm5, %v2286_v42, %v933_v30  ;;  %v954_v20 = vrot.slane %v373_v6, 5  ;;  %v361_v23 = vld [vmem:[%s2811_s8 + $0x110] sm:$0xf]  ;;  %v368_v29 = vld [vmem:[%s2811_s8 + $0x12c] sm:$0xf] }
  0x53   : > { %v2304_v57 = vcombine.low %v3039_v37, %v930_v41  ;;  %v362_v37 = vld [vmem:[%s2811_s8 + $0x114] sm:$0x3]  ;;  %v1431_v38 = vrot.slane %v361_v23, 6  ;;  %v379_v39 = vld [vmem:[%s2811_s8 + $0x158] sm:$0xf]  ;;  %v961_v41 = vrot.slane %v380_v28, 5 }
  0x54   : > { %v937_v56 = vsel %vm2888_vm5, %v935_v47, %v936_v43  ;;  %v1438_v42 = vrot.slane %v368_v29, 6  ;;  %v1434_v51 = vrot.slane %v362_v37, 6  ;;  %v383_v14 = vld [vmem:[%s2811_s8 + $0x168] sm:$0x3] }
  0x55   : > { %v2305_v21 = vcombine.low %v934_v61, %v937_v56  ;;  %v2343_v61 = vrot.slane %v3068_v0, 10  ;;  %v968_v56 = vrot.slane %v387_v52, 5  ;;  %v1455_v29 = vrot.slane %v383_v14, 6  ;;  %v407_v52 = vld [vmem:[%s2811_s8 + $0x1c8] sm:$0xf] }
  0x57   : > { %2600 = vmatmul.mubr.msk.bf16.vlgmr.msra.gmra.mxu0 %vm546_vm2, %v2353_v50  ;;  %2566 = vmatmul.mubr.msk.bf16.gmra.mxu1 %vm546_vm2, %v2300_v40  ;;  %v347_v40 = vld [vmem:[%s2811_s8 + $0xd8] sm:$0xf]  ;;  %v1413_v50 = vrot.slane %v341_v34, 6  ;;  %v1428_v34 = vsel %vm2924_vm7, %v1426_v17, %v1427_v18  ;;  %v393_v18 = vld [vmem:[%s2811_s8 + $0x190] sm:$0xf] }
  0x58   : > { %2603 = vmatprep.mubr.msk.bf16.mxu0 %vm546_vm2, %v2354_v63  ;;  %2569 = vmatprep.mubr.msk.bf16.mxu1 %vm546_vm2, %v2301_v7  ;;  %v1417_v55 = vrot.slane %v347_v40, 6  ;;  %v365_v63 = vld [vmem:[%s2811_s8 + $0x120] sm:$0xf]  ;;  %v942_v7 = vrot.slane %v940_v54, 4 }
  0x59   : > { %v1414_v2 = vsel %vm2924_vm7, %v1412_v49, %v1413_v50  ;;  %v2288_v12 = vrot.slane %v365_v63, 9  ;;  %v3112_v40 = vld [vmem:[%s2811_s8 + $0x160] sm:$0xf]  ;;  %v2342_v50 = vrot.slane %v3055_v53, 10  ;;  %v1441_v63 = vrot.slane %v369_v46, 6 }
  0x5a   : > { %v1419_v10 = vrot.slane %v1417_v55, 4  ;;  %v2358_v16 = vcombine.low %v1411_v62, %v1414_v2  ;;  %v944_v24 = vsel %vm2888_vm5, %v942_v7, %v943_v4  ;;  %v1418_v25 = vsel %vm2924_vm7, %v2340_v9, %v1417_v55  ;;  %v386_v53 = vld [vmem:[%s2811_s8 + $0x174] sm:$0xf]  ;;  %v3130_v2 = vld [vmem:[%s2811_s8 + $0x17c] sm:$0xf] }
  0x5b   : > { %v948_v30 = vsel %vm2888_vm5, %v2288_v12, %v947_v59  ;;  %v2306_v43 = vcombine.low %v941_v8, %v944_v24  ;;  %v1433_v55 = vrot.slane %v1431_v38, 4  ;;  %v964_v48 = vrot.slane %v3112_v40, 5  ;;  %v375_v59 = vld [vmem:[%s2811_s8 + $0x148] sm:$0xf]  ;;  %v394_v4 = vld [vmem:[%s2811_s8 + $0x194] sm:$0xf] }
  0x5c   : > { %v1421_v26 = vsel %vm2924_vm7, %v1419_v10, %v1420_v11  ;;  %v2307_v45 = vcombine.low %v948_v30, %v951_v31  ;;  %v1440_v62 = vrot.slane %v1438_v42, 4  ;;  %v1445_v3 = vrot.slane %v375_v59, 6  ;;  %v376_v7 = vld [vmem:[%s2811_s8 + $0x14c] sm:$0x3]  ;;  %v3155_v24 = vld [vmem:[%s2811_s8 + $0x198] sm:$0xf] }
  0x5d   : > { %v2359_v44 = vcombine.low %v1418_v25, %v1421_v26  ;;  %v1432_v0 = vsel %vm2924_vm7, %v2342_v50, %v1431_v38  ;;  %v1435_v6 = vsel %vm2924_vm7, %v1433_v55, %v1434_v51  ;;  %v1439_v12 = vsel %vm2924_vm7, %v2343_v61, %v1438_v42  ;;  %v401_v30 = vld [vmem:[%s2811_s8 + $0x1b0] sm:$0xf]  ;;  %v396_v38 = vld [vmem:[%s2811_s8 + $0x19c] sm:$0xf]  ;;  %v3174_v42 = vld [vmem:[%s2811_s8 + $0x1b4] sm:$0xf] }
  0x5e   : > { %v1442_v13 = vsel %vm2924_vm7, %v1440_v62, %v1441_v63  ;;  %v971_v17 = vrot.slane %v3130_v2, 5  ;;  %v1447_v23 = vrot.slane %v1445_v3, 4  ;;  %v1448_v8 = vrot.slane %v376_v7, 6  ;;  %v390_v46 = vld [vmem:[%s2811_s8 + $0x184] sm:$0x3] }
  0x5f   : > { %2604 = vmatmul.mubr.msk.bf16.gmra.mxu0 %vm546_vm2, %v2355_v33  ;;  %2570 = vmatmul.mubr.msk.bf16.gmra.mxu1 %vm546_vm2, %v2302_v32  ;;  %v1425_v32 = vsel %vm2924_vm7, %v2341_v15, %v1424_v1  ;;  %v2289_v33 = vrot.slane %v372_v19, 9  ;;  %v382_v1 = vld [vmem:[%s2811_s8 + $0x164] sm:$0xf]  ;;  %v2291_v15 = vrot.slane %v386_v53, 9  ;;  %v975_v19 = vrot.slane %v394_v4, 5 }
  0x60   : > { %2607 = vmatprep.mubr.msk.bf16.mxu0 %vm546_vm2, %v2356_v36  ;;  %2573 = vmatprep.mubr.msk.bf16.mxu1 %vm546_vm2, %v2303_v35  ;;  %v956_v35 = vrot.slane %v954_v20, 4  ;;  %v957_v36 = vrot.slane %v3083_v22, 5  ;;  %v2360_v47 = vcombine.low %v1425_v32, %v1428_v34  ;;  %v1452_v9 = vrot.slane %v382_v1, 6  ;;  %v408_v34 = vld [vmem:[%s2811_s8 + $0x1cc] sm:$0xf] }
  0x61   : > { %v3117_v49 = vsel %vm2888_vm5, %v2289_v33, %v954_v20  ;;  %v2361_v20 = vcombine.low %v1432_v0, %v1435_v6  ;;  %v2362_v25 = vcombine.low %v1439_v12, %v1442_v13  ;;  %v2345_v26 = vrot.slane %v3112_v40, 10  ;;  %v389_v33 = vld [vmem:[%s2811_s8 + $0x180] sm:$0xf]  ;;  %v410_v12 = vld [vmem:[%s2811_s8 + $0x1d4] sm:$0xf] }
  0x62   : > { %v958_v54 = vsel %vm2888_vm5, %v956_v35, %v957_v36  ;;  %v1454_v28 = vrot.slane %v1452_v9, 4  ;;  %v2292_v32 = vrot.slane %v393_v18, 9  ;;  %v977_v36 = vrot.slane %v975_v19, 4  ;;  %v397_v61 = vld [vmem:[%s2811_s8 + $0x1a0] sm:$0x3] }
  0x63   : > { %v2308_v5 = vcombine.low %v3117_v49, %v958_v54  ;;  %v978_v37 = vrot.slane %v3155_v24, 5  ;;  %v1449_v40 = vsel %vm2924_vm7, %v1447_v23, %v1448_v8  ;;  %v989_v49 = vrot.slane %v408_v34, 5  ;;  %v3188_v54 = vld [vmem:[%s2811_s8 + $0x1d0] sm:$0xf]  ;;  %v414_v18 = vld [vmem:[%s2811_s8 + $0x1e4] sm:$0xf] }
  0x64   : > { %v976_v51 = vsel %vm2888_vm5, %v2292_v32, %v975_v19  ;;  %v1466_v55 = vrot.slane %v396_v38, 6  ;;  %v2346_v1 = vrot.slane %v3130_v2, 10  ;;  %v1462_v53 = vrot.slane %v390_v46, 6  ;;  %v416_v19 = vld [vmem:[%s2811_s8 + $0x1ec] sm:$0xf] }
  0x65   : > { %v991_v4 = vrot.slane %v989_v49, 4  ;;  %v2347_v6 = vrot.slane %v3155_v24, 10  ;;  %v404_v24 = vld [vmem:[%s2811_s8 + $0x1bc] sm:$0x3]  ;;  %v999_v32 = vrot.slane %v416_v19, 5  ;;  %v2348_v34 = vrot.slane %v3174_v42, 10 }
  0x66   : > { %v1468_v7 = vrot.slane %v1466_v55, 4 }
  0x67   : > { %2608 = vmatmul.mubr.msk.bf16.gmra.mxu0 %vm546_vm2, %v2357_v60  ;;  %2574 = vmatmul.mubr.msk.bf16.gmra.mxu1 %vm546_vm2, %v2304_v57  ;;  %v2290_v57 = vrot.slane %v379_v39, 9  ;;  %v963_v60 = vrot.slane %v961_v41, 4 }
  0x68   : > { %2611 = vmatprep.mubr.msk.bf16.mxu0 %vm546_vm2, %v2358_v16  ;;  %2577 = vmatprep.mubr.msk.bf16.mxu1 %vm546_vm2, %v2305_v21  ;;  %v970_v16 = vrot.slane %v968_v56, 4  ;;  %v2344_v21 = vrot.slane %v3083_v22, 10  ;;  %v969_v22 = vsel %vm2888_vm5, %v2291_v15, %v968_v56 }
  0x69   : > { %v962_v10 = vsel %vm2888_vm5, %v2290_v57, %v961_v41  ;;  %v965_v11 = vsel %vm2888_vm5, %v963_v60, %v964_v48  ;;  %v400_v41 = vld [vmem:[%s2811_s8 + $0x1ac] sm:$0xf]  ;;  %v979_v48 = vsel %vm2888_vm5, %v977_v36, %v978_v37  ;;  %v985_v60 = vrot.slane %v3174_v42, 5 }
  0x6a   : > { %v2309_v31 = vcombine.low %v962_v10, %v965_v11  ;;  %v972_v35 = vsel %vm2888_vm5, %v970_v16, %v971_v17  ;;  %v1446_v39 = vsel %vm2924_vm7, %v2344_v21, %v1445_v3  ;;  %v2293_v59 = vrot.slane %v400_v41, 9  ;;  %v403_v10 = vld [vmem:[%s2811_s8 + $0x1b8] sm:$0xf]  ;;  %v415_v11 = vld [vmem:[%s2811_s8 + $0x1e8] sm:$0xf] }
  0x6b   : > { %v2310_v50 = vcombine.low %v969_v22, %v972_v35  ;;  %v2363_v57 = vcombine.low %v1446_v39, %v1449_v40  ;;  %v2294_v3 = vrot.slane %v407_v52, 9  ;;  %v2311_v0 = vcombine.low %v976_v51, %v979_v48  ;;  %v417_v40 = vld [vmem:[%s2811_s8 + $0x1f0] sm:$0xf] }
  0x6c   : > { %v1467_v21 = vsel %vm2924_vm7, %v2347_v6, %v1466_v55  ;;  %v996_v8 = vrot.slane %v415_v11, 5  ;;  %v1476_v35 = vrot.slane %v404_v24, 6  ;;  %v2349_v37 = vrot.slane %v3188_v54, 10 }
  0x6d   : > { %v990_v16 = vsel %vm2888_vm5, %v2294_v3, %v989_v49  ;;  %v418_v49 = vld [vmem:[%s2811_s8 + $0x1f4] sm:$0x3]  ;;  %v2350_v51 = vrot.slane %v416_v19, 10 }
  0x6e   : > { %v998_v36 = vrot.slane %v996_v8, 4 }
  0x6f   : > { %2612 = vmatmul.mubr.msk.bf16.gmra.mxu0 %vm546_vm2, %v2359_v44  ;;  %2578 = vmatmul.mubr.msk.bf16.gmra.mxu1 %vm546_vm2, %v2306_v43  ;;  %v982_v43 = vrot.slane %v401_v30, 5  ;;  %v1453_v44 = vsel %vm2924_vm7, %v2345_v26, %v1452_v9  ;;  %v1469_v9 = vrot.slane %v397_v61, 6 }
  0x70   : > { %2615 = vmatprep.mubr.msk.bf16.mxu0 %vm546_vm2, %v2360_v47  ;;  %2581 = vmatprep.mubr.msk.bf16.mxu1 %vm546_vm2, %v2307_v45  ;;  %v1456_v45 = vsel %vm2924_vm7, %v1454_v28, %v1455_v29  ;;  %v1459_v47 = vrot.slane %v389_v33, 6  ;;  %v411_v28 = vld [vmem:[%s2811_s8 + $0x1d8] sm:$0x3] }
  0x71   : > { %v2364_v62 = vcombine.low %v1453_v44, %v1456_v45  ;;  %v984_v63 = vrot.slane %v982_v43, 4  ;;  %v983_v2 = vsel %vm2888_vm5, %v2293_v59, %v982_v43  ;;  %v1470_v23 = vsel %vm2924_vm7, %v1468_v7, %v1469_v9 }
  0x72   : > { %v1461_v56 = vrot.slane %v1459_v47, 4  ;;  %v1460_v14 = vsel %vm2924_vm7, %v2346_v1, %v1459_v47  ;;  %v2366_v33 = vcombine.low %v1467_v21, %v1470_v23  ;;  %v1483_v39 = vrot.slane %v411_v28, 6 }
  0x73   : > { %v986_v13 = vsel %vm2888_vm5, %v984_v63, %v985_v60  ;;  %v1487_v43 = vrot.slane %v417_v40, 6  ;;  %v1000_v45 = vsel %vm2888_vm5, %v998_v36, %v999_v32  ;;  %v419_v32 = vld [vmem:[#allocation2] sm:$0xff]  ;;  %v420_v40 = vld [vmem:[#allocation2 + $0x8] sm:$0xff] }
  0x74   : > { %v1463_v15 = vsel %vm2924_vm7, %v1461_v56, %v1462_v53  ;;  %v2312_v26 = vcombine.low %v983_v2, %v986_v13 }
  0x75   : > { %v2365_v29 = vcombine.low %v1460_v14, %v1463_v15  ;;  %v1489_v55 = vrot.slane %v1487_v43, 4  ;;  %v1488_v27 = vsel %vm2924_vm7, %v2350_v51, %v1487_v43 }
  0x77   : > { %2616 = vmatmul.mubr.msk.bf16.gmra.mxu0 %vm546_vm2, %v2361_v20  ;;  %2582 = vmatmul.mubr.msk.bf16.gmra.mxu1 %vm546_vm2, %v2308_v5  ;;  %v992_v5 = vrot.slane %v3188_v54, 5  ;;  %v1473_v20 = vrot.slane %v403_v10, 6 }
  0x78   : > { %2619 = vmatprep.mubr.msk.bf16.mxu0 %vm546_vm2, %v2362_v25  ;;  %2585 = vmatprep.mubr.msk.bf16.mxu1 %vm546_vm2, %v2309_v31  ;;  %v1480_v25 = vrot.slane %v410_v12, 6  ;;  %v2295_v31 = vrot.slane %v414_v18, 9 }
  0x79   : > { %v993_v17 = vsel %vm2888_vm5, %v991_v4, %v992_v5  ;;  %v1475_v22 = vrot.slane %v1473_v20, 4  ;;  %v1474_v41 = vsel %vm2924_vm7, %v2348_v34, %v1473_v20 }
  0x7a   : > { %v2313_v30 = vcombine.low %v990_v16, %v993_v17  ;;  %v1482_v38 = vrot.slane %v1480_v25, 4  ;;  %v997_v44 = vsel %vm2888_vm5, %v2295_v31, %v996_v8  ;;  %v1481_v46 = vsel %vm2924_vm7, %v2349_v37, %v1480_v25 }
  0x7b   : > { %v1477_v42 = vsel %vm2924_vm7, %v1475_v22, %v1476_v35  ;;  %v2314_v52 = vcombine.low %v997_v44, %v1000_v45  ;;  %v422_v35 = vld [vmem:[#allocation2 + $0x18] sm:$0xff] }
  0x7c   : > { %v1484_v47 = vsel %vm2924_vm7, %v1482_v38, %v1483_v39 }
  0x7d   : > { %v2368_v54 = vcombine.low %v1481_v46, %v1484_v47  ;;  %v425_v46 = vld [vmem:[#allocation2 + $0x30] sm:$0xff] }
  0x7f   : > { %2620 = vmatmul.mubr.msk.bf16.gmra.mxu0 %vm546_vm2, %v2363_v57  ;;  %2586 = vmatmul.mubr.msk.bf16.gmra.mxu1 %vm546_vm2, %v2310_v50  ;;  %v2367_v50 = vcombine.low %v1474_v41, %v1477_v42  ;;  %v1490_v57 = vrot.slane %v418_v49, 6 }
  0x80   : > { %2623 = vmatprep.mubr.msk.bf16.mxu0 %vm546_vm2, %v2364_v62  ;;  %2589 = vmatprep.mubr.msk.bf16.mxu1 %vm546_vm2, %v2311_v0 }
  0x81   : > { %v1491_v48 = vsel %vm2924_vm7, %v1489_v55, %v1490_v57 }
  0x82   : > { %v2369_v59 = vcombine.low %v1488_v27, %v1491_v48 }
  0x87   : > { %2624 = vmatmul.mubr.msk.bf16.gmra.mxu0 %vm546_vm2, %v2365_v29  ;;  %2590 = vmatmul.mubr.msk.bf16.gmra.mxu1 %vm546_vm2, %v2312_v26  ;;  %v421_v29 = vld [vmem:[#allocation2 + $0x10] sm:$0xff] }
  0x88   : > { %2627 = vmatprep.mubr.msk.bf16.mxu0 %vm546_vm2, %v2366_v33  ;;  %2593 = vmatprep.mubr.msk.bf16.mxu1 %vm546_vm2, %v2313_v30 }
  0x8f   : > { %2628 = vmatmul.mubr.msk.bf16.gmra.mxu0 %vm546_vm2, %v2367_v50  ;;  %2594 = vmatmul.mubr.msk.bf16.gmra.mxu1 %vm546_vm2, %v2314_v52 }
  0x90   : > { %2631 = vmatprep.mubr.msk.bf16.mxu0 %vm546_vm2, %v2368_v54  ;;  %v423_v54 = vld [vmem:[#allocation2 + $0x20] sm:$0xff] }
  0x97   : > { %2632 = vmatmul.mubr.msk.bf16.gmra.mxu0 %vm546_vm2, %v2369_v59 }
  0xef   : > { %v2525_v60 = vpop.f32.mrf.mxu0  ;;  %v3252_v61 = vpop.f32.mrf.mxu1 }
  0xf0   : > { %v784_v34 = vadd.f32 %v2525_v60, %v421_v29  ;;  %v426_v60 = vld [vmem:[#allocation2 + $0x38] sm:$0xff] }
  0xf1   : > { %v639_v62 = vpop.f32.mrf.mxu0  ;;  %v3254_v63 = vpop.f32.mrf.mxu1 }
  0xf2   : > { %v782_v37 = vadd.f32 %v639_v62, %v419_v32 }
  0xf3   : > { %v2526_v1 = vpop.f32.mrf.mxu0  ;;  %v3256_v53 = vpop.f32.mrf.mxu1 }
  0xf4   : > { %v785_v42 = vadd.f32 %v2526_v1, %v422_v35 }
  0xf5   : > { %v642_v56 = vpop.f32.mrf.mxu0  ;;  %v3258_v3 = vpop.f32.mrf.mxu1 }
  0xf6   : > { %v783_v49 = vadd.f32 %v642_v56, %v420_v40 }
  0xf7   : > { %v2529_v4 = vpop.f32.mrf.mxu0  ;;  %v3260_v5 = vpop.f32.mrf.mxu1 }
  0xf8   : > { %v788_v57 = vadd.f32 %v2529_v4, %v425_v46 }
  0xf9   : > { %v655_v58 = vpop.f32.mrf.mxu0  ;;  %v3262_v0 = vpop.f32.mrf.mxu1 }
  0xfa   : > { %v786_v1 = vadd.f32 %v655_v58, %v423_v54 }
  0xfb   : > { %v3264_v6 = vpop.f32.mrf.mxu0  ;;  %v3266_v7 = vpop.f32.mrf.mxu1 }
  0xfc   : > { %v789_v4 = vadd.f32 %v3264_v6, %v426_v60 }
  0xfd   : > { %v3268_v9 = vpop.f32.mrf.mxu0  ;;  %v3270_v10 = vpop.f32.mrf.mxu1 }
  0xff   : > { %v3272_v11 = vpop.f32.mrf.mxu0  ;;  %v3274_v12 = vpop.f32.mrf.mxu1 }
 0x101   : > { %v3276_v2 = vpop.f32.mrf.mxu0  ;;  %v3278_v13 = vpop.f32.mrf.mxu1 }
 0x103   : > { %v3280_v14 = vpop.f32.mrf.mxu0  ;;  %v3282_v15 = vpop.f32.mrf.mxu1 }
 0x105   : > { %v3284_v16 = vpop.f32.mrf.mxu0  ;;  %v3286_v17 = vpop.f32.mrf.mxu1 }
 0x107   : > { %v3288_v18 = vpop.f32.mrf.mxu0  ;;  %v3290_v19 = vpop.f32.mrf.mxu1 }
 0x109   : > { %v3292_v20 = vpop.f32.mrf.mxu0  ;;  %v3294_v21 = vpop.f32.mrf.mxu1 }
 0x10b   : > { %v3296_v23 = vpop.f32.mrf.mxu0  ;;  %v3298_v8 = vpop.f32.mrf.mxu1 }
 0x10d   : > { %v3300_v24 = vpop.f32.mrf.mxu0  ;;  %v3302_v25 = vpop.f32.mrf.mxu1 }
 0x10f   : > { %v3304_v26 = vpop.f32.mrf.mxu0  ;;  %v2563_v28 = vpop.f32.mrf.mxu1 }
 0x110   : > { %v1293_v38 = vadd.f32 %v2563_v28, %v784_v34 }
 0x111   : > { %v3306_v30 = vpop.f32.mrf.mxu0  ;;  %v1148_v31 = vpop.f32.mrf.mxu1 }
 0x112   : > { %v1291_v43 = vadd.f32 %v1148_v31, %v782_v37  ;;  %v424_v31 = vld [vmem:[#allocation2 + $0x28] sm:$0xff]  ;;  %v429_v37 = vld [vmem:[#allocation2 + $0x50] sm:$0xff] }
 0x113   : > { %v3308_v33 = vpop.f32.mrf.mxu0  ;;  %v2564_v22 = vpop.f32.mrf.mxu1 }
 0x114   : > { %v1294_v50 = vadd.f32 %v2564_v22, %v785_v42  ;;  %v427_v42 = vld [vmem:[#allocation2 + $0x40] sm:$0xff] }
 0x115   : > { %v3310_v36 = vpop.f32.mrf.mxu0  ;;  %v1151_v39 = vpop.f32.mrf.mxu1 }
 0x116   : > { %v1292_v27 = vadd.f32 %v1151_v39, %v783_v49  ;;  %v430_v49 = vld [vmem:[#allocation2 + $0x58] sm:$0xff] }
 0x117   : > { %v2601_v41 = vpop.f32.mrf.mxu0  ;;  %v2567_v44 = vpop.f32.mrf.mxu1 }
 0x118   : > { %v3312_v45 = vadd.f32 %v2601_v41, %v1293_v38  ;;  %v1297_v56 = vadd.f32 %v2567_v44, %v788_v57  ;;  %v787_v38 = vadd.f32 %v3268_v9, %v424_v31  ;;  %v428_v57 = vld [vmem:[#allocation2 + $0x48] sm:$0xff] }
 0x119   : > { %v1639_v47 = vpop.f32.mrf.mxu0  ;;  %v1164_v51 = vpop.f32.mrf.mxu1 }
 0x11a   : > { %1821 = vst.msk [vmem:[#allocation2 + $0x10] sm:$0xff] %vm1818_vm8, %v3312_v45  ;;  %v3316_v52 = vadd.f32 %v1639_v47, %v1291_v43  ;;  %v1295_v34 = vadd.f32 %v1164_v51, %v786_v1  ;;  %v792_v43 = vadd.f32 %v3272_v11, %v429_v37  ;;  %v433_v1 = vld [vmem:[#allocation2 + $0x70] sm:$0xff] }
 0x11b   : > { %v2602_v55 = vpop.f32.mrf.mxu0  ;;  %v2568_v48 = vpop.f32.mrf.mxu1 }
 0x11c   : > { %1819 = vst.msk [vmem:[#allocation2] sm:$0xff] %vm1818_vm8, %v3316_v52  ;;  %v3320_v59 = vadd.f32 %v2602_v55, %v1294_v50  ;;  %v1298_v39 = vadd.f32 %v2568_v48, %v789_v4  ;;  %v790_v50 = vadd.f32 %v3276_v2, %v427_v42  ;;  %v431_v4 = vld [vmem:[#allocation2 + $0x60] sm:$0xff] }
 0x11d   : > { %v1642_v62 = vpop.f32.mrf.mxu0  ;;  %v1167_v28 = vpop.f32.mrf.mxu1 }
 0x11e   : > { %1822 = vst.msk [vmem:[#allocation2 + $0x18] sm:$0xff] %vm1818_vm8, %v3320_v59  ;;  %v3324_v29 = vadd.f32 %v1642_v62, %v1292_v27  ;;  %v1296_v44 = vadd.f32 %v1167_v28, %v787_v38  ;;  %v793_v27 = vadd.f32 %v3280_v14, %v430_v49  ;;  %v434_v38 = vld [vmem:[#allocation2 + $0x78] sm:$0xff] }
 0x11f   : > { %v2605_v32 = vpop.f32.mrf.mxu0  ;;  %v2571_v22 = vpop.f32.mrf.mxu1 }
 0x120   : > { %1820 = vst.msk [vmem:[#allocation2 + $0x8] sm:$0xff] %vm1818_vm8, %v3324_v29  ;;  %v3329_v35 = vadd.f32 %v2605_v32, %v1297_v56  ;;  %v1301_v51 = vadd.f32 %v2571_v22, %v792_v43  ;;  %v791_v56 = vadd.f32 %v3284_v16, %v428_v57  ;;  %v432_v43 = vld [vmem:[#allocation2 + $0x68] sm:$0xff] }
 0x121   : > { %v1655_v58 = vpop.f32.mrf.mxu0  ;;  %v1180_v40 = vpop.f32.mrf.mxu1 }
 0x122   : > { %1825 = vst.msk [vmem:[#allocation2 + $0x30] sm:$0xff] %vm1818_vm8, %v3329_v35  ;;  %v3334_v41 = vadd.f32 %v1655_v58, %v1295_v34  ;;  %v1299_v48 = vadd.f32 %v1180_v40, %v790_v50  ;;  %v796_v34 = vadd.f32 %v3288_v18, %v433_v1  ;;  %v437_v50 = vld [vmem:[#allocation2 + $0x90] sm:$0xff] }
 0x123   : > { %v2606_v6 = vpop.f32.mrf.mxu0  ;;  %v2572_v46 = vpop.f32.mrf.mxu1 }
 0x124   : > { %1823 = vst.msk [vmem:[#allocation2 + $0x20] sm:$0xff] %vm1818_vm8, %v3334_v41  ;;  %v3339_v47 = vadd.f32 %v2606_v6, %v1298_v39  ;;  %v1302_v28 = vadd.f32 %v2572_v46, %v793_v27  ;;  %v794_v39 = vadd.f32 %v3292_v20, %v431_v4  ;;  %v435_v27 = vld [vmem:[#allocation2 + $0x80] sm:$0xff] }
 0x125   : > { %v1658_v9 = vpop.f32.mrf.mxu0  ;;  %v1183_v54 = vpop.f32.mrf.mxu1 }
 0x126   : > { %1826 = vst.msk [vmem:[#allocation2 + $0x38] sm:$0xff] %vm1818_vm8, %v3339_v47  ;;  %v3344_v55 = vadd.f32 %v1658_v9, %v1296_v44  ;;  %v1300_v22 = vadd.f32 %v1183_v54, %v791_v56  ;;  %v797_v44 = vadd.f32 %v3296_v23, %v434_v38  ;;  %v438_v56 = vld [vmem:[#allocation2 + $0x98] sm:$0xff] }
 0x127   : > { %v2609_v11 = vpop.f32.mrf.mxu0  ;;  %v2575_v60 = vpop.f32.mrf.mxu1 }
 0x128   : > { %1824 = vst.msk [vmem:[#allocation2 + $0x28] sm:$0xff] %vm1818_vm8, %v3344_v55  ;;  %v3349_v62 = vadd.f32 %v2609_v11, %v1301_v51  ;;  %v1305_v40 = vadd.f32 %v2575_v60, %v796_v34  ;;  %v795_v51 = vadd.f32 %v3300_v24, %v432_v43  ;;  %v436_v34 = vld [vmem:[#allocation2 + $0x88] sm:$0xff] }
 0x129   : > { %v1671_v2 = vpop.f32.mrf.mxu0  ;;  %v1196_v31 = vpop.f32.mrf.mxu1 }
 0x12a   : > { %1829 = vst.msk [vmem:[#allocation2 + $0x50] sm:$0xff] %vm1818_vm8, %v3349_v62  ;;  %v3354_v32 = vadd.f32 %v1671_v2, %v1299_v48  ;;  %v1303_v46 = vadd.f32 %v1196_v31, %v794_v39  ;;  %v800_v48 = vadd.f32 %v3304_v26, %v437_v50  ;;  %v441_v39 = vld [vmem:[#allocation2 + $0xb0] sm:$0xff] }
 0x12b   : > { %v2610_v14 = vpop.f32.mrf.mxu0  ;;  %v2576_v37 = vpop.f32.mrf.mxu1 }
 0x12c   : > { %1827 = vst.msk [vmem:[#allocation2 + $0x40] sm:$0xff] %vm1818_vm8, %v3354_v32  ;;  %v3359_v58 = vadd.f32 %v2610_v14, %v1302_v28  ;;  %v1306_v54 = vadd.f32 %v2576_v37, %v797_v44  ;;  %v798_v28 = vadd.f32 %v3306_v30, %v435_v27  ;;  %v439_v44 = vld [vmem:[#allocation2 + $0xa0] sm:$0xff] }
 0x12d   : > { %v1674_v16 = vpop.f32.mrf.mxu0  ;;  %v1199_v42 = vpop.f32.mrf.mxu1 }
 0x12e   : > { %1830 = vst.msk [vmem:[#allocation2 + $0x58] sm:$0xff] %vm1818_vm8, %v3359_v58  ;;  %v3364_v6 = vadd.f32 %v1674_v16, %v1300_v22  ;;  %v1304_v60 = vadd.f32 %v1199_v42, %v795_v51  ;;  %v801_v22 = vadd.f32 %v3308_v33, %v438_v56  ;;  %v442_v51 = vld [vmem:[#allocation2 + $0xb8] sm:$0xff] }
 0x12f   : > { %v2613_v18 = vpop.f32.mrf.mxu0  ;;  %v2579_v49 = vpop.f32.mrf.mxu1 }
 0x130   : > { %1828 = vst.msk [vmem:[#allocation2 + $0x48] sm:$0xff] %vm1818_vm8, %v3364_v6  ;;  %v3369_v9 = vadd.f32 %v2613_v18, %v1305_v40  ;;  %v1309_v31 = vadd.f32 %v2579_v49, %v800_v48  ;;  %v799_v40 = vadd.f32 %v3310_v36, %v436_v34  ;;  %v440_v48 = vld [vmem:[#allocation2 + $0xa8] sm:$0xff] }
 0x131   : > { %v1687_v20 = vpop.f32.mrf.mxu0  ;;  %v1212_v57 = vpop.f32.mrf.mxu1 }
 0x132   : > { %1833 = vst.msk [vmem:[#allocation2 + $0x70] sm:$0xff] %vm1818_vm8, %v3369_v9  ;;  %v3374_v11 = vadd.f32 %v1687_v20, %v1303_v46  ;;  %v1307_v37 = vadd.f32 %v1212_v57, %v798_v28  ;;  %v804_v46 = vadd.f32 %v3252_v61, %v441_v39  ;;  %v445_v28 = vld [vmem:[#allocation2 + $0xd0] sm:$0xff] }
 0x133   : > { %v2614_v23 = vpop.f32.mrf.mxu0  ;;  %v2580_v1 = vpop.f32.mrf.mxu1 }
 0x134   : > { %1831 = vst.msk [vmem:[#allocation2 + $0x60] sm:$0xff] %vm1818_vm8, %v3374_v11  ;;  %v3379_v2 = vadd.f32 %v2614_v23, %v1306_v54  ;;  %v1310_v42 = vadd.f32 %v2580_v1, %v801_v22  ;;  %v802_v54 = vadd.f32 %v3254_v63, %v439_v44  ;;  %v443_v22 = vld [vmem:[#allocation2 + $0xc0] sm:$0xff] }
 0x135   : > { %v1690_v24 = vpop.f32.mrf.mxu0  ;;  %v1215_v4 = vpop.f32.mrf.mxu1 }
 0x136   : > { %1834 = vst.msk [vmem:[#allocation2 + $0x78] sm:$0xff] %vm1818_vm8, %v3379_v2  ;;  %v3384_v14 = vadd.f32 %v1690_v24, %v1304_v60  ;;  %v1308_v49 = vadd.f32 %v1215_v4, %v799_v40  ;;  %v805_v60 = vadd.f32 %v3256_v53, %v442_v51  ;;  %v446_v40 = vld [vmem:[#allocation2 + $0xd8] sm:$0xff] }
 0x137   : > { %v2617_v26 = vpop.f32.mrf.mxu0  ;;  %v2583_v38 = vpop.f32.mrf.mxu1 }
 0x138   : > { %1832 = vst.msk [vmem:[#allocation2 + $0x68] sm:$0xff] %vm1818_vm8, %v3384_v14  ;;  %v3389_v16 = vadd.f32 %v2617_v26, %v1309_v31  ;;  %v1313_v57 = vadd.f32 %v2583_v38, %v804_v46  ;;  %v803_v31 = vadd.f32 %v3258_v3, %v440_v48  ;;  %v444_v46 = vld [vmem:[#allocation2 + $0xc8] sm:$0xff] }
 0x139   : > { %v1703_v30 = vpop.f32.mrf.mxu0  ;;  %v1228_v43 = vpop.f32.mrf.mxu1 }
 0x13a   : > { %1837 = vst.msk [vmem:[#allocation2 + $0x90] sm:$0xff] %vm1818_vm8, %v3389_v16  ;;  %v3394_v18 = vadd.f32 %v1703_v30, %v1307_v37  ;;  %v1311_v1 = vadd.f32 %v1228_v43, %v802_v54  ;;  %v808_v37 = vadd.f32 %v3260_v5, %v445_v28  ;;  %v449_v54 = vld [vmem:[#allocation2 + $0xf0] sm:$0xff] }
 0x13b   : > { %v2618_v33 = vpop.f32.mrf.mxu0  ;;  %v2584_v50 = vpop.f32.mrf.mxu1 }
 0x13c   : > { %1835 = vst.msk [vmem:[#allocation2 + $0x80] sm:$0xff] %vm1818_vm8, %v3394_v18  ;;  %v3399_v20 = vadd.f32 %v2618_v33, %v1310_v42  ;;  %v1314_v4 = vadd.f32 %v2584_v50, %v805_v60  ;;  %v806_v42 = vadd.f32 %v3262_v0, %v443_v22  ;;  %v447_v60 = vld [vmem:[#allocation2 + $0xe0] sm:$0xff] }
 0x13d   : > { %v1706_v36 = vpop.f32.mrf.mxu0  ;;  %v1231_v27 = vpop.f32.mrf.mxu1 }
 0x13e   : > { %1838 = vst.msk [vmem:[#allocation2 + $0x98] sm:$0xff] %vm1818_vm8, %v3399_v20  ;;  %v3404_v23 = vadd.f32 %v1706_v36, %v1308_v49  ;;  %v1312_v38 = vadd.f32 %v1231_v27, %v803_v31  ;;  %v809_v49 = vadd.f32 %v3266_v7, %v446_v40  ;;  %v450_v31 = vld [vmem:[#allocation2 + $0xf8] sm:$0xff] }
 0x13f   : > { %v2621_v61 = vpop.f32.mrf.mxu0  ;;  %v2587_v56 = vpop.f32.mrf.mxu1 }
 0x140   : > { %1836 = vst.msk [vmem:[#allocation2 + $0x88] sm:$0xff] %vm1818_vm8, %v3404_v23  ;;  %v3409_v24 = vadd.f32 %v2621_v61, %v1313_v57  ;;  %v1317_v43 = vadd.f32 %v2587_v56, %v808_v37  ;;  %v807_v57 = vadd.f32 %v3270_v10, %v444_v46  ;;  %v448_v37 = vld [vmem:[#allocation2 + $0xe8] sm:$0xff] }
 0x141   : > { %v1719_v63 = vpop.f32.mrf.mxu0  ;;  %v1244_v34 = vpop.f32.mrf.mxu1 }
 0x142   : > { %1841 = vst.msk [vmem:[#allocation2 + $0xb0] sm:$0xff] %vm1818_vm8, %v3409_v24  ;;  %v3414_v26 = vadd.f32 %v1719_v63, %v1311_v1  ;;  %v1315_v50 = vadd.f32 %v1244_v34, %v806_v42  ;;  %v812_v1 = vadd.f32 %v3274_v12, %v449_v54  ;;  %v453_v42 = vld [vmem:[#allocation2 + $0x110] sm:$0xff] }
 0x143   : > { %v2622_v53 = vpop.f32.mrf.mxu0  ;;  %v2588_v39 = vpop.f32.mrf.mxu1 }
 0x144   : > { %1839 = vst.msk [vmem:[#allocation2 + $0xa0] sm:$0xff] %vm1818_vm8, %v3414_v26  ;;  %v3419_v30 = vadd.f32 %v2622_v53, %v1314_v4  ;;  %v1318_v27 = vadd.f32 %v2588_v39, %v809_v49  ;;  %v810_v4 = vadd.f32 %v3278_v13, %v447_v60  ;;  %v451_v49 = vld [vmem:[#allocation2 + $0x100] sm:$0xff] }
 0x145   : > { %v1722_v3 = vpop.f32.mrf.mxu0  ;;  %v1247_v44 = vpop.f32.mrf.mxu1 }
 0x146   : > { %1842 = vst.msk [vmem:[#allocation2 + $0xb8] sm:$0xff] %vm1818_vm8, %v3419_v30  ;;  %v3424_v33 = vadd.f32 %v1722_v3, %v1312_v38  ;;  %v1316_v56 = vadd.f32 %v1247_v44, %v807_v57  ;;  %v813_v38 = vadd.f32 %v3282_v15, %v450_v31 }
 0x147   : > { %v2625_v5 = vpop.f32.mrf.mxu0  ;;  %v2591_v51 = vpop.f32.mrf.mxu1 }
 0x148   : > { %1840 = vst.msk [vmem:[#allocation2 + $0xa8] sm:$0xff] %vm1818_vm8, %v3424_v33  ;;  %v3429_v36 = vadd.f32 %v2625_v5, %v1317_v43  ;;  %v1321_v34 = vadd.f32 %v2591_v51, %v812_v1  ;;  %v811_v43 = vadd.f32 %v3286_v17, %v448_v37 }
 0x149   : > { %v1735_v0 = vpop.f32.mrf.mxu0  ;;  %v1260_v48 = vpop.f32.mrf.mxu1 }
 0x14a   : > { %1845 = vst.msk [vmem:[#allocation2 + $0xd0] sm:$0xff] %vm1818_vm8, %v3429_v36  ;;  %v3434_v61 = vadd.f32 %v1735_v0, %v1315_v50  ;;  %v1319_v39 = vadd.f32 %v1260_v48, %v810_v4  ;;  %v816_v50 = vadd.f32 %v3290_v19, %v453_v42  ;;  %v454_v0 = vld [vmem:[#allocation2 + $0x118] sm:$0xff] }
 0x14b   : > { %v2626_v7 = vpop.f32.mrf.mxu0  ;;  %v2592_v28 = vpop.f32.mrf.mxu1  ;;  %v817_v19 = vadd.f32 %v3298_v8, %v454_v0 }
 0x14c   : > { %1843 = vst.msk [vmem:[#allocation2 + $0xc0] sm:$0xff] %vm1818_vm8, %v3434_v61  ;;  %v3439_v63 = vadd.f32 %v2626_v7, %v1318_v27  ;;  %v1322_v44 = vadd.f32 %v2592_v28, %v813_v38  ;;  %v814_v27 = vadd.f32 %v3294_v21, %v451_v49  ;;  %v452_v7 = vld [vmem:[#allocation2 + $0x108] sm:$0xff] }
 0x14d   : > { %v1738_v10 = vpop.f32.mrf.mxu0  ;;  %v1263_v22 = vpop.f32.mrf.mxu1  ;;  %v815_v21 = vadd.f32 %v3302_v25, %v452_v7 }
 0x14e   : > { %1846 = vst.msk [vmem:[#allocation2 + $0xd8] sm:$0xff] %vm1818_vm8, %v3439_v63  ;;  %v3444_v53 = vadd.f32 %v1738_v10, %v1316_v56  ;;  %v1320_v51 = vadd.f32 %v1263_v22, %v811_v43 }
 0x14f   : > { %v2629_v12 = vpop.f32.mrf.mxu0  ;;  %v2595_v40 = vpop.f32.mrf.mxu1 }
 0x150   : > { %1844 = vst.msk [vmem:[#allocation2 + $0xc8] sm:$0xff] %vm1818_vm8, %v3444_v53  ;;  %v3449_v3 = vadd.f32 %v2629_v12, %v1321_v34  ;;  %v1325_v48 = vadd.f32 %v2595_v40, %v816_v50 }
 0x151   : > { %v1751_v13 = vpop.f32.mrf.mxu0  ;;  %v1276_v46 = vpop.f32.mrf.mxu1 }
 0x152   : > { %1849 = vst.msk [vmem:[#allocation2 + $0xf0] sm:$0xff] %vm1818_vm8, %v3449_v3  ;;  %v3454_v5 = vadd.f32 %v1751_v13, %v1319_v39  ;;  %v1323_v56 = vadd.f32 %v1276_v46, %v814_v27 }
 0x153   : > { %v2630_v15 = vpop.f32.mrf.mxu0  ;;  %v2596_v57 = vpop.f32.mrf.mxu1 }
 0x154   : > { %1847 = vst.msk [vmem:[#allocation2 + $0xe0] sm:$0xff] %vm1818_vm8, %v3454_v5  ;;  %v3459_v54 = vadd.f32 %v2630_v15, %v1322_v44  ;;  %v1326_v4 = vadd.f32 %v2596_v57, %v817_v19 }
 0x155   : > { %v1754_v17 = vpop.f32.mrf.mxu0  ;;  %v1279_v31 = vpop.f32.mrf.mxu1 }
 0x156   : > { %1850 = vst.msk [vmem:[#allocation2 + $0xf8] sm:$0xff] %vm1818_vm8, %v3459_v54  ;;  %v3464_v60 = vadd.f32 %v1754_v17, %v1320_v51  ;;  %v1324_v37 = vadd.f32 %v1279_v31, %v815_v21 }
 0x157   : > { %v2633_v1 = vpop.f32.mrf.mxu0 }
 0x158   : > { %1848 = vst.msk [vmem:[#allocation2 + $0xe8] sm:$0xff] %vm1818_vm8, %v3464_v60  ;;  %v3469_v28 = vadd.f32 %v2633_v1, %v1325_v48 }
 0x159   : > { %v1767_v10 = vpop.f32.mrf.mxu0 }
 0x15a   : > { %1853 = vst.msk [vmem:[#allocation2 + $0x110] sm:$0xff] %vm1818_vm8, %v3469_v28  ;;  %v3474_v34 = vadd.f32 %v1767_v10, %v1323_v56 }
 0x15b   : > { %v2634_v22 = vpop.f32.mrf.mxu0 }
 0x15c   : > { %1851 = vst.msk [vmem:[#allocation2 + $0x100] sm:$0xff] %vm1818_vm8, %v3474_v34  ;;  %v3478_v8 = vadd.f32 %v2634_v22, %v1326_v4  ;;  %1858 = sbr.rel (%p2388_p9) target bundleno = 386 (0x182), region = 40 }
 0x15d   : > { %v1770_v12 = vpop.f32.mrf.mxu0 }
 0x15e   : > { %1854 = vst.msk [vmem:[#allocation2 + $0x118] sm:$0xff] %vm1818_vm8, %v3478_v8  ;;  %v3482_v38 = vadd.f32 %v1770_v12, %v1324_v37 }
 0x160   : > { %1852 = vst.msk [vmem:[#allocation2 + $0x108] sm:$0xff] %vm1818_vm8, %v3482_v38 }
 0x161   : > { %v3490_v25 = vld [vmem:[%s3653_s2] ss:$0 sm:$0xff]  ;;  %vm2082_vm9 = vcmask 60416  }
 0x162   : > { %v1866_v39 = vadd.f32 %v3490_v25, %v3316_v52  ;;  %v1867_v40 = vadd.f32 %v3490_v25, %v3324_v29  ;;  %v1868_v42 = vadd.f32 %v3490_v25, %v3312_v45  ;;  %v1869_v13 = vadd.f32 %v3490_v25, %v3320_v59 }
 0x163   : > { %v1870_v43 = vadd.f32 %v3490_v25, %v3334_v41  ;;  %v1871_v44 = vadd.f32 %v3490_v25, %v3344_v55  ;;  %v1872_v46 = vadd.f32 %v3490_v25, %v3329_v35  ;;  %v1873_v52 = vadd.f32 %v3490_v25, %v3339_v47 }
 0x164   : > { %v1902_v49 = vmax.f32 %v1866_v39, 0.0  ;;  %v1903_v29 = vmax.f32 %v1867_v40, 0.0  ;;  %v1904_v45 = vmax.f32 %v1868_v42, 0.0  ;;  %v1905_v15 = vmax.f32 %v1869_v13, 0.0 }
 0x165   : > { %v1906_v59 = vmax.f32 %v1870_v43, 0.0  ;;  %v1907_v50 = vmax.f32 %v1871_v44, 0.0  ;;  %v1908_v41 = vmax.f32 %v1872_v46, 0.0  ;;  %v1909_v51 = vmax.f32 %v1873_v52, 0.0 }
 0x166   : > { %v2428_v0 = vpack.c.bf16 %v1902_v49, %v1902_v49  ;;  %v2429_v55 = vpack.c.bf16 %v1903_v29, %v1903_v29  ;;  %v2430_v35 = vpack.c.bf16 %v1904_v45, %v1904_v45  ;;  %v2431_v57 = vpack.c.bf16 %v1905_v15, %v1905_v15 }
 0x167   : > { %v2432_v47 = vpack.c.bf16 %v1906_v59, %v1906_v59  ;;  %v2433_v17 = vpack.c.bf16 %v1907_v50, %v1907_v50  ;;  %v2434_v27 = vpack.c.bf16 %v1908_v41, %v1908_v41  ;;  %v2435_v48 = vpack.c.bf16 %v1909_v51, %v1909_v51 }
 0x168   : > { %2083 = vst.msk [vmem:[%s2806_s5] sm:$0xf] %vm2082_vm9, %v2428_v0  ;;  %2084 = vst.msk [vmem:[%s2806_s5 + $0x4] sm:$0xf] %vm2082_vm9, %v2429_v55  ;;  %v1874_v7 = vadd.f32 %v3490_v25, %v3354_v32  ;;  %v1875_v1 = vadd.f32 %v3490_v25, %v3364_v6  ;;  %v1876_v19 = vadd.f32 %v3490_v25, %v3349_v62 }
 0x169   : > { %2085 = vst.msk [vmem:[%s2806_s5 + $0x8] sm:$0xf] %vm2082_vm9, %v2430_v35  ;;  %2086 = vst.msk [vmem:[%s2806_s5 + $0xc] sm:$0xf] %vm2082_vm9, %v2431_v57  ;;  %v1877_v56 = vadd.f32 %v3490_v25, %v3359_v58  ;;  %v1878_v32 = vadd.f32 %v3490_v25, %v3374_v11  ;;  %v1879_v6 = vadd.f32 %v3490_v25, %v3384_v14 }
 0x16a   : > { %2087 = vst.msk [vmem:[%s2806_s5 + $0x10] sm:$0xf] %vm2082_vm9, %v2432_v47  ;;  %2088 = vst.msk [vmem:[%s2806_s5 + $0x14] sm:$0xf] %vm2082_vm9, %v2433_v17  ;;  %v1880_v62 = vadd.f32 %v3490_v25, %v3369_v9  ;;  %v1881_v58 = vadd.f32 %v3490_v25, %v3379_v2  ;;  %v1910_v31 = vmax.f32 %v1874_v7, 0.0  ;;  %v1911_v10 = vmax.f32 %v1875_v1, 0.0 }
 0x16b   : > { %2089 = vst.msk [vmem:[%s2806_s5 + $0x18] sm:$0xf] %vm2082_vm9, %v2434_v27  ;;  %2090 = vst.msk [vmem:[%s2806_s5 + $0x1c] sm:$0xf] %vm2082_vm9, %v2435_v48  ;;  %v1912_v21 = vmax.f32 %v1876_v19, 0.0  ;;  %v1913_v4 = vmax.f32 %v1877_v56, 0.0  ;;  %v1882_v44 = vadd.f32 %v3490_v25, %v3394_v18  ;;  %v1883_v46 = vadd.f32 %v3490_v25, %v3404_v23 }
 0x16c   : > { %v1914_v22 = vmax.f32 %v1878_v32, 0.0  ;;  %v1915_v37 = vmax.f32 %v1879_v6, 0.0  ;;  %v1916_v11 = vmax.f32 %v1880_v62, 0.0  ;;  %v1917_v12 = vmax.f32 %v1881_v58, 0.0 }
 0x16d   : > { %v2436_v39 = vpack.c.bf16 %v1910_v31, %v1910_v31  ;;  %v2437_v14 = vpack.c.bf16 %v1911_v10, %v1911_v10  ;;  %v2438_v9 = vpack.c.bf16 %v1912_v21, %v1912_v21  ;;  %v2439_v40 = vpack.c.bf16 %v1913_v4, %v1913_v4 }
 0x16e   : > { %v2440_v2 = vpack.c.bf16 %v1914_v22, %v1914_v22  ;;  %v2441_v42 = vpack.c.bf16 %v1915_v37, %v1915_v37  ;;  %v2442_v13 = vpack.c.bf16 %v1916_v11, %v1916_v11  ;;  %v2443_v43 = vpack.c.bf16 %v1917_v12, %v1917_v12 }
 0x16f   : > { %2091 = vst.msk [vmem:[%s2806_s5 + $0x20] sm:$0xf] %vm2082_vm9, %v2436_v39  ;;  %2092 = vst.msk [vmem:[%s2806_s5 + $0x24] sm:$0xf] %vm2082_vm9, %v2437_v14  ;;  %v1884_v52 = vadd.f32 %v3490_v25, %v3389_v16  ;;  %v1885_v49 = vadd.f32 %v3490_v25, %v3399_v20  ;;  %v1886_v18 = vadd.f32 %v3490_v25, %v3414_v26  ;;  %v1918_v29 = vmax.f32 %v1882_v44, 0.0 }
 0x170   : > { %2093 = vst.msk [vmem:[%s2806_s5 + $0x28] sm:$0xf] %vm2082_vm9, %v2438_v9  ;;  %2094 = vst.msk [vmem:[%s2806_s5 + $0x2c] sm:$0xf] %vm2082_vm9, %v2439_v40  ;;  %v1887_v23 = vadd.f32 %v3490_v25, %v3424_v33  ;;  %v1888_v16 = vadd.f32 %v3490_v25, %v3409_v24  ;;  %v1889_v20 = vadd.f32 %v3490_v25, %v3419_v30  ;;  %v1919_v45 = vmax.f32 %v1883_v46, 0.0 }
 0x171   : > { %2095 = vst.msk [vmem:[%s2806_s5 + $0x30] sm:$0xf] %vm2082_vm9, %v2440_v2  ;;  %2096 = vst.msk [vmem:[%s2806_s5 + $0x34] sm:$0xf] %vm2082_vm9, %v2441_v42  ;;  %v1920_v15 = vmax.f32 %v1884_v52, 0.0  ;;  %v1921_v59 = vmax.f32 %v1885_v49, 0.0  ;;  %v2444_v0 = vpack.c.bf16 %v1918_v29, %v1918_v29  ;;  %v1890_v17 = vadd.f32 %v3490_v25, %v3434_v61 }
 0x172   : > { %2097 = vst.msk [vmem:[%s2806_s5 + $0x38] sm:$0xf] %vm2082_vm9, %v2442_v13  ;;  %2098 = vst.msk [vmem:[%s2806_s5 + $0x3c] sm:$0xf] %vm2082_vm9, %v2443_v43  ;;  %v1922_v50 = vmax.f32 %v1886_v18, 0.0  ;;  %v1923_v41 = vmax.f32 %v1887_v23, 0.0  ;;  %v2445_v33 = vpack.c.bf16 %v1919_v45, %v1919_v45  ;;  %v1891_v27 = vadd.f32 %v3490_v25, %v3444_v53 }
 0x173   : > { %v1924_v26 = vmax.f32 %v1888_v16, 0.0  ;;  %v1925_v51 = vmax.f32 %v1889_v20, 0.0  ;;  %v2446_v24 = vpack.c.bf16 %v1920_v15, %v1920_v15  ;;  %v2447_v55 = vpack.c.bf16 %v1921_v59, %v1921_v59  ;;  %2099 = vst.msk [vmem:[%s2806_s5 + $0x40] sm:$0xf] %vm2082_vm9, %v2444_v0 }
 0x174   : > { %v2448_v30 = vpack.c.bf16 %v1922_v50, %v1922_v50  ;;  %v2449_v35 = vpack.c.bf16 %v1923_v41, %v1923_v41  ;;  %2100 = vst.msk [vmem:[%s2806_s5 + $0x44] sm:$0xf] %vm2082_vm9, %v2445_v33  ;;  %v1892_v48 = vadd.f32 %v3490_v25, %v3429_v36  ;;  %v1893_v7 = vadd.f32 %v3490_v25, %v3439_v63 }
 0x175   : > { %v2450_v57 = vpack.c.bf16 %v1924_v26, %v1924_v26  ;;  %v2451_v47 = vpack.c.bf16 %v1925_v51, %v1925_v51  ;;  %2101 = vst.msk [vmem:[%s2806_s5 + $0x48] sm:$0xf] %vm2082_vm9, %v2446_v24  ;;  %2102 = vst.msk [vmem:[%s2806_s5 + $0x4c] sm:$0xf] %vm2082_vm9, %v2447_v55  ;;  %v1894_v61 = vadd.f32 %v3490_v25, %v3454_v5  ;;  %v1926_v1 = vmax.f32 %v1890_v17, 0.0 }
 0x176   : > { %2103 = vst.msk [vmem:[%s2806_s5 + $0x50] sm:$0xf] %vm2082_vm9, %v2448_v30  ;;  %2104 = vst.msk [vmem:[%s2806_s5 + $0x54] sm:$0xf] %vm2082_vm9, %v2449_v35  ;;  %v1895_v53 = vadd.f32 %v3490_v25, %v3464_v60  ;;  %v1896_v36 = vadd.f32 %v3490_v25, %v3449_v3  ;;  %v1897_v63 = vadd.f32 %v3490_v25, %v3459_v54  ;;  %v1927_v19 = vmax.f32 %v1891_v27, 0.0 }
 0x177   : > { %2105 = vst.msk [vmem:[%s2806_s5 + $0x58] sm:$0xf] %vm2082_vm9, %v2450_v57  ;;  %2106 = vst.msk [vmem:[%s2806_s5 + $0x5c] sm:$0xf] %vm2082_vm9, %v2451_v47  ;;  %v1928_v56 = vmax.f32 %v1892_v48, 0.0  ;;  %v1929_v32 = vmax.f32 %v1893_v7, 0.0  ;;  %v2452_v31 = vpack.c.bf16 %v1926_v1, %v1926_v1  ;;  %v1898_v37 = vadd.f32 %v3490_v25, %v3474_v34 }
 0x178   : > { %v1930_v6 = vmax.f32 %v1894_v61, 0.0  ;;  %v1931_v62 = vmax.f32 %v1895_v53, 0.0  ;;  %v1932_v5 = vmax.f32 %v1896_v36, 0.0  ;;  %v1933_v58 = vmax.f32 %v1897_v63, 0.0 }
 0x179   : > { %v2453_v60 = vpack.c.bf16 %v1927_v19, %v1927_v19  ;;  %v2454_v3 = vpack.c.bf16 %v1928_v56, %v1928_v56  ;;  %v2455_v10 = vpack.c.bf16 %v1929_v32, %v1929_v32  ;;  %2107 = vst.msk [vmem:[%s2806_s5 + $0x60] sm:$0xf] %vm2082_vm9, %v2452_v31  ;;  %v1899_v11 = vadd.f32 %v3490_v25, %v3482_v38 }
 0x17a   : > { %v2456_v54 = vpack.c.bf16 %v1930_v6, %v1930_v6  ;;  %v2457_v21 = vpack.c.bf16 %v1931_v62, %v1931_v62  ;;  %v2458_v4 = vpack.c.bf16 %v1932_v5, %v1932_v5  ;;  %v2459_v22 = vpack.c.bf16 %v1933_v58, %v1933_v58 }
 0x17b   : > { %2108 = vst.msk [vmem:[%s2806_s5 + $0x64] sm:$0xf] %vm2082_vm9, %v2453_v60  ;;  %2109 = vst.msk [vmem:[%s2806_s5 + $0x68] sm:$0xf] %vm2082_vm9, %v2454_v3  ;;  %v1900_v12 = vadd.f32 %v3490_v25, %v3469_v28  ;;  %v1901_v39 = vadd.f32 %v3490_v25, %v3478_v8  ;;  %v1934_v34 = vmax.f32 %v1898_v37, 0.0  ;;  %v1935_v14 = vmax.f32 %v1899_v11, 0.0 }
 0x17c   : > { %2110 = vst.msk [vmem:[%s2806_s5 + $0x6c] sm:$0xf] %vm2082_vm9, %v2455_v10  ;;  %2111 = vst.msk [vmem:[%s2806_s5 + $0x70] sm:$0xf] %vm2082_vm9, %v2456_v54 }
 0x17d   : > { %2112 = vst.msk [vmem:[%s2806_s5 + $0x74] sm:$0xf] %vm2082_vm9, %v2457_v21  ;;  %2113 = vst.msk [vmem:[%s2806_s5 + $0x78] sm:$0xf] %vm2082_vm9, %v2458_v4  ;;  %v1936_v38 = vmax.f32 %v1900_v12, 0.0  ;;  %v1937_v9 = vmax.f32 %v1901_v39, 0.0  ;;  %v2460_v40 = vpack.c.bf16 %v1934_v34, %v1934_v34  ;;  %v2461_v2 = vpack.c.bf16 %v1935_v14, %v1935_v14 }
 0x17e   : > { %2114 = vst.msk [vmem:[%s2806_s5 + $0x7c] sm:$0xf] %vm2082_vm9, %v2459_v22 }
 0x17f   : > { %v2462_v28 = vpack.c.bf16 %v1936_v38, %v1936_v38  ;;  %v2463_v42 = vpack.c.bf16 %v1937_v9, %v1937_v9  ;;  %2115 = vst.msk [vmem:[%s2806_s5 + $0x80] sm:$0xf] %vm2082_vm9, %v2460_v40  ;;  %2116 = vst.msk [vmem:[%s2806_s5 + $0x84] sm:$0xf] %vm2082_vm9, %v2461_v2 }
 0x181   : > { %2117 = vst.msk [vmem:[%s2806_s5 + $0x88] sm:$0xf] %vm2082_vm9, %v2462_v28  ;;  %2118 = vst.msk [vmem:[%s2806_s5 + $0x8c] sm:$0xf] %vm2082_vm9, %v2463_v42 }
 0x182 PF: > { %s13_s16 = sadd.s32 1, %s2741_s16   ;;  %s3659_s12 = smov %s2733_s14 }
 0x183   : > { %p10_p10 = scmp.ge.s32.totalorder %s13_s16, 8   ;;  %s3660_s13 = smov %s2737_s15 }
 0x184   : > { %s3661_s14 = smov %s3664_s17  ;;  %s3662_s15 = smov %s3668_s18 }
 0x185   :  { %12 = sbr.rel (!%p10_p10) target bundleno = 3 (0x3), region = 75 }

// kernel: aspp_forward.11
= control target key start
LH: loop header
LB: loop body
LE: loop exit
PB: predicated region body
PF: predicated region fallthrough
CT: control target
= control target key end

     0   :  { %s1957_s12 = smov 0   ;;  %s1959_s13 = smov 0   ;;  %s2518_s0 = inlined_call_operand.vmem [shape: bf16[2,48,40,4], index: 0, kind: input, shape index: {}]   ;;  %s2519_s1 = inlined_call_operand.vmem [shape: bf16[9,4,8], index: 1, kind: input, shape index: {}]   ;;  %s2520_s2 = inlined_call_operand.vmem [shape: f32[1,8], index: 2, kind: input, shape index: {}]   ;;  %s2521_s3 = inlined_call_operand.vmem [shape: bf16[2,24,16,8], index: 3, kind: output, shape index: {}]  }
   0x1   :  { %s1961_s14 = smov 0   ;;  %s1963_s15 = smov 0  }
   0x2   :  { %s1965_s16 = smov 0   ;;  %s1967_s17 = smov 0  }
   0x3   :  { %s1969_s18 = smov 0  }
   0x4 LB: > { %s25_s19 = sadd.s32 1, %s1922_s15  ;;  %s28_s20 = sadd.s32 1, %s1926_s16  ;;  %s1934_s18 = sphi %s1969_s18, %s13_s18   ;;  %s1930_s17 = sphi %s1967_s17, %s2529_s17   ;;  %s1926_s16 = sphi %s1965_s16, %s2528_s16   ;;  %s1922_s15 = sphi %s1963_s15, %s2527_s15   ;;  %s1918_s14 = sphi %s1961_s14, %s2526_s14   ;;  %s1914_s13 = sphi %s1959_s13, %s2525_s13   ;;  %s1910_s12 = sphi %s1957_s12, %s2524_s12  }
   0x5   : > { %p26_p0 = scmp.ge.s32.totalorder %s25_s19, 3  ;;  %p1529_p1 = scmp.ge.s32.totalorder %s1934_s18, 1 }
   0x6   : > { %p181_p2 = scmp.lt.s32.totalorder %s1934_s18, 13  ;;  %s32_s21 = sadd.s32 1, %s1930_s17 }
   0x7   : > { %s2531_s19 = smov (%p26_p0, %s25_s19), 0  ;;  %s2533_s20 = smov (!%p26_p0, %s28_s20), %s1926_s16 }
   0x8   : > { %p182_p3 = pnand %p1529_p1, %p181_p2  ;;  %p30_p4 = scmp.ge.s32.totalorder %s2533_s20, 2 }
   0x9   : > { %s221_s22 = sadd.s32 (!%p182_p3), %s1910_s12, %s1914_s13  ;;  %p223_p6 = scmp.lt.s32.totalorder (!%p182_p3), %s1918_s14, 1 }
   0xa   : > { %s2535_s20 = smov (%p30_p4, %s2533_s20), 0  ;;  %s2537_s21 = smov (!%p30_p4, %s32_s21), %s1930_s17 }
   0xb   : > { %p34_p5 = scmp.ge.s32.totalorder %s2537_s21, 2  ;;  %185 = sbr.rel (%p182_p3) target bundleno = 338 (0x152), region = 32 }
   0xc   : > { %s222_s23 = smul.u32 (!%p182_p3), 12, %s221_s22  ;;  %p1534_p10 = scmp.ne.s32.totalorder (!%p182_p3), %s1910_s12, 0 }
   0xd   : > { %s2539_s21 = smov (%p34_p5, %s2537_s21), 0  ;;  %s234_s24 = smul.u32 (!%p182_p3), 3, %s1910_s12 }
   0xe   : > { %p225_p7 = scmp.lt.s32.totalorder (!%p182_p3), %s222_s23, 47  ;;  %s240_s26 = smul.u32 (!%p182_p3), 12, %s1914_s13 }
   0xf   : > { %p235_p8 = scmp.lt.s32.totalorder (!%p182_p3), %s234_s24, 8 }
  0x10   : > { %s2541_s14 = smov (!%p223_p6, %s1918_s14), 1  ;;  %s2543_s23 = smov (!%p225_p7, %s222_s23), 47 }
  0x11   : > { %s1797_s25 = smul.u32 240, %s2541_s14  ;;  %s2545_s24 = smov (!%p235_p8, %s234_s24), 8 }
  0x12   : > { %s1796_s27 = smul.u32 5, %s2543_s23  ;;  %p243_p9 = scmp.lt.s32.totalorder %s240_s26, 23 }
  0x13   : > { %s1531_s30 = sshll.u32 %s2545_s24, 1  ;;  %s1798_s10 = smul.u32 48, %s2541_s14 }
  0x14   : > { %s229_s28 = sadd.s32 %s1797_s25, %s1796_s27  ;;  %s2015_s9 = scalar_lea.vmem %s2519_s1, %s1531_s30 }
  0x15   : > { %s1530_s29 = sshll.u32 %s229_s28, 2  ;;  %s2547_s26 = smov (!%p243_p9, %s240_s26), 23 }
  0x16   : > { %s2010_s6 = scalar_lea.vmem %s2518_s0, %s1530_s29  ;;  %s1532_s11 = sshll.u32 %s2547_s26, 1 }
  0x17   : > { %s247_s13 = sadd.s32 %s1798_s10, %s1532_s11  ;;  %255 = sbr.rel (%p1534_p10) target bundleno = 41 (0x29), region = 36 }
  0x18   : > { %s1533_s22 = sshll.u32 %s247_s13, 2 }
  0x19   : > { %s2020_s27 = scalar_lea.vmem %s2521_s3, %s1533_s22 }
  0x1c   : > { %vm256_vm0 = vcmask 64512   ;;  %v1936_v0 = vmov 0.0  }
  0x1d   : > { %257 = vst.msk [vmem:[#allocation2] sm:$0xff] %vm256_vm0, %v1936_v0  ;;  %258 = vst.msk [vmem:[#allocation2 + $0x8] sm:$0xff] %vm256_vm0, %v1936_v0 }
  0x1e   : > { %259 = vst.msk [vmem:[#allocation2 + $0x10] sm:$0xff] %vm256_vm0, %v1936_v0  ;;  %260 = vst.msk [vmem:[#allocation2 + $0x18] sm:$0xff] %vm256_vm0, %v1936_v0 }
  0x1f   : > { %261 = vst.msk [vmem:[#allocation2 + $0x20] sm:$0xff] %vm256_vm0, %v1936_v0  ;;  %262 = vst.msk [vmem:[#allocation2 + $0x28] sm:$0xff] %vm256_vm0, %v1936_v0 }
  0x20   : > { %263 = vst.msk [vmem:[#allocation2 + $0x30] sm:$0xff] %vm256_vm0, %v1936_v0  ;;  %264 = vst.msk [vmem:[#allocation2 + $0x38] sm:$0xff] %vm256_vm0, %v1936_v0 }
  0x21   : > { %265 = vst.msk [vmem:[#allocation2 + $0x40] sm:$0xff] %vm256_vm0, %v1936_v0  ;;  %266 = vst.msk [vmem:[#allocation2 + $0x48] sm:$0xff] %vm256_vm0, %v1936_v0 }
  0x22   : > { %267 = vst.msk [vmem:[#allocation2 + $0x50] sm:$0xff] %vm256_vm0, %v1936_v0  ;;  %268 = vst.msk [vmem:[#allocation2 + $0x58] sm:$0xff] %vm256_vm0, %v1936_v0 }
  0x23   : > { %269 = vst.msk [vmem:[#allocation2 + $0x60] sm:$0xff] %vm256_vm0, %v1936_v0  ;;  %270 = vst.msk [vmem:[#allocation2 + $0x68] sm:$0xff] %vm256_vm0, %v1936_v0 }
  0x24   : > { %271 = vst.msk [vmem:[#allocation2 + $0x70] sm:$0xff] %vm256_vm0, %v1936_v0  ;;  %272 = vst.msk [vmem:[#allocation2 + $0x78] sm:$0xff] %vm256_vm0, %v1936_v0 }
  0x25   : > { %273 = vst.msk [vmem:[#allocation2 + $0x80] sm:$0xff] %vm256_vm0, %v1936_v0  ;;  %274 = vst.msk [vmem:[#allocation2 + $0x88] sm:$0xff] %vm256_vm0, %v1936_v0 }
  0x26   : > { %275 = vst.msk [vmem:[#allocation2 + $0x90] sm:$0xff] %vm256_vm0, %v1936_v0  ;;  %276 = vst.msk [vmem:[#allocation2 + $0x98] sm:$0xff] %vm256_vm0, %v1936_v0 }
  0x27   : > { %277 = vst.msk [vmem:[#allocation2 + $0xa0] sm:$0xff] %vm256_vm0, %v1936_v0  ;;  %278 = vst.msk [vmem:[#allocation2 + $0xa8] sm:$0xff] %vm256_vm0, %v1936_v0 }
  0x28   : > { %279 = vst.msk [vmem:[#allocation2 + $0xb0] sm:$0xff] %vm256_vm0, %v1936_v0  ;;  %280 = vst.msk [vmem:[#allocation2 + $0xb8] sm:$0xff] %vm256_vm0, %v1936_v0 }
  0x29 PF: > { %v365_v1 = vld [vmem:[%s2015_s9] sm:$0x3]  ;;  %vm463_vm1 = vcmask 1041408   ;;  %v2053_v4 = vld [vmem:[%s2010_s6 + $0x4] sm:$0xf]  ;;  %vm426_vm2 = vcmask 31744  }
  0x2a   : > { %v281_v2 = vld [vmem:[%s2010_s6] sm:$0xf]  ;;  %1792 = vmatprep.subr.msk.bf16.mxu0 %vm463_vm1, %v365_v1  ;;  %1793 = vmatprep.subr.msk.bf16.mxu1 %vm463_vm1, %v365_v1  ;;  %v465_v3 = vsel %vm463_vm1, %v365_v1, 0  ;;  %v311_v6 = vld [vmem:[%s2010_s6 + $0x78] sm:$0xf]  ;;  %vm645_vm3 = vcmask 1045508  }
  0x2b   : > { %1713 = vmatpush3.bf16.msra.mxu0 %v465_v3  ;;  %1791 = vmatpush3.bf16.msra.mxu1 %v465_v3  ;;  %v1535_v5 = vcombine.low %v281_v2, %v2053_v4  ;;  %v2058_v7 = vld [vmem:[%s2010_s6 + $0x7c] sm:$0xf]  ;;  %v286_v9 = vld [vmem:[%s2010_s6 + $0x14] sm:$0xf]  ;;  %v2064_v10 = vld [vmem:[%s2010_s6 + $0x18] sm:$0xf] }
  0x2c   : > { %v1541_v8 = vcombine.low %v311_v6, %v2058_v7  ;;  %v1536_v11 = vcombine.low %v286_v9, %v2064_v10  ;;  %v316_v12 = vld [vmem:[%s2010_s6 + $0x8c] sm:$0xf]  ;;  %v2070_v13 = vld [vmem:[%s2010_s6 + $0x90] sm:$0xf]  ;;  %v1571_v14 = vld [vmem:[%s2015_s9 + $0x2] sm:$0x3] }
  0x2d   : > { %1714 = vmatprep.mubr.msk.bf16.mxu0 %vm426_vm2, %v1535_v5  ;;  %v283_v15 = vld [vmem:[%s2010_s6 + $0x8] sm:$0xf]  ;;  %v1542_v16 = vcombine.low %v316_v12, %v2070_v13  ;;  %1794 = vmatprep.subr.msk.bf16.mxu1 %vm463_vm1, %v1571_v14  ;;  %v1596_v17 = vld [vmem:[%s2015_s9 + $0x4] sm:$0x3]  ;;  %v806_v19 = vsel %vm463_vm1, %v1571_v14, 0  ;;  %v1559_v39 = vrot.slane %v2053_v4, 10  ;;  %vm2119_vm4 = vmor %vm463_vm1, %vm645_vm3 }
  0x2e   : > { %1726 = vmatprep.mubr.msk.bf16.mxu1 %vm426_vm2, %v1541_v8  ;;  %1715 = vmatmul.mubr.msk.bf16.vlgmr.msra.gmra.mxu0 %vm426_vm2, %v1536_v11  ;;  %v291_v18 = vld [vmem:[%s2010_s6 + $0x28] sm:$0xf]  ;;  %v1048_v20 = vsel %vm463_vm1, %v1596_v17, 0  ;;  %v2083_v21 = vld [vmem:[%s2010_s6 + $0x2c] sm:$0xf]  ;;  %v649_v29 = vrot.slane %v283_v15, 6 }
  0x2f   : > { %1795 = vmatprep.subr.msk.bf16.mxu0 %vm463_vm1, %v1596_v17  ;;  %v321_v22 = vld [vmem:[%s2010_s6 + $0xa0] sm:$0xf]  ;;  %1727 = vmatmul.mubr.msk.bf16.vlgmr.msra.gmra.mxu1 %vm426_vm2, %v1542_v16  ;;  %v1537_v23 = vcombine.low %v291_v18, %v2083_v21  ;;  %v2089_v24 = vld [vmem:[%s2010_s6 + $0xa4] sm:$0xf]  ;;  %v296_v25 = vld [vmem:[%s2010_s6 + $0x3c] sm:$0xf] }
  0x30   : > { %1765 = vmatpush3.bf16.msra.mxu0 %v1048_v20  ;;  %1739 = vmatpush3.bf16.msra.mxu1 %v806_v19  ;;  %v1543_v26 = vcombine.low %v321_v22, %v2089_v24  ;;  %v2094_v27 = vld [vmem:[%s2010_s6 + $0x40] sm:$0xf]  ;;  %v326_v28 = vld [vmem:[%s2010_s6 + $0xb4] sm:$0xf]  ;;  %v2100_v31 = vld [vmem:[%s2010_s6 + $0xb8] sm:$0xf]  ;;  %v650_v52 = vsel %vm2119_vm4, %v1559_v39, %v649_v29 }
  0x31   : > { %1718 = vmatprep.mubr.msk.bf16.mxu0 %vm426_vm2, %v1537_v23  ;;  %v1538_v30 = vcombine.low %v296_v25, %v2094_v27  ;;  %v301_v32 = vld [vmem:[%s2010_s6 + $0x50] sm:$0xf]  ;;  %v2105_v33 = vld [vmem:[%s2010_s6 + $0x54] sm:$0xf]  ;;  %v331_v34 = vld [vmem:[%s2010_s6 + $0xc8] sm:$0xf]  ;;  %v1544_v35 = vcombine.low %v326_v28, %v2100_v31 }
  0x32   : > { %1730 = vmatprep.mubr.msk.bf16.mxu1 %vm426_vm2, %v1543_v26  ;;  %v1539_v36 = vcombine.low %v301_v32, %v2105_v33  ;;  %v2111_v37 = vld [vmem:[%s2010_s6 + $0xcc] sm:$0xf]  ;;  %v288_v40 = vld [vmem:[%s2010_s6 + $0x1c] sm:$0xf]  ;;  %v651_v42 = vrot.slane %v649_v29, 4  ;;  %v1560_v60 = vrot.slane %v2064_v10, 10 }
  0x33   : > { %v1545_v38 = vcombine.low %v331_v34, %v2111_v37  ;;  %v284_v41 = vld [vmem:[%s2010_s6 + $0xc] sm:$0xf]  ;;  %v306_v44 = vld [vmem:[%s2010_s6 + $0x64] sm:$0xf]  ;;  %v2126_v45 = vld [vmem:[%s2010_s6 + $0x68] sm:$0xf] }
  0x34   : > { %v652_v46 = vrot.slane %v284_v41, 6  ;;  %v285_v47 = vld [vmem:[%s2010_s6 + $0x10] sm:$0xf]  ;;  %v656_v49 = vrot.slane %v288_v40, 6  ;;  %v336_v50 = vld [vmem:[%s2010_s6 + $0xdc] sm:$0xf]  ;;  %v1540_v54 = vcombine.low %v306_v44, %v2126_v45 }
  0x35   : > { %v293_v48 = vld [vmem:[%s2010_s6 + $0x30] sm:$0xf]  ;;  %v2134_v51 = vld [vmem:[%s2010_s6 + $0xe0] sm:$0xf]  ;;  %v1597_v57 = vcombine.low %v284_v41, %v285_v47  ;;  %v294_v58 = vld [vmem:[%s2010_s6 + $0x34] sm:$0xf] }
  0x36   : > { %1719 = vmatmul.mubr.msk.bf16.gmra.mxu0 %vm426_vm2, %v1538_v30  ;;  %v289_v53 = vld [vmem:[%s2010_s6 + $0x20] sm:$0xf]  ;;  %v653_v55 = vsel %vm2119_vm4, %v651_v42, %v652_v46  ;;  %v663_v56 = vrot.slane %v293_v48, 6  ;;  %v1546_v59 = vcombine.low %v336_v50, %v2134_v51  ;;  %v658_v61 = vrot.slane %v656_v49, 4  ;;  %v298_v3 = vld [vmem:[%s2010_s6 + $0x44] sm:$0xf] }
  0x37   : > { %1722 = vmatprep.mubr.msk.bf16.mxu0 %vm426_vm2, %v1539_v36  ;;  %1731 = vmatmul.mubr.msk.bf16.gmra.mxu1 %vm426_vm2, %v1544_v35  ;;  %v659_v62 = vrot.slane %v289_v53, 6  ;;  %v1572_v63 = vcombine.low %v650_v52, %v653_v55  ;;  %v1561_v0 = vrot.slane %v2083_v21, 10  ;;  %v666_v2 = vrot.slane %v294_v58, 6  ;;  %v290_v4 = vld [vmem:[%s2010_s6 + $0x24] sm:$0xf]  ;;  %p1621_p11 = scmp.ne.s32.totalorder %s1910_s12, 2 }
  0x38   : > { %1734 = vmatprep.mubr.msk.bf16.mxu1 %vm426_vm2, %v1545_v38  ;;  %v665_v1 = vrot.slane %v663_v56, 4  ;;  %v303_v5 = vld [vmem:[%s2010_s6 + $0x58] sm:$0xf]  ;;  %v657_v8 = vsel %vm2119_vm4, %v1560_v60, %v656_v49  ;;  %v670_v10 = vrot.slane %v298_v3, 6  ;;  %v1598_v11 = vcombine.low %v289_v53, %v290_v4  ;;  %v299_v15 = vld [vmem:[%s2010_s6 + $0x48] sm:$0xf] }
  0x39   : > { %v295_v6 = vld [vmem:[%s2010_s6 + $0x38] sm:$0xf]  ;;  %v660_v9 = vsel %vm2119_vm4, %v658_v61, %v659_v62  ;;  %v664_v12 = vsel %vm2119_vm4, %v1561_v0, %v663_v56  ;;  %v677_v16 = vrot.slane %v303_v5, 6  ;;  %v304_v18 = vld [vmem:[%s2010_s6 + $0x5c] sm:$0xf]  ;;  %v1562_v20 = vrot.slane %v2094_v27, 10 }
  0x3a   : > { %v667_v14 = vsel %vm2119_vm4, %v665_v1, %v666_v2  ;;  %v1599_v17 = vcombine.low %v294_v58, %v295_v6  ;;  %v1573_v19 = vcombine.low %v657_v8, %v660_v9  ;;  %v672_v22 = vrot.slane %v670_v10, 4  ;;  %v308_v29 = vld [vmem:[%s2010_s6 + $0x6c] sm:$0xf]  ;;  %v313_v30 = vld [vmem:[%s2010_s6 + $0x80] sm:$0xf] }
  0x3b   : > { %v1574_v21 = vcombine.low %v664_v12, %v667_v14  ;;  %v673_v23 = vrot.slane %v299_v15, 6  ;;  %v1563_v25 = vrot.slane %v2105_v33, 10  ;;  %v679_v26 = vrot.slane %v677_v16, 4  ;;  %v300_v32 = vld [vmem:[%s2010_s6 + $0x4c] sm:$0xf] }
  0x3c   : > { %v680_v28 = vrot.slane %v304_v18, 6  ;;  %v305_v34 = vld [vmem:[%s2010_s6 + $0x60] sm:$0xf]  ;;  %v671_v27 = vsel %vm2119_vm4, %v1562_v20, %v670_v10  ;;  %v684_v35 = vrot.slane %v308_v29, 6  ;;  %v691_v36 = vrot.slane %v313_v30, 6 }
  0x3d   : > { %v674_v33 = vsel %vm2119_vm4, %v672_v22, %v673_v23  ;;  %v1600_v38 = vcombine.low %v299_v15, %v300_v32  ;;  %v678_v39 = vsel %vm2119_vm4, %v1563_v25, %v677_v16  ;;  %v309_v41 = vld [vmem:[%s2010_s6 + $0x70] sm:$0xf]  ;;  %v1601_v42 = vcombine.low %v304_v18, %v305_v34  ;;  %v314_v44 = vld [vmem:[%s2010_s6 + $0x84] sm:$0xf]  ;;  %v318_v55 = vld [vmem:[%s2010_s6 + $0x94] sm:$0xf] }
  0x3e   : > { %1723 = vmatmul.mubr.msk.bf16.gmra.mxu0 %vm426_vm2, %v1540_v54  ;;  %v681_v40 = vsel %vm2119_vm4, %v679_v26, %v680_v28  ;;  %v1575_v46 = vcombine.low %v671_v27, %v674_v33  ;;  %v1564_v47 = vrot.slane %v2126_v45, 10  ;;  %v686_v49 = vrot.slane %v684_v35, 4  ;;  %v310_v56 = vld [vmem:[%s2010_s6 + $0x74] sm:$0xf]  ;;  %v315_v58 = vld [vmem:[%s2010_s6 + $0x88] sm:$0xf] }
  0x3f   : > { %1766 = vmatprep.mubr.msk.bf16.mxu0 %vm426_vm2, %v1597_v57  ;;  %1735 = vmatmul.mubr.msk.bf16.gmra.mxu1 %vm426_vm2, %v1546_v59  ;;  %v1576_v48 = vcombine.low %v678_v39, %v681_v40  ;;  %v687_v50 = vrot.slane %v309_v41, 6  ;;  %v1565_v52 = vrot.slane %v2058_v7, 10  ;;  %v693_v53 = vrot.slane %v691_v36, 4  ;;  %v323_v57 = vld [vmem:[%s2010_s6 + $0xa8] sm:$0xf] }
  0x40   : > { %1740 = vmatprep.mubr.msk.bf16.mxu1 %vm426_vm2, %v1572_v63  ;;  %v694_v54 = vrot.slane %v314_v44, 6  ;;  %v685_v45 = vsel %vm2119_vm4, %v1564_v47, %v684_v35  ;;  %v698_v59 = vrot.slane %v318_v55, 6  ;;  %v1602_v61 = vcombine.low %v309_v41, %v310_v56  ;;  %v319_v63 = vld [vmem:[%s2010_s6 + $0x98] sm:$0xf]  ;;  %v324_v2 = vld [vmem:[%s2010_s6 + $0xac] sm:$0xf] }
  0x41   : > { %v688_v7 = vsel %vm2119_vm4, %v686_v49, %v687_v50  ;;  %v692_v60 = vsel %vm2119_vm4, %v1565_v52, %v691_v36  ;;  %v705_v0 = vrot.slane %v323_v57, 6  ;;  %v1603_v1 = vcombine.low %v314_v44, %v315_v58  ;;  %v328_v12 = vld [vmem:[%s2010_s6 + $0xbc] sm:$0xf]  ;;  %v333_v15 = vld [vmem:[%s2010_s6 + $0xd0] sm:$0xf] }
  0x42   : > { %v695_v62 = vsel %vm2119_vm4, %v693_v53, %v694_v54  ;;  %v1577_v3 = vcombine.low %v685_v45, %v688_v7  ;;  %v1566_v4 = vrot.slane %v2070_v13, 10  ;;  %v700_v6 = vrot.slane %v698_v59, 4  ;;  %v320_v14 = vld [vmem:[%s2010_s6 + $0x9c] sm:$0xf]  ;;  %v325_v16 = vld [vmem:[%s2010_s6 + $0xb0] sm:$0xf] }
  0x43   : > { %v1578_v5 = vcombine.low %v692_v60, %v695_v62  ;;  %v701_v8 = vrot.slane %v319_v63, 6  ;;  %v1567_v9 = vrot.slane %v2089_v24, 10  ;;  %v707_v10 = vrot.slane %v705_v0, 4  ;;  %v334_v25 = vld [vmem:[%s2010_s6 + $0xd4] sm:$0xf] }
  0x44   : > { %v699_v13 = vsel %vm2119_vm4, %v1566_v4, %v698_v59  ;;  %v1604_v18 = vcombine.low %v319_v63, %v320_v14  ;;  %v719_v22 = vrot.slane %v333_v15, 6  ;;  %v1605_v23 = vcombine.low %v324_v2, %v325_v16  ;;  %v338_v35 = vld [vmem:[%s2010_s6 + $0xe4] sm:$0xf]  ;;  %v339_v44 = vld [vmem:[%s2010_s6 + $0xe8] sm:$0xf] }
  0x45   : > { %v702_v24 = vsel %vm2119_vm4, %v700_v6, %v701_v8  ;;  %v1568_v28 = vrot.slane %v2100_v31, 10  ;;  %v1569_v34 = vrot.slane %v2111_v37, 10  ;;  %v722_v33 = vrot.slane %v334_v25, 6  ;;  %v330_v36 = vld [vmem:[%s2010_s6 + $0xc4] sm:$0xf] }
  0x46   : > { %1767 = vmatmul.mubr.msk.bf16.vlgmr.msra.gmra.mxu0 %vm426_vm2, %v1598_v11  ;;  %v708_v11 = vrot.slane %v324_v2, 6  ;;  %v1579_v26 = vcombine.low %v699_v13, %v702_v24  ;;  %v721_v27 = vrot.slane %v719_v22, 4  ;;  %v726_v39 = vrot.slane %v338_v35, 6  ;;  %v340_v53 = vld [vmem:[%s2010_s6 + $0xec] sm:$0xf]  ;;  %v341_v16 = vld [vmem:[#allocation2] sm:$0xff] }
  0x47   : > { %1770 = vmatprep.mubr.msk.bf16.mxu0 %vm426_vm2, %v1599_v17  ;;  %1741 = vmatmul.mubr.msk.bf16.vlgmr.msra.gmra.mxu1 %vm426_vm2, %v1573_v19  ;;  %v712_v17 = vrot.slane %v328_v12, 6  ;;  %v706_v19 = vsel %vm2119_vm4, %v1567_v9, %v705_v0  ;;  %v720_v41 = vsel %vm2119_vm4, %v1569_v34, %v719_v22  ;;  %v729_v52 = vrot.slane %v339_v44, 6  ;;  %v343_v12 = vld [vmem:[#allocation2 + $0x10] sm:$0xff] }
  0x48   : > { %1744 = vmatprep.mubr.msk.bf16.mxu1 %vm426_vm2, %v1574_v21  ;;  %v709_v20 = vsel %vm2119_vm4, %v707_v10, %v708_v11  ;;  %v329_v21 = vld [vmem:[%s2010_s6 + $0xc0] sm:$0xf]  ;;  %v728_v50 = vrot.slane %v726_v39, 4  ;;  %v1608_v56 = vcombine.low %v339_v44, %v340_v53  ;;  %vm1203_vm5 = vcmask 64512  }
  0x49   : > { %v1580_v29 = vcombine.low %v706_v19, %v709_v20  ;;  %v714_v30 = vrot.slane %v712_v17, 4  ;;  %v715_v32 = vrot.slane %v329_v21, 6  ;;  %v713_v31 = vsel %vm2119_vm4, %v1568_v28, %v712_v17 }
  0x4a   : > { %v1606_v40 = vcombine.low %v329_v21, %v330_v36  ;;  %v730_v55 = vsel %vm2119_vm4, %v728_v50, %v729_v52  ;;  %v346_v50 = vld [vmem:[#allocation2 + $0x28] sm:$0xff] }
  0x4b   : > { %v716_v37 = vsel %vm2119_vm4, %v714_v30, %v715_v32  ;;  %v347_v32 = vld [vmem:[#allocation2 + $0x30] sm:$0xff] }
  0x4c   : > { %v1581_v47 = vcombine.low %v713_v31, %v716_v37 }
  0x4e   : > { %1771 = vmatmul.mubr.msk.bf16.gmra.mxu0 %vm426_vm2, %v1600_v38  ;;  %v335_v38 = vld [vmem:[%s2010_s6 + $0xd8] sm:$0xf] }
  0x4f   : > { %1774 = vmatprep.mubr.msk.bf16.mxu0 %vm426_vm2, %v1601_v42  ;;  %1745 = vmatmul.mubr.msk.bf16.gmra.mxu1 %vm426_vm2, %v1575_v46  ;;  %v723_v42 = vsel %vm2119_vm4, %v721_v27, %v722_v33  ;;  %v1607_v46 = vcombine.low %v334_v25, %v335_v38  ;;  %v345_v38 = vld [vmem:[#allocation2 + $0x20] sm:$0xff] }
  0x50   : > { %1748 = vmatprep.mubr.msk.bf16.mxu1 %vm426_vm2, %v1576_v48  ;;  %v1570_v48 = vrot.slane %v2134_v51, 10  ;;  %v1582_v49 = vcombine.low %v720_v41, %v723_v42  ;;  %v348_v42 = vld [vmem:[#allocation2 + $0x38] sm:$0xff] }
  0x52   : > { %v727_v54 = vsel %vm2119_vm4, %v1570_v48, %v726_v39 }
  0x53   : > { %v1583_v51 = vcombine.low %v727_v54, %v730_v55 }
  0x56   : > { %1775 = vmatmul.mubr.msk.bf16.gmra.mxu0 %vm426_vm2, %v1602_v61 }
  0x57   : > { %1778 = vmatprep.mubr.msk.bf16.mxu0 %vm426_vm2, %v1603_v1  ;;  %1749 = vmatmul.mubr.msk.bf16.gmra.mxu1 %vm426_vm2, %v1577_v3 }
  0x58   : > { %1752 = vmatprep.mubr.msk.bf16.mxu1 %vm426_vm2, %v1578_v5 }
  0x5e   : > { %1779 = vmatmul.mubr.msk.bf16.gmra.mxu0 %vm426_vm2, %v1604_v18  ;;  %v344_v18 = vld [vmem:[#allocation2 + $0x18] sm:$0xff] }
  0x5f   : > { %1782 = vmatprep.mubr.msk.bf16.mxu0 %vm426_vm2, %v1605_v23  ;;  %1753 = vmatmul.mubr.msk.bf16.gmra.mxu1 %vm426_vm2, %v1579_v26  ;;  %v342_v23 = vld [vmem:[#allocation2 + $0x8] sm:$0xff] }
  0x60   : > { %1756 = vmatprep.mubr.msk.bf16.mxu1 %vm426_vm2, %v1580_v29 }
  0x66   : > { %1783 = vmatmul.mubr.msk.bf16.gmra.mxu0 %vm426_vm2, %v1606_v40 }
  0x67   : > { %1786 = vmatprep.mubr.msk.bf16.mxu0 %vm426_vm2, %v1607_v46  ;;  %1757 = vmatmul.mubr.msk.bf16.gmra.mxu1 %vm426_vm2, %v1581_v47 }
  0x68   : > { %1760 = vmatprep.mubr.msk.bf16.mxu1 %vm426_vm2, %v1582_v49 }
  0x6e   : > { %1787 = vmatmul.mubr.msk.bf16.gmra.mxu0 %vm426_vm2, %v1608_v56 }
  0x6f   : > { %1761 = vmatmul.mubr.msk.bf16.gmra.mxu1 %vm426_vm2, %v1583_v51  ;;  %v351_v51 = vld [vmem:[#allocation2 + $0x50] sm:$0xff] }
  0xee   : > { %v1716_v57 = vpop.f32.mrf.mxu0 }
  0xef   : > { %v2254_v58 = vpop.f32.mrf.mxu1  ;;  %v598_v17 = vadd.f32 %v1716_v57, %v343_v12 }
  0xf0   : > { %v501_v45 = vpop.f32.mrf.mxu0 }
  0xf1   : > { %v2256_v7 = vpop.f32.mrf.mxu1  ;;  %v596_v21 = vadd.f32 %v501_v45, %v341_v16 }
  0xf2   : > { %v1717_v59 = vpop.f32.mrf.mxu0 }
  0xf3   : > { %v2258_v60 = vpop.f32.mrf.mxu1  ;;  %v599_v28 = vadd.f32 %v1717_v59, %v344_v18  ;;  %v352_v18 = vld [vmem:[#allocation2 + $0x58] sm:$0xff] }
  0xf4   : > { %v504_v61 = vpop.f32.mrf.mxu0 }
  0xf5   : > { %v2260_v62 = vpop.f32.mrf.mxu1  ;;  %v597_v33 = vadd.f32 %v504_v61, %v342_v23  ;;  %v350_v23 = vld [vmem:[#allocation2 + $0x48] sm:$0xff] }
  0xf6   : > { %v1720_v43 = vpop.f32.mrf.mxu0 }
  0xf7   : > { %v2262_v63 = vpop.f32.mrf.mxu1  ;;  %v602_v39 = vadd.f32 %v1720_v43, %v347_v32  ;;  %v355_v32 = vld [vmem:[#allocation2 + $0x70] sm:$0xff] }
  0xf8   : > { %v517_v0 = vpop.f32.mrf.mxu0 }
  0xf9   : > { %v2264_v1 = vpop.f32.mrf.mxu1  ;;  %v600_v47 = vadd.f32 %v517_v0, %v345_v38  ;;  %v349_v0 = vld [vmem:[#allocation2 + $0x40] sm:$0xff] }
  0xfa   : > { %v1721_v2 = vpop.f32.mrf.mxu0  ;;  %v353_v38 = vld [vmem:[#allocation2 + $0x60] sm:$0xff] }
  0xfb   : > { %v2266_v3 = vpop.f32.mrf.mxu1  ;;  %v603_v54 = vadd.f32 %v1721_v2, %v348_v42  ;;  %v356_v42 = vld [vmem:[#allocation2 + $0x78] sm:$0xff] }
  0xfc   : > { %v520_v4 = vpop.f32.mrf.mxu0 }
  0xfd   : > { %v2268_v5 = vpop.f32.mrf.mxu1  ;;  %v601_v59 = vadd.f32 %v520_v4, %v346_v50  ;;  %v354_v50 = vld [vmem:[#allocation2 + $0x68] sm:$0xff] }
  0xfe   : > { %v1724_v6 = vpop.f32.mrf.mxu0 }
  0xff   : > { %v2270_v8 = vpop.f32.mrf.mxu1  ;;  %v606_v2 = vadd.f32 %v1724_v6, %v351_v51  ;;  %v359_v51 = vld [vmem:[#allocation2 + $0x90] sm:$0xff] }
 0x100   : > { %v2272_v9 = vpop.f32.mrf.mxu0 }
 0x101   : > { %v2274_v10 = vpop.f32.mrf.mxu1  ;;  %v604_v4 = vadd.f32 %v2272_v9, %v349_v0  ;;  %v357_v0 = vld [vmem:[#allocation2 + $0x80] sm:$0xff] }
 0x102   : > { %v2276_v11 = vpop.f32.mrf.mxu0 }
 0x103   : > { %v2278_v14 = vpop.f32.mrf.mxu1 }
 0x104   : > { %v2280_v15 = vpop.f32.mrf.mxu0 }
 0x105   : > { %v2282_v13 = vpop.f32.mrf.mxu1 }
 0x106   : > { %v1768_v24 = vpop.f32.mrf.mxu0 }
 0x107   : > { %v1742_v19 = vpop.f32.mrf.mxu1 }
 0x108   : > { %v1084_v20 = vpop.f32.mrf.mxu0  ;;  %v939_v22 = vadd.f32 %v1742_v19, %v598_v17 }
 0x109   : > { %v842_v25 = vpop.f32.mrf.mxu1 }
 0x10a   : > { %v1769_v26 = vpop.f32.mrf.mxu0  ;;  %v2284_v29 = vadd.f32 %v1768_v24, %v939_v22  ;;  %v937_v30 = vadd.f32 %v842_v25, %v596_v21 }
 0x10b   : > { %v1743_v34 = vpop.f32.mrf.mxu1 }
 0x10c   : > { %v1087_v27 = vpop.f32.mrf.mxu0  ;;  %1206 = vst.msk [vmem:[#allocation2 + $0x10] sm:$0xff] %vm1203_vm5, %v2284_v29  ;;  %v2288_v35 = vadd.f32 %v1084_v20, %v937_v30  ;;  %v940_v36 = vadd.f32 %v1743_v34, %v599_v28 }
 0x10d   : > { %v845_v31 = vpop.f32.mrf.mxu1 }
 0x10e   : > { %v1772_v37 = vpop.f32.mrf.mxu0  ;;  %1204 = vst.msk [vmem:[#allocation2] sm:$0xff] %vm1203_vm5, %v2288_v35  ;;  %v2292_v40 = vadd.f32 %v1769_v26, %v940_v36  ;;  %v938_v41 = vadd.f32 %v845_v31, %v597_v33  ;;  %v607_v26 = vadd.f32 %v2276_v11, %v352_v18  ;;  %v360_v18 = vld [vmem:[#allocation2 + $0x98] sm:$0xff] }
 0x10f   : > { %v1746_v44 = vpop.f32.mrf.mxu1 }
 0x110   : > { %v1100_v46 = vpop.f32.mrf.mxu0  ;;  %1207 = vst.msk [vmem:[#allocation2 + $0x18] sm:$0xff] %vm1203_vm5, %v2292_v40  ;;  %v2296_v48 = vadd.f32 %v1087_v27, %v938_v41  ;;  %v943_v49 = vadd.f32 %v1746_v44, %v602_v39  ;;  %v605_v27 = vadd.f32 %v2280_v15, %v350_v23  ;;  %v358_v23 = vld [vmem:[#allocation2 + $0x88] sm:$0xff] }
 0x111   : > { %v858_v52 = vpop.f32.mrf.mxu1 }
 0x112   : > { %v1773_v53 = vpop.f32.mrf.mxu0  ;;  %1205 = vst.msk [vmem:[#allocation2 + $0x8] sm:$0xff] %vm1203_vm5, %v2296_v48  ;;  %v2300_v55 = vadd.f32 %v1772_v37, %v943_v49  ;;  %v941_v56 = vadd.f32 %v858_v52, %v600_v47  ;;  %v610_v37 = vadd.f32 %v2254_v58, %v355_v32  ;;  %v363_v32 = vld [vmem:[#allocation2 + $0xb0] sm:$0xff] }
 0x113   : > { %v1747_v57 = vpop.f32.mrf.mxu1 }
 0x114   : > { %v1103_v45 = vpop.f32.mrf.mxu0  ;;  %1210 = vst.msk [vmem:[#allocation2 + $0x30] sm:$0xff] %vm1203_vm5, %v2300_v55  ;;  %v2304_v61 = vadd.f32 %v1100_v46, %v941_v56  ;;  %v944_v43 = vadd.f32 %v1747_v57, %v603_v54  ;;  %v608_v46 = vadd.f32 %v2256_v7, %v353_v38  ;;  %v361_v38 = vld [vmem:[#allocation2 + $0xa0] sm:$0xff] }
 0x115   : > { %v861_v12 = vpop.f32.mrf.mxu1 }
 0x116   : > { %v1776_v16 = vpop.f32.mrf.mxu0  ;;  %1208 = vst.msk [vmem:[#allocation2 + $0x20] sm:$0xff] %vm1203_vm5, %v2304_v61  ;;  %v2308_v24 = vadd.f32 %v1773_v53, %v944_v43  ;;  %v942_v17 = vadd.f32 %v861_v12, %v601_v59  ;;  %v611_v53 = vadd.f32 %v2258_v60, %v356_v42  ;;  %v364_v42 = vld [vmem:[#allocation2 + $0xb8] sm:$0xff] }
 0x117   : > { %v1750_v19 = vpop.f32.mrf.mxu1 }
 0x118   : > { %v1116_v20 = vpop.f32.mrf.mxu0  ;;  %1211 = vst.msk [vmem:[#allocation2 + $0x38] sm:$0xff] %vm1203_vm5, %v2308_v24  ;;  %v2313_v21 = vadd.f32 %v1103_v45, %v942_v17  ;;  %v947_v22 = vadd.f32 %v1750_v19, %v606_v2  ;;  %v609_v45 = vadd.f32 %v2260_v62, %v354_v50  ;;  %v362_v50 = vld [vmem:[#allocation2 + $0xa8] sm:$0xff] }
 0x119   : > { %v874_v25 = vpop.f32.mrf.mxu1 }
 0x11a   : > { %v1777_v6 = vpop.f32.mrf.mxu0  ;;  %1209 = vst.msk [vmem:[#allocation2 + $0x28] sm:$0xff] %vm1203_vm5, %v2313_v21  ;;  %v2318_v28 = vadd.f32 %v1776_v16, %v947_v22  ;;  %v945_v30 = vadd.f32 %v874_v25, %v604_v4  ;;  %v614_v16 = vadd.f32 %v2262_v63, %v359_v51 }
 0x11b   : > { %v1751_v34 = vpop.f32.mrf.mxu1 }
 0x11c   : > { %v1119_v9 = vpop.f32.mrf.mxu0  ;;  %1214 = vst.msk [vmem:[#allocation2 + $0x50] sm:$0xff] %vm1203_vm5, %v2318_v28  ;;  %v2323_v33 = vadd.f32 %v1116_v20, %v945_v30  ;;  %v948_v36 = vadd.f32 %v1751_v34, %v607_v26  ;;  %v612_v20 = vadd.f32 %v2264_v1, %v357_v0 }
 0x11d   : > { %v877_v31 = vpop.f32.mrf.mxu1 }
 0x11e   : > { %v1780_v11 = vpop.f32.mrf.mxu0  ;;  %1212 = vst.msk [vmem:[#allocation2 + $0x40] sm:$0xff] %vm1203_vm5, %v2323_v33  ;;  %v2328_v39 = vadd.f32 %v1777_v6, %v948_v36  ;;  %v946_v41 = vadd.f32 %v877_v31, %v605_v27  ;;  %v615_v6 = vadd.f32 %v2266_v3, %v360_v18 }
 0x11f   : > { %v1754_v44 = vpop.f32.mrf.mxu1 }
 0x120   : > { %v1132_v15 = vpop.f32.mrf.mxu0  ;;  %1215 = vst.msk [vmem:[#allocation2 + $0x58] sm:$0xff] %vm1203_vm5, %v2328_v39  ;;  %v2333_v47 = vadd.f32 %v1119_v9, %v946_v41  ;;  %v951_v49 = vadd.f32 %v1754_v44, %v610_v37  ;;  %v613_v9 = vadd.f32 %v2268_v5, %v358_v23 }
 0x121   : > { %v890_v52 = vpop.f32.mrf.mxu1 }
 0x122   : > { %v1781_v58 = vpop.f32.mrf.mxu0  ;;  %1213 = vst.msk [vmem:[#allocation2 + $0x48] sm:$0xff] %vm1203_vm5, %v2333_v47  ;;  %v2338_v54 = vadd.f32 %v1780_v11, %v951_v49  ;;  %v949_v56 = vadd.f32 %v890_v52, %v608_v46  ;;  %v618_v11 = vadd.f32 %v2270_v8, %v363_v32  ;;  %v619_v8 = vadd.f32 %v2278_v14, %v364_v42 }
 0x123   : > { %v1755_v57 = vpop.f32.mrf.mxu1 }
 0x124   : > { %v1135_v7 = vpop.f32.mrf.mxu0  ;;  %1218 = vst.msk [vmem:[#allocation2 + $0x70] sm:$0xff] %vm1203_vm5, %v2338_v54  ;;  %v2343_v59 = vadd.f32 %v1132_v15, %v949_v56  ;;  %v952_v43 = vadd.f32 %v1755_v57, %v611_v53  ;;  %v616_v15 = vadd.f32 %v2274_v10, %v361_v38  ;;  %v617_v10 = vadd.f32 %v2282_v13, %v362_v50 }
 0x125   : > { %v893_v12 = vpop.f32.mrf.mxu1 }
 0x126   : > { %v1784_v60 = vpop.f32.mrf.mxu0  ;;  %1216 = vst.msk [vmem:[#allocation2 + $0x60] sm:$0xff] %vm1203_vm5, %v2343_v59  ;;  %v2348_v2 = vadd.f32 %v1781_v58, %v952_v43  ;;  %v950_v17 = vadd.f32 %v893_v12, %v609_v45 }
 0x127   : > { %v1758_v19 = vpop.f32.mrf.mxu1 }
 0x128   : > { %v1148_v62 = vpop.f32.mrf.mxu0  ;;  %1219 = vst.msk [vmem:[#allocation2 + $0x78] sm:$0xff] %vm1203_vm5, %v2348_v2  ;;  %v2353_v4 = vadd.f32 %v1135_v7, %v950_v17  ;;  %v955_v22 = vadd.f32 %v1758_v19, %v614_v16 }
 0x129   : > { %v906_v25 = vpop.f32.mrf.mxu1 }
 0x12a   : > { %v1785_v63 = vpop.f32.mrf.mxu0  ;;  %1217 = vst.msk [vmem:[#allocation2 + $0x68] sm:$0xff] %vm1203_vm5, %v2353_v4  ;;  %v2358_v26 = vadd.f32 %v1784_v60, %v955_v22  ;;  %v953_v30 = vadd.f32 %v906_v25, %v612_v20 }
 0x12b   : > { %v1759_v34 = vpop.f32.mrf.mxu1 }
 0x12c   : > { %v1151_v1 = vpop.f32.mrf.mxu0  ;;  %1222 = vst.msk [vmem:[#allocation2 + $0x90] sm:$0xff] %vm1203_vm5, %v2358_v26  ;;  %v2363_v27 = vadd.f32 %v1148_v62, %v953_v30  ;;  %v956_v36 = vadd.f32 %v1759_v34, %v615_v6 }
 0x12d   : > { %v909_v31 = vpop.f32.mrf.mxu1 }
 0x12e   : > { %v1788_v3 = vpop.f32.mrf.mxu0  ;;  %1220 = vst.msk [vmem:[#allocation2 + $0x80] sm:$0xff] %vm1203_vm5, %v2363_v27  ;;  %v2368_v37 = vadd.f32 %v1785_v63, %v956_v36  ;;  %v954_v41 = vadd.f32 %v909_v31, %v613_v9 }
 0x12f   : > { %v1762_v44 = vpop.f32.mrf.mxu1 }
 0x130   : > { %v1164_v5 = vpop.f32.mrf.mxu0  ;;  %1223 = vst.msk [vmem:[#allocation2 + $0x98] sm:$0xff] %vm1203_vm5, %v2368_v37  ;;  %v2373_v46 = vadd.f32 %v1151_v1, %v954_v41  ;;  %v959_v49 = vadd.f32 %v1762_v44, %v618_v11 }
 0x131   : > { %v922_v52 = vpop.f32.mrf.mxu1 }
 0x132   : > { %1221 = vst.msk [vmem:[#allocation2 + $0x88] sm:$0xff] %vm1203_vm5, %v2373_v46  ;;  %v2378_v58 = vadd.f32 %v1788_v3, %v959_v49  ;;  %v957_v53 = vadd.f32 %v922_v52, %v616_v15  ;;  %v1789_v51 = vpop.f32.mrf.mxu0 }
 0x133   : > { %v1763_v56 = vpop.f32.mrf.mxu1 }
 0x134   : > { %1226 = vst.msk [vmem:[#allocation2 + $0xb0] sm:$0xff] %vm1203_vm5, %v2378_v58  ;;  %v2383_v57 = vadd.f32 %v1164_v5, %v957_v53  ;;  %v960_v7 = vadd.f32 %v1763_v56, %v619_v8  ;;  %v1167_v0 = vpop.f32.mrf.mxu0 }
 0x135   : > { %v925_v45 = vpop.f32.mrf.mxu1 }
 0x136   : > { %1224 = vst.msk [vmem:[#allocation2 + $0xa0] sm:$0xff] %vm1203_vm5, %v2383_v57  ;;  %v2387_v14 = vadd.f32 %v1789_v51, %v960_v7  ;;  %v958_v43 = vadd.f32 %v925_v45, %v617_v10  ;;  %1231 = sbr.rel (%p1621_p11) target bundleno = 338 (0x152), region = 40 }
 0x138   : > { %1227 = vst.msk [vmem:[#allocation2 + $0xb8] sm:$0xff] %vm1203_vm5, %v2387_v14  ;;  %v2391_v12 = vadd.f32 %v1167_v0, %v958_v43 }
 0x13a   : > { %1225 = vst.msk [vmem:[#allocation2 + $0xa8] sm:$0xff] %vm1203_vm5, %v2391_v12 }
 0x13b   : > { %v2399_v13 = vld [vmem:[%s2520_s2] ss:$0 sm:$0xff]  ;;  %vm1383_vm6 = vcmask 60416  }
 0x13c   : > { %v1239_v60 = vadd.f32 %v2399_v13, %v2288_v35  ;;  %v1240_v16 = vadd.f32 %v2399_v13, %v2296_v48  ;;  %v1241_v17 = vadd.f32 %v2399_v13, %v2284_v29  ;;  %v1242_v18 = vadd.f32 %v2399_v13, %v2292_v40 }
 0x13d   : > { %v1243_v19 = vadd.f32 %v2399_v13, %v2304_v61  ;;  %v1244_v62 = vadd.f32 %v2399_v13, %v2313_v21  ;;  %v1245_v20 = vadd.f32 %v2399_v13, %v2300_v55  ;;  %v1246_v35 = vadd.f32 %v2399_v13, %v2308_v24 }
 0x13e   : > { %v1263_v22 = vmax.f32 %v1239_v60, 0.0  ;;  %v1264_v48 = vmax.f32 %v1240_v16, 0.0  ;;  %v1265_v29 = vmax.f32 %v1241_v17, 0.0  ;;  %v1266_v23 = vmax.f32 %v1242_v18, 0.0 }
 0x13f   : > { %v1267_v40 = vmax.f32 %v1243_v19, 0.0  ;;  %v1268_v25 = vmax.f32 %v1244_v62, 0.0  ;;  %v1269_v61 = vmax.f32 %v1245_v20, 0.0  ;;  %v1270_v63 = vmax.f32 %v1246_v35, 0.0 }
 0x140   : > { %v1649_v6 = vpack.c.bf16 %v1263_v22, %v1263_v22  ;;  %v1650_v21 = vpack.c.bf16 %v1264_v48, %v1264_v48  ;;  %v1651_v55 = vpack.c.bf16 %v1265_v29, %v1265_v29  ;;  %v1652_v30 = vpack.c.bf16 %v1266_v23, %v1266_v23 }
 0x141   : > { %v1653_v24 = vpack.c.bf16 %v1267_v40, %v1267_v40  ;;  %v1654_v32 = vpack.c.bf16 %v1268_v25, %v1268_v25  ;;  %v1655_v34 = vpack.c.bf16 %v1269_v61, %v1269_v61  ;;  %v1656_v1 = vpack.c.bf16 %v1270_v63, %v1270_v63 }
 0x142   : > { %1384 = vst.msk [vmem:[%s2020_s27] sm:$0xf] %vm1383_vm6, %v1649_v6  ;;  %1385 = vst.msk [vmem:[%s2020_s27 + $0x4] sm:$0xf] %vm1383_vm6, %v1650_v21  ;;  %v1247_v9 = vadd.f32 %v2399_v13, %v2323_v33  ;;  %v1248_v36 = vadd.f32 %v2399_v13, %v2333_v47  ;;  %v1249_v38 = vadd.f32 %v2399_v13, %v2318_v28 }
 0x143   : > { %1386 = vst.msk [vmem:[%s2020_s27 + $0x8] sm:$0xf] %vm1383_vm6, %v1651_v55  ;;  %1387 = vst.msk [vmem:[%s2020_s27 + $0xc] sm:$0xf] %vm1383_vm6, %v1652_v30  ;;  %v1250_v31 = vadd.f32 %v2399_v13, %v2328_v39  ;;  %v1251_v33 = vadd.f32 %v2399_v13, %v2343_v59  ;;  %v1252_v47 = vadd.f32 %v2399_v13, %v2353_v4 }
 0x144   : > { %1388 = vst.msk [vmem:[%s2020_s27 + $0x10] sm:$0xf] %vm1383_vm6, %v1653_v24  ;;  %1389 = vst.msk [vmem:[%s2020_s27 + $0x14] sm:$0xf] %vm1383_vm6, %v1654_v32  ;;  %v1253_v28 = vadd.f32 %v2399_v13, %v2338_v54  ;;  %v1254_v39 = vadd.f32 %v2399_v13, %v2348_v2  ;;  %v1271_v3 = vmax.f32 %v1247_v9, 0.0  ;;  %v1272_v11 = vmax.f32 %v1248_v36, 0.0 }
 0x145   : > { %1390 = vst.msk [vmem:[%s2020_s27 + $0x18] sm:$0xf] %vm1383_vm6, %v1655_v34  ;;  %1391 = vst.msk [vmem:[%s2020_s27 + $0x1c] sm:$0xf] %vm1383_vm6, %v1656_v1  ;;  %v1273_v41 = vmax.f32 %v1249_v38, 0.0  ;;  %v1274_v42 = vmax.f32 %v1250_v31, 0.0  ;;  %v1255_v56 = vadd.f32 %v2399_v13, %v2363_v27  ;;  %v1256_v51 = vadd.f32 %v2399_v13, %v2373_v46 }
 0x146   : > { %v1275_v44 = vmax.f32 %v1251_v33, 0.0  ;;  %v1276_v5 = vmax.f32 %v1252_v47, 0.0  ;;  %v1277_v59 = vmax.f32 %v1253_v28, 0.0  ;;  %v1278_v15 = vmax.f32 %v1254_v39, 0.0 }
 0x147   : > { %v1657_v49 = vpack.c.bf16 %v1271_v3, %v1271_v3  ;;  %v1658_v4 = vpack.c.bf16 %v1272_v11, %v1272_v11  ;;  %v1659_v54 = vpack.c.bf16 %v1273_v41, %v1273_v41  ;;  %v1660_v50 = vpack.c.bf16 %v1274_v42, %v1274_v42 }
 0x148   : > { %v1661_v2 = vpack.c.bf16 %v1275_v44, %v1275_v44  ;;  %v1662_v52 = vpack.c.bf16 %v1276_v5, %v1276_v5  ;;  %v1663_v8 = vpack.c.bf16 %v1277_v59, %v1277_v59  ;;  %v1664_v53 = vpack.c.bf16 %v1278_v15, %v1278_v15 }
 0x149   : > { %1392 = vst.msk [vmem:[%s2020_s27 + $0x20] sm:$0xf] %vm1383_vm6, %v1657_v49  ;;  %1393 = vst.msk [vmem:[%s2020_s27 + $0x24] sm:$0xf] %vm1383_vm6, %v1658_v4  ;;  %v1257_v10 = vadd.f32 %v2399_v13, %v2358_v26  ;;  %v1258_v7 = vadd.f32 %v2399_v13, %v2368_v37  ;;  %v1259_v27 = vadd.f32 %v2399_v13, %v2383_v57  ;;  %v1279_v45 = vmax.f32 %v1255_v56, 0.0 }
 0x14a   : > { %1394 = vst.msk [vmem:[%s2020_s27 + $0x28] sm:$0xf] %vm1383_vm6, %v1659_v54  ;;  %1395 = vst.msk [vmem:[%s2020_s27 + $0x2c] sm:$0xf] %vm1383_vm6, %v1660_v50  ;;  %v1260_v46 = vadd.f32 %v2399_v13, %v2391_v12  ;;  %v1261_v26 = vadd.f32 %v2399_v13, %v2378_v58  ;;  %v1262_v37 = vadd.f32 %v2399_v13, %v2387_v14  ;;  %v1280_v43 = vmax.f32 %v1256_v51, 0.0 }
 0x14b   : > { %1396 = vst.msk [vmem:[%s2020_s27 + $0x30] sm:$0xf] %vm1383_vm6, %v1661_v2  ;;  %1397 = vst.msk [vmem:[%s2020_s27 + $0x34] sm:$0xf] %vm1383_vm6, %v1662_v52  ;;  %v1281_v0 = vmax.f32 %v1257_v10, 0.0  ;;  %v1282_v60 = vmax.f32 %v1258_v7, 0.0  ;;  %v1665_v58 = vpack.c.bf16 %v1279_v45, %v1279_v45 }
 0x14c   : > { %1398 = vst.msk [vmem:[%s2020_s27 + $0x38] sm:$0xf] %vm1383_vm6, %v1663_v8  ;;  %1399 = vst.msk [vmem:[%s2020_s27 + $0x3c] sm:$0xf] %vm1383_vm6, %v1664_v53  ;;  %v1283_v16 = vmax.f32 %v1259_v27, 0.0  ;;  %v1284_v57 = vmax.f32 %v1260_v46, 0.0  ;;  %v1666_v18 = vpack.c.bf16 %v1280_v43, %v1280_v43 }
 0x14d   : > { %v1285_v17 = vmax.f32 %v1261_v26, 0.0  ;;  %v1286_v12 = vmax.f32 %v1262_v37, 0.0  ;;  %v1667_v19 = vpack.c.bf16 %v1281_v0, %v1281_v0  ;;  %v1668_v14 = vpack.c.bf16 %v1282_v60, %v1282_v60  ;;  %1400 = vst.msk [vmem:[%s2020_s27 + $0x40] sm:$0xf] %vm1383_vm6, %v1665_v58 }
 0x14e   : > { %v1669_v13 = vpack.c.bf16 %v1283_v16, %v1283_v16  ;;  %v1670_v62 = vpack.c.bf16 %v1284_v57, %v1284_v57  ;;  %1401 = vst.msk [vmem:[%s2020_s27 + $0x44] sm:$0xf] %vm1383_vm6, %v1666_v18 }
 0x14f   : > { %v1671_v20 = vpack.c.bf16 %v1285_v17, %v1285_v17  ;;  %v1672_v35 = vpack.c.bf16 %v1286_v12, %v1286_v12  ;;  %1402 = vst.msk [vmem:[%s2020_s27 + $0x48] sm:$0xf] %vm1383_vm6, %v1667_v19  ;;  %1403 = vst.msk [vmem:[%s2020_s27 + $0x4c] sm:$0xf] %vm1383_vm6, %v1668_v14 }
 0x150   : > { %1404 = vst.msk [vmem:[%s2020_s27 + $0x50] sm:$0xf] %vm1383_vm6, %v1669_v13  ;;  %1405 = vst.msk [vmem:[%s2020_s27 + $0x54] sm:$0xf] %vm1383_vm6, %v1670_v62 }
 0x151   : > { %1406 = vst.msk [vmem:[%s2020_s27 + $0x58] sm:$0xf] %vm1383_vm6, %v1671_v20  ;;  %1407 = vst.msk [vmem:[%s2020_s27 + $0x5c] sm:$0xf] %vm1383_vm6, %v1672_v35 }
 0x152 PF: > { %s13_s18 = sadd.s32 1, %s1934_s18   ;;  %s2524_s12 = smov %s1922_s15 }
 0x153   : > { %p10_p12 = scmp.ge.s32.totalorder %s13_s18, 14   ;;  %s2525_s13 = smov %s1926_s16 }
 0x154   : > { %s2526_s14 = smov %s1930_s17  ;;  %s2527_s15 = smov %s2531_s19 }
 0x155   : > { %s2528_s16 = smov %s2535_s20  ;;  %s2529_s17 = smov %s2539_s21 }
 0x156   :  { %12 = sbr.rel (!%p10_p12) target bundleno = 4 (0x4), region = 75 }

// kernel: aspp_forward.10
= control target key start
LH: loop header
LB: loop body
LE: loop exit
PB: predicated region body
PF: predicated region fallthrough
CT: control target
= control target key end

     0   :  { %s1348_s12 = smov 0   ;;  %s1350_s13 = smov 0   ;;  %s1660_s0 = inlined_call_operand.vmem [shape: bf16[2,30,28,4], index: 0, kind: input, shape index: {}]   ;;  %s1661_s1 = inlined_call_operand.vmem [shape: bf16[9,4,8], index: 1, kind: input, shape index: {}]   ;;  %s1662_s2 = inlined_call_operand.vmem [shape: f32[1,8], index: 2, kind: input, shape index: {}]   ;;  %s1663_s3 = inlined_call_operand.vmem [shape: bf16[2,18,16,8], index: 3, kind: output, shape index: {}]  }
   0x1   :  { %s1352_s14 = smov 0   ;;  %s1354_s15 = smov 0  }
   0x2   :  { %s1356_s16 = smov 0   ;;  %s1358_s17 = smov 0  }
   0x3   :  { %s1360_s18 = smov 0  }
   0x4 LB: > { %s25_s19 = sadd.s32 1, %s1313_s15  ;;  %s28_s20 = sadd.s32 1, %s1317_s16  ;;  %s1325_s18 = sphi %s1360_s18, %s13_s18   ;;  %s1321_s17 = sphi %s1358_s17, %s1673_s17   ;;  %s1317_s16 = sphi %s1356_s16, %s1672_s16   ;;  %s1313_s15 = sphi %s1354_s15, %s1671_s15   ;;  %s1309_s14 = sphi %s1352_s14, %s1670_s14   ;;  %s1305_s13 = sphi %s1350_s13, %s1669_s13   ;;  %s1301_s12 = sphi %s1348_s12, %s1668_s12  }
   0x5   : > { %p26_p0 = scmp.ge.s32.totalorder %s25_s19, 3  ;;  %p1052_p1 = scmp.ge.s32.totalorder %s1325_s18, 1 }
   0x6   : > { %p181_p2 = scmp.lt.s32.totalorder %s1325_s18, 19  ;;  %s32_s21 = sadd.s32 1, %s1321_s17 }
   0x7   : > { %s1675_s19 = smov (%p26_p0, %s25_s19), 0  ;;  %s1677_s20 = smov (!%p26_p0, %s28_s20), %s1317_s16 }
   0x8   : > { %p182_p3 = pnand %p1052_p1, %p181_p2  ;;  %p30_p4 = scmp.ge.s32.totalorder %s1677_s20, 3 }
   0x9   : > { %s221_s22 = sadd.s32 (!%p182_p3), %s1301_s12, %s1305_s13  ;;  %p223_p6 = scmp.lt.s32.totalorder (!%p182_p3), %s1309_s14, 1 }
   0xa   : > { %s1679_s20 = smov (%p30_p4, %s1677_s20), 0  ;;  %s1681_s21 = smov (!%p30_p4, %s32_s21), %s1321_s17 }
   0xb   : > { %p34_p5 = scmp.ge.s32.totalorder %s1681_s21, 2  ;;  %185 = sbr.rel (%p182_p3) target bundleno = 291 (0x123), region = 32 }
   0xc   : > { %s222_s23 = smul.u32 (!%p182_p3), 6, %s221_s22  ;;  %p1058_p10 = scmp.ne.s32.totalorder (!%p182_p3), %s1301_s12, 0 }
   0xd   : > { %s1683_s21 = smov (%p34_p5, %s1681_s21), 0  ;;  %s234_s24 = smul.u32 (!%p182_p3), 3, %s1301_s12 }
   0xe   : > { %p225_p7 = scmp.lt.s32.totalorder (!%p182_p3), %s222_s23, 29  ;;  %s240_s26 = smul.u32 (!%p182_p3), 6, %s1305_s13 }
   0xf   : > { %p235_p8 = scmp.lt.s32.totalorder (!%p182_p3), %s234_s24, 8 }
  0x10   : > { %s1685_s14 = smov (!%p223_p6, %s1309_s14), 1  ;;  %s1687_s23 = smov (!%p225_p7, %s222_s23), 29 }
  0x11   : > { %s1206_s25 = smul.u32 120, %s1685_s14  ;;  %s1053_s27 = sshll.u32 %s1687_s23, 2 }
  0x12   : > { %p243_p9 = scmp.lt.s32.totalorder %s240_s26, 17  ;;  %s1207_s6 = smul.u32 36, %s1685_s14 }
  0x13   : > { %s229_s28 = sadd.s32 %s1206_s25, %s1053_s27  ;;  %s1689_s24 = smov (!%p235_p8, %s234_s24), 8 }
  0x14   : > { %s1054_s29 = sshll.u32 %s229_s28, 2  ;;  %s1691_s26 = smov (!%p243_p9, %s240_s26), 17 }
  0x15   : > { %s1401_s5 = scalar_lea.vmem %s1660_s0, %s1054_s29  ;;  %s1055_s7 = sshll.u32 %s1689_s24, 1 }
  0x16   : > { %s1406_s10 = scalar_lea.vmem %s1661_s1, %s1055_s7  ;;  %s1056_s11 = sshll.u32 %s1691_s26, 1 }
  0x17   : > { %s247_s13 = sadd.s32 %s1207_s6, %s1056_s11  ;;  %255 = sbr.rel (%p1058_p10) target bundleno = 35 (0x23), region = 36 }
  0x18   : > { %s1057_s22 = sshll.u32 %s247_s13, 2 }
  0x19   : > { %s1411_s27 = scalar_lea.vmem %s1663_s3, %s1057_s22 }
  0x1c   : > { %vm256_vm0 = vcmask 64512   ;;  %v1327_v0 = vmov 0.0  }
  0x1d   : > { %257 = vst.msk [vmem:[#allocation2] sm:$0xff] %vm256_vm0, %v1327_v0  ;;  %258 = vst.msk [vmem:[#allocation2 + $0x8] sm:$0xff] %vm256_vm0, %v1327_v0 }
  0x1e   : > { %259 = vst.msk [vmem:[#allocation2 + $0x10] sm:$0xff] %vm256_vm0, %v1327_v0  ;;  %260 = vst.msk [vmem:[#allocation2 + $0x18] sm:$0xff] %vm256_vm0, %v1327_v0 }
  0x1f   : > { %261 = vst.msk [vmem:[#allocation2 + $0x20] sm:$0xff] %vm256_vm0, %v1327_v0  ;;  %262 = vst.msk [vmem:[#allocation2 + $0x28] sm:$0xff] %vm256_vm0, %v1327_v0 }
  0x20   : > { %263 = vst.msk [vmem:[#allocation2 + $0x30] sm:$0xff] %vm256_vm0, %v1327_v0  ;;  %264 = vst.msk [vmem:[#allocation2 + $0x38] sm:$0xff] %vm256_vm0, %v1327_v0 }
  0x21   : > { %265 = vst.msk [vmem:[#allocation2 + $0x40] sm:$0xff] %vm256_vm0, %v1327_v0  ;;  %266 = vst.msk [vmem:[#allocation2 + $0x48] sm:$0xff] %vm256_vm0, %v1327_v0 }
  0x22   : > { %267 = vst.msk [vmem:[#allocation2 + $0x50] sm:$0xff] %vm256_vm0, %v1327_v0  ;;  %268 = vst.msk [vmem:[#allocation2 + $0x58] sm:$0xff] %vm256_vm0, %v1327_v0 }
  0x23 PF: > { %v305_v1 = vld [vmem:[%s1406_s10] sm:$0x3]  ;;  %vm355_vm1 = vcmask 1041408   ;;  %v1419_v4 = vld [vmem:[%s1401_s5 + $0x24] sm:$0xf]  ;;  %vm336_vm2 = vcmask 31744  }
  0x24   : > { %v277_v2 = vld [vmem:[%s1401_s5 + $0x20] sm:$0xf]  ;;  %1203 = vmatprep.subr.msk.bf16.mxu1 %vm355_vm1, %v305_v1  ;;  %v357_v3 = vsel %vm355_vm1, %v305_v1, 0  ;;  %1202 = vmatprep.subr.msk.bf16.mxu0 %vm355_vm1, %v305_v1  ;;  %v477_v6 = vrot.slane %v1419_v4, 7  ;;  %v1425_v7 = vld [vmem:[%s1401_s5 + $0x30] sm:$0xf] }
  0x25   : > { %1201 = vmatpush3.bf16.msra.mxu1 %v357_v3  ;;  %v1061_v5 = vcombine.low %v277_v2, %v1419_v4  ;;  %1159 = vmatpush3.bf16.msra.mxu0 %v357_v3  ;;  %v1428_v8 = vld [vmem:[%s1401_s5 + $0x34] sm:$0xf]  ;;  %v1077_v9 = vld [vmem:[%s1406_s10 + $0x2] sm:$0x3]  ;;  %vm644_vm3 = vcmask 1045508   ;;  %vm458_vm4 = vcmask 1040384  }
  0x26   : > { %v1062_v10 = vcombine.low %v1425_v7, %v1428_v8  ;;  %1204 = vmatprep.subr.msk.bf16.mxu1 %vm355_vm1, %v1077_v9  ;;  %v269_v11 = vld [vmem:[%s1401_s5] sm:$0xf]  ;;  %v270_v12 = vld [vmem:[%s1401_s5 + $0x4] sm:$0xf]  ;;  %vm459_vm5 = vcmask 1044484   ;;  %v542_v13 = vsel %vm355_vm1, %v1077_v9, 0  ;;  %vm1475_vm7 = vmor %vm355_vm1, %vm644_vm3 }
  0x27   : > { %1164 = vmatprep.mubr.msk.bf16.mxu1 %vm336_vm2, %v1061_v5  ;;  %v1059_v14 = vcombine.low %v269_v11, %v270_v12  ;;  %v273_v15 = vld [vmem:[%s1401_s5 + $0x10] sm:$0xf]  ;;  %v1073_v16 = vrot.slane %v277_v2, 11  ;;  %v1439_v17 = vrot.slane %v477_v6, 4  ;;  %v1092_v18 = vrot.slane %v1419_v4, 10  ;;  %vm1451_vm6 = vmor %vm458_vm4, %vm459_vm5  ;;  %p1109_p11 = scmp.ne.s32.totalorder %s1301_s12, 2 }
  0x28   : > { %1165 = vmatmul.mubr.msk.bf16.vlgmr.msra.gmra.mxu1 %vm336_vm2, %v1062_v10  ;;  %v1074_v19 = vrot.slane %v1425_v7, 11  ;;  %v274_v20 = vld [vmem:[%s1401_s5 + $0x14] sm:$0xf]  ;;  %v1071_v21 = vrot.slane %v269_v11, 11  ;;  %v463_v22 = vrot.slane %v270_v12, 7  ;;  %v484_v27 = vrot.slane %v1428_v8, 7 }
  0x29   : > { %1173 = vmatpush3.bf16.msra.mxu1 %v542_v13  ;;  %1160 = vmatprep.mubr.msk.bf16.mxu0 %vm336_vm2, %v1059_v14  ;;  %v1060_v23 = vcombine.low %v273_v15, %v274_v20  ;;  %v470_v24 = vrot.slane %v274_v20, 7  ;;  %v1447_v25 = vld [vmem:[%s1401_s5 + $0x40] sm:$0xf]  ;;  %v275_v28 = vld [vmem:[%s1401_s5 + $0x18] sm:$0xf]  ;;  %v1072_v29 = vrot.slane %v273_v15, 11  ;;  %v1481_v42 = vsel %vm1451_vm6, %v1073_v16, %v477_v6 }
  0x2a   : > { %v1458_v30 = vld [vmem:[%s1401_s5 + $0x44] sm:$0xf]  ;;  %v473_v32 = vrot.slane %v275_v28, 7  ;;  %v1464_v34 = vld [vmem:[%s1401_s5 + $0x50] sm:$0xf]  ;;  %v1093_v36 = vrot.slane %v1428_v8, 10  ;;  %v464_v43 = vsel %vm1451_vm6, %v1071_v21, %v463_v22 }
  0x2b   : > { %1161 = vmatmul.mubr.msk.bf16.vlgmr.msra.gmra.mxu0 %vm336_vm2, %v1060_v23  ;;  %v472_v31 = vrot.slane %v470_v24, 4  ;;  %v1063_v33 = vcombine.low %v1447_v25, %v1458_v30  ;;  %v1467_v35 = vld [vmem:[%s1401_s5 + $0x54] sm:$0xf]  ;;  %v1090_v37 = vrot.slane %v270_v12, 10  ;;  %v1091_v38 = vrot.slane %v274_v20, 10 }
  0x2c   : > { %v1064_v39 = vcombine.low %v1464_v34, %v1467_v35  ;;  %v1096_v40 = vld [vmem:[%s1406_s10 + $0x4] sm:$0x3]  ;;  %v465_v44 = vrot.slane %v463_v22, 4  ;;  %v271_v46 = vld [vmem:[%s1401_s5 + $0x8] sm:$0xf]  ;;  %v491_v48 = vrot.slane %v1458_v30, 7  ;;  %v471_v53 = vsel %vm1451_vm6, %v1072_v29, %v470_v24 }
  0x2d   : > { %1168 = vmatprep.mubr.msk.bf16.mxu1 %vm336_vm2, %v1063_v33  ;;  %1205 = vmatprep.subr.msk.bf16.mxu0 %vm355_vm1, %v1096_v40  ;;  %v727_v45 = vsel %vm355_vm1, %v1096_v40, 0  ;;  %v272_v47 = vld [vmem:[%s1401_s5 + $0xc] sm:$0x3]  ;;  %v648_v49 = vrot.slane %v271_v46, 6  ;;  %v276_v51 = vld [vmem:[%s1401_s5 + $0x1c] sm:$0x3]  ;;  %v474_v54 = vsel %vm1451_vm6, %v472_v31, %v473_v32 }
  0x2e   : > { %1187 = vmatpush3.bf16.msra.mxu0 %v727_v45  ;;  %v651_v50 = vrot.slane %v272_v47, 6  ;;  %v655_v52 = vrot.slane %v275_v28, 6  ;;  %v658_v55 = vrot.slane %v276_v51, 6  ;;  %v466_v56 = vrot.slane %v271_v46, 7  ;;  %v279_v57 = vld [vmem:[%s1401_s5 + $0x28] sm:$0xf] }
  0x2f   : > { %v280_v58 = vld [vmem:[%s1401_s5 + $0x2c] sm:$0x3]  ;;  %v649_v59 = vsel %vm1475_vm7, %v1090_v37, %v648_v49  ;;  %v650_v60 = vrot.slane %v648_v49, 4  ;;  %v283_v63 = vld [vmem:[%s1401_s5 + $0x38] sm:$0xf]  ;;  %v662_v2 = vrot.slane %v279_v57, 6  ;;  %v1079_v21 = vcombine.low %v471_v53, %v474_v54 }
  0x30   : > { %1169 = vmatmul.mubr.msk.bf16.gmra.mxu1 %vm336_vm2, %v1064_v39  ;;  %v656_v61 = vsel %vm1475_vm7, %v1091_v38, %v655_v52  ;;  %v657_v62 = vrot.slane %v655_v52, 4  ;;  %v284_v0 = vld [vmem:[%s1401_s5 + $0x3c] sm:$0x3]  ;;  %v467_v1 = vsel %vm1451_vm6, %v465_v44, %v466_v56  ;;  %v665_v3 = vrot.slane %v280_v58, 6  ;;  %v287_v12 = vld [vmem:[%s1401_s5 + $0x48] sm:$0xf] }
  0x31   : > { %v669_v5 = vrot.slane %v283_v63, 6  ;;  %v652_v6 = vsel %vm1475_vm7, %v650_v60, %v651_v50  ;;  %v1078_v10 = vcombine.low %v464_v43, %v467_v1  ;;  %v672_v11 = vrot.slane %v284_v0, 6  ;;  %v288_v20 = vld [vmem:[%s1401_s5 + $0x4c] sm:$0x3]  ;;  %v291_v28 = vld [vmem:[%s1401_s5 + $0x58] sm:$0xf] }
  0x32   : > { %v659_v9 = vsel %vm1475_vm7, %v657_v62, %v658_v55  ;;  %v1097_v13 = vcombine.low %v649_v59, %v652_v6  ;;  %v663_v15 = vsel %vm1475_vm7, %v1092_v18, %v662_v2  ;;  %v664_v16 = vrot.slane %v662_v2, 4  ;;  %v292_v45 = vld [vmem:[%s1401_s5 + $0x5c] sm:$0x3] }
  0x33   : > { %v1098_v14 = vcombine.low %v656_v61, %v659_v9  ;;  %v1094_v22 = vrot.slane %v1458_v30, 10  ;;  %1174 = vmatprep.mubr.msk.bf16.mxu1 %vm336_vm2, %v1078_v10  ;;  %v671_v23 = vrot.slane %v669_v5, 4  ;;  %v480_v24 = vrot.slane %v279_v57, 7  ;;  %v295_v9 = vld [vmem:[#allocation2 + $0x10] sm:$0xff]  ;;  %v293_v10 = vld [vmem:[#allocation2] sm:$0xff] }
  0x34   : > { %1188 = vmatprep.mubr.msk.bf16.mxu0 %vm336_vm2, %v1097_v13  ;;  %v666_v29 = vsel %vm1475_vm7, %v664_v16, %v665_v3  ;;  %v486_v4 = vrot.slane %v484_v27, 4  ;;  %v487_v31 = vrot.slane %v283_v63, 7  ;;  %v676_v18 = vrot.slane %v287_v12, 6 }
  0x35   : > { %v1075_v32 = vrot.slane %v1447_v25, 11  ;;  %1189 = vmatmul.mubr.msk.bf16.vlgmr.msra.gmra.mxu0 %vm336_vm2, %v1098_v14  ;;  %v1099_v33 = vcombine.low %v663_v15, %v666_v29  ;;  %v481_v37 = vsel %vm1451_vm6, %v1439_v17, %v480_v24  ;;  %v679_v38 = vrot.slane %v288_v20, 6  ;;  %v296_v14 = vld [vmem:[#allocation2 + $0x18] sm:$0xff] }
  0x36   : > { %v670_v39 = vsel %vm1475_vm7, %v1093_v36, %v669_v5  ;;  %v673_v40 = vsel %vm1475_vm7, %v671_v23, %v672_v11  ;;  %v1080_v43 = vcombine.low %v1481_v42, %v481_v37  ;;  %v683_v44 = vrot.slane %v291_v28, 6 }
  0x37   : > { %1192 = vmatprep.mubr.msk.bf16.mxu0 %vm336_vm2, %v1099_v33  ;;  %v485_v17 = vsel %vm1451_vm6, %v1074_v19, %v484_v27  ;;  %v677_v25 = vsel %vm1475_vm7, %v1094_v22, %v676_v18  ;;  %v678_v36 = vrot.slane %v676_v18, 4  ;;  %v498_v46 = vrot.slane %v1467_v35, 7  ;;  %v294_v22 = vld [vmem:[#allocation2 + $0x8] sm:$0xff] }
  0x38   : > { %1175 = vmatmul.mubr.msk.bf16.vlgmr.msra.gmra.mxu1 %vm336_vm2, %v1079_v21  ;;  %v488_v42 = vsel %vm1451_vm6, %v486_v4, %v487_v31  ;;  %v493_v8 = vrot.slane %v491_v48, 4  ;;  %v494_v47 = vrot.slane %v287_v12, 7  ;;  %v1095_v7 = vrot.slane %v1467_v35, 10  ;;  %v299_v31 = vld [vmem:[#allocation2 + $0x30] sm:$0xff] }
  0x39   : > { %1178 = vmatprep.mubr.msk.bf16.mxu1 %vm336_vm2, %v1080_v43  ;;  %v1100_v49 = vcombine.low %v670_v39, %v673_v40  ;;  %v680_v19 = vsel %vm1475_vm7, %v678_v36, %v679_v38  ;;  %v492_v27 = vsel %vm1451_vm6, %v1075_v32, %v491_v48  ;;  %v685_v51 = vrot.slane %v683_v44, 4  ;;  %v297_v39 = vld [vmem:[#allocation2 + $0x20] sm:$0xff]  ;;  %v300_v36 = vld [vmem:[#allocation2 + $0x38] sm:$0xff] }
  0x3a   : > { %v1101_v50 = vcombine.low %v677_v25, %v680_v19  ;;  %v686_v52 = vrot.slane %v292_v45, 6  ;;  %v495_v53 = vsel %vm1451_vm6, %v493_v8, %v494_v47  ;;  %v1081_v54 = vcombine.low %v485_v17, %v488_v42 }
  0x3b   : > { %v1076_v55 = vrot.slane %v1464_v34, 11  ;;  %v1082_v56 = vcombine.low %v492_v27, %v495_v53  ;;  %v500_v35 = vrot.slane %v498_v46, 4  ;;  %v501_v57 = vrot.slane %v291_v28, 7 }
  0x3c   : > { %v684_v30 = vsel %vm1475_vm7, %v1095_v7, %v683_v44  ;;  %v687_v48 = vsel %vm1475_vm7, %v685_v51, %v686_v52  ;;  %vm822_vm8 = vcmask 64512   ;;  %v298_v7 = vld [vmem:[#allocation2 + $0x28] sm:$0xff]  ;;  %v303_v52 = vld [vmem:[#allocation2 + $0x50] sm:$0xff] }
  0x3d   : > { %1193 = vmatmul.mubr.msk.bf16.gmra.mxu0 %vm336_vm2, %v1100_v49  ;;  %v499_v34 = vsel %vm1451_vm6, %v1076_v55, %v498_v46  ;;  %v502_v58 = vsel %vm1451_vm6, %v500_v35, %v501_v57  ;;  %v1102_v59 = vcombine.low %v684_v30, %v687_v48  ;;  %v301_v57 = vld [vmem:[#allocation2 + $0x40] sm:$0xff] }
  0x3e   : > { %1196 = vmatprep.mubr.msk.bf16.mxu0 %vm336_vm2, %v1101_v50  ;;  %v1083_v60 = vcombine.low %v499_v34, %v502_v58 }
  0x40   : > { %1179 = vmatmul.mubr.msk.bf16.gmra.mxu1 %vm336_vm2, %v1081_v54 }
  0x41   : > { %1182 = vmatprep.mubr.msk.bf16.mxu1 %vm336_vm2, %v1082_v56 }
  0x45   : > { %1197 = vmatmul.mubr.msk.bf16.gmra.mxu0 %vm336_vm2, %v1102_v59 }
  0x48   : > { %1183 = vmatmul.mubr.msk.bf16.gmra.mxu1 %vm336_vm2, %v1083_v60  ;;  %v304_v60 = vld [vmem:[#allocation2 + $0x58] sm:$0xff] }
  0xe8   : > { %v1166_v61 = vpop.f32.mrf.mxu1 }
  0xe9   : > { %v446_v44 = vadd.f32 %v1166_v61, %v299_v31 }
  0xea   : > { %v409_v62 = vpop.f32.mrf.mxu1 }
  0xeb   : > { %v1162_v41 = vpop.f32.mrf.mxu0  ;;  %v444_v42 = vadd.f32 %v409_v62, %v297_v39 }
  0xec   : > { %v1167_v63 = vpop.f32.mrf.mxu1  ;;  %v442_v13 = vadd.f32 %v1162_v41, %v295_v9 }
  0xed   : > { %v393_v0 = vpop.f32.mrf.mxu0  ;;  %v447_v27 = vadd.f32 %v1167_v63, %v300_v36 }
  0xee   : > { %v412_v1 = vpop.f32.mrf.mxu1  ;;  %v440_v20 = vadd.f32 %v393_v0, %v293_v10 }
  0xef   : > { %v1163_v2 = vpop.f32.mrf.mxu0  ;;  %v445_v55 = vadd.f32 %v412_v1, %v298_v7  ;;  %v302_v1 = vld [vmem:[#allocation2 + $0x48] sm:$0xff] }
  0xf0   : > { %v1170_v3 = vpop.f32.mrf.mxu1  ;;  %v443_v28 = vadd.f32 %v1163_v2, %v296_v14 }
  0xf1   : > { %v396_v6 = vpop.f32.mrf.mxu0  ;;  %v450_v34 = vadd.f32 %v1170_v3, %v303_v52 }
  0xf2   : > { %v1578_v5 = vpop.f32.mrf.mxu1  ;;  %v441_v33 = vadd.f32 %v396_v6, %v294_v22 }
  0xf3   : > { %v448_v41 = vadd.f32 %v1578_v5, %v301_v57 }
  0xf4   : > { %v1580_v26 = vpop.f32.mrf.mxu1 }
  0xf5   : > { %v1190_v11 = vpop.f32.mrf.mxu0  ;;  %v451_v6 = vadd.f32 %v1580_v26, %v304_v60 }
  0xf6   : > { %v1582_v12 = vpop.f32.mrf.mxu1 }
  0xf7   : > { %v763_v15 = vpop.f32.mrf.mxu0 }
  0xf8   : > { %v1176_v16 = vpop.f32.mrf.mxu1 }
  0xf9   : > { %v627_v21 = vadd.f32 %v1176_v16, %v442_v13  ;;  %v1191_v23 = vpop.f32.mrf.mxu0  ;;  %v449_v13 = vadd.f32 %v1582_v12, %v302_v1 }
  0xfa   : > { %v578_v24 = vpop.f32.mrf.mxu1 }
  0xfb   : > { %v1584_v29 = vadd.f32 %v1190_v11, %v627_v21  ;;  %v625_v4 = vadd.f32 %v578_v24, %v440_v20  ;;  %v766_v18 = vpop.f32.mrf.mxu0 }
  0xfc   : > { %v1177_v32 = vpop.f32.mrf.mxu1 }
  0xfd   : > { %825 = vst.msk [vmem:[#allocation2 + $0x10] sm:$0xff] %vm822_vm8, %v1584_v29  ;;  %v1588_v37 = vadd.f32 %v763_v15, %v625_v4  ;;  %v628_v38 = vadd.f32 %v1177_v32, %v443_v28  ;;  %v1194_v40 = vpop.f32.mrf.mxu0 }
  0xfe   : > { %v581_v43 = vpop.f32.mrf.mxu1 }
  0xff   : > { %823 = vst.msk [vmem:[#allocation2] sm:$0xff] %vm822_vm8, %v1588_v37  ;;  %v1592_v17 = vadd.f32 %v1191_v23, %v628_v38  ;;  %v626_v25 = vadd.f32 %v581_v43, %v441_v33  ;;  %v779_v45 = vpop.f32.mrf.mxu0 }
 0x100   : > { %v1180_v46 = vpop.f32.mrf.mxu1 }
 0x101   : > { %826 = vst.msk [vmem:[#allocation2 + $0x18] sm:$0xff] %vm822_vm8, %v1592_v17  ;;  %v811_v8 = vadd.f32 %v766_v18, %v626_v25  ;;  %v631_v47 = vadd.f32 %v1180_v46, %v446_v44  ;;  %v1195_v49 = vpop.f32.mrf.mxu0 }
 0x102   : > { %v594_v19 = vpop.f32.mrf.mxu1 }
 0x103   : > { %824 = vst.msk [vmem:[#allocation2 + $0x8] sm:$0xff] %vm822_vm8, %v811_v8  ;;  %v816_v50 = vadd.f32 %v1194_v40, %v631_v47  ;;  %v629_v51 = vadd.f32 %v594_v19, %v444_v42  ;;  %v782_v53 = vpop.f32.mrf.mxu0 }
 0x104   : > { %v1181_v54 = vpop.f32.mrf.mxu1 }
 0x105   : > { %829 = vst.msk [vmem:[#allocation2 + $0x30] sm:$0xff] %vm822_vm8, %v816_v50  ;;  %v814_v56 = vadd.f32 %v779_v45, %v629_v51  ;;  %v632_v35 = vadd.f32 %v1181_v54, %v447_v27  ;;  %v1198_v30 = vpop.f32.mrf.mxu0 }
 0x106   : > { %v597_v48 = vpop.f32.mrf.mxu1 }
 0x107   : > { %827 = vst.msk [vmem:[#allocation2 + $0x20] sm:$0xff] %vm822_vm8, %v814_v56  ;;  %v817_v58 = vadd.f32 %v1195_v49, %v632_v35  ;;  %v630_v59 = vadd.f32 %v597_v48, %v445_v55  ;;  %v795_v61 = vpop.f32.mrf.mxu0 }
 0x108   : > { %v1184_v62 = vpop.f32.mrf.mxu1 }
 0x109   : > { %830 = vst.msk [vmem:[#allocation2 + $0x38] sm:$0xff] %vm822_vm8, %v817_v58  ;;  %v815_v63 = vadd.f32 %v782_v53, %v630_v59  ;;  %v635_v0 = vadd.f32 %v1184_v62, %v450_v34  ;;  %v1199_v10 = vpop.f32.mrf.mxu0 }
 0x10a   : > { %v610_v2 = vpop.f32.mrf.mxu1 }
 0x10b   : > { %828 = vst.msk [vmem:[#allocation2 + $0x28] sm:$0xff] %vm822_vm8, %v815_v63  ;;  %v820_v3 = vadd.f32 %v1198_v30, %v635_v0  ;;  %v633_v9 = vadd.f32 %v610_v2, %v448_v41  ;;  %v798_v21 = vpop.f32.mrf.mxu0 }
 0x10c   : > { %v1185_v11 = vpop.f32.mrf.mxu1 }
 0x10d   : > { %833 = vst.msk [vmem:[#allocation2 + $0x50] sm:$0xff] %vm822_vm8, %v820_v3  ;;  %v818_v14 = vadd.f32 %v795_v61, %v633_v9  ;;  %v636_v5 = vadd.f32 %v1185_v11, %v451_v6 }
 0x10e   : > { %v613_v15 = vpop.f32.mrf.mxu1 }
 0x10f   : > { %831 = vst.msk [vmem:[#allocation2 + $0x40] sm:$0xff] %vm822_vm8, %v818_v14  ;;  %v821_v16 = vadd.f32 %v1199_v10, %v636_v5  ;;  %v634_v20 = vadd.f32 %v613_v15, %v449_v13  ;;  %838 = sbr.rel (%p1109_p11) target bundleno = 291 (0x123), region = 40 }
 0x111   : > { %834 = vst.msk [vmem:[#allocation2 + $0x58] sm:$0xff] %vm822_vm8, %v821_v16  ;;  %v819_v26 = vadd.f32 %v798_v21, %v634_v20 }
 0x113   : > { %832 = vst.msk [vmem:[#allocation2 + $0x48] sm:$0xff] %vm822_vm8, %v819_v26 }
 0x114   : > { %v1110_v12 = vld [vmem:[%s1662_s2] ss:$0 sm:$0xff]  ;;  %vm918_vm9 = vcmask 60416  }
 0x115   : > { %v846_v22 = vadd.f32 %v1110_v12, %v1588_v37  ;;  %v847_v23 = vadd.f32 %v1110_v12, %v811_v8  ;;  %v848_v24 = vadd.f32 %v1110_v12, %v1584_v29  ;;  %v849_v28 = vadd.f32 %v1110_v12, %v1592_v17 }
 0x116   : > { %v850_v4 = vadd.f32 %v1110_v12, %v814_v56  ;;  %v851_v31 = vadd.f32 %v1110_v12, %v815_v63  ;;  %v852_v18 = vadd.f32 %v1110_v12, %v816_v50  ;;  %v853_v32 = vadd.f32 %v1110_v12, %v817_v58 }
 0x117   : > { %v858_v33 = vmax.f32 %v846_v22, 0.0  ;;  %v859_v38 = vmax.f32 %v847_v23, 0.0  ;;  %v860_v39 = vmax.f32 %v848_v24, 0.0  ;;  %v861_v40 = vmax.f32 %v849_v28, 0.0 }
 0x118   : > { %v862_v43 = vmax.f32 %v850_v4, 0.0  ;;  %v863_v44 = vmax.f32 %v851_v31, 0.0  ;;  %v864_v37 = vmax.f32 %v852_v18, 0.0  ;;  %v865_v25 = vmax.f32 %v853_v32, 0.0 }
 0x119   : > { %v1125_v36 = vpack.c.bf16 %v858_v33, %v858_v33  ;;  %v1126_v29 = vpack.c.bf16 %v859_v38, %v859_v38  ;;  %v1127_v17 = vpack.c.bf16 %v860_v39, %v860_v39  ;;  %v1128_v45 = vpack.c.bf16 %v861_v40, %v861_v40 }
 0x11a   : > { %v1129_v46 = vpack.c.bf16 %v862_v43, %v862_v43  ;;  %v1130_v42 = vpack.c.bf16 %v863_v44, %v863_v44  ;;  %v1131_v8 = vpack.c.bf16 %v864_v37, %v864_v37  ;;  %v1132_v47 = vpack.c.bf16 %v865_v25, %v865_v25 }
 0x11b   : > { %919 = vst.msk [vmem:[%s1411_s27] sm:$0xf] %vm918_vm9, %v1125_v36  ;;  %920 = vst.msk [vmem:[%s1411_s27 + $0x4] sm:$0xf] %vm918_vm9, %v1126_v29  ;;  %v854_v7 = vadd.f32 %v1110_v12, %v818_v14  ;;  %v855_v49 = vadd.f32 %v1110_v12, %v819_v26  ;;  %v856_v19 = vadd.f32 %v1110_v12, %v820_v3 }
 0x11c   : > { %921 = vst.msk [vmem:[%s1411_s27 + $0x8] sm:$0xf] %vm918_vm9, %v1127_v17  ;;  %922 = vst.msk [vmem:[%s1411_s27 + $0xc] sm:$0xf] %vm918_vm9, %v1128_v45  ;;  %v857_v27 = vadd.f32 %v1110_v12, %v821_v16 }
 0x11d   : > { %923 = vst.msk [vmem:[%s1411_s27 + $0x10] sm:$0xf] %vm918_vm9, %v1129_v46  ;;  %924 = vst.msk [vmem:[%s1411_s27 + $0x14] sm:$0xf] %vm918_vm9, %v1130_v42  ;;  %v866_v50 = vmax.f32 %v854_v7, 0.0  ;;  %v867_v51 = vmax.f32 %v855_v49, 0.0 }
 0x11e   : > { %925 = vst.msk [vmem:[%s1411_s27 + $0x18] sm:$0xf] %vm918_vm9, %v1131_v8  ;;  %926 = vst.msk [vmem:[%s1411_s27 + $0x1c] sm:$0xf] %vm918_vm9, %v1132_v47  ;;  %v868_v52 = vmax.f32 %v856_v19, 0.0  ;;  %v869_v53 = vmax.f32 %v857_v27, 0.0 }
 0x11f   : > { %v1133_v54 = vpack.c.bf16 %v866_v50, %v866_v50  ;;  %v1134_v55 = vpack.c.bf16 %v867_v51, %v867_v51 }
 0x120   : > { %v1135_v56 = vpack.c.bf16 %v868_v52, %v868_v52  ;;  %v1136_v35 = vpack.c.bf16 %v869_v53, %v869_v53 }
 0x121   : > { %927 = vst.msk [vmem:[%s1411_s27 + $0x20] sm:$0xf] %vm918_vm9, %v1133_v54  ;;  %928 = vst.msk [vmem:[%s1411_s27 + $0x24] sm:$0xf] %vm918_vm9, %v1134_v55 }
 0x122   : > { %929 = vst.msk [vmem:[%s1411_s27 + $0x28] sm:$0xf] %vm918_vm9, %v1135_v56  ;;  %930 = vst.msk [vmem:[%s1411_s27 + $0x2c] sm:$0xf] %vm918_vm9, %v1136_v35 }
 0x123 PF: > { %s13_s18 = sadd.s32 1, %s1325_s18   ;;  %s1668_s12 = smov %s1313_s15 }
 0x124   : > { %p10_p12 = scmp.ge.s32.totalorder %s13_s18, 20   ;;  %s1669_s13 = smov %s1317_s16 }
 0x125   : > { %s1670_s14 = smov %s1321_s17  ;;  %s1671_s15 = smov %s1675_s19 }
 0x126   : > { %s1672_s16 = smov %s1679_s20  ;;  %s1673_s17 = smov %s1683_s21 }
 0x127   :  { %12 = sbr.rel (!%p10_p12) target bundleno = 4 (0x4), region = 75 }

// kernel: aspp_forward.13
= control target key start
LH: loop header
LB: loop body
LE: loop exit
PB: predicated region body
PF: predicated region fallthrough
CT: control target
= control target key end

     0   :  { %vm85_vm0 = vcmask 1041408   ;;  %v371_v0 = vmov 0.0   ;;  %vm372_vm1 = vmmov 0   ;;  %vm63_vm2 = vcmask 31744   ;;  %s500_s1 = inlined_call_operand.vmem [shape: bf16[1,4,8], index: 1, kind: input, shape index: {}]   ;;  %s501_s0 = inlined_call_operand.vmem [shape: bf16[98,4], index: 0, kind: input, shape index: {}]   ;;  %s502_s2 = inlined_call_operand.vmem [shape: f32[1,8], index: 2, kind: input, shape index: {}]   ;;  %s503_s3 = inlined_call_operand.vmem [shape: bf16[98,8], index: 3, kind: output, shape index: {}]  }
   0x1   :  { %330 = vmatprep.subr.bf16.mxu0 %v371_v0  ;;  %v29_v1 = vld [vmem:[%s500_s1] sm:$0x3]  ;;  %332 = vmatprep.mubr.msk.bf16.mxu0 %vm372_vm1, %v371_v0  ;;  %v366_v5 = vld [vmem:[%s501_s0 + $0x8] sm:$0xff]   ;;  %v368_v7 = vld [vmem:[%s501_s0 + $0x10] sm:$0xff]   ;;  %vm262_vm3 = vcmask 60416   ;;  %vm275_vm4 = vcmask 57344  }
   0x2   :  { %v87_v2 = vsel %vm85_vm0, %v29_v1, 0  ;;  %v364_v3 = vld [vmem:[%s501_s0] sm:$0xff]   ;;  %360 = vmatprep.subr.bf16.mxu1 %v371_v0  ;;  %348 = vmatprep.mubr.msk.bf16.mxu1 %vm372_vm1, %v371_v0  ;;  %v367_v6 = vld [vmem:[%s501_s0 + $0x28] sm:$0xff]   ;;  %v369_v8 = vld [vmem:[%s501_s0 + $0x30] ss:$0 sps:$4 sm:$0x11]  }
   0x3   :  { %331 = vmatpush3.bf16.msra.mxu0 %v87_v2  ;;  %361 = vmatpush3.bf16.msra.mxu1 %v87_v2  ;;  %v365_v4 = vld [vmem:[%s501_s0 + $0x20] sm:$0xff]   ;;  %v370_v9 = vld [vmem:[%s501_s0 + $0x18] sm:$0xff]  }
   0x4   :  { %v434_v10 = vld [vmem:[%s502_s2] ss:$0 sm:$0xff] }
   0x6   :  { %333 = vmatmul.mubr.msk.bf16.vlgmr.msra.gmra.mxu0 %vm63_vm2, %v364_v3  ;;  %349 = vmatmul.mubr.msk.bf16.vlgmr.msra.gmra.mxu1 %vm63_vm2, %v365_v4 }
   0x7   :  { %336 = vmatprep.mubr.msk.bf16.mxu0 %vm372_vm1, %v371_v0  ;;  %352 = vmatprep.mubr.msk.bf16.mxu1 %vm372_vm1, %v371_v0 }
   0xe   :  { %337 = vmatmul.mubr.msk.bf16.gmra.mxu0 %vm63_vm2, %v366_v5  ;;  %353 = vmatmul.mubr.msk.bf16.gmra.mxu1 %vm63_vm2, %v367_v6 }
   0xf   :  { %340 = vmatprep.mubr.msk.bf16.mxu0 %vm372_vm1, %v371_v0  ;;  %356 = vmatprep.mubr.msk.bf16.mxu1 %vm372_vm1, %v371_v0 }
  0x16   :  { %341 = vmatmul.mubr.msk.bf16.gmra.mxu0 %vm63_vm2, %v368_v7  ;;  %357 = vmatmul.mubr.msk.bf16.gmra.mxu1 %vm63_vm2, %v369_v8 }
  0x17   :  { %344 = vmatprep.mubr.msk.bf16.mxu0 %vm372_vm1, %v371_v0 }
  0x1e   :  { %345 = vmatmul.mubr.msk.bf16.gmra.mxu0 %vm63_vm2, %v370_v9 }
  0xc6   :  { %v123_v11 = vpop.f32.mrf.mxu0  ;;  %v155_v12 = vpop.f32.mrf.mxu1 }
  0xc7   :  { %v183_v13 = vadd.f32 %v434_v10, %v123_v11  ;;  %v191_v14 = vadd.f32 %v434_v10, %v155_v12 }
  0xc8   :  { %v334_v15 = vpop.f32.mrf.mxu0  ;;  %v350_v16 = vpop.f32.mrf.mxu1 }
  0xc9   :  { %v196_v17 = vmax.f32 %v183_v13, 0.0  ;;  %v204_v18 = vmax.f32 %v191_v14, 0.0 }
  0xca   :  { %v126_v19 = vpop.f32.mrf.mxu0  ;;  %v158_v20 = vpop.f32.mrf.mxu1 }
  0xcb   :  { %v309_v21 = vpack.c.bf16 %v196_v17, %v196_v17  ;;  %v184_v22 = vadd.f32 %v434_v10, %v126_v19  ;;  %v317_v23 = vpack.c.bf16 %v204_v18, %v204_v18  ;;  %v192_v24 = vadd.f32 %v434_v10, %v158_v20 }
  0xcc   :  { %v335_v25 = vpop.f32.mrf.mxu0  ;;  %v351_v26 = vpop.f32.mrf.mxu1 }
  0xcd   :  { %263 = vst.msk [vmem:[%s503_s3] sm:$0xf] %vm262_vm3, %v309_v21  ;;  %v197_v27 = vmax.f32 %v184_v22, 0.0  ;;  %271 = vst.msk [vmem:[%s503_s3 + $0x20] sm:$0xf] %vm262_vm3, %v317_v23  ;;  %v205_v28 = vmax.f32 %v192_v24, 0.0 }
  0xce   :  { %v131_v29 = vpop.f32.mrf.mxu0  ;;  %v163_v30 = vpop.f32.mrf.mxu1 }
  0xcf   :  { %v310_v31 = vpack.c.bf16 %v197_v27, %v197_v27  ;;  %v185_v32 = vadd.f32 %v434_v10, %v131_v29  ;;  %v318_v33 = vpack.c.bf16 %v205_v28, %v205_v28  ;;  %v193_v34 = vadd.f32 %v434_v10, %v163_v30 }
  0xd0   :  { %v338_v35 = vpop.f32.mrf.mxu0  ;;  %v354_v36 = vpop.f32.mrf.mxu1 }
  0xd1   :  { %264 = vst.msk [vmem:[%s503_s3 + $0x4] sm:$0xf] %vm262_vm3, %v310_v31  ;;  %v198_v37 = vmax.f32 %v185_v32, 0.0  ;;  %272 = vst.msk [vmem:[%s503_s3 + $0x24] sm:$0xf] %vm262_vm3, %v318_v33  ;;  %v206_v38 = vmax.f32 %v193_v34, 0.0 }
  0xd2   :  { %v134_v39 = vpop.f32.mrf.mxu0  ;;  %v166_v40 = vpop.f32.mrf.mxu1 }
  0xd3   :  { %v311_v41 = vpack.c.bf16 %v198_v37, %v198_v37  ;;  %v186_v42 = vadd.f32 %v434_v10, %v134_v39  ;;  %v319_v43 = vpack.c.bf16 %v206_v38, %v206_v38  ;;  %v194_v44 = vadd.f32 %v434_v10, %v166_v40 }
  0xd4   :  { %v339_v45 = vpop.f32.mrf.mxu0  ;;  %v355_v46 = vpop.f32.mrf.mxu1 }
  0xd5   :  { %265 = vst.msk [vmem:[%s503_s3 + $0x8] sm:$0xf] %vm262_vm3, %v311_v41  ;;  %v199_v47 = vmax.f32 %v186_v42, 0.0  ;;  %273 = vst.msk [vmem:[%s503_s3 + $0x28] sm:$0xf] %vm262_vm3, %v319_v43  ;;  %v207_v48 = vmax.f32 %v194_v44, 0.0 }
  0xd6   :  { %v139_v49 = vpop.f32.mrf.mxu0  ;;  %v171_v50 = vpop.f32.mrf.mxu1 }
  0xd7   :  { %v312_v51 = vpack.c.bf16 %v199_v47, %v199_v47  ;;  %v187_v52 = vadd.f32 %v434_v10, %v139_v49  ;;  %v320_v53 = vpack.c.bf16 %v207_v48, %v207_v48  ;;  %v195_v54 = vadd.f32 %v434_v10, %v171_v50 }
  0xd8   :  { %v342_v55 = vpop.f32.mrf.mxu0  ;;  %v358_v56 = vpop.f32.mrf.mxu1 }
  0xd9   :  { %266 = vst.msk [vmem:[%s503_s3 + $0xc] sm:$0xf] %vm262_vm3, %v312_v51  ;;  %v200_v57 = vmax.f32 %v187_v52, 0.0  ;;  %274 = vst.msk [vmem:[%s503_s3 + $0x2c] sm:$0xf] %vm262_vm3, %v320_v53  ;;  %v208_v58 = vmax.f32 %v195_v54, 0.0 }
  0xda   :  { %v142_v59 = vpop.f32.mrf.mxu0  ;;  %v174_v60 = vpop.f32.mrf.mxu1 }
  0xdb   :  { %v313_v61 = vpack.c.bf16 %v200_v57, %v200_v57  ;;  %v188_v62 = vadd.f32 %v434_v10, %v142_v59  ;;  %v321_v63 = vpack.c.bf16 %v208_v58, %v208_v58 }
  0xdc   :  { %v343_v0 = vpop.f32.mrf.mxu0  ;;  %v359_v1 = vpop.f32.mrf.mxu1 }
  0xdd   :  { %267 = vst.msk [vmem:[%s503_s3 + $0x10] sm:$0xf] %vm262_vm3, %v313_v61  ;;  %v201_v2 = vmax.f32 %v188_v62, 0.0 }
  0xde   :  { %276 = vst.msk [vmem:[%s503_s3 + $0x30] sm:$0x1] %vm275_vm4, %v321_v63  ;;  %v147_v3 = vpop.f32.mrf.mxu0 }
  0xdf   :  { %v314_v4 = vpack.c.bf16 %v201_v2, %v201_v2  ;;  %v189_v5 = vadd.f32 %v434_v10, %v147_v3 }
  0xe0   :  { %v346_v6 = vpop.f32.mrf.mxu0 }
  0xe1   :  { %268 = vst.msk [vmem:[%s503_s3 + $0x14] sm:$0xf] %vm262_vm3, %v314_v4  ;;  %v202_v7 = vmax.f32 %v189_v5, 0.0 }
  0xe2   :  { %v150_v8 = vpop.f32.mrf.mxu0 }
  0xe3   :  { %v315_v9 = vpack.c.bf16 %v202_v7, %v202_v7  ;;  %v190_v11 = vadd.f32 %v434_v10, %v150_v8 }
  0xe4   :  { %v347_v12 = vpop.f32.mrf.mxu0 }
  0xe5   :  { %269 = vst.msk [vmem:[%s503_s3 + $0x18] sm:$0xf] %vm262_vm3, %v315_v9  ;;  %v203_v13 = vmax.f32 %v190_v11, 0.0 }
  0xe7   :  { %v316_v14 = vpack.c.bf16 %v203_v13, %v203_v13 }
  0xe9   :  { %270 = vst.msk [vmem:[%s503_s3 + $0x1c] sm:$0xf] %vm262_vm3, %v316_v14 }

// kernel: aspp_forward.9
= control target key start
LH: loop header
LB: loop body
LE: loop exit
PB: predicated region body
PF: predicated region fallthrough
CT: control target
= control target key end

     0   :  { %vm338_vm0 = vcmask 1041408   ;;  %vm241_vm1 = vcmask 31744   ;;  %vm1021_vm2 = vcmask 60416   ;;  %s1894_s1 = inlined_call_operand.vmem [shape: bf16[1,4,8], index: 1, kind: input, shape index: {}]   ;;  %s1895_s0 = inlined_call_operand.vmem [shape: bf16[512,4], index: 0, kind: input, shape index: {}]   ;;  %s1896_s2 = inlined_call_operand.vmem [shape: f32[1,8], index: 2, kind: input, shape index: {}]   ;;  %s1897_s3 = inlined_call_operand.vmem [shape: bf16[512,8], index: 3, kind: output, shape index: {}]  }
   0x1   :  { %v80_v0 = vld [vmem:[%s1894_s1] sm:$0x3]  ;;  %v1388_v4 = vld [vmem:[%s1895_s0 + $0x8] sm:$0xff]   ;;  %v1390_v6 = vld [vmem:[%s1895_s0 + $0x10] sm:$0xff]  }
   0x2   :  { %1384 = vmatprep.subr.msk.bf16.mxu0 %vm338_vm0, %v80_v0  ;;  %1385 = vmatprep.subr.msk.bf16.mxu1 %vm338_vm0, %v80_v0  ;;  %v340_v1 = vsel %vm338_vm0, %v80_v0, 0  ;;  %v1386_v2 = vld [vmem:[%s1895_s0] sm:$0xff]   ;;  %v1389_v5 = vld [vmem:[%s1895_s0 + $0x88] sm:$0xff]   ;;  %v1391_v7 = vld [vmem:[%s1895_s0 + $0x90] sm:$0xff]  }
   0x3   :  { %1317 = vmatpush3.bf16.msra.mxu0 %v340_v1  ;;  %1383 = vmatpush3.bf16.msra.mxu1 %v340_v1  ;;  %v1387_v3 = vld [vmem:[%s1895_s0 + $0x80] sm:$0xff]   ;;  %v1392_v8 = vld [vmem:[%s1895_s0 + $0x18] sm:$0xff]   ;;  %v1396_v12 = vld [vmem:[%s1895_s0 + $0x28] sm:$0xff]  }
   0x4   :  { %1318 = vmatprep.mubr.msk.bf16.mxu0 %vm241_vm1, %v1386_v2  ;;  %1350 = vmatprep.mubr.msk.bf16.mxu1 %vm241_vm1, %v1387_v3  ;;  %v1393_v9 = vld [vmem:[%s1895_s0 + $0x98] sm:$0xff]   ;;  %v1394_v10 = vld [vmem:[%s1895_s0 + $0x20] sm:$0xff]   ;;  %v1397_v13 = vld [vmem:[%s1895_s0 + $0xa8] sm:$0xff]  }
   0x5   :  { %v1395_v11 = vld [vmem:[%s1895_s0 + $0xa0] sm:$0xff]   ;;  %v1398_v14 = vld [vmem:[%s1895_s0 + $0x30] sm:$0xff]   ;;  %v1400_v16 = vld [vmem:[%s1895_s0 + $0x38] sm:$0xff]  }
   0x6   :  { %1319 = vmatmul.mubr.msk.bf16.vlgmr.msra.gmra.mxu0 %vm241_vm1, %v1388_v4  ;;  %1351 = vmatmul.mubr.msk.bf16.vlgmr.msra.gmra.mxu1 %vm241_vm1, %v1389_v5  ;;  %v1399_v15 = vld [vmem:[%s1895_s0 + $0xb0] sm:$0xff]   ;;  %v1401_v17 = vld [vmem:[%s1895_s0 + $0xb8] sm:$0xff]   ;;  %v1402_v18 = vld [vmem:[%s1895_s0 + $0x40] sm:$0xff]  }
   0x7   :  { %1322 = vmatprep.mubr.msk.bf16.mxu0 %vm241_vm1, %v1390_v6  ;;  %1354 = vmatprep.mubr.msk.bf16.mxu1 %vm241_vm1, %v1391_v7  ;;  %v1403_v19 = vld [vmem:[%s1895_s0 + $0xc0] sm:$0xff]   ;;  %v1404_v20 = vld [vmem:[%s1895_s0 + $0x48] sm:$0xff]   ;;  %v1406_v22 = vld [vmem:[%s1895_s0 + $0x50] sm:$0xff]  }
   0x8   :  { %v1405_v21 = vld [vmem:[%s1895_s0 + $0xc8] sm:$0xff]   ;;  %v1407_v23 = vld [vmem:[%s1895_s0 + $0xd0] sm:$0xff]   ;;  %v1408_v24 = vld [vmem:[%s1895_s0 + $0x58] sm:$0xff]  }
   0x9   :  { %v1409_v25 = vld [vmem:[%s1895_s0 + $0xd8] sm:$0xff]   ;;  %v1410_v26 = vld [vmem:[%s1895_s0 + $0x60] sm:$0xff]   ;;  %v1412_v28 = vld [vmem:[%s1895_s0 + $0x68] sm:$0xff]  }
   0xa   :  { %v1411_v27 = vld [vmem:[%s1895_s0 + $0xe0] sm:$0xff]   ;;  %v1413_v29 = vld [vmem:[%s1895_s0 + $0xe8] sm:$0xff]   ;;  %v1414_v30 = vld [vmem:[%s1895_s0 + $0x70] sm:$0xff]  }
   0xb   :  { %v1415_v31 = vld [vmem:[%s1895_s0 + $0xf0] sm:$0xff]   ;;  %v1416_v32 = vld [vmem:[%s1895_s0 + $0x78] sm:$0xff]   ;;  %v1572_v34 = vld [vmem:[%s1896_s2] ss:$0 sm:$0xff] }
   0xc   :  { %v1417_v33 = vld [vmem:[%s1895_s0 + $0xf8] sm:$0xff]  }
   0xe   :  { %1323 = vmatmul.mubr.msk.bf16.gmra.mxu0 %vm241_vm1, %v1392_v8  ;;  %1355 = vmatmul.mubr.msk.bf16.gmra.mxu1 %vm241_vm1, %v1393_v9 }
   0xf   :  { %1326 = vmatprep.mubr.msk.bf16.mxu0 %vm241_vm1, %v1394_v10  ;;  %1358 = vmatprep.mubr.msk.bf16.mxu1 %vm241_vm1, %v1395_v11 }
  0x16   :  { %1327 = vmatmul.mubr.msk.bf16.gmra.mxu0 %vm241_vm1, %v1396_v12  ;;  %1359 = vmatmul.mubr.msk.bf16.gmra.mxu1 %vm241_vm1, %v1397_v13 }
  0x17   :  { %1330 = vmatprep.mubr.msk.bf16.mxu0 %vm241_vm1, %v1398_v14  ;;  %1362 = vmatprep.mubr.msk.bf16.mxu1 %vm241_vm1, %v1399_v15 }
  0x1e   :  { %1331 = vmatmul.mubr.msk.bf16.gmra.mxu0 %vm241_vm1, %v1400_v16  ;;  %1363 = vmatmul.mubr.msk.bf16.gmra.mxu1 %vm241_vm1, %v1401_v17 }
  0x1f   :  { %1334 = vmatprep.mubr.msk.bf16.mxu0 %vm241_vm1, %v1402_v18  ;;  %1366 = vmatprep.mubr.msk.bf16.mxu1 %vm241_vm1, %v1403_v19 }
  0x26   :  { %1335 = vmatmul.mubr.msk.bf16.gmra.mxu0 %vm241_vm1, %v1404_v20  ;;  %1367 = vmatmul.mubr.msk.bf16.gmra.mxu1 %vm241_vm1, %v1405_v21 }
  0x27   :  { %1338 = vmatprep.mubr.msk.bf16.mxu0 %vm241_vm1, %v1406_v22  ;;  %1370 = vmatprep.mubr.msk.bf16.mxu1 %vm241_vm1, %v1407_v23 }
  0x2e   :  { %1339 = vmatmul.mubr.msk.bf16.gmra.mxu0 %vm241_vm1, %v1408_v24  ;;  %1371 = vmatmul.mubr.msk.bf16.gmra.mxu1 %vm241_vm1, %v1409_v25 }
  0x2f   :  { %1342 = vmatprep.mubr.msk.bf16.mxu0 %vm241_vm1, %v1410_v26  ;;  %1374 = vmatprep.mubr.msk.bf16.mxu1 %vm241_vm1, %v1411_v27 }
  0x36   :  { %1343 = vmatmul.mubr.msk.bf16.gmra.mxu0 %vm241_vm1, %v1412_v28  ;;  %1375 = vmatmul.mubr.msk.bf16.gmra.mxu1 %vm241_vm1, %v1413_v29 }
  0x37   :  { %1346 = vmatprep.mubr.msk.bf16.mxu0 %vm241_vm1, %v1414_v30  ;;  %1378 = vmatprep.mubr.msk.bf16.mxu1 %vm241_vm1, %v1415_v31 }
  0x3e   :  { %1347 = vmatmul.mubr.msk.bf16.gmra.mxu0 %vm241_vm1, %v1416_v32  ;;  %1379 = vmatmul.mubr.msk.bf16.gmra.mxu1 %vm241_vm1, %v1417_v33 }
  0xc6   :  { %v1320_v35 = vpop.f32.mrf.mxu0  ;;  %v1352_v37 = vpop.f32.mrf.mxu1 }
  0xc7   :  { %v639_v36 = vadd.f32 %v1320_v35, %v1572_v34  ;;  %v671_v38 = vadd.f32 %v1352_v37, %v1572_v34 }
  0xc8   :  { %v376_v39 = vpop.f32.mrf.mxu0  ;;  %v504_v42 = vpop.f32.mrf.mxu1 }
  0xc9   :  { %v703_v40 = vmax.f32 %v639_v36, 0.0  ;;  %v637_v41 = vadd.f32 %v1572_v34, %v376_v39  ;;  %v735_v43 = vmax.f32 %v671_v38, 0.0  ;;  %v669_v44 = vadd.f32 %v1572_v34, %v504_v42 }
  0xca   :  { %v1321_v45 = vpop.f32.mrf.mxu0  ;;  %v1353_v49 = vpop.f32.mrf.mxu1 }
  0xcb   :  { %v1221_v46 = vpack.c.bf16 %v703_v40, %v703_v40  ;;  %v701_v47 = vmax.f32 %v637_v41, 0.0  ;;  %v640_v48 = vadd.f32 %v1321_v45, %v1572_v34  ;;  %v1253_v50 = vpack.c.bf16 %v735_v43, %v735_v43 }
  0xcc   :  { %v733_v51 = vmax.f32 %v669_v44, 0.0  ;;  %v672_v52 = vadd.f32 %v1353_v49, %v1572_v34  ;;  %v379_v53 = vpop.f32.mrf.mxu0  ;;  %v507_v57 = vpop.f32.mrf.mxu1 }
  0xcd   :  { %1024 = vst.msk [vmem:[%s1897_s3 + $0x8] sm:$0xf] %vm1021_vm2, %v1221_v46  ;;  %v1219_v54 = vpack.c.bf16 %v701_v47, %v701_v47  ;;  %v704_v55 = vmax.f32 %v640_v48, 0.0  ;;  %v638_v56 = vadd.f32 %v1572_v34, %v379_v53  ;;  %1056 = vst.msk [vmem:[%s1897_s3 + $0x88] sm:$0xf] %vm1021_vm2, %v1253_v50  ;;  %v670_v60 = vadd.f32 %v1572_v34, %v507_v57 }
  0xce   :  { %v1251_v58 = vpack.c.bf16 %v733_v51, %v733_v51  ;;  %v736_v59 = vmax.f32 %v672_v52, 0.0  ;;  %v1324_v61 = vpop.f32.mrf.mxu0  ;;  %v1356_v1 = vpop.f32.mrf.mxu1 }
  0xcf   :  { %1022 = vst.msk [vmem:[%s1897_s3] sm:$0xf] %vm1021_vm2, %v1219_v54  ;;  %v1222_v62 = vpack.c.bf16 %v704_v55, %v704_v55  ;;  %v702_v63 = vmax.f32 %v638_v56, 0.0  ;;  %v643_v0 = vadd.f32 %v1324_v61, %v1572_v34  ;;  %v734_v3 = vmax.f32 %v670_v60, 0.0 }
  0xd0   :  { %1054 = vst.msk [vmem:[%s1897_s3 + $0x80] sm:$0xf] %vm1021_vm2, %v1251_v58  ;;  %v1254_v2 = vpack.c.bf16 %v736_v59, %v736_v59  ;;  %v675_v4 = vadd.f32 %v1356_v1, %v1572_v34  ;;  %v392_v5 = vpop.f32.mrf.mxu0  ;;  %v520_v9 = vpop.f32.mrf.mxu1 }
  0xd1   :  { %1025 = vst.msk [vmem:[%s1897_s3 + $0xc] sm:$0xf] %vm1021_vm2, %v1222_v62  ;;  %v1220_v6 = vpack.c.bf16 %v702_v63, %v702_v63  ;;  %v707_v7 = vmax.f32 %v643_v0, 0.0  ;;  %v641_v8 = vadd.f32 %v1572_v34, %v392_v5  ;;  %v1252_v10 = vpack.c.bf16 %v734_v3, %v734_v3 }
  0xd2   :  { %1057 = vst.msk [vmem:[%s1897_s3 + $0x8c] sm:$0xf] %vm1021_vm2, %v1254_v2  ;;  %v739_v11 = vmax.f32 %v675_v4, 0.0  ;;  %v673_v12 = vadd.f32 %v1572_v34, %v520_v9  ;;  %v1325_v13 = vpop.f32.mrf.mxu0  ;;  %v1357_v17 = vpop.f32.mrf.mxu1 }
  0xd3   :  { %1023 = vst.msk [vmem:[%s1897_s3 + $0x4] sm:$0xf] %vm1021_vm2, %v1220_v6  ;;  %v1225_v14 = vpack.c.bf16 %v707_v7, %v707_v7  ;;  %v705_v15 = vmax.f32 %v641_v8, 0.0  ;;  %v644_v16 = vadd.f32 %v1325_v13, %v1572_v34  ;;  %1055 = vst.msk [vmem:[%s1897_s3 + $0x84] sm:$0xf] %vm1021_vm2, %v1252_v10  ;;  %v676_v20 = vadd.f32 %v1357_v17, %v1572_v34 }
  0xd4   :  { %v1257_v18 = vpack.c.bf16 %v739_v11, %v739_v11  ;;  %v737_v19 = vmax.f32 %v673_v12, 0.0  ;;  %v395_v21 = vpop.f32.mrf.mxu0  ;;  %v523_v25 = vpop.f32.mrf.mxu1 }
  0xd5   :  { %1028 = vst.msk [vmem:[%s1897_s3 + $0x18] sm:$0xf] %vm1021_vm2, %v1225_v14  ;;  %v1223_v22 = vpack.c.bf16 %v705_v15, %v705_v15  ;;  %v708_v23 = vmax.f32 %v644_v16, 0.0  ;;  %v642_v24 = vadd.f32 %v1572_v34, %v395_v21  ;;  %v740_v27 = vmax.f32 %v676_v20, 0.0 }
  0xd6   :  { %1060 = vst.msk [vmem:[%s1897_s3 + $0x98] sm:$0xf] %vm1021_vm2, %v1257_v18  ;;  %v1255_v26 = vpack.c.bf16 %v737_v19, %v737_v19  ;;  %v674_v28 = vadd.f32 %v1572_v34, %v523_v25  ;;  %v1328_v29 = vpop.f32.mrf.mxu0  ;;  %v1360_v33 = vpop.f32.mrf.mxu1 }
  0xd7   :  { %1026 = vst.msk [vmem:[%s1897_s3 + $0x10] sm:$0xf] %vm1021_vm2, %v1223_v22  ;;  %v1226_v30 = vpack.c.bf16 %v708_v23, %v708_v23  ;;  %v706_v31 = vmax.f32 %v642_v24, 0.0  ;;  %v647_v32 = vadd.f32 %v1328_v29, %v1572_v34  ;;  %v1258_v35 = vpack.c.bf16 %v740_v27, %v740_v27 }
  0xd8   :  { %1058 = vst.msk [vmem:[%s1897_s3 + $0x90] sm:$0xf] %vm1021_vm2, %v1255_v26  ;;  %v738_v36 = vmax.f32 %v674_v28, 0.0  ;;  %v679_v37 = vadd.f32 %v1360_v33, %v1572_v34  ;;  %v408_v38 = vpop.f32.mrf.mxu0  ;;  %v536_v42 = vpop.f32.mrf.mxu1 }
  0xd9   :  { %1029 = vst.msk [vmem:[%s1897_s3 + $0x1c] sm:$0xf] %vm1021_vm2, %v1226_v30  ;;  %v1224_v39 = vpack.c.bf16 %v706_v31, %v706_v31  ;;  %v711_v40 = vmax.f32 %v647_v32, 0.0  ;;  %v645_v41 = vadd.f32 %v1572_v34, %v408_v38  ;;  %1061 = vst.msk [vmem:[%s1897_s3 + $0x9c] sm:$0xf] %vm1021_vm2, %v1258_v35  ;;  %v677_v45 = vadd.f32 %v1572_v34, %v536_v42 }
  0xda   :  { %v1256_v43 = vpack.c.bf16 %v738_v36, %v738_v36  ;;  %v743_v44 = vmax.f32 %v679_v37, 0.0  ;;  %v1329_v46 = vpop.f32.mrf.mxu0  ;;  %v1361_v50 = vpop.f32.mrf.mxu1 }
  0xdb   :  { %1027 = vst.msk [vmem:[%s1897_s3 + $0x14] sm:$0xf] %vm1021_vm2, %v1224_v39  ;;  %v1229_v47 = vpack.c.bf16 %v711_v40, %v711_v40  ;;  %v709_v48 = vmax.f32 %v645_v41, 0.0  ;;  %v648_v49 = vadd.f32 %v1329_v46, %v1572_v34  ;;  %v741_v52 = vmax.f32 %v677_v45, 0.0 }
  0xdc   :  { %1059 = vst.msk [vmem:[%s1897_s3 + $0x94] sm:$0xf] %vm1021_vm2, %v1256_v43  ;;  %v1261_v51 = vpack.c.bf16 %v743_v44, %v743_v44  ;;  %v680_v53 = vadd.f32 %v1361_v50, %v1572_v34  ;;  %v411_v54 = vpop.f32.mrf.mxu0  ;;  %v539_v58 = vpop.f32.mrf.mxu1 }
  0xdd   :  { %1032 = vst.msk [vmem:[%s1897_s3 + $0x28] sm:$0xf] %vm1021_vm2, %v1229_v47  ;;  %v1227_v55 = vpack.c.bf16 %v709_v48, %v709_v48  ;;  %v712_v56 = vmax.f32 %v648_v49, 0.0  ;;  %v646_v57 = vadd.f32 %v1572_v34, %v411_v54  ;;  %v1259_v59 = vpack.c.bf16 %v741_v52, %v741_v52 }
  0xde   :  { %1064 = vst.msk [vmem:[%s1897_s3 + $0xa8] sm:$0xf] %vm1021_vm2, %v1261_v51  ;;  %v744_v60 = vmax.f32 %v680_v53, 0.0  ;;  %v678_v61 = vadd.f32 %v1572_v34, %v539_v58  ;;  %v1332_v62 = vpop.f32.mrf.mxu0  ;;  %v1364_v2 = vpop.f32.mrf.mxu1 }
  0xdf   :  { %1030 = vst.msk [vmem:[%s1897_s3 + $0x20] sm:$0xf] %vm1021_vm2, %v1227_v55  ;;  %v1230_v63 = vpack.c.bf16 %v712_v56, %v712_v56  ;;  %v710_v0 = vmax.f32 %v646_v57, 0.0  ;;  %v651_v1 = vadd.f32 %v1332_v62, %v1572_v34  ;;  %1062 = vst.msk [vmem:[%s1897_s3 + $0xa0] sm:$0xf] %vm1021_vm2, %v1259_v59  ;;  %v683_v5 = vadd.f32 %v1364_v2, %v1572_v34 }
  0xe0   :  { %v1262_v3 = vpack.c.bf16 %v744_v60, %v744_v60  ;;  %v742_v4 = vmax.f32 %v678_v61, 0.0  ;;  %v424_v6 = vpop.f32.mrf.mxu0  ;;  %v552_v10 = vpop.f32.mrf.mxu1 }
  0xe1   :  { %1033 = vst.msk [vmem:[%s1897_s3 + $0x2c] sm:$0xf] %vm1021_vm2, %v1230_v63  ;;  %v1228_v7 = vpack.c.bf16 %v710_v0, %v710_v0  ;;  %v715_v8 = vmax.f32 %v651_v1, 0.0  ;;  %v649_v9 = vadd.f32 %v1572_v34, %v424_v6  ;;  %v747_v12 = vmax.f32 %v683_v5, 0.0 }
  0xe2   :  { %1065 = vst.msk [vmem:[%s1897_s3 + $0xac] sm:$0xf] %vm1021_vm2, %v1262_v3  ;;  %v1260_v11 = vpack.c.bf16 %v742_v4, %v742_v4  ;;  %v681_v13 = vadd.f32 %v1572_v34, %v552_v10  ;;  %v1333_v14 = vpop.f32.mrf.mxu0  ;;  %v1365_v18 = vpop.f32.mrf.mxu1 }
  0xe3   :  { %1031 = vst.msk [vmem:[%s1897_s3 + $0x24] sm:$0xf] %vm1021_vm2, %v1228_v7  ;;  %v1233_v15 = vpack.c.bf16 %v715_v8, %v715_v8  ;;  %v713_v16 = vmax.f32 %v649_v9, 0.0  ;;  %v652_v17 = vadd.f32 %v1333_v14, %v1572_v34  ;;  %v1265_v19 = vpack.c.bf16 %v747_v12, %v747_v12 }
  0xe4   :  { %1063 = vst.msk [vmem:[%s1897_s3 + $0xa4] sm:$0xf] %vm1021_vm2, %v1260_v11  ;;  %v745_v20 = vmax.f32 %v681_v13, 0.0  ;;  %v684_v21 = vadd.f32 %v1365_v18, %v1572_v34  ;;  %v427_v22 = vpop.f32.mrf.mxu0  ;;  %v555_v26 = vpop.f32.mrf.mxu1 }
  0xe5   :  { %1036 = vst.msk [vmem:[%s1897_s3 + $0x38] sm:$0xf] %vm1021_vm2, %v1233_v15  ;;  %v1231_v23 = vpack.c.bf16 %v713_v16, %v713_v16  ;;  %v716_v24 = vmax.f32 %v652_v17, 0.0  ;;  %v650_v25 = vadd.f32 %v1572_v34, %v427_v22  ;;  %1068 = vst.msk [vmem:[%s1897_s3 + $0xb8] sm:$0xf] %vm1021_vm2, %v1265_v19  ;;  %v682_v29 = vadd.f32 %v1572_v34, %v555_v26 }
  0xe6   :  { %v1263_v27 = vpack.c.bf16 %v745_v20, %v745_v20  ;;  %v748_v28 = vmax.f32 %v684_v21, 0.0  ;;  %v1336_v30 = vpop.f32.mrf.mxu0  ;;  %v1368_v35 = vpop.f32.mrf.mxu1 }
  0xe7   :  { %1034 = vst.msk [vmem:[%s1897_s3 + $0x30] sm:$0xf] %vm1021_vm2, %v1231_v23  ;;  %v1234_v31 = vpack.c.bf16 %v716_v24, %v716_v24  ;;  %v714_v32 = vmax.f32 %v650_v25, 0.0  ;;  %v655_v33 = vadd.f32 %v1336_v30, %v1572_v34  ;;  %v746_v37 = vmax.f32 %v682_v29, 0.0 }
  0xe8   :  { %1066 = vst.msk [vmem:[%s1897_s3 + $0xb0] sm:$0xf] %vm1021_vm2, %v1263_v27  ;;  %v1266_v36 = vpack.c.bf16 %v748_v28, %v748_v28  ;;  %v687_v38 = vadd.f32 %v1368_v35, %v1572_v34  ;;  %v440_v39 = vpop.f32.mrf.mxu0  ;;  %v568_v43 = vpop.f32.mrf.mxu1 }
  0xe9   :  { %1037 = vst.msk [vmem:[%s1897_s3 + $0x3c] sm:$0xf] %vm1021_vm2, %v1234_v31  ;;  %v1232_v40 = vpack.c.bf16 %v714_v32, %v714_v32  ;;  %v719_v41 = vmax.f32 %v655_v33, 0.0  ;;  %v653_v42 = vadd.f32 %v1572_v34, %v440_v39  ;;  %v1264_v44 = vpack.c.bf16 %v746_v37, %v746_v37 }
  0xea   :  { %1069 = vst.msk [vmem:[%s1897_s3 + $0xbc] sm:$0xf] %vm1021_vm2, %v1266_v36  ;;  %v751_v45 = vmax.f32 %v687_v38, 0.0  ;;  %v685_v46 = vadd.f32 %v1572_v34, %v568_v43  ;;  %v1337_v47 = vpop.f32.mrf.mxu0  ;;  %v1369_v51 = vpop.f32.mrf.mxu1 }
  0xeb   :  { %1035 = vst.msk [vmem:[%s1897_s3 + $0x34] sm:$0xf] %vm1021_vm2, %v1232_v40  ;;  %v1237_v48 = vpack.c.bf16 %v719_v41, %v719_v41  ;;  %v717_v49 = vmax.f32 %v653_v42, 0.0  ;;  %v656_v50 = vadd.f32 %v1337_v47, %v1572_v34  ;;  %1067 = vst.msk [vmem:[%s1897_s3 + $0xb4] sm:$0xf] %vm1021_vm2, %v1264_v44  ;;  %v688_v54 = vadd.f32 %v1369_v51, %v1572_v34 }
  0xec   :  { %v1269_v52 = vpack.c.bf16 %v751_v45, %v751_v45  ;;  %v749_v53 = vmax.f32 %v685_v46, 0.0  ;;  %v443_v55 = vpop.f32.mrf.mxu0  ;;  %v571_v59 = vpop.f32.mrf.mxu1 }
  0xed   :  { %1040 = vst.msk [vmem:[%s1897_s3 + $0x48] sm:$0xf] %vm1021_vm2, %v1237_v48  ;;  %v1235_v56 = vpack.c.bf16 %v717_v49, %v717_v49  ;;  %v720_v57 = vmax.f32 %v656_v50, 0.0  ;;  %v654_v58 = vadd.f32 %v1572_v34, %v443_v55  ;;  %v752_v61 = vmax.f32 %v688_v54, 0.0 }
  0xee   :  { %1072 = vst.msk [vmem:[%s1897_s3 + $0xc8] sm:$0xf] %vm1021_vm2, %v1269_v52  ;;  %v1267_v60 = vpack.c.bf16 %v749_v53, %v749_v53  ;;  %v686_v62 = vadd.f32 %v1572_v34, %v571_v59  ;;  %v1340_v63 = vpop.f32.mrf.mxu0  ;;  %v1372_v3 = vpop.f32.mrf.mxu1 }
  0xef   :  { %1038 = vst.msk [vmem:[%s1897_s3 + $0x40] sm:$0xf] %vm1021_vm2, %v1235_v56  ;;  %v1238_v0 = vpack.c.bf16 %v720_v57, %v720_v57  ;;  %v718_v1 = vmax.f32 %v654_v58, 0.0  ;;  %v659_v2 = vadd.f32 %v1340_v63, %v1572_v34  ;;  %v1270_v4 = vpack.c.bf16 %v752_v61, %v752_v61 }
  0xf0   :  { %1070 = vst.msk [vmem:[%s1897_s3 + $0xc0] sm:$0xf] %vm1021_vm2, %v1267_v60  ;;  %v750_v5 = vmax.f32 %v686_v62, 0.0  ;;  %v691_v6 = vadd.f32 %v1372_v3, %v1572_v34  ;;  %v456_v7 = vpop.f32.mrf.mxu0  ;;  %v584_v11 = vpop.f32.mrf.mxu1 }
  0xf1   :  { %1041 = vst.msk [vmem:[%s1897_s3 + $0x4c] sm:$0xf] %vm1021_vm2, %v1238_v0  ;;  %v1236_v8 = vpack.c.bf16 %v718_v1, %v718_v1  ;;  %v723_v9 = vmax.f32 %v659_v2, 0.0  ;;  %v657_v10 = vadd.f32 %v1572_v34, %v456_v7  ;;  %1073 = vst.msk [vmem:[%s1897_s3 + $0xcc] sm:$0xf] %vm1021_vm2, %v1270_v4  ;;  %v689_v14 = vadd.f32 %v1572_v34, %v584_v11 }
  0xf2   :  { %v1268_v12 = vpack.c.bf16 %v750_v5, %v750_v5  ;;  %v755_v13 = vmax.f32 %v691_v6, 0.0  ;;  %v1341_v15 = vpop.f32.mrf.mxu0  ;;  %v1373_v19 = vpop.f32.mrf.mxu1 }
  0xf3   :  { %1039 = vst.msk [vmem:[%s1897_s3 + $0x44] sm:$0xf] %vm1021_vm2, %v1236_v8  ;;  %v1241_v16 = vpack.c.bf16 %v723_v9, %v723_v9  ;;  %v721_v17 = vmax.f32 %v657_v10, 0.0  ;;  %v660_v18 = vadd.f32 %v1341_v15, %v1572_v34  ;;  %v753_v21 = vmax.f32 %v689_v14, 0.0 }
  0xf4   :  { %1071 = vst.msk [vmem:[%s1897_s3 + $0xc4] sm:$0xf] %vm1021_vm2, %v1268_v12  ;;  %v1273_v20 = vpack.c.bf16 %v755_v13, %v755_v13  ;;  %v692_v22 = vadd.f32 %v1373_v19, %v1572_v34  ;;  %v459_v23 = vpop.f32.mrf.mxu0  ;;  %v587_v27 = vpop.f32.mrf.mxu1 }
  0xf5   :  { %1044 = vst.msk [vmem:[%s1897_s3 + $0x58] sm:$0xf] %vm1021_vm2, %v1241_v16  ;;  %v1239_v24 = vpack.c.bf16 %v721_v17, %v721_v17  ;;  %v724_v25 = vmax.f32 %v660_v18, 0.0  ;;  %v658_v26 = vadd.f32 %v1572_v34, %v459_v23  ;;  %v1271_v28 = vpack.c.bf16 %v753_v21, %v753_v21 }
  0xf6   :  { %1076 = vst.msk [vmem:[%s1897_s3 + $0xd8] sm:$0xf] %vm1021_vm2, %v1273_v20  ;;  %v756_v29 = vmax.f32 %v692_v22, 0.0  ;;  %v690_v30 = vadd.f32 %v1572_v34, %v587_v27  ;;  %v1344_v31 = vpop.f32.mrf.mxu0  ;;  %v1376_v36 = vpop.f32.mrf.mxu1 }
  0xf7   :  { %1042 = vst.msk [vmem:[%s1897_s3 + $0x50] sm:$0xf] %vm1021_vm2, %v1239_v24  ;;  %v1242_v32 = vpack.c.bf16 %v724_v25, %v724_v25  ;;  %v722_v33 = vmax.f32 %v658_v26, 0.0  ;;  %v663_v35 = vadd.f32 %v1344_v31, %v1572_v34  ;;  %1074 = vst.msk [vmem:[%s1897_s3 + $0xd0] sm:$0xf] %vm1021_vm2, %v1271_v28  ;;  %v695_v39 = vadd.f32 %v1376_v36, %v1572_v34 }
  0xf8   :  { %v1274_v37 = vpack.c.bf16 %v756_v29, %v756_v29  ;;  %v754_v38 = vmax.f32 %v690_v30, 0.0  ;;  %v472_v40 = vpop.f32.mrf.mxu0  ;;  %v600_v44 = vpop.f32.mrf.mxu1 }
  0xf9   :  { %1045 = vst.msk [vmem:[%s1897_s3 + $0x5c] sm:$0xf] %vm1021_vm2, %v1242_v32  ;;  %v1240_v41 = vpack.c.bf16 %v722_v33, %v722_v33  ;;  %v727_v42 = vmax.f32 %v663_v35, 0.0  ;;  %v661_v43 = vadd.f32 %v1572_v34, %v472_v40  ;;  %v759_v46 = vmax.f32 %v695_v39, 0.0 }
  0xfa   :  { %1077 = vst.msk [vmem:[%s1897_s3 + $0xdc] sm:$0xf] %vm1021_vm2, %v1274_v37  ;;  %v1272_v45 = vpack.c.bf16 %v754_v38, %v754_v38  ;;  %v693_v47 = vadd.f32 %v1572_v34, %v600_v44  ;;  %v1345_v48 = vpop.f32.mrf.mxu0  ;;  %v1377_v52 = vpop.f32.mrf.mxu1 }
  0xfb   :  { %1043 = vst.msk [vmem:[%s1897_s3 + $0x54] sm:$0xf] %vm1021_vm2, %v1240_v41  ;;  %v1245_v49 = vpack.c.bf16 %v727_v42, %v727_v42  ;;  %v725_v50 = vmax.f32 %v661_v43, 0.0  ;;  %v664_v51 = vadd.f32 %v1345_v48, %v1572_v34  ;;  %v1277_v53 = vpack.c.bf16 %v759_v46, %v759_v46 }
  0xfc   :  { %1075 = vst.msk [vmem:[%s1897_s3 + $0xd4] sm:$0xf] %vm1021_vm2, %v1272_v45  ;;  %v757_v54 = vmax.f32 %v693_v47, 0.0  ;;  %v696_v55 = vadd.f32 %v1377_v52, %v1572_v34  ;;  %v475_v56 = vpop.f32.mrf.mxu0  ;;  %v603_v60 = vpop.f32.mrf.mxu1 }
  0xfd   :  { %1048 = vst.msk [vmem:[%s1897_s3 + $0x68] sm:$0xf] %vm1021_vm2, %v1245_v49  ;;  %v1243_v57 = vpack.c.bf16 %v725_v50, %v725_v50  ;;  %v728_v58 = vmax.f32 %v664_v51, 0.0  ;;  %v662_v59 = vadd.f32 %v1572_v34, %v475_v56  ;;  %1080 = vst.msk [vmem:[%s1897_s3 + $0xe8] sm:$0xf] %vm1021_vm2, %v1277_v53  ;;  %v694_v63 = vadd.f32 %v1572_v34, %v603_v60 }
  0xfe   :  { %v1275_v61 = vpack.c.bf16 %v757_v54, %v757_v54  ;;  %v760_v62 = vmax.f32 %v696_v55, 0.0  ;;  %v1348_v0 = vpop.f32.mrf.mxu0  ;;  %v1380_v4 = vpop.f32.mrf.mxu1 }
  0xff   :  { %1046 = vst.msk [vmem:[%s1897_s3 + $0x60] sm:$0xf] %vm1021_vm2, %v1243_v57  ;;  %v1246_v1 = vpack.c.bf16 %v728_v58, %v728_v58  ;;  %v726_v2 = vmax.f32 %v662_v59, 0.0  ;;  %v667_v3 = vadd.f32 %v1348_v0, %v1572_v34  ;;  %v758_v6 = vmax.f32 %v694_v63, 0.0 }
 0x100   :  { %1078 = vst.msk [vmem:[%s1897_s3 + $0xe0] sm:$0xf] %vm1021_vm2, %v1275_v61  ;;  %v1278_v5 = vpack.c.bf16 %v760_v62, %v760_v62  ;;  %v699_v7 = vadd.f32 %v1380_v4, %v1572_v34  ;;  %v488_v8 = vpop.f32.mrf.mxu0  ;;  %v616_v12 = vpop.f32.mrf.mxu1 }
 0x101   :  { %1049 = vst.msk [vmem:[%s1897_s3 + $0x6c] sm:$0xf] %vm1021_vm2, %v1246_v1  ;;  %v1244_v9 = vpack.c.bf16 %v726_v2, %v726_v2  ;;  %v731_v10 = vmax.f32 %v667_v3, 0.0  ;;  %v665_v11 = vadd.f32 %v1572_v34, %v488_v8  ;;  %v1276_v13 = vpack.c.bf16 %v758_v6, %v758_v6 }
 0x102   :  { %1081 = vst.msk [vmem:[%s1897_s3 + $0xec] sm:$0xf] %vm1021_vm2, %v1278_v5  ;;  %v763_v14 = vmax.f32 %v699_v7, 0.0  ;;  %v697_v15 = vadd.f32 %v1572_v34, %v616_v12  ;;  %v1349_v16 = vpop.f32.mrf.mxu0  ;;  %v1381_v20 = vpop.f32.mrf.mxu1 }
 0x103   :  { %1047 = vst.msk [vmem:[%s1897_s3 + $0x64] sm:$0xf] %vm1021_vm2, %v1244_v9  ;;  %v1249_v17 = vpack.c.bf16 %v731_v10, %v731_v10  ;;  %v729_v18 = vmax.f32 %v665_v11, 0.0  ;;  %v668_v19 = vadd.f32 %v1349_v16, %v1572_v34  ;;  %1079 = vst.msk [vmem:[%s1897_s3 + $0xe4] sm:$0xf] %vm1021_vm2, %v1276_v13  ;;  %v700_v23 = vadd.f32 %v1381_v20, %v1572_v34 }
 0x104   :  { %v1281_v21 = vpack.c.bf16 %v763_v14, %v763_v14  ;;  %v761_v22 = vmax.f32 %v697_v15, 0.0  ;;  %v491_v24 = vpop.f32.mrf.mxu0  ;;  %v619_v28 = vpop.f32.mrf.mxu1 }
 0x105   :  { %1052 = vst.msk [vmem:[%s1897_s3 + $0x78] sm:$0xf] %vm1021_vm2, %v1249_v17  ;;  %v1247_v25 = vpack.c.bf16 %v729_v18, %v729_v18  ;;  %v732_v26 = vmax.f32 %v668_v19, 0.0  ;;  %v666_v27 = vadd.f32 %v1572_v34, %v491_v24  ;;  %v764_v30 = vmax.f32 %v700_v23, 0.0 }
 0x106   :  { %1084 = vst.msk [vmem:[%s1897_s3 + $0xf8] sm:$0xf] %vm1021_vm2, %v1281_v21  ;;  %v1279_v29 = vpack.c.bf16 %v761_v22, %v761_v22  ;;  %v698_v31 = vadd.f32 %v1572_v34, %v619_v28 }
 0x107   :  { %1050 = vst.msk [vmem:[%s1897_s3 + $0x70] sm:$0xf] %vm1021_vm2, %v1247_v25  ;;  %v1250_v32 = vpack.c.bf16 %v732_v26, %v732_v26  ;;  %v730_v33 = vmax.f32 %v666_v27, 0.0  ;;  %v1282_v35 = vpack.c.bf16 %v764_v30, %v764_v30 }
 0x108   :  { %1082 = vst.msk [vmem:[%s1897_s3 + $0xf0] sm:$0xf] %vm1021_vm2, %v1279_v29  ;;  %v762_v36 = vmax.f32 %v698_v31, 0.0 }
 0x109   :  { %1053 = vst.msk [vmem:[%s1897_s3 + $0x7c] sm:$0xf] %vm1021_vm2, %v1250_v32  ;;  %v1248_v34 = vpack.c.bf16 %v730_v33, %v730_v33  ;;  %1085 = vst.msk [vmem:[%s1897_s3 + $0xfc] sm:$0xf] %vm1021_vm2, %v1282_v35 }
 0x10a   :  { %v1280_v37 = vpack.c.bf16 %v762_v36, %v762_v36 }
 0x10b   :  { %1051 = vst.msk [vmem:[%s1897_s3 + $0x74] sm:$0xf] %vm1021_vm2, %v1248_v34 }
 0x10c   :  { %1083 = vst.msk [vmem:[%s1897_s3 + $0xf4] sm:$0xf] %vm1021_vm2, %v1280_v37 }

// kernel: aspp_forward.15
= control target key start
LH: loop header
LB: loop body
LE: loop exit
PB: predicated region body
PF: predicated region fallthrough
CT: control target
= control target key end

     0   :  { %vm338_vm0 = vcmask 1043456   ;;  %vm241_vm1 = vcmask 64512   ;;  %vm957_vm2 = vcmask 93184   ;;  %s1830_s1 = inlined_call_operand.vmem [shape: bf16[1,8,12], index: 1, kind: input, shape index: {}]   ;;  %s1831_s0 = inlined_call_operand.vmem [shape: bf16[512,8], index: 0, kind: input, shape index: {}]   ;;  %s1832_s2 = inlined_call_operand.vmem [shape: f32[1,12], index: 2, kind: input, shape index: {}]   ;;  %s1833_s3 = inlined_call_operand.vmem [shape: bf16[512,12], index: 3, kind: output, shape index: {}]  }
   0x1   :  { %v80_v0 = vld [vmem:[%s1830_s1] sm:$0xf]  ;;  %v1324_v4 = vld [vmem:[%s1831_s0 + $0x8] sm:$0xff]   ;;  %v1326_v6 = vld [vmem:[%s1831_s0 + $0x10] sm:$0xff]  }
   0x2   :  { %1320 = vmatprep.subr.msk.bf16.mxu0 %vm338_vm0, %v80_v0  ;;  %1321 = vmatprep.subr.msk.bf16.mxu1 %vm338_vm0, %v80_v0  ;;  %v340_v1 = vsel %vm338_vm0, %v80_v0, 0  ;;  %v1322_v2 = vld [vmem:[%s1831_s0] sm:$0xff]   ;;  %v1325_v5 = vld [vmem:[%s1831_s0 + $0x88] sm:$0xff]   ;;  %v1327_v7 = vld [vmem:[%s1831_s0 + $0x90] sm:$0xff]  }
   0x3   :  { %1253 = vmatpush3.bf16.msra.mxu0 %v340_v1  ;;  %1319 = vmatpush3.bf16.msra.mxu1 %v340_v1  ;;  %v1323_v3 = vld [vmem:[%s1831_s0 + $0x80] sm:$0xff]   ;;  %v1328_v8 = vld [vmem:[%s1831_s0 + $0x18] sm:$0xff]   ;;  %v1332_v12 = vld [vmem:[%s1831_s0 + $0x28] sm:$0xff]  }
   0x4   :  { %1254 = vmatprep.mubr.msk.bf16.mxu0 %vm241_vm1, %v1322_v2  ;;  %1286 = vmatprep.mubr.msk.bf16.mxu1 %vm241_vm1, %v1323_v3  ;;  %v1329_v9 = vld [vmem:[%s1831_s0 + $0x98] sm:$0xff]   ;;  %v1330_v10 = vld [vmem:[%s1831_s0 + $0x20] sm:$0xff]   ;;  %v1333_v13 = vld [vmem:[%s1831_s0 + $0xa8] sm:$0xff]  }
   0x5   :  { %v1331_v11 = vld [vmem:[%s1831_s0 + $0xa0] sm:$0xff]   ;;  %v1334_v14 = vld [vmem:[%s1831_s0 + $0x30] sm:$0xff]   ;;  %v1336_v16 = vld [vmem:[%s1831_s0 + $0x38] sm:$0xff]  }
   0x6   :  { %1255 = vmatmul.mubr.msk.bf16.vlgmr.msra.gmra.mxu0 %vm241_vm1, %v1324_v4  ;;  %1287 = vmatmul.mubr.msk.bf16.vlgmr.msra.gmra.mxu1 %vm241_vm1, %v1325_v5  ;;  %v1335_v15 = vld [vmem:[%s1831_s0 + $0xb0] sm:$0xff]   ;;  %v1337_v17 = vld [vmem:[%s1831_s0 + $0xb8] sm:$0xff]   ;;  %v1338_v18 = vld [vmem:[%s1831_s0 + $0x40] sm:$0xff]  }
   0x7   :  { %1258 = vmatprep.mubr.msk.bf16.mxu0 %vm241_vm1, %v1326_v6  ;;  %1290 = vmatprep.mubr.msk.bf16.mxu1 %vm241_vm1, %v1327_v7  ;;  %v1339_v19 = vld [vmem:[%s1831_s0 + $0xc0] sm:$0xff]   ;;  %v1340_v20 = vld [vmem:[%s1831_s0 + $0x48] sm:$0xff]   ;;  %v1342_v22 = vld [vmem:[%s1831_s0 + $0x50] sm:$0xff]  }
   0x8   :  { %v1341_v21 = vld [vmem:[%s1831_s0 + $0xc8] sm:$0xff]   ;;  %v1343_v23 = vld [vmem:[%s1831_s0 + $0xd0] sm:$0xff]   ;;  %v1344_v24 = vld [vmem:[%s1831_s0 + $0x58] sm:$0xff]  }
   0x9   :  { %v1345_v25 = vld [vmem:[%s1831_s0 + $0xd8] sm:$0xff]   ;;  %v1346_v26 = vld [vmem:[%s1831_s0 + $0x60] sm:$0xff]   ;;  %v1348_v28 = vld [vmem:[%s1831_s0 + $0x68] sm:$0xff]  }
   0xa   :  { %v1347_v27 = vld [vmem:[%s1831_s0 + $0xe0] sm:$0xff]   ;;  %v1349_v29 = vld [vmem:[%s1831_s0 + $0xe8] sm:$0xff]   ;;  %v1350_v30 = vld [vmem:[%s1831_s0 + $0x70] sm:$0xff]  }
   0xb   :  { %v1351_v31 = vld [vmem:[%s1831_s0 + $0xf0] sm:$0xff]   ;;  %v1352_v32 = vld [vmem:[%s1831_s0 + $0x78] sm:$0xff]   ;;  %v1508_v34 = vld [vmem:[%s1832_s2] ss:$0 sm:$0xff] }
   0xc   :  { %v1353_v33 = vld [vmem:[%s1831_s0 + $0xf8] sm:$0xff]  }
   0xe   :  { %1259 = vmatmul.mubr.msk.bf16.gmra.mxu0 %vm241_vm1, %v1328_v8  ;;  %1291 = vmatmul.mubr.msk.bf16.gmra.mxu1 %vm241_vm1, %v1329_v9 }
   0xf   :  { %1262 = vmatprep.mubr.msk.bf16.mxu0 %vm241_vm1, %v1330_v10  ;;  %1294 = vmatprep.mubr.msk.bf16.mxu1 %vm241_vm1, %v1331_v11 }
  0x16   :  { %1263 = vmatmul.mubr.msk.bf16.gmra.mxu0 %vm241_vm1, %v1332_v12  ;;  %1295 = vmatmul.mubr.msk.bf16.gmra.mxu1 %vm241_vm1, %v1333_v13 }
  0x17   :  { %1266 = vmatprep.mubr.msk.bf16.mxu0 %vm241_vm1, %v1334_v14  ;;  %1298 = vmatprep.mubr.msk.bf16.mxu1 %vm241_vm1, %v1335_v15 }
  0x1e   :  { %1267 = vmatmul.mubr.msk.bf16.gmra.mxu0 %vm241_vm1, %v1336_v16  ;;  %1299 = vmatmul.mubr.msk.bf16.gmra.mxu1 %vm241_vm1, %v1337_v17 }
  0x1f   :  { %1270 = vmatprep.mubr.msk.bf16.mxu0 %vm241_vm1, %v1338_v18  ;;  %1302 = vmatprep.mubr.msk.bf16.mxu1 %vm241_vm1, %v1339_v19 }
  0x26   :  { %1271 = vmatmul.mubr.msk.bf16.gmra.mxu0 %vm241_vm1, %v1340_v20  ;;  %1303 = vmatmul.mubr.msk.bf16.gmra.mxu1 %vm241_vm1, %v1341_v21 }
  0x27   :  { %1274 = vmatprep.mubr.msk.bf16.mxu0 %vm241_vm1, %v1342_v22  ;;  %1306 = vmatprep.mubr.msk.bf16.mxu1 %vm241_vm1, %v1343_v23 }
  0x2e   :  { %1275 = vmatmul.mubr.msk.bf16.gmra.mxu0 %vm241_vm1, %v1344_v24  ;;  %1307 = vmatmul.mubr.msk.bf16.gmra.mxu1 %vm241_vm1, %v1345_v25 }
  0x2f   :  { %1278 = vmatprep.mubr.msk.bf16.mxu0 %vm241_vm1, %v1346_v26  ;;  %1310 = vmatprep.mubr.msk.bf16.mxu1 %vm241_vm1, %v1347_v27 }
  0x36   :  { %1279 = vmatmul.mubr.msk.bf16.gmra.mxu0 %vm241_vm1, %v1348_v28  ;;  %1311 = vmatmul.mubr.msk.bf16.gmra.mxu1 %vm241_vm1, %v1349_v29 }
  0x37   :  { %1282 = vmatprep.mubr.msk.bf16.mxu0 %vm241_vm1, %v1350_v30  ;;  %1314 = vmatprep.mubr.msk.bf16.mxu1 %vm241_vm1, %v1351_v31 }
  0x3e   :  { %1283 = vmatmul.mubr.msk.bf16.gmra.mxu0 %vm241_vm1, %v1352_v32  ;;  %1315 = vmatmul.mubr.msk.bf16.gmra.mxu1 %vm241_vm1, %v1353_v33 }
  0xc6   :  { %v1256_v35 = vpop.f32.mrf.mxu0  ;;  %v1288_v37 = vpop.f32.mrf.mxu1 }
  0xc7   :  { %v639_v36 = vadd.f32 %v1256_v35, %v1508_v34  ;;  %v671_v38 = vadd.f32 %v1288_v37, %v1508_v34 }
  0xc8   :  { %v376_v39 = vpop.f32.mrf.mxu0  ;;  %v504_v42 = vpop.f32.mrf.mxu1 }
  0xc9   :  { %v1157_v40 = vpack.c.bf16 %v639_v36, %v639_v36  ;;  %v637_v41 = vadd.f32 %v1508_v34, %v376_v39  ;;  %v1189_v43 = vpack.c.bf16 %v671_v38, %v671_v38  ;;  %v669_v44 = vadd.f32 %v1508_v34, %v504_v42 }
  0xca   :  { %v1257_v45 = vpop.f32.mrf.mxu0  ;;  %v1289_v48 = vpop.f32.mrf.mxu1 }
  0xcb   :  { %960 = vst.msk [vmem:[%s1833_s3 + $0x8] sm:$0xf] %vm957_vm2, %v1157_v40  ;;  %v1155_v46 = vpack.c.bf16 %v637_v41, %v637_v41  ;;  %v640_v47 = vadd.f32 %v1257_v45, %v1508_v34  ;;  %992 = vst.msk [vmem:[%s1833_s3 + $0x88] sm:$0xf] %vm957_vm2, %v1189_v43  ;;  %v1187_v49 = vpack.c.bf16 %v669_v44, %v669_v44 }
  0xcc   :  { %v672_v50 = vadd.f32 %v1289_v48, %v1508_v34  ;;  %v379_v51 = vpop.f32.mrf.mxu0  ;;  %v507_v54 = vpop.f32.mrf.mxu1 }
  0xcd   :  { %958 = vst.msk [vmem:[%s1833_s3] sm:$0xf] %vm957_vm2, %v1155_v46  ;;  %v1158_v52 = vpack.c.bf16 %v640_v47, %v640_v47  ;;  %v638_v53 = vadd.f32 %v1508_v34, %v379_v51  ;;  %990 = vst.msk [vmem:[%s1833_s3 + $0x80] sm:$0xf] %vm957_vm2, %v1187_v49  ;;  %v670_v56 = vadd.f32 %v1508_v34, %v507_v54 }
  0xce   :  { %v1190_v55 = vpack.c.bf16 %v672_v50, %v672_v50  ;;  %v1260_v57 = vpop.f32.mrf.mxu0  ;;  %v1292_v60 = vpop.f32.mrf.mxu1 }
  0xcf   :  { %961 = vst.msk [vmem:[%s1833_s3 + $0xc] sm:$0xf] %vm957_vm2, %v1158_v52  ;;  %v1156_v58 = vpack.c.bf16 %v638_v53, %v638_v53  ;;  %v643_v59 = vadd.f32 %v1260_v57, %v1508_v34  ;;  %v1188_v61 = vpack.c.bf16 %v670_v56, %v670_v56  ;;  %v675_v62 = vadd.f32 %v1292_v60, %v1508_v34 }
  0xd0   :  { %993 = vst.msk [vmem:[%s1833_s3 + $0x8c] sm:$0xf] %vm957_vm2, %v1190_v55  ;;  %v392_v63 = vpop.f32.mrf.mxu0  ;;  %v520_v2 = vpop.f32.mrf.mxu1 }
  0xd1   :  { %959 = vst.msk [vmem:[%s1833_s3 + $0x4] sm:$0xf] %vm957_vm2, %v1156_v58  ;;  %v1161_v0 = vpack.c.bf16 %v643_v59, %v643_v59  ;;  %v641_v1 = vadd.f32 %v1508_v34, %v392_v63  ;;  %991 = vst.msk [vmem:[%s1833_s3 + $0x84] sm:$0xf] %vm957_vm2, %v1188_v61  ;;  %v1193_v3 = vpack.c.bf16 %v675_v62, %v675_v62 }
  0xd2   :  { %v673_v4 = vadd.f32 %v1508_v34, %v520_v2  ;;  %v1261_v5 = vpop.f32.mrf.mxu0  ;;  %v1293_v8 = vpop.f32.mrf.mxu1 }
  0xd3   :  { %964 = vst.msk [vmem:[%s1833_s3 + $0x18] sm:$0xf] %vm957_vm2, %v1161_v0  ;;  %v1159_v6 = vpack.c.bf16 %v641_v1, %v641_v1  ;;  %v644_v7 = vadd.f32 %v1261_v5, %v1508_v34  ;;  %996 = vst.msk [vmem:[%s1833_s3 + $0x98] sm:$0xf] %vm957_vm2, %v1193_v3  ;;  %v676_v10 = vadd.f32 %v1293_v8, %v1508_v34 }
  0xd4   :  { %v1191_v9 = vpack.c.bf16 %v673_v4, %v673_v4  ;;  %v395_v11 = vpop.f32.mrf.mxu0  ;;  %v523_v14 = vpop.f32.mrf.mxu1 }
  0xd5   :  { %962 = vst.msk [vmem:[%s1833_s3 + $0x10] sm:$0xf] %vm957_vm2, %v1159_v6  ;;  %v1162_v12 = vpack.c.bf16 %v644_v7, %v644_v7  ;;  %v642_v13 = vadd.f32 %v1508_v34, %v395_v11  ;;  %v1194_v15 = vpack.c.bf16 %v676_v10, %v676_v10  ;;  %v674_v16 = vadd.f32 %v1508_v34, %v523_v14 }
  0xd6   :  { %994 = vst.msk [vmem:[%s1833_s3 + $0x90] sm:$0xf] %vm957_vm2, %v1191_v9  ;;  %v1264_v17 = vpop.f32.mrf.mxu0  ;;  %v1296_v20 = vpop.f32.mrf.mxu1 }
  0xd7   :  { %965 = vst.msk [vmem:[%s1833_s3 + $0x1c] sm:$0xf] %vm957_vm2, %v1162_v12  ;;  %v1160_v18 = vpack.c.bf16 %v642_v13, %v642_v13  ;;  %v647_v19 = vadd.f32 %v1264_v17, %v1508_v34  ;;  %997 = vst.msk [vmem:[%s1833_s3 + $0x9c] sm:$0xf] %vm957_vm2, %v1194_v15  ;;  %v1192_v21 = vpack.c.bf16 %v674_v16, %v674_v16 }
  0xd8   :  { %v679_v22 = vadd.f32 %v1296_v20, %v1508_v34  ;;  %v408_v23 = vpop.f32.mrf.mxu0  ;;  %v536_v26 = vpop.f32.mrf.mxu1 }
  0xd9   :  { %963 = vst.msk [vmem:[%s1833_s3 + $0x14] sm:$0xf] %vm957_vm2, %v1160_v18  ;;  %v1165_v24 = vpack.c.bf16 %v647_v19, %v647_v19  ;;  %v645_v25 = vadd.f32 %v1508_v34, %v408_v23  ;;  %995 = vst.msk [vmem:[%s1833_s3 + $0x94] sm:$0xf] %vm957_vm2, %v1192_v21  ;;  %v677_v28 = vadd.f32 %v1508_v34, %v536_v26 }
  0xda   :  { %v1197_v27 = vpack.c.bf16 %v679_v22, %v679_v22  ;;  %v1265_v29 = vpop.f32.mrf.mxu0  ;;  %v1297_v32 = vpop.f32.mrf.mxu1 }
  0xdb   :  { %968 = vst.msk [vmem:[%s1833_s3 + $0x28] sm:$0xf] %vm957_vm2, %v1165_v24  ;;  %v1163_v30 = vpack.c.bf16 %v645_v25, %v645_v25  ;;  %v648_v31 = vadd.f32 %v1265_v29, %v1508_v34  ;;  %v1195_v33 = vpack.c.bf16 %v677_v28, %v677_v28  ;;  %v680_v35 = vadd.f32 %v1297_v32, %v1508_v34 }
  0xdc   :  { %1000 = vst.msk [vmem:[%s1833_s3 + $0xa8] sm:$0xf] %vm957_vm2, %v1197_v27  ;;  %v411_v36 = vpop.f32.mrf.mxu0  ;;  %v539_v39 = vpop.f32.mrf.mxu1 }
  0xdd   :  { %966 = vst.msk [vmem:[%s1833_s3 + $0x20] sm:$0xf] %vm957_vm2, %v1163_v30  ;;  %v1166_v37 = vpack.c.bf16 %v648_v31, %v648_v31  ;;  %v646_v38 = vadd.f32 %v1508_v34, %v411_v36  ;;  %998 = vst.msk [vmem:[%s1833_s3 + $0xa0] sm:$0xf] %vm957_vm2, %v1195_v33  ;;  %v1198_v40 = vpack.c.bf16 %v680_v35, %v680_v35 }
  0xde   :  { %v678_v41 = vadd.f32 %v1508_v34, %v539_v39  ;;  %v1268_v42 = vpop.f32.mrf.mxu0  ;;  %v1300_v45 = vpop.f32.mrf.mxu1 }
  0xdf   :  { %969 = vst.msk [vmem:[%s1833_s3 + $0x2c] sm:$0xf] %vm957_vm2, %v1166_v37  ;;  %v1164_v43 = vpack.c.bf16 %v646_v38, %v646_v38  ;;  %v651_v44 = vadd.f32 %v1268_v42, %v1508_v34  ;;  %1001 = vst.msk [vmem:[%s1833_s3 + $0xac] sm:$0xf] %vm957_vm2, %v1198_v40  ;;  %v683_v47 = vadd.f32 %v1300_v45, %v1508_v34 }
  0xe0   :  { %v1196_v46 = vpack.c.bf16 %v678_v41, %v678_v41  ;;  %v424_v48 = vpop.f32.mrf.mxu0  ;;  %v552_v51 = vpop.f32.mrf.mxu1 }
  0xe1   :  { %967 = vst.msk [vmem:[%s1833_s3 + $0x24] sm:$0xf] %vm957_vm2, %v1164_v43  ;;  %v1169_v49 = vpack.c.bf16 %v651_v44, %v651_v44  ;;  %v649_v50 = vadd.f32 %v1508_v34, %v424_v48  ;;  %v1201_v52 = vpack.c.bf16 %v683_v47, %v683_v47  ;;  %v681_v53 = vadd.f32 %v1508_v34, %v552_v51 }
  0xe2   :  { %999 = vst.msk [vmem:[%s1833_s3 + $0xa4] sm:$0xf] %vm957_vm2, %v1196_v46  ;;  %v1269_v54 = vpop.f32.mrf.mxu0  ;;  %v1301_v57 = vpop.f32.mrf.mxu1 }
  0xe3   :  { %972 = vst.msk [vmem:[%s1833_s3 + $0x38] sm:$0xf] %vm957_vm2, %v1169_v49  ;;  %v1167_v55 = vpack.c.bf16 %v649_v50, %v649_v50  ;;  %v652_v56 = vadd.f32 %v1269_v54, %v1508_v34  ;;  %1004 = vst.msk [vmem:[%s1833_s3 + $0xb8] sm:$0xf] %vm957_vm2, %v1201_v52  ;;  %v1199_v58 = vpack.c.bf16 %v681_v53, %v681_v53 }
  0xe4   :  { %v684_v59 = vadd.f32 %v1301_v57, %v1508_v34  ;;  %v427_v60 = vpop.f32.mrf.mxu0  ;;  %v555_v63 = vpop.f32.mrf.mxu1 }
  0xe5   :  { %970 = vst.msk [vmem:[%s1833_s3 + $0x30] sm:$0xf] %vm957_vm2, %v1167_v55  ;;  %v1170_v61 = vpack.c.bf16 %v652_v56, %v652_v56  ;;  %v650_v62 = vadd.f32 %v1508_v34, %v427_v60  ;;  %1002 = vst.msk [vmem:[%s1833_s3 + $0xb0] sm:$0xf] %vm957_vm2, %v1199_v58  ;;  %v682_v1 = vadd.f32 %v1508_v34, %v555_v63 }
  0xe6   :  { %v1202_v0 = vpack.c.bf16 %v684_v59, %v684_v59  ;;  %v1272_v2 = vpop.f32.mrf.mxu0  ;;  %v1304_v5 = vpop.f32.mrf.mxu1 }
  0xe7   :  { %973 = vst.msk [vmem:[%s1833_s3 + $0x3c] sm:$0xf] %vm957_vm2, %v1170_v61  ;;  %v1168_v3 = vpack.c.bf16 %v650_v62, %v650_v62  ;;  %v655_v4 = vadd.f32 %v1272_v2, %v1508_v34  ;;  %v1200_v6 = vpack.c.bf16 %v682_v1, %v682_v1  ;;  %v687_v7 = vadd.f32 %v1304_v5, %v1508_v34 }
  0xe8   :  { %1005 = vst.msk [vmem:[%s1833_s3 + $0xbc] sm:$0xf] %vm957_vm2, %v1202_v0  ;;  %v440_v8 = vpop.f32.mrf.mxu0  ;;  %v568_v11 = vpop.f32.mrf.mxu1 }
  0xe9   :  { %971 = vst.msk [vmem:[%s1833_s3 + $0x34] sm:$0xf] %vm957_vm2, %v1168_v3  ;;  %v1173_v9 = vpack.c.bf16 %v655_v4, %v655_v4  ;;  %v653_v10 = vadd.f32 %v1508_v34, %v440_v8  ;;  %1003 = vst.msk [vmem:[%s1833_s3 + $0xb4] sm:$0xf] %vm957_vm2, %v1200_v6  ;;  %v1205_v12 = vpack.c.bf16 %v687_v7, %v687_v7 }
  0xea   :  { %v685_v13 = vadd.f32 %v1508_v34, %v568_v11  ;;  %v1273_v14 = vpop.f32.mrf.mxu0  ;;  %v1305_v17 = vpop.f32.mrf.mxu1 }
  0xeb   :  { %976 = vst.msk [vmem:[%s1833_s3 + $0x48] sm:$0xf] %vm957_vm2, %v1173_v9  ;;  %v1171_v15 = vpack.c.bf16 %v653_v10, %v653_v10  ;;  %v656_v16 = vadd.f32 %v1273_v14, %v1508_v34  ;;  %1008 = vst.msk [vmem:[%s1833_s3 + $0xc8] sm:$0xf] %vm957_vm2, %v1205_v12  ;;  %v688_v19 = vadd.f32 %v1305_v17, %v1508_v34 }
  0xec   :  { %v1203_v18 = vpack.c.bf16 %v685_v13, %v685_v13  ;;  %v443_v20 = vpop.f32.mrf.mxu0  ;;  %v571_v23 = vpop.f32.mrf.mxu1 }
  0xed   :  { %974 = vst.msk [vmem:[%s1833_s3 + $0x40] sm:$0xf] %vm957_vm2, %v1171_v15  ;;  %v1174_v21 = vpack.c.bf16 %v656_v16, %v656_v16  ;;  %v654_v22 = vadd.f32 %v1508_v34, %v443_v20  ;;  %v1206_v24 = vpack.c.bf16 %v688_v19, %v688_v19  ;;  %v686_v25 = vadd.f32 %v1508_v34, %v571_v23 }
  0xee   :  { %1006 = vst.msk [vmem:[%s1833_s3 + $0xc0] sm:$0xf] %vm957_vm2, %v1203_v18  ;;  %v1276_v26 = vpop.f32.mrf.mxu0  ;;  %v1308_v29 = vpop.f32.mrf.mxu1 }
  0xef   :  { %977 = vst.msk [vmem:[%s1833_s3 + $0x4c] sm:$0xf] %vm957_vm2, %v1174_v21  ;;  %v1172_v27 = vpack.c.bf16 %v654_v22, %v654_v22  ;;  %v659_v28 = vadd.f32 %v1276_v26, %v1508_v34  ;;  %1009 = vst.msk [vmem:[%s1833_s3 + $0xcc] sm:$0xf] %vm957_vm2, %v1206_v24  ;;  %v1204_v30 = vpack.c.bf16 %v686_v25, %v686_v25 }
  0xf0   :  { %v691_v31 = vadd.f32 %v1308_v29, %v1508_v34  ;;  %v456_v32 = vpop.f32.mrf.mxu0  ;;  %v584_v36 = vpop.f32.mrf.mxu1 }
  0xf1   :  { %975 = vst.msk [vmem:[%s1833_s3 + $0x44] sm:$0xf] %vm957_vm2, %v1172_v27  ;;  %v1177_v33 = vpack.c.bf16 %v659_v28, %v659_v28  ;;  %v657_v35 = vadd.f32 %v1508_v34, %v456_v32  ;;  %1007 = vst.msk [vmem:[%s1833_s3 + $0xc4] sm:$0xf] %vm957_vm2, %v1204_v30  ;;  %v689_v38 = vadd.f32 %v1508_v34, %v584_v36 }
  0xf2   :  { %v1209_v37 = vpack.c.bf16 %v691_v31, %v691_v31  ;;  %v1277_v39 = vpop.f32.mrf.mxu0  ;;  %v1309_v42 = vpop.f32.mrf.mxu1 }
  0xf3   :  { %980 = vst.msk [vmem:[%s1833_s3 + $0x58] sm:$0xf] %vm957_vm2, %v1177_v33  ;;  %v1175_v40 = vpack.c.bf16 %v657_v35, %v657_v35  ;;  %v660_v41 = vadd.f32 %v1277_v39, %v1508_v34  ;;  %v1207_v43 = vpack.c.bf16 %v689_v38, %v689_v38  ;;  %v692_v44 = vadd.f32 %v1309_v42, %v1508_v34 }
  0xf4   :  { %1012 = vst.msk [vmem:[%s1833_s3 + $0xd8] sm:$0xf] %vm957_vm2, %v1209_v37  ;;  %v459_v45 = vpop.f32.mrf.mxu0  ;;  %v587_v48 = vpop.f32.mrf.mxu1 }
  0xf5   :  { %978 = vst.msk [vmem:[%s1833_s3 + $0x50] sm:$0xf] %vm957_vm2, %v1175_v40  ;;  %v1178_v46 = vpack.c.bf16 %v660_v41, %v660_v41  ;;  %v658_v47 = vadd.f32 %v1508_v34, %v459_v45  ;;  %1010 = vst.msk [vmem:[%s1833_s3 + $0xd0] sm:$0xf] %vm957_vm2, %v1207_v43  ;;  %v1210_v49 = vpack.c.bf16 %v692_v44, %v692_v44 }
  0xf6   :  { %v690_v50 = vadd.f32 %v1508_v34, %v587_v48  ;;  %v1280_v51 = vpop.f32.mrf.mxu0  ;;  %v1312_v54 = vpop.f32.mrf.mxu1 }
  0xf7   :  { %981 = vst.msk [vmem:[%s1833_s3 + $0x5c] sm:$0xf] %vm957_vm2, %v1178_v46  ;;  %v1176_v52 = vpack.c.bf16 %v658_v47, %v658_v47  ;;  %v663_v53 = vadd.f32 %v1280_v51, %v1508_v34  ;;  %1013 = vst.msk [vmem:[%s1833_s3 + $0xdc] sm:$0xf] %vm957_vm2, %v1210_v49  ;;  %v695_v56 = vadd.f32 %v1312_v54, %v1508_v34 }
  0xf8   :  { %v1208_v55 = vpack.c.bf16 %v690_v50, %v690_v50  ;;  %v472_v57 = vpop.f32.mrf.mxu0  ;;  %v600_v60 = vpop.f32.mrf.mxu1 }
  0xf9   :  { %979 = vst.msk [vmem:[%s1833_s3 + $0x54] sm:$0xf] %vm957_vm2, %v1176_v52  ;;  %v1181_v58 = vpack.c.bf16 %v663_v53, %v663_v53  ;;  %v661_v59 = vadd.f32 %v1508_v34, %v472_v57  ;;  %v1213_v61 = vpack.c.bf16 %v695_v56, %v695_v56  ;;  %v693_v62 = vadd.f32 %v1508_v34, %v600_v60 }
  0xfa   :  { %1011 = vst.msk [vmem:[%s1833_s3 + $0xd4] sm:$0xf] %vm957_vm2, %v1208_v55  ;;  %v1281_v63 = vpop.f32.mrf.mxu0  ;;  %v1313_v2 = vpop.f32.mrf.mxu1 }
  0xfb   :  { %984 = vst.msk [vmem:[%s1833_s3 + $0x68] sm:$0xf] %vm957_vm2, %v1181_v58  ;;  %v1179_v0 = vpack.c.bf16 %v661_v59, %v661_v59  ;;  %v664_v1 = vadd.f32 %v1281_v63, %v1508_v34  ;;  %1016 = vst.msk [vmem:[%s1833_s3 + $0xe8] sm:$0xf] %vm957_vm2, %v1213_v61  ;;  %v1211_v3 = vpack.c.bf16 %v693_v62, %v693_v62 }
  0xfc   :  { %v696_v4 = vadd.f32 %v1313_v2, %v1508_v34  ;;  %v475_v5 = vpop.f32.mrf.mxu0  ;;  %v603_v8 = vpop.f32.mrf.mxu1 }
  0xfd   :  { %982 = vst.msk [vmem:[%s1833_s3 + $0x60] sm:$0xf] %vm957_vm2, %v1179_v0  ;;  %v1182_v6 = vpack.c.bf16 %v664_v1, %v664_v1  ;;  %v662_v7 = vadd.f32 %v1508_v34, %v475_v5  ;;  %1014 = vst.msk [vmem:[%s1833_s3 + $0xe0] sm:$0xf] %vm957_vm2, %v1211_v3  ;;  %v694_v10 = vadd.f32 %v1508_v34, %v603_v8 }
  0xfe   :  { %v1214_v9 = vpack.c.bf16 %v696_v4, %v696_v4  ;;  %v1284_v11 = vpop.f32.mrf.mxu0  ;;  %v1316_v14 = vpop.f32.mrf.mxu1 }
  0xff   :  { %985 = vst.msk [vmem:[%s1833_s3 + $0x6c] sm:$0xf] %vm957_vm2, %v1182_v6  ;;  %v1180_v12 = vpack.c.bf16 %v662_v7, %v662_v7  ;;  %v667_v13 = vadd.f32 %v1284_v11, %v1508_v34  ;;  %v1212_v15 = vpack.c.bf16 %v694_v10, %v694_v10  ;;  %v699_v16 = vadd.f32 %v1316_v14, %v1508_v34 }
 0x100   :  { %1017 = vst.msk [vmem:[%s1833_s3 + $0xec] sm:$0xf] %vm957_vm2, %v1214_v9  ;;  %v488_v17 = vpop.f32.mrf.mxu0  ;;  %v616_v20 = vpop.f32.mrf.mxu1 }
 0x101   :  { %983 = vst.msk [vmem:[%s1833_s3 + $0x64] sm:$0xf] %vm957_vm2, %v1180_v12  ;;  %v1185_v18 = vpack.c.bf16 %v667_v13, %v667_v13  ;;  %v665_v19 = vadd.f32 %v1508_v34, %v488_v17  ;;  %1015 = vst.msk [vmem:[%s1833_s3 + $0xe4] sm:$0xf] %vm957_vm2, %v1212_v15  ;;  %v1217_v21 = vpack.c.bf16 %v699_v16, %v699_v16 }
 0x102   :  { %v697_v22 = vadd.f32 %v1508_v34, %v616_v20  ;;  %v1285_v23 = vpop.f32.mrf.mxu0  ;;  %v1317_v26 = vpop.f32.mrf.mxu1 }
 0x103   :  { %988 = vst.msk [vmem:[%s1833_s3 + $0x78] sm:$0xf] %vm957_vm2, %v1185_v18  ;;  %v1183_v24 = vpack.c.bf16 %v665_v19, %v665_v19  ;;  %v668_v25 = vadd.f32 %v1285_v23, %v1508_v34  ;;  %1020 = vst.msk [vmem:[%s1833_s3 + $0xf8] sm:$0xf] %vm957_vm2, %v1217_v21  ;;  %v700_v28 = vadd.f32 %v1317_v26, %v1508_v34 }
 0x104   :  { %v1215_v27 = vpack.c.bf16 %v697_v22, %v697_v22  ;;  %v491_v29 = vpop.f32.mrf.mxu0  ;;  %v619_v32 = vpop.f32.mrf.mxu1 }
 0x105   :  { %986 = vst.msk [vmem:[%s1833_s3 + $0x70] sm:$0xf] %vm957_vm2, %v1183_v24  ;;  %v1186_v30 = vpack.c.bf16 %v668_v25, %v668_v25  ;;  %v666_v31 = vadd.f32 %v1508_v34, %v491_v29  ;;  %v1218_v33 = vpack.c.bf16 %v700_v28, %v700_v28  ;;  %v698_v35 = vadd.f32 %v1508_v34, %v619_v32 }
 0x106   :  { %1018 = vst.msk [vmem:[%s1833_s3 + $0xf0] sm:$0xf] %vm957_vm2, %v1215_v27 }
 0x107   :  { %989 = vst.msk [vmem:[%s1833_s3 + $0x7c] sm:$0xf] %vm957_vm2, %v1186_v30  ;;  %v1184_v36 = vpack.c.bf16 %v666_v31, %v666_v31  ;;  %1021 = vst.msk [vmem:[%s1833_s3 + $0xfc] sm:$0xf] %vm957_vm2, %v1218_v33  ;;  %v1216_v37 = vpack.c.bf16 %v698_v35, %v698_v35 }
 0x109   :  { %987 = vst.msk [vmem:[%s1833_s3 + $0x74] sm:$0xf] %vm957_vm2, %v1184_v36  ;;  %1019 = vst.msk [vmem:[%s1833_s3 + $0xf4] sm:$0xf] %vm957_vm2, %v1216_v37 }

// kernel: aspp_forward.16
= control target key start
LH: loop header
LB: loop body
LE: loop exit
PB: predicated region body
PF: predicated region fallthrough
CT: control target
= control target key end

     0   :  { %s1957_s9 = smov 0   ;;  %s1959_s10 = smov 0   ;;  %s2563_s0 = inlined_call_operand.vmem [shape: bf16[2,256,12], index: 0, kind: input, shape index: {}, may-alias: {0,1}]   ;;  %s2564_s1 = inlined_call_operand.vmem [shape: bf16[2,256,12], index: 1, kind: input, shape index: {}, may-alias: {0,1}]   ;;  %s2565_s2 = inlined_call_operand.vmem [shape: bf16[2,256,4], index: 2, kind: output, shape index: {}]  }
   0x1   :  { %s1961_s11 = smov 0   ;;  %s1963_s12 = smov 0  }
   0x2   :  { %s1965_s13 = smov 0   ;;  %s1967_s14 = smov 0  }
   0x3   :  { %s1969_s15 = smov 0  }
   0x4 LB: > { %s24_s16 = sadd.s32 1, %s1922_s12  ;;  %s27_s17 = sadd.s32 1, %s1926_s13  ;;  %s1934_s15 = sphi %s1969_s15, %s12_s15   ;;  %s1930_s14 = sphi %s1967_s14, %s2571_s14   ;;  %s1926_s13 = sphi %s1965_s13, %s2570_s13   ;;  %s1922_s12 = sphi %s1963_s12, %s2569_s12   ;;  %s1918_s11 = sphi %s1961_s11, %s2568_s11   ;;  %s1914_s10 = sphi %s1959_s10, %s2567_s10   ;;  %s1910_s9 = sphi %s1957_s9, %s2566_s9  }
   0x5   : > { %p25_p0 = scmp.ge.s32.totalorder %s24_s16, 2  ;;  %p1528_p1 = scmp.ge.s32.totalorder %s1934_s15, 1 }
   0x6   : > { %p157_p2 = scmp.lt.s32.totalorder %s1934_s15, 9  ;;  %s31_s18 = sadd.s32 1, %s1930_s14 }
   0x7   : > { %s2573_s16 = smov (%p25_p0, %s24_s16), 0  ;;  %s2575_s17 = smov (!%p25_p0, %s27_s17), %s1926_s13 }
   0x8   : > { %p158_p3 = pnand %p1528_p1, %p157_p2  ;;  %p29_p4 = scmp.ge.s32.totalorder %s2575_s17, 2 }
   0x9   : > { %s1529_s19 = sshll.u32 (!%p158_p3), %s1914_s10, 4  ;;  %p197_p6 = scmp.lt.s32.totalorder (!%p158_p3), %s1918_s11, 1 }
   0xa   : > { %s2577_s17 = smov (%p29_p4, %s2575_s17), 0  ;;  %s2579_s18 = smov (!%p29_p4, %s31_s18), %s1930_s14 }
   0xb   : > { %p33_p5 = scmp.ge.s32.totalorder %s2579_s18, 2  ;;  %161 = sbr.rel (%p158_p3) target bundleno = 1127 (0x467), region = 28 }
   0xc   : > { %p199_p7 = scmp.lt.s32.totalorder (!%p158_p3), %s1529_s19, 31  ;;  %s1532_s20 = sshll.u32 (!%p158_p3), %s1910_s9, 4 }
   0xd   : > { %s2581_s18 = smov (%p33_p5, %s2579_s18), 0  ;;  %p209_p8 = scmp.lt.s32.totalorder (!%p158_p3), %s1532_s20, 31 }
   0xe   : > { %p1538_p9 = scmp.ne.s32.totalorder (!%p158_p3), %s1910_s9, 0 }
  0x10   : > { %s2583_s11 = smov (!%p197_p6, %s1918_s11), 1  ;;  %s2585_s19 = smov (!%p199_p7, %s1529_s19), 31 }
  0x11   : > { %s1530_s21 = sshll.u32 %s2583_s11, 5  ;;  %s2587_s20 = smov (!%p209_p8, %s1532_s20), 31 }
  0x12   : > { %s202_s22 = sadd.s32 %s1530_s21, %s2585_s19  ;;  %s212_s30 = sadd.s32 %s1530_s21, %s2587_s20 }
  0x13   : > { %s1531_s23 = sshll.u32 %s202_s22, 2  ;;  %s1534_s3 = sshll.u32 %s212_s30, 2 }
  0x14   : > { %s2005_s26 = scalar_lea.vmem %s2563_s0, %s1531_s23  ;;  %s2010_s29 = scalar_lea.vmem %s2565_s2, %s1531_s23 }
  0x15   : > { %s2015_s6 = scalar_lea.vmem %s2564_s1, %s1534_s3  ;;  %230 = sbr.rel (%p1538_p9) target bundleno = 51 (0x33), region = 32 }
  0x1a   : > { %vm231_vm0 = vcmask 7168   ;;  %vm264_vm1 = vcmask 31744   ;;  %v1936_v0 = vmov -inf   ;;  %v1937_v1 = vmov 0.0  }
  0x1b   : > { %232 = vst.msk [vmem:[#allocation2] sm:$0xff] %vm231_vm0, %v1936_v0  ;;  %233 = vst.msk [vmem:[#allocation2 + $0x8] sm:$0xff] %vm231_vm0, %v1936_v0 }
  0x1c   : > { %234 = vst.msk [vmem:[#allocation2 + $0x10] sm:$0xff] %vm231_vm0, %v1936_v0  ;;  %235 = vst.msk [vmem:[#allocation2 + $0x18] sm:$0xff] %vm231_vm0, %v1936_v0 }
  0x1d   : > { %236 = vst.msk [vmem:[#allocation2 + $0x20] sm:$0xff] %vm231_vm0, %v1936_v0  ;;  %237 = vst.msk [vmem:[#allocation2 + $0x28] sm:$0xff] %vm231_vm0, %v1936_v0 }
  0x1e   : > { %238 = vst.msk [vmem:[#allocation2 + $0x30] sm:$0xff] %vm231_vm0, %v1936_v0  ;;  %239 = vst.msk [vmem:[#allocation2 + $0x38] sm:$0xff] %vm231_vm0, %v1936_v0 }
  0x1f   : > { %240 = vst.msk [vmem:[#allocation2 + $0x40] sm:$0xff] %vm231_vm0, %v1936_v0  ;;  %241 = vst.msk [vmem:[#allocation2 + $0x48] sm:$0xff] %vm231_vm0, %v1936_v0 }
  0x20   : > { %242 = vst.msk [vmem:[#allocation2 + $0x50] sm:$0xff] %vm231_vm0, %v1936_v0  ;;  %243 = vst.msk [vmem:[#allocation2 + $0x58] sm:$0xff] %vm231_vm0, %v1936_v0 }
  0x21   : > { %244 = vst.msk [vmem:[#allocation2 + $0x60] sm:$0xff] %vm231_vm0, %v1936_v0  ;;  %245 = vst.msk [vmem:[#allocation2 + $0x68] sm:$0xff] %vm231_vm0, %v1936_v0 }
  0x22   : > { %246 = vst.msk [vmem:[#allocation2 + $0x70] sm:$0xff] %vm231_vm0, %v1936_v0  ;;  %247 = vst.msk [vmem:[#allocation2 + $0x78] sm:$0xff] %vm231_vm0, %v1936_v0 }
  0x23   : > { %248 = vst.msk [vmem:[#allocation3] sm:$0xff] %vm231_vm0, %v1937_v1  ;;  %249 = vst.msk [vmem:[#allocation3 + $0x8] sm:$0xff] %vm231_vm0, %v1937_v1 }
  0x24   : > { %250 = vst.msk [vmem:[#allocation3 + $0x10] sm:$0xff] %vm231_vm0, %v1937_v1  ;;  %251 = vst.msk [vmem:[#allocation3 + $0x18] sm:$0xff] %vm231_vm0, %v1937_v1 }
  0x25   : > { %252 = vst.msk [vmem:[#allocation3 + $0x20] sm:$0xff] %vm231_vm0, %v1937_v1  ;;  %253 = vst.msk [vmem:[#allocation3 + $0x28] sm:$0xff] %vm231_vm0, %v1937_v1 }
  0x26   : > { %254 = vst.msk [vmem:[#allocation3 + $0x30] sm:$0xff] %vm231_vm0, %v1937_v1  ;;  %255 = vst.msk [vmem:[#allocation3 + $0x38] sm:$0xff] %vm231_vm0, %v1937_v1 }
  0x27   : > { %256 = vst.msk [vmem:[#allocation3 + $0x40] sm:$0xff] %vm231_vm0, %v1937_v1  ;;  %257 = vst.msk [vmem:[#allocation3 + $0x48] sm:$0xff] %vm231_vm0, %v1937_v1 }
  0x28   : > { %258 = vst.msk [vmem:[#allocation3 + $0x50] sm:$0xff] %vm231_vm0, %v1937_v1  ;;  %259 = vst.msk [vmem:[#allocation3 + $0x58] sm:$0xff] %vm231_vm0, %v1937_v1 }
  0x29   : > { %260 = vst.msk [vmem:[#allocation3 + $0x60] sm:$0xff] %vm231_vm0, %v1937_v1  ;;  %261 = vst.msk [vmem:[#allocation3 + $0x68] sm:$0xff] %vm231_vm0, %v1937_v1 }
  0x2a   : > { %262 = vst.msk [vmem:[#allocation3 + $0x70] sm:$0xff] %vm231_vm0, %v1937_v1  ;;  %263 = vst.msk [vmem:[#allocation3 + $0x78] sm:$0xff] %vm231_vm0, %v1937_v1 }
  0x2b   : > { %265 = vst.msk [vmem:[#allocation4] sm:$0xff] %vm264_vm1, %v1937_v1  ;;  %266 = vst.msk [vmem:[#allocation4 + $0x8] sm:$0xff] %vm264_vm1, %v1937_v1 }
  0x2c   : > { %267 = vst.msk [vmem:[#allocation4 + $0x10] sm:$0xff] %vm264_vm1, %v1937_v1  ;;  %268 = vst.msk [vmem:[#allocation4 + $0x18] sm:$0xff] %vm264_vm1, %v1937_v1 }
  0x2d   : > { %269 = vst.msk [vmem:[#allocation4 + $0x20] sm:$0xff] %vm264_vm1, %v1937_v1  ;;  %270 = vst.msk [vmem:[#allocation4 + $0x28] sm:$0xff] %vm264_vm1, %v1937_v1 }
  0x2e   : > { %271 = vst.msk [vmem:[#allocation4 + $0x30] sm:$0xff] %vm264_vm1, %v1937_v1  ;;  %272 = vst.msk [vmem:[#allocation4 + $0x38] sm:$0xff] %vm264_vm1, %v1937_v1 }
  0x2f   : > { %273 = vst.msk [vmem:[#allocation4 + $0x40] sm:$0xff] %vm264_vm1, %v1937_v1  ;;  %274 = vst.msk [vmem:[#allocation4 + $0x48] sm:$0xff] %vm264_vm1, %v1937_v1 }
  0x30   : > { %275 = vst.msk [vmem:[#allocation4 + $0x50] sm:$0xff] %vm264_vm1, %v1937_v1  ;;  %276 = vst.msk [vmem:[#allocation4 + $0x58] sm:$0xff] %vm264_vm1, %v1937_v1 }
  0x31   : > { %277 = vst.msk [vmem:[#allocation4 + $0x60] sm:$0xff] %vm264_vm1, %v1937_v1  ;;  %278 = vst.msk [vmem:[#allocation4 + $0x68] sm:$0xff] %vm264_vm1, %v1937_v1 }
  0x32   : > { %279 = vst.msk [vmem:[#allocation4 + $0x70] sm:$0xff] %vm264_vm1, %v1937_v1  ;;  %280 = vst.msk [vmem:[#allocation4 + $0x78] sm:$0xff] %vm264_vm1, %v1937_v1 }
  0x33 PF: > { %v2067_v2 = vld [vmem:[%s2015_s6 + $0x38] sm:$0xff]   ;;  %v2070_v3 = vld [vmem:[%s2015_s6 + $0x30] sm:$0xff]   ;;  %s1938_s7 = smov 124   ;;  %v2074_v4 = vld [vmem:[%s2015_s6 + $0x28] sm:$0xff]   ;;  %vm409_vm2 = vcmask 31744   ;;  %v1939_v41 = vmov 0  }
  0x34   : > { %407 = vrot.lane.b32.xlu0 %v2067_v2, %s1938_s7  ;;  %403 = vrot.lane.b32.xlu1 %v2074_v4, %s1938_s7  ;;  %v2078_v5 = vld [vmem:[%s2015_s6 + $0x20] sm:$0xff]   ;;  %v2082_v6 = vld [vmem:[%s2015_s6 + $0x18] sm:$0xff]   ;;  %s1940_s8 = smov 120   ;;  %v2190_v51 = vld [vmem:[#allocation2 + $0x10] sm:$0xff]  ;;  %vm875_vm3 = vcmask 7168   ;;  %p1563_p10 = scmp.ne.s32.totalorder %s1910_s9, 1 }
  0x35   : > { %v2085_v7 = vld [vmem:[%s2015_s6 + $0x10] sm:$0xff]   ;;  %v2089_v8 = vld [vmem:[%s2015_s6 + $0x8] sm:$0xff]   ;;  %v2093_v9 = vld [vmem:[%s2015_s6] sm:$0xff]   ;;  %1764 = vset.pattern.permute.xlu0 %v1939_v41  ;;  %1765 = vset.pattern.permute.xlu1 %v1939_v41 }
  0x36   : > { %v1774_v10 = vld [vmem:[%s2005_s26] sm:$0xff]   ;;  %v1775_v27 = vld [vmem:[%s2005_s26 + $0x8] sm:$0xff]   ;;  %v1776_v28 = vld [vmem:[%s2005_s26 + $0x10] sm:$0xff]  }
  0x37   : > { %1646 = vmatprep.mubr.msk.bf16.mxu0 %vm409_vm2, %v1774_v10  ;;  %v1777_v29 = vld [vmem:[%s2005_s26 + $0x18] sm:$0xff]   ;;  %v1778_v30 = vld [vmem:[%s2005_s26 + $0x20] sm:$0xff]   ;;  %v1779_v31 = vld [vmem:[%s2005_s26 + $0x28] sm:$0xff]  }
  0x38   : > { %405 = vrot.lane.b32.xlu0 %v2070_v3, %s1938_s7  ;;  %401 = vrot.lane.b32.xlu1 %v2078_v5, %s1938_s7  ;;  %v1780_v32 = vld [vmem:[%s2005_s26 + $0x30] sm:$0xff]   ;;  %v1781_v33 = vld [vmem:[%s2005_s26 + $0x38] sm:$0xff]   ;;  %v2195_v54 = vld [vmem:[#allocation2] sm:$0xff] }
  0x39   : > { %v556_v56 = vld [vmem:[#allocation2 + $0x8] sm:$0xff]  ;;  %v2203_v59 = vld [vmem:[#allocation2 + $0x18] sm:$0xff]  ;;  %v2208_v62 = vld [vmem:[#allocation2 + $0x30] sm:$0xff] }
  0x3a   : > { %v2232_v10 = vld [vmem:[#allocation2 + $0x38] sm:$0xff] }
  0x3c   : > { %399 = vrot.lane.b32.xlu0 %v2082_v6, %s1938_s7  ;;  %397 = vrot.lane.b32.xlu1 %v2085_v7, %s1938_s7 }
  0x40   : > { %395 = vrot.lane.b32.xlu0 %v2089_v8, %s1938_s7  ;;  %393 = vrot.lane.b32.xlu1 %v2093_v9, %s1938_s7 }
  0xa6   : > { %v408_v11 = vpop.permute.xlu0 %407  ;;  %v404_v15 = vpop.permute.xlu1 %403 }
  0xa7   : > { %1694 = vmatprep.subr.msk.bf16.mxu0 %vm409_vm2, %v408_v11  ;;  %v456_v12 = vsel %vm409_vm2, %v408_v11, 0  ;;  %v450_v16 = vsel %vm409_vm2, %v404_v15, 0  ;;  %v2234_v11 = vld [vmem:[#allocation2 + $0x50] sm:$0xff] }
  0xa8   : > { %1631 = vmatpush3.bf16.xpose.msra.mxu0 %v456_v12 }
  0xaa   : > { %v406_v13 = vpop.permute.xlu0 %405  ;;  %v402_v17 = vpop.permute.xlu1 %401 }
  0xab   : > { %1695 = vmatprep.subr.msk.bf16.mxu0 %vm409_vm2, %v406_v13  ;;  %v453_v14 = vsel %vm409_vm2, %v406_v13, 0  ;;  %v447_v18 = vsel %vm409_vm2, %v402_v17, 0 }
  0xae   : > { %v400_v19 = vpop.permute.xlu0 %399  ;;  %v398_v21 = vpop.permute.xlu1 %397 }
  0xaf   : > { %v444_v20 = vsel %vm409_vm2, %v400_v19, 0  ;;  %v441_v22 = vsel %vm409_vm2, %v398_v21, 0 }
  0xb0   : > { %1633 = vmatpush3.bf16.xpose.msra.mxu0 %v453_v14 }
  0xb1   : > { %1696 = vmatprep.subr.msk.bf16.mxu0 %vm409_vm2, %v404_v15 }
  0xb2   : > { %v396_v23 = vpop.permute.xlu0 %395  ;;  %v394_v25 = vpop.permute.xlu1 %393 }
  0xb3   : > { %v438_v24 = vsel %vm409_vm2, %v396_v23, 0  ;;  %v435_v26 = vsel %vm409_vm2, %v394_v25, 0 }
  0xb8   : > { %1635 = vmatpush3.bf16.xpose.msra.mxu0 %v450_v16  ;;  %v2247_v16 = vld [vmem:[#allocation2 + $0x40] sm:$0xff] }
  0xb9   : > { %1697 = vmatprep.subr.msk.bf16.mxu0 %vm409_vm2, %v402_v17  ;;  %v2249_v17 = vld [vmem:[#allocation2 + $0x48] sm:$0xff] }
  0xc0   : > { %1637 = vmatpush3.bf16.xpose.msra.mxu0 %v447_v18 }
  0xc1   : > { %1698 = vmatprep.subr.msk.bf16.mxu0 %vm409_vm2, %v400_v19 }
  0xc8   : > { %1639 = vmatpush3.bf16.xpose.msra.mxu0 %v444_v20 }
  0xc9   : > { %1699 = vmatprep.subr.msk.bf16.mxu0 %vm409_vm2, %v398_v21 }
  0xd0   : > { %1641 = vmatpush3.bf16.xpose.msra.mxu0 %v441_v22  ;;  %v2263_v22 = vld [vmem:[#allocation2 + $0x58] sm:$0xff] }
  0xd1   : > { %1700 = vmatprep.subr.msk.bf16.mxu0 %vm409_vm2, %v396_v23  ;;  %v2265_v23 = vld [vmem:[#allocation2 + $0x70] sm:$0xff] }
  0xd8   : > { %1643 = vmatpush3.bf16.xpose.msra.mxu0 %v438_v24 }
  0xd9   : > { %1701 = vmatprep.subr.msk.bf16.mxu0 %vm409_vm2, %v394_v25 }
  0xe0   : > { %1645 = vmatpush3.bf16.xpose.msra.mxu0 %v435_v26 }
  0xe7   : > { %1647 = vmatmul.mubr.msk.bf16.vlgmr.msra.gmra.mxu0 %vm409_vm2, %v1775_v27 }
  0xe8   : > { %1650 = vmatprep.mubr.msk.bf16.mxu0 %vm409_vm2, %v1776_v28 }
  0xef   : > { %1651 = vmatmul.mubr.msk.bf16.gmra.mxu0 %vm409_vm2, %v1777_v29 }
  0xf0   : > { %1654 = vmatprep.mubr.msk.bf16.mxu0 %vm409_vm2, %v1778_v30  ;;  %v2281_v30 = vld [vmem:[#allocation2 + $0x68] sm:$0xff] }
  0xf7   : > { %1655 = vmatmul.mubr.msk.bf16.gmra.mxu0 %vm409_vm2, %v1779_v31  ;;  %v2283_v31 = vld [vmem:[#allocation2 + $0x60] sm:$0xff] }
  0xf8   : > { %1658 = vmatprep.mubr.msk.bf16.mxu0 %vm409_vm2, %v1780_v32 }
  0xff   : > { %1659 = vmatmul.mubr.msk.bf16.gmra.mxu0 %vm409_vm2, %v1781_v33 }
 0x1a7   : > { %v2130_v34 = vpop.f32.mrf.mxu0 }
 0x1a8   : > { %575 = vmax.xlane.f32.xlu0 %v2130_v34 }
 0x1a9   : > { %v2133_v35 = vpop.f32.mrf.mxu0 }
 0x1ab   : > { %v2135_v36 = vpop.f32.mrf.mxu0 }
 0x1ac   : > { %571 = vmax.xlane.f32.xlu0 %v2133_v35 }
 0x1ad   : > { %v2138_v37 = vpop.f32.mrf.mxu0 }
 0x1ae   : > { %573 = vmax.xlane.f32.xlu1 %v2138_v37 }
 0x1af   : > { %v2141_v38 = vpop.f32.mrf.mxu0 }
 0x1b0   : > { %577 = vmax.xlane.f32.xlu0 %v2135_v36 }
 0x1b1   : > { %v2144_v39 = vpop.f32.mrf.mxu0 }
 0x1b2   : > { %583 = vmax.xlane.f32.xlu1 %v2141_v38 }
 0x1b3   : > { %v2147_v40 = vpop.f32.mrf.mxu0 }
 0x1b5   : > { %v2149_v42 = vpop.f32.mrf.mxu0 }
 0x1b6   : > { %579 = vmax.xlane.f32.xlu1 %v2144_v39  ;;  %581 = vmax.xlane.f32.xlu0 %v2149_v42 }
 0x1b7   : > { %v2153_v43 = vpop.f32.mrf.mxu0 }
 0x1b9   : > { %v2155_v44 = vpop.f32.mrf.mxu0 }
 0x1ba   : > { %585 = vmax.xlane.f32.xlu0 %v2147_v40  ;;  %591 = vmax.xlane.f32.xlu1 %v2153_v43 }
 0x1bb   : > { %v2159_v45 = vpop.f32.mrf.mxu0 }
 0x1bd   : > { %v2161_v46 = vpop.f32.mrf.mxu0 }
 0x1be   : > { %587 = vmax.xlane.f32.xlu1 %v2155_v44  ;;  %589 = vmax.xlane.f32.xlu0 %v2161_v46 }
 0x1bf   : > { %v2165_v47 = vpop.f32.mrf.mxu0 }
 0x1c1   : > { %v2167_v48 = vpop.f32.mrf.mxu0 }
 0x1c2   : > { %593 = vmax.xlane.f32.xlu0 %v2159_v45  ;;  %599 = vmax.xlane.f32.xlu1 %v2165_v47 }
 0x1c3   : > { %v2171_v49 = vpop.f32.mrf.mxu0 }
 0x1c5   : > { %v2173_v50 = vpop.f32.mrf.mxu0 }
 0x1c6   : > { %597 = vmax.xlane.f32.xlu0 %v2173_v50  ;;  %595 = vmax.xlane.f32.xlu1 %v2167_v48 }
 0x1ca   : > { %601 = vmax.xlane.f32.xlu0 %v2171_v49 }
 0x1d7   : > { %1026 = vrot.lane.b32.xlu1 %v2067_v2, %s1940_s8  ;;  %v2220_v2 = vld [vmem:[#allocation2 + $0x20] sm:$0xff] }
 0x1db   : > { %1022 = vrot.lane.b32.xlu1 %v2074_v4, %s1940_s8 }
 0x1df   : > { %1018 = vrot.lane.b32.xlu1 %v2082_v6, %s1940_s8 }
 0x1e0   : > { %1024 = vrot.lane.b32.xlu0 %v2070_v3, %s1940_s8  ;;  %v2222_v3 = vld [vmem:[#allocation2 + $0x28] sm:$0xff] }
 0x1e4   : > { %1020 = vrot.lane.b32.xlu0 %v2078_v5, %s1940_s8 }
 0x1e8   : > { %1016 = vrot.lane.b32.xlu0 %v2085_v7, %s1940_s8 }
 0x231   : > { %v576_v52 = vpop.xlane.xlu0 %575 }
 0x232   : > { %v2193_v53 = vmax.f32 %v2190_v51, %v576_v52 }
 0x234   : > { %1167 = vst.msk [vmem:[#allocation2 + $0x10] sm:$0xff] %vm875_vm3, %v2193_v53  ;;  %679 = vperm.xlu0 %1764, %v2193_v53   ;;  %v621_v32 = vsub.f32 %v2190_v51, %v2193_v53 }
 0x235   : > { %v572_v55 = vpop.xlane.xlu0 %571 }
 0x236   : > { %v2201_v57 = vmax.f32 %v2195_v54, %v572_v55 }
 0x237   : > { %v574_v58 = vpop.xlane.xlu1 %573 }
 0x238   : > { %1165 = vst.msk [vmem:[#allocation2] sm:$0xff] %vm875_vm3, %v2201_v57  ;;  %v604_v60 = vmax.f32 %v556_v56, %v574_v58  ;;  %669 = vperm.xlu1 %1765, %v2201_v57   ;;  %v619_v27 = vsub.f32 %v2195_v54, %v2201_v57  ;;  %v2303_v57 = vld [vmem:[#allocation2 + $0x78] sm:$0xff]  ;;  %v639_v58 = vmul.f32 1.442695, %v621_v32 }
 0x239   : > { %v578_v61 = vpop.xlane.xlu0 %577 }
 0x23a   : > { %1166 = vst.msk [vmem:[#allocation2 + $0x8] sm:$0xff] %vm875_vm3, %v604_v60  ;;  %v2212_v63 = vmax.f32 %v2203_v59, %v578_v61  ;;  %v620_v24 = vsub.f32 %v556_v56, %v604_v60  ;;  %v635_v55 = vmul.f32 1.442695, %v619_v27 }
 0x23b   : > { %v584_v0 = vpop.xlane.xlu1 %583 }
 0x23c   : > { %1168 = vst.msk [vmem:[#allocation2 + $0x18] sm:$0xff] %vm875_vm3, %v2212_v63  ;;  %v2217_v1 = vmax.f32 %v2208_v62, %v584_v0  ;;  %684 = vperm.xlu1 %1765, %v2212_v63   ;;  %v637_v33 = vmul.f32 1.442695, %v620_v24  ;;  %v622_v56 = vsub.f32 %v2203_v59, %v2212_v63 }
 0x23e   : > { %1171 = vst.msk [vmem:[#allocation2 + $0x30] sm:$0xff] %vm875_vm3, %v2217_v1  ;;  %1782 = vpow2.f32 %v637_v33  ;;  %v641_v63 = vmul.f32 1.442695, %v622_v56 }
 0x23f   : > { %v580_v4 = vpop.xlane.xlu1 %579  ;;  %v582_v5 = vpop.xlane.xlu0 %581  ;;  %1784 = vpow2.f32 %v635_v55 }
 0x240   : > { %v2227_v6 = vmax.f32 %v2220_v2, %v580_v4  ;;  %v2230_v7 = vmax.f32 %v2222_v3, %v582_v5  ;;  %674 = vperm.xlu1 %1765, %v604_v60   ;;  %1786 = vpow2.f32 %v639_v58 }
 0x241   : > { %1788 = vpow2.f32 %v641_v63 }
 0x242   : > { %1169 = vst.msk [vmem:[#allocation2 + $0x20] sm:$0xff] %vm875_vm3, %v2227_v6  ;;  %1170 = vst.msk [vmem:[#allocation2 + $0x28] sm:$0xff] %vm875_vm3, %v2230_v7  ;;  %v623_v60 = vsub.f32 %v2220_v2, %v2227_v6  ;;  %v625_v2 = vsub.f32 %v2208_v62, %v2217_v1 }
 0x243   : > { %v586_v12 = vpop.xlane.xlu0 %585  ;;  %v592_v13 = vpop.xlane.xlu1 %591 }
 0x244   : > { %v2241_v14 = vmax.f32 %v2232_v10, %v586_v12  ;;  %v2244_v15 = vmax.f32 %v2234_v11, %v592_v13  ;;  %699 = vperm.xlu1 %1765, %v2217_v1   ;;  %v643_v5 = vmul.f32 1.442695, %v623_v60  ;;  %v647_v62 = vmul.f32 1.442695, %v625_v2 }
 0x246   : > { %1172 = vst.msk [vmem:[#allocation2 + $0x38] sm:$0xff] %vm875_vm3, %v2241_v14  ;;  %1175 = vst.msk [vmem:[#allocation2 + $0x50] sm:$0xff] %vm875_vm3, %v2244_v15  ;;  %704 = vperm.xlu0 %1764, %v2241_v14   ;;  %v626_v0 = vsub.f32 %v2232_v10, %v2241_v14  ;;  %1790 = vpow2.f32 %v643_v5  ;;  %v629_v1 = vsub.f32 %v2234_v11, %v2244_v15 }
 0x247   : > { %v588_v18 = vpop.xlane.xlu1 %587  ;;  %v590_v19 = vpop.xlane.xlu0 %589 }
 0x248   : > { %v2257_v20 = vmax.f32 %v2247_v16, %v588_v18  ;;  %v2260_v21 = vmax.f32 %v2249_v17, %v590_v19  ;;  %689 = vperm.xlu1 %1765, %v2227_v6   ;;  %v649_v13 = vmul.f32 1.442695, %v626_v0 }
 0x24a   : > { %1173 = vst.msk [vmem:[#allocation2 + $0x40] sm:$0xff] %vm875_vm3, %v2257_v20  ;;  %1174 = vst.msk [vmem:[#allocation2 + $0x48] sm:$0xff] %vm875_vm3, %v2260_v21  ;;  %694 = vperm.xlu0 %1764, %v2230_v7   ;;  %1792 = vpow2.f32 %v649_v13  ;;  %v628_v19 = vsub.f32 %v2249_v17, %v2260_v21 }
 0x24b   : > { %v594_v25 = vpop.xlane.xlu0 %593  ;;  %v600_v26 = vpop.xlane.xlu1 %599  ;;  %1794 = vpow2.f32 %v647_v62 }
 0x24c   : > { %v2275_v28 = vmax.f32 %v2263_v22, %v594_v25  ;;  %719 = vperm.xlu1 %1765, %v2244_v15   ;;  %v2279_v29 = vmax.f32 %v2265_v23, %v600_v26  ;;  %v2339_v11 = vpop.eup %1782  ;;  %v653_v26 = vmul.f32 1.442695, %v628_v19 }
 0x24e   : > { %1176 = vst.msk [vmem:[#allocation2 + $0x58] sm:$0xff] %vm875_vm3, %v2275_v28  ;;  %724 = vperm.xlu0 %1764, %v2275_v28   ;;  %v633_v41 = vsub.f32 %v2265_v23, %v2279_v29  ;;  %1179 = vst.msk [vmem:[#allocation2 + $0x70] sm:$0xff] %vm875_vm3, %v2279_v29  ;;  %v630_v18 = vsub.f32 %v2263_v22, %v2275_v28  ;;  %v2344_v22 = vpop.eup %1784 }
 0x24f   : > { %v598_v52 = vpop.xlane.xlu0 %597  ;;  %v596_v54 = vpop.xlane.xlu1 %595 }
 0x250   : > { %v2297_v51 = vmax.f32 %v2281_v30, %v598_v52  ;;  %709 = vperm.xlu1 %1765, %v2257_v20   ;;  %v2301_v53 = vmax.f32 %v2283_v31, %v596_v54  ;;  %v657_v24 = vmul.f32 1.442695, %v630_v18 }
 0x252   : > { %1178 = vst.msk [vmem:[#allocation2 + $0x68] sm:$0xff] %vm875_vm3, %v2297_v51  ;;  %714 = vperm.xlu0 %1764, %v2260_v21   ;;  %1177 = vst.msk [vmem:[#allocation2 + $0x60] sm:$0xff] %vm875_vm3, %v2301_v53  ;;  %v632_v17 = vsub.f32 %v2281_v30, %v2297_v51 }
 0x253   : > { %v602_v59 = vpop.xlane.xlu0 %601  ;;  %v1027_v61 = vpop.permute.xlu1 %1026 }
 0x254   : > { %v2315_v4 = vmax.f32 %v2303_v57, %v602_v59  ;;  %1014 = vrot.lane.b32.xlu1 %v2089_v8, %s1940_s8  ;;  %1662 = vmatprep.subr.bf16.mxu1 %v1027_v61  ;;  %v624_v8 = vsub.f32 %v2222_v3, %v2230_v7  ;;  %v655_v3 = vmul.f32 1.442695, %v629_v1  ;;  %v627_v7 = vsub.f32 %v2247_v16, %v2257_v20  ;;  %v2349_v20 = vpop.eup %1786 }
 0x255   : > { %1663 = vmatpush3.bf16.msra.mxu1 %v1027_v61  ;;  %v631_v16 = vsub.f32 %v2283_v31, %v2301_v53  ;;  %v2354_v21 = vpop.eup %1788  ;;  %v661_v32 = vmul.f32 1.442695, %v632_v17 }
 0x256   : > { %v634_v6 = vsub.f32 %v2303_v57, %v2315_v4  ;;  %1180 = vst.msk [vmem:[#allocation2 + $0x78] sm:$0xff] %vm875_vm3, %v2315_v4  ;;  %1012 = vrot.lane.b32.xlu0 %v2093_v9, %s1940_s8  ;;  %v645_v14 = vmul.f32 1.442695, %v624_v8  ;;  %v651_v25 = vmul.f32 1.442695, %v627_v7  ;;  %v2357_v31 = vpop.eup %1790 }
 0x257   : > { %v1025_v10 = vpop.permute.xlu0 %1024  ;;  %v1023_v12 = vpop.permute.xlu1 %1022  ;;  %v659_v28 = vmul.f32 1.442695, %v631_v16 }
 0x258   : > { %729 = vperm.xlu1 %1765, %v2301_v53   ;;  %1664 = vmatprep.subr.bf16.mxu1 %v1025_v10  ;;  %1796 = vpow2.f32 %v645_v14  ;;  %v2360_v33 = vpop.eup %1792 }
 0x259   : > { %1665 = vmatpush3.bf16.msra.mxu1 %v1025_v10  ;;  %1798 = vpow2.f32 %v655_v3  ;;  %v2363_v30 = vpop.eup %1794 }
 0x25a   : > { %734 = vperm.xlu0 %1764, %v2297_v51   ;;  %1666 = vmatprep.subr.bf16.mxu1 %v1023_v12  ;;  %1800 = vpow2.f32 %v657_v24 }
 0x25b   : > { %v1021_v9 = vpop.permute.xlu0 %1020  ;;  %v1019_v15 = vpop.permute.xlu1 %1018  ;;  %1802 = vpow2.f32 %v651_v25 }
 0x25c   : > { %739 = vperm.xlu1 %1765, %v2279_v29   ;;  %1804 = vpow2.f32 %v653_v26 }
 0x25d   : > { %1667 = vmatpush3.bf16.msra.mxu1 %v1023_v12  ;;  %1806 = vpow2.f32 %v659_v28 }
 0x25e   : > { %744 = vperm.xlu0 %1764, %v2315_v4   ;;  %1668 = vmatprep.subr.bf16.mxu1 %v1021_v9  ;;  %1808 = vpow2.f32 %v661_v32 }
 0x25f   : > { %v1017_v27 = vpop.permute.xlu0 %1016 }
 0x260   : > { %915 = vperm.xlu1 %1765, %v2339_v11  }
 0x261   : > { %1669 = vmatpush3.bf16.msra.mxu1 %v1021_v9 }
 0x262   : > { %910 = vperm.xlu0 %1764, %v2344_v22   ;;  %1670 = vmatprep.subr.bf16.mxu1 %v1019_v15 }
 0x264   : > { %920 = vperm.xlu1 %1765, %v2349_v20  }
 0x265   : > { %1671 = vmatpush3.bf16.msra.mxu1 %v1019_v15  ;;  %v2366_v52 = vpop.eup %1796 }
 0x266   : > { %925 = vperm.xlu0 %1764, %v2354_v21   ;;  %1672 = vmatprep.subr.bf16.mxu1 %v1017_v27  ;;  %v2369_v54 = vpop.eup %1798 }
 0x267   : > { %v2372_v55 = vpop.eup %1800 }
 0x268   : > { %930 = vperm.xlu1 %1765, %v2357_v31   ;;  %v2375_v56 = vpop.eup %1802 }
 0x269   : > { %1673 = vmatpush3.bf16.msra.mxu1 %v1017_v27  ;;  %v2378_v51 = vpop.eup %1804 }
 0x26a   : > { %945 = vperm.xlu0 %1764, %v2360_v33   ;;  %v2381_v53 = vpop.eup %1806 }
 0x26b   : > { %v2384_v58 = vpop.eup %1808 }
 0x26c   : > { %940 = vperm.xlu1 %1765, %v2363_v30  }
 0x26e   : > { %935 = vperm.xlu0 %1764, %v2366_v52  }
 0x270   : > { %960 = vperm.xlu1 %1765, %v2369_v54  }
 0x272   : > { %965 = vperm.xlu0 %1764, %v2372_v55  }
 0x274   : > { %950 = vperm.xlu1 %1765, %v2375_v56  }
 0x276   : > { %955 = vperm.xlu0 %1764, %v2378_v51  }
 0x278   : > { %970 = vperm.xlu1 %1765, %v2381_v53  }
 0x27a   : > { %975 = vperm.xlu0 %1764, %v2384_v58  }
 0x2af   : > { %v680_v60 = vpop.permute.xlu0 %679 }
 0x2b0   : > { %v749_v59 = vsub.f32 %v2130_v34, %v680_v60 }
 0x2b2   : > { %v767_v61 = vmul.f32 1.442695, %v749_v59 }
 0x2b3   : > { %v670_v63 = vpop.permute.xlu1 %669 }
 0x2b4   : > { %1810 = vpow2.f32 %v767_v61  ;;  %v747_v0 = vsub.f32 %v2133_v35, %v670_v63 }
 0x2b6   : > { %v763_v2 = vmul.f32 1.442695, %v747_v0 }
 0x2b7   : > { %v685_v5 = vpop.permute.xlu1 %684 }
 0x2b8   : > { %1812 = vpow2.f32 %v763_v2  ;;  %v750_v10 = vsub.f32 %v2135_v36, %v685_v5 }
 0x2ba   : > { %v769_v12 = vmul.f32 1.442695, %v750_v10 }
 0x2bb   : > { %v675_v8 = vpop.permute.xlu1 %674 }
 0x2bc   : > { %1814 = vpow2.f32 %v769_v12  ;;  %v748_v13 = vsub.f32 %v2138_v37, %v675_v8 }
 0x2be   : > { %v765_v62 = vmul.f32 1.442695, %v748_v13 }
 0x2bf   : > { %v700_v1 = vpop.permute.xlu1 %699 }
 0x2c0   : > { %1816 = vpow2.f32 %v765_v62  ;;  %v753_v34 = vsub.f32 %v2141_v38, %v700_v1 }
 0x2c1   : > { %v2392_v9 = vpop.eup %1810  ;;  %v705_v14 = vpop.permute.xlu0 %704 }
 0x2c2   : > { %v775_v18 = vmul.f32 1.442695, %v753_v34  ;;  %v754_v35 = vsub.f32 %v2147_v40, %v705_v14  ;;  %831 = vadd.xlane.f32.xlu0 %v2392_v9 }
 0x2c3   : > { %v690_v3 = vpop.permute.xlu1 %689 }
 0x2c4   : > { %1818 = vpow2.f32 %v775_v18  ;;  %v777_v36 = vmul.f32 1.442695, %v754_v35  ;;  %v751_v7 = vsub.f32 %v2144_v39, %v690_v3 }
 0x2c5   : > { %v1813_v15 = vpop.eup %1812  ;;  %v695_v37 = vpop.permute.xlu0 %694 }
 0x2c6   : > { %1820 = vpow2.f32 %v777_v36  ;;  %v771_v19 = vmul.f32 1.442695, %v751_v7  ;;  %v752_v24 = vsub.f32 %v2149_v42, %v695_v37  ;;  %827 = vadd.xlane.f32.xlu1 %v1813_v15 }
 0x2c7   : > { %v720_v38 = vpop.permute.xlu1 %719 }
 0x2c8   : > { %1822 = vpow2.f32 %v771_v19  ;;  %v773_v25 = vmul.f32 1.442695, %v752_v24  ;;  %v757_v16 = vsub.f32 %v2153_v43, %v720_v38 }
 0x2c9   : > { %v1815_v40 = vpop.eup %1814  ;;  %v725_v26 = vpop.permute.xlu0 %724 }
 0x2ca   : > { %1824 = vpow2.f32 %v773_v25  ;;  %v783_v17 = vmul.f32 1.442695, %v757_v16  ;;  %v758_v27 = vsub.f32 %v2159_v45, %v725_v26  ;;  %833 = vadd.xlane.f32.xlu1 %v1815_v40  ;;  %v1005_v62 = vpack.c.bf16 %v1815_v40, %v2392_v9 }
 0x2cb   : > { %v710_v39 = vpop.permute.xlu1 %709 }
 0x2cc   : > { %1826 = vpow2.f32 %v783_v17  ;;  %v785_v28 = vmul.f32 1.442695, %v758_v27  ;;  %v755_v32 = vsub.f32 %v2155_v44, %v710_v39  ;;  %v663_v17 = vmul.f32 1.442695, %v633_v41 }
 0x2cd   : > { %v1817_v60 = vpop.eup %1816  ;;  %v715_v42 = vpop.permute.xlu0 %714  ;;  %v665_v27 = vmul.f32 1.442695, %v634_v6 }
 0x2ce   : > { %1828 = vpow2.f32 %v785_v28  ;;  %v779_v59 = vmul.f32 1.442695, %v755_v32  ;;  %v756_v61 = vsub.f32 %v2161_v46, %v715_v42  ;;  %829 = vadd.xlane.f32.xlu0 %v1817_v60  ;;  %v1004_v43 = vpack.c.bf16 %v1817_v60, %v1813_v15 }
 0x2cf   : > { %v1015_v63 = vpop.permute.xlu1 %1014 }
 0x2d0   : > { %1830 = vpow2.f32 %v779_v59  ;;  %v781_v0 = vmul.f32 1.442695, %v756_v61  ;;  %1674 = vmatprep.subr.bf16.mxu1 %v1015_v63  ;;  %1678 = vmatprep.mubr.bf16.mxu1 %v1004_v43 }
 0x2d1   : > { %v1819_v45 = vpop.eup %1818  ;;  %1675 = vmatpush3.bf16.msra.mxu1 %v1015_v63  ;;  %v1013_v2 = vpop.permute.xlu0 %1012 }
 0x2d2   : > { %1832 = vpow2.f32 %v781_v0  ;;  %839 = vadd.xlane.f32.xlu0 %v1819_v45  ;;  %1676 = vmatprep.subr.bf16.mxu1 %v1013_v2  ;;  %v797_v0 = vld [vmem:[#allocation3 + $0x10] sm:$0xff] }
 0x2d3   : > { %v1821_v44 = vpop.eup %1820  ;;  %v730_v5 = vpop.permute.xlu1 %729 }
 0x2d4   : > { %v759_v10 = vsub.f32 %v2167_v48, %v730_v5  ;;  %841 = vadd.xlane.f32.xlu1 %v1821_v44  ;;  %v795_v5 = vld [vmem:[#allocation3] sm:$0xff] }
 0x2d5   : > { %v1823_v12 = vpop.eup %1822  ;;  %1677 = vmatpush3.bf16.msra.mxu1 %v1013_v2  ;;  %v735_v46 = vpop.permute.xlu0 %734 }
 0x2d6   : > { %v787_v8 = vmul.f32 1.442695, %v759_v10  ;;  %v760_v13 = vsub.f32 %v2173_v50, %v735_v46  ;;  %835 = vadd.xlane.f32.xlu0 %v1823_v12 }
 0x2d7   : > { %v1825_v1 = vpop.eup %1824  ;;  %v740_v34 = vpop.permute.xlu1 %739 }
 0x2d8   : > { %v789_v14 = vmul.f32 1.442695, %v760_v13  ;;  %v761_v18 = vsub.f32 %v2165_v47, %v740_v34  ;;  %837 = vadd.xlane.f32.xlu1 %v1825_v1  ;;  %1679 = vmatmul.mubr.bf16.vlgmr.msra.gmra.mxu1 %v1005_v62  ;;  %v1006_v35 = vpack.c.bf16 %v1825_v1, %v1823_v12  ;;  %1834 = vpow2.f32 %v787_v8  ;;  %v798_v8 = vld [vmem:[#allocation3 + $0x18] sm:$0xff]  ;;  %v796_v34 = vld [vmem:[#allocation3 + $0x8] sm:$0xff] }
 0x2d9   : > { %v1827_v3 = vpop.eup %1826  ;;  %v745_v48 = vpop.permute.xlu0 %744  ;;  %v1007_v47 = vpack.c.bf16 %v1821_v44, %v1819_v45  ;;  %v813_v45 = vmul.f32 %v2349_v20, %v797_v0  ;;  %v811_v12 = vmul.f32 %v2344_v22, %v795_v5  ;;  %v814_v62 = vmul.f32 %v2354_v21, %v798_v8 }
 0x2da   : > { %1836 = vpow2.f32 %v789_v14  ;;  %v791_v36 = vmul.f32 1.442695, %v761_v18  ;;  %v762_v7 = vsub.f32 %v2171_v49, %v745_v48  ;;  %847 = vadd.xlane.f32.xlu0 %v1827_v3  ;;  %1682 = vmatprep.mubr.bf16.mxu1 %v1006_v35  ;;  %v812_v20 = vmul.f32 %v2339_v11, %v796_v34  ;;  %v801_v35 = vld [vmem:[#allocation3 + $0x30] sm:$0xff]  ;;  %v802_v48 = vld [vmem:[#allocation3 + $0x38] sm:$0xff]  ;;  %v808_v34 = vld [vmem:[#allocation3 + $0x68] sm:$0xff] }
 0x2db   : > { %v1829_v50 = vpop.eup %1828  ;;  %v2421_v23 = vpop.permute.xlu1 %915  ;;  %v817_v22 = vmul.f32 %v2363_v30, %v801_v35  ;;  %v818_v21 = vmul.f32 %v2360_v33, %v802_v48  ;;  %v824_v35 = vmul.f32 %v2384_v58, %v808_v34  ;;  %v892_v48 = vld [vmem:[#allocation4] sm:$0xff]  ;;  %v907_v34 = vld [vmem:[#allocation4 + $0x78] sm:$0xff] }
 0x2dc   : > { %1838 = vpow2.f32 %v791_v36  ;;  %v793_v9 = vmul.f32 1.442695, %v762_v7  ;;  %849 = vadd.xlane.f32.xlu1 %v1829_v50  ;;  %v1009_v38 = vpack.c.bf16 %v1829_v50, %v1827_v3  ;;  %v799_v7 = vld [vmem:[#allocation3 + $0x20] sm:$0xff] }
 0x2dd   : > { %v1831_v15 = vpop.eup %1830  ;;  %v2419_v32 = vpop.permute.xlu0 %910  ;;  %v815_v11 = vmul.f32 %v2357_v31, %v799_v7 }
 0x2de   : > { %1840 = vpow2.f32 %v793_v9  ;;  %843 = vadd.xlane.f32.xlu0 %v1831_v15 }
 0x2df   : > { %v1833_v37 = vpop.eup %1832  ;;  %1842 = vpow2.f32 %v663_v17  ;;  %v2425_v41 = vpop.permute.xlu1 %920 }
 0x2e0   : > { %845 = vadd.xlane.f32.xlu1 %v1833_v37  ;;  %1683 = vmatmul.mubr.bf16.gmra.mxu1 %v1007_v47  ;;  %v1008_v19 = vpack.c.bf16 %v1833_v37, %v1831_v15  ;;  %1844 = vpow2.f32 %v665_v27  ;;  %v800_v15 = vld [vmem:[#allocation3 + $0x28] sm:$0xff] }
 0x2e1   : > { %v2423_v29 = vpop.permute.xlu0 %925  ;;  %v804_v27 = vld [vmem:[#allocation3 + $0x48] sm:$0xff] }
 0x2e2   : > { %1686 = vmatprep.mubr.bf16.mxu1 %v1008_v19  ;;  %v805_v19 = vld [vmem:[#allocation3 + $0x50] sm:$0xff] }
 0x2e3   : > { %v2429_v4 = vpop.permute.xlu1 %930  ;;  %v821_v33 = vmul.f32 %v2369_v54, %v805_v19  ;;  %v820_v54 = vmul.f32 %v2378_v51, %v804_v27  ;;  %v900_v27 = vld [vmem:[#allocation4 + $0x40] sm:$0xff] }
 0x2e5   : > { %v1835_v24 = vpop.eup %1834  ;;  %v2427_v57 = vpop.permute.xlu0 %945 }
 0x2e7   : > { %v1837_v25 = vpop.eup %1836  ;;  %v2433_v60 = vpop.permute.xlu1 %940 }
 0x2e8   : > { %1687 = vmatmul.mubr.bf16.gmra.mxu1 %v1009_v38  ;;  %v1010_v49 = vpack.c.bf16 %v1837_v25, %v1835_v24  ;;  %v816_v38 = vmul.f32 %v2366_v52, %v800_v15 }
 0x2e9   : > { %v1839_v16 = vpop.eup %1838  ;;  %v2431_v6 = vpop.permute.xlu0 %935 }
 0x2ea   : > { %855 = vadd.xlane.f32.xlu0 %v1839_v16  ;;  %1690 = vmatprep.mubr.bf16.mxu1 %v1010_v49 }
 0x2eb   : > { %v1841_v40 = vpop.eup %1840  ;;  %v2437_v59 = vpop.permute.xlu1 %960 }
 0x2ec   : > { %857 = vadd.xlane.f32.xlu1 %v1841_v40  ;;  %v1011_v26 = vpack.c.bf16 %v1841_v40, %v1839_v16  ;;  %v2413_v39 = vpop.eup %1842  ;;  %v803_v40 = vld [vmem:[#allocation3 + $0x40] sm:$0xff] }
 0x2ed   : > { %v2416_v28 = vpop.eup %1844  ;;  %v2435_v42 = vpop.permute.xlu0 %965  ;;  %v819_v52 = vmul.f32 %v2375_v56, %v803_v40 }
 0x2ee   : > { %851 = vadd.xlane.f32.xlu0 %v1835_v24 }
 0x2ef   : > { %v2441_v43 = vpop.permute.xlu1 %950 }
 0x2f0   : > { %853 = vadd.xlane.f32.xlu1 %v1837_v25  ;;  %1691 = vmatmul.mubr.bf16.gmra.mxu1 %v1011_v26  ;;  %v806_v25 = vld [vmem:[#allocation3 + $0x58] sm:$0xff] }
 0x2f1   : > { %v2439_v61 = vpop.permute.xlu0 %955  ;;  %v822_v31 = vmul.f32 %v2372_v55, %v806_v25  ;;  %v809_v55 = vld [vmem:[#allocation3 + $0x70] sm:$0xff] }
 0x2f3   : > { %v2446_v2 = vpop.permute.xlu1 %970 }
 0x2f5   : > { %v2443_v63 = vpop.permute.xlu0 %975 }
 0x301   : > { %980 = vperm.xlu1 %1765, %v2413_v39  }
 0x304   : > { %985 = vperm.xlu0 %1764, %v2416_v28  }
 0x34b   : > { %v832_v44 = vpop.xlane.xlu0 %831 }
 0x34c   : > { %v861_v10 = vadd.f32 %v832_v44, %v813_v45 }
 0x34e   : > { %878 = vst.msk [vmem:[#allocation3 + $0x10] sm:$0xff] %vm875_vm3, %v861_v10 }
 0x34f   : > { %v828_v46 = vpop.xlane.xlu1 %827 }
 0x350   : > { %v859_v13 = vadd.f32 %v828_v46, %v811_v12  ;;  %v810_v12 = vld [vmem:[#allocation3 + $0x78] sm:$0xff]  ;;  %v825_v46 = vmul.f32 %v2413_v39, %v809_v55 }
 0x351   : > { %v826_v56 = vmul.f32 %v2416_v28, %v810_v12  ;;  %v894_v28 = vld [vmem:[#allocation4 + $0x10] sm:$0xff] }
 0x352   : > { %876 = vst.msk [vmem:[#allocation3] sm:$0xff] %vm875_vm3, %v859_v13  ;;  %v807_v13 = vld [vmem:[#allocation3 + $0x60] sm:$0xff]  ;;  %v906_v12 = vld [vmem:[#allocation4 + $0x70] sm:$0xff] }
 0x353   : > { %v834_v1 = vpop.xlane.xlu1 %833 }
 0x354   : > { %v862_v14 = vadd.f32 %v834_v1, %v814_v62 }
 0x356   : > { %879 = vst.msk [vmem:[#allocation3 + $0x18] sm:$0xff] %vm875_vm3, %v862_v14  ;;  %v823_v14 = vmul.f32 %v2381_v53, %v807_v13  ;;  %v988_v53 = vmul.f32 %v2419_v32, %v892_v48 }
 0x357   : > { %v830_v18 = vpop.xlane.xlu0 %829 }
 0x358   : > { %v860_v3 = vadd.f32 %v830_v18, %v812_v20 }
 0x35a   : > { %877 = vst.msk [vmem:[#allocation3 + $0x8] sm:$0xff] %vm875_vm3, %v860_v3 }
 0x35b   : > { %v840_v36 = vpop.xlane.xlu0 %839 }
 0x35c   : > { %v865_v50 = vadd.f32 %v840_v36, %v817_v22  ;;  %v990_v22 = vmul.f32 %v2425_v41, %v894_v28  ;;  %v895_v36 = vld [vmem:[#allocation4 + $0x18] sm:$0xff]  ;;  %v896_v41 = vld [vmem:[#allocation4 + $0x20] sm:$0xff] }
 0x35d   : > { %v842_v9 = vpop.xlane.xlu1 %841  ;;  %v991_v15 = vmul.f32 %v2423_v29, %v895_v36  ;;  %v992_v29 = vmul.f32 %v2429_v4, %v896_v41 }
 0x35e   : > { %882 = vst.msk [vmem:[#allocation3 + $0x30] sm:$0xff] %vm875_vm3, %v865_v50  ;;  %v866_v47 = vadd.f32 %v842_v9, %v818_v21  ;;  %v893_v21 = vld [vmem:[#allocation4 + $0x8] sm:$0xff] }
 0x35f   : > { %v836_v37 = vpop.xlane.xlu0 %835 }
 0x360   : > { %883 = vst.msk [vmem:[#allocation3 + $0x38] sm:$0xff] %vm875_vm3, %v866_v47  ;;  %v863_v24 = vadd.f32 %v836_v37, %v815_v11  ;;  %v898_v47 = vld [vmem:[#allocation4 + $0x30] sm:$0xff]  ;;  %v989_v37 = vmul.f32 %v2421_v23, %v893_v21 }
 0x361   : > { %v838_v30 = vpop.xlane.xlu1 %837 }
 0x362   : > { %880 = vst.msk [vmem:[#allocation3 + $0x20] sm:$0xff] %vm875_vm3, %v863_v24  ;;  %v864_v49 = vadd.f32 %v838_v30, %v816_v38  ;;  %v994_v38 = vmul.f32 %v2433_v60, %v898_v47  ;;  %v899_v30 = vld [vmem:[#allocation4 + $0x38] sm:$0xff] }
 0x363   : > { %v848_v16 = vpop.xlane.xlu0 %847  ;;  %v995_v23 = vmul.f32 %v2427_v57, %v899_v30  ;;  %v996_v57 = vmul.f32 %v2441_v43, %v900_v27 }
 0x364   : > { %881 = vst.msk [vmem:[#allocation3 + $0x28] sm:$0xff] %vm875_vm3, %v864_v49  ;;  %v869_v26 = vadd.f32 %v848_v16, %v821_v33  ;;  %v897_v33 = vld [vmem:[#allocation4 + $0x28] sm:$0xff] }
 0x365   : > { %v850_v17 = vpop.xlane.xlu1 %849  ;;  %v993_v60 = vmul.f32 %v2431_v6, %v897_v33 }
 0x366   : > { %886 = vst.msk [vmem:[#allocation3 + $0x50] sm:$0xff] %vm875_vm3, %v869_v26  ;;  %v870_v0 = vadd.f32 %v850_v17, %v822_v31  ;;  %v902_v26 = vld [vmem:[#allocation4 + $0x50] sm:$0xff] }
 0x367   : > { %v844_v45 = vpop.xlane.xlu0 %843  ;;  %v998_v4 = vmul.f32 %v2437_v59, %v902_v26 }
 0x368   : > { %887 = vst.msk [vmem:[#allocation3 + $0x58] sm:$0xff] %vm875_vm3, %v870_v0  ;;  %v867_v44 = vadd.f32 %v844_v45, %v819_v52  ;;  %v903_v45 = vld [vmem:[#allocation4 + $0x58] sm:$0xff] }
 0x369   : > { %v846_v5 = vpop.xlane.xlu1 %845  ;;  %v999_v6 = vmul.f32 %v2435_v42, %v903_v45 }
 0x36a   : > { %884 = vst.msk [vmem:[#allocation3 + $0x40] sm:$0xff] %vm875_vm3, %v867_v44  ;;  %v868_v10 = vadd.f32 %v846_v5, %v820_v54  ;;  %v901_v5 = vld [vmem:[#allocation4 + $0x48] sm:$0xff] }
 0x36c   : > { %885 = vst.msk [vmem:[#allocation3 + $0x48] sm:$0xff] %vm875_vm3, %v868_v10 }
 0x373   : > { %v856_v8 = vpop.xlane.xlu0 %855 }
 0x374   : > { %v873_v62 = vadd.f32 %v856_v8, %v825_v46  ;;  %v997_v8 = vmul.f32 %v2439_v61, %v901_v5 }
 0x375   : > { %v858_v1 = vpop.xlane.xlu1 %857 }
 0x376   : > { %890 = vst.msk [vmem:[#allocation3 + $0x70] sm:$0xff] %vm875_vm3, %v873_v62  ;;  %v874_v51 = vadd.f32 %v858_v1, %v826_v56  ;;  %v904_v62 = vld [vmem:[#allocation4 + $0x60] sm:$0xff] }
 0x377   : > { %v852_v20 = vpop.xlane.xlu0 %851 }
 0x378   : > { %891 = vst.msk [vmem:[#allocation3 + $0x78] sm:$0xff] %vm875_vm3, %v874_v51  ;;  %v871_v18 = vadd.f32 %v852_v20, %v823_v14  ;;  %v1000_v14 = vmul.f32 %v2446_v2, %v904_v62 }
 0x379   : > { %v854_v3 = vpop.xlane.xlu1 %853 }
 0x37a   : > { %888 = vst.msk [vmem:[#allocation3 + $0x60] sm:$0xff] %vm875_vm3, %v871_v18  ;;  %v872_v39 = vadd.f32 %v854_v3, %v824_v35  ;;  %v905_v18 = vld [vmem:[#allocation4 + $0x68] sm:$0xff] }
 0x37b   : > { %v1001_v28 = vmul.f32 %v2443_v63, %v905_v18 }
 0x37c   : > { %889 = vst.msk [vmem:[#allocation3 + $0x68] sm:$0xff] %vm875_vm3, %v872_v39 }
 0x37d   : > { %v981_v46 = vpop.permute.xlu1 %980 }
 0x37e   : > { %v1002_v56 = vmul.f32 %v981_v46, %v906_v12 }
 0x37f   : > { %v986_v51 = vpop.permute.xlu0 %985 }
 0x380   : > { %v1003_v61 = vmul.f32 %v986_v51, %v907_v34 }
 0x398   : > { %v1680_v7 = vpop.f32.mrf.mxu1 }
 0x399   : > { %v1135_v50 = vadd.f32 %v1680_v7, %v990_v22 }
 0x39a   : > { %v1070_v9 = vpop.f32.mrf.mxu1 }
 0x39b   : > { %1151 = vst.msk [vmem:[#allocation4 + $0x10] sm:$0xff] %vm409_vm2, %v1135_v50  ;;  %v1133_v58 = vadd.f32 %v1070_v9, %v988_v53 }
 0x39c   : > { %v1681_v11 = vpop.f32.mrf.mxu1 }
 0x39d   : > { %1149 = vst.msk [vmem:[#allocation4] sm:$0xff] %vm409_vm2, %v1133_v58  ;;  %v1136_v19 = vadd.f32 %v1681_v11, %v991_v15 }
 0x39e   : > { %v1073_v24 = vpop.f32.mrf.mxu1 }
 0x39f   : > { %1152 = vst.msk [vmem:[#allocation4 + $0x18] sm:$0xff] %vm409_vm2, %v1136_v19  ;;  %v1134_v32 = vadd.f32 %v1073_v24, %v989_v37 }
 0x3a0   : > { %v1684_v25 = vpop.f32.mrf.mxu1 }
 0x3a1   : > { %1150 = vst.msk [vmem:[#allocation4 + $0x8] sm:$0xff] %vm409_vm2, %v1134_v32  ;;  %v1139_v49 = vadd.f32 %v1684_v25, %v994_v38 }
 0x3a2   : > { %v1086_v16 = vpop.f32.mrf.mxu1 }
 0x3a3   : > { %1155 = vst.msk [vmem:[#allocation4 + $0x30] sm:$0xff] %vm409_vm2, %v1139_v49  ;;  %v1137_v40 = vadd.f32 %v1086_v16, %v992_v29 }
 0x3a4   : > { %v1685_v31 = vpop.f32.mrf.mxu1 }
 0x3a5   : > { %1153 = vst.msk [vmem:[#allocation4 + $0x20] sm:$0xff] %vm409_vm2, %v1137_v40  ;;  %v1140_v17 = vadd.f32 %v1685_v31, %v995_v23 }
 0x3a6   : > { %v1089_v0 = vpop.f32.mrf.mxu1 }
 0x3a7   : > { %1156 = vst.msk [vmem:[#allocation4 + $0x38] sm:$0xff] %vm409_vm2, %v1140_v17  ;;  %v1138_v52 = vadd.f32 %v1089_v0, %v993_v60 }
 0x3a8   : > { %v1688_v44 = vpop.f32.mrf.mxu1 }
 0x3a9   : > { %1154 = vst.msk [vmem:[#allocation4 + $0x28] sm:$0xff] %vm409_vm2, %v1138_v52  ;;  %v1143_v54 = vadd.f32 %v1688_v44, %v998_v4 }
 0x3aa   : > { %v1102_v10 = vpop.f32.mrf.mxu1 }
 0x3ab   : > { %1159 = vst.msk [vmem:[#allocation4 + $0x50] sm:$0xff] %vm409_vm2, %v1143_v54  ;;  %v1141_v55 = vadd.f32 %v1102_v10, %v996_v57 }
 0x3ac   : > { %v1689_v59 = vpop.f32.mrf.mxu1 }
 0x3ad   : > { %1157 = vst.msk [vmem:[#allocation4 + $0x40] sm:$0xff] %vm409_vm2, %v1141_v55  ;;  %v1144_v13 = vadd.f32 %v1689_v59, %v999_v6 }
 0x3ae   : > { %v1105_v43 = vpop.f32.mrf.mxu1 }
 0x3af   : > { %1160 = vst.msk [vmem:[#allocation4 + $0x58] sm:$0xff] %vm409_vm2, %v1144_v13  ;;  %v1142_v1 = vadd.f32 %v1105_v43, %v997_v8 }
 0x3b0   : > { %v1692_v42 = vpop.f32.mrf.mxu1 }
 0x3b1   : > { %1158 = vst.msk [vmem:[#allocation4 + $0x48] sm:$0xff] %vm409_vm2, %v1142_v1  ;;  %v1147_v20 = vadd.f32 %v1692_v42, %v1002_v56 }
 0x3b2   : > { %v1118_v35 = vpop.f32.mrf.mxu1 }
 0x3b3   : > { %1163 = vst.msk [vmem:[#allocation4 + $0x70] sm:$0xff] %vm409_vm2, %v1147_v20  ;;  %v1145_v3 = vadd.f32 %v1118_v35, %v1000_v14 }
 0x3b4   : > { %v1693_v39 = vpop.f32.mrf.mxu1 }
 0x3b5   : > { %1161 = vst.msk [vmem:[#allocation4 + $0x60] sm:$0xff] %vm409_vm2, %v1145_v3  ;;  %v1148_v48 = vadd.f32 %v1693_v39, %v1003_v61  ;;  %1184 = sbr.rel (%p1563_p10) target bundleno = 1127 (0x467), region = 36 }
 0x3b6   : > { %v1121_v22 = vpop.f32.mrf.mxu1 }
 0x3b7   : > { %1164 = vst.msk [vmem:[#allocation4 + $0x78] sm:$0xff] %vm409_vm2, %v1148_v48  ;;  %v1146_v36 = vadd.f32 %v1121_v22, %v1001_v28 }
 0x3b9   : > { %1162 = vst.msk [vmem:[#allocation4 + $0x68] sm:$0xff] %vm409_vm2, %v1146_v36 }
 0x3ba   : > { %v1187_v2 = vld [vmem:[#allocation3 + $0x10] sm:$0xff]  ;;  %v1185_v7 = vld [vmem:[#allocation3] sm:$0xff]  ;;  %v1188_v53 = vld [vmem:[#allocation3 + $0x18] sm:$0xff]  ;;  %v1941_v50 = vmov 0   ;;  %vm1393_vm4 = vcmask 27648  }
 0x3bb   : > { %1847 = vset.pattern.permute.xlu1 %v1941_v50  ;;  %1846 = vset.pattern.permute.xlu0 %v1941_v50  ;;  %1848 = vrcp.f32 %v1187_v2  ;;  %v1186_v63 = vld [vmem:[#allocation3 + $0x8] sm:$0xff]  ;;  %v1189_v9 = vld [vmem:[#allocation3 + $0x20] sm:$0xff]  ;;  %v1192_v15 = vld [vmem:[#allocation3 + $0x38] sm:$0xff] }
 0x3bc   : > { %1850 = vrcp.f32 %v1185_v7  ;;  %v1190_v21 = vld [vmem:[#allocation3 + $0x28] sm:$0xff]  ;;  %v1191_v58 = vld [vmem:[#allocation3 + $0x30] sm:$0xff]  ;;  %v1193_v11 = vld [vmem:[#allocation3 + $0x40] sm:$0xff] }
 0x3bd   : > { %1852 = vrcp.f32 %v1188_v53  ;;  %v1194_v47 = vld [vmem:[#allocation3 + $0x48] sm:$0xff]  ;;  %v1196_v24 = vld [vmem:[#allocation3 + $0x58] sm:$0xff]  ;;  %v1195_v32 = vld [vmem:[#allocation3 + $0x50] sm:$0xff] }
 0x3be   : > { %1854 = vrcp.f32 %v1186_v63  ;;  %v1198_v25 = vld [vmem:[#allocation3 + $0x68] sm:$0xff]  ;;  %v1197_v49 = vld [vmem:[#allocation3 + $0x60] sm:$0xff]  ;;  %v1200_v16 = vld [vmem:[#allocation3 + $0x78] sm:$0xff] }
 0x3bf   : > { %1856 = vrcp.f32 %v1190_v21  ;;  %v1199_v40 = vld [vmem:[#allocation3 + $0x70] sm:$0xff]  ;;  %v1217_v44 = vld [vmem:[#allocation4] sm:$0xff]  ;;  %v1220_v6 = vld [vmem:[#allocation4 + $0x18] sm:$0xff] }
 0x3c0   : > { %1858 = vrcp.f32 %v1189_v9  ;;  %v1219_v45 = vld [vmem:[#allocation4 + $0x10] sm:$0xff]  ;;  %v1218_v12 = vld [vmem:[#allocation4 + $0x8] sm:$0xff]  ;;  %v1221_v1 = vld [vmem:[#allocation4 + $0x20] sm:$0xff] }
 0x3c1   : > { %1860 = vrcp.f32 %v1192_v15  ;;  %v1222_v43 = vld [vmem:[#allocation4 + $0x28] sm:$0xff]  ;;  %v1224_v18 = vld [vmem:[#allocation4 + $0x38] sm:$0xff]  ;;  %v1223_v61 = vld [vmem:[#allocation4 + $0x30] sm:$0xff] }
 0x3c2   : > { %1862 = vrcp.f32 %v1191_v58  ;;  %v1226_v36 = vld [vmem:[#allocation4 + $0x48] sm:$0xff]  ;;  %v1225_v7 = vld [vmem:[#allocation4 + $0x40] sm:$0xff]  ;;  %v1228_v15 = vld [vmem:[#allocation4 + $0x58] sm:$0xff] }
 0x3c3   : > { %1864 = vrcp.f32 %v1194_v47  ;;  %v1227_v47 = vld [vmem:[#allocation4 + $0x50] sm:$0xff] }
 0x3c4   : > { %1866 = vrcp.f32 %v1193_v11 }
 0x3c5   : > { %1868 = vrcp.f32 %v1196_v24 }
 0x3c6   : > { %1870 = vrcp.f32 %v1195_v32 }
 0x3c7   : > { %1872 = vrcp.f32 %v1198_v25 }
 0x3c8   : > { %v1849_v37 = vpop.eup %1848  ;;  %1874 = vrcp.f32 %v1197_v49 }
 0x3c9   : > { %v1851_v19 = vpop.eup %1850  ;;  %1245 = vperm.xlu1 %1847, %v1849_v37   ;;  %1876 = vrcp.f32 %v1200_v16 }
 0x3ca   : > { %v1853_v41 = vpop.eup %1852  ;;  %1235 = vperm.xlu0 %1846, %v1851_v19   ;;  %1878 = vrcp.f32 %v1199_v40 }
 0x3cb   : > { %v1855_v38 = vpop.eup %1854 }
 0x3cc   : > { %v1857_v30 = vpop.eup %1856 }
 0x3cd   : > { %1250 = vperm.xlu1 %1847, %v1853_v41   ;;  %v1859_v29 = vpop.eup %1858 }
 0x3ce   : > { %1240 = vperm.xlu0 %1846, %v1855_v38   ;;  %v1861_v33 = vpop.eup %1860  ;;  %v1230_v38 = vld [vmem:[#allocation4 + $0x68] sm:$0xff] }
 0x3cf   : > { %v1863_v23 = vpop.eup %1862 }
 0x3d0   : > { %v1865_v26 = vpop.eup %1864 }
 0x3d1   : > { %1260 = vperm.xlu1 %1847, %v1857_v30   ;;  %v1867_v31 = vpop.eup %1866  ;;  %v1229_v30 = vld [vmem:[#allocation4 + $0x60] sm:$0xff] }
 0x3d2   : > { %1255 = vperm.xlu0 %1846, %v1859_v29   ;;  %v1869_v60 = vpop.eup %1868 }
 0x3d3   : > { %v1871_v17 = vpop.eup %1870 }
 0x3d4   : > { %v1873_v27 = vpop.eup %1872 }
 0x3d5   : > { %1270 = vperm.xlu1 %1847, %v1861_v33   ;;  %v1875_v0 = vpop.eup %1874 }
 0x3d6   : > { %1265 = vperm.xlu0 %1846, %v1863_v23   ;;  %v1877_v4 = vpop.eup %1876  ;;  %v1232_v23 = vld [vmem:[#allocation4 + $0x78] sm:$0xff] }
 0x3d7   : > { %v1879_v52 = vpop.eup %1878 }
 0x3d9   : > { %1280 = vperm.xlu1 %1847, %v1865_v26   ;;  %v1231_v26 = vld [vmem:[#allocation4 + $0x70] sm:$0xff] }
 0x3da   : > { %1275 = vperm.xlu0 %1846, %v1867_v31  }
 0x3dd   : > { %1290 = vperm.xlu1 %1847, %v1869_v60  }
 0x3de   : > { %1285 = vperm.xlu0 %1846, %v1871_v17  }
 0x3e1   : > { %1300 = vperm.xlu1 %1847, %v1873_v27  }
 0x3e2   : > { %1295 = vperm.xlu0 %1846, %v1875_v0  }
 0x3e5   : > { %1310 = vperm.xlu1 %1847, %v1877_v4  }
 0x3e6   : > { %1305 = vperm.xlu0 %1846, %v1879_v52  }
 0x444   : > { %v1246_v57 = vpop.permute.xlu1 %1245 }
 0x445   : > { %v1315_v54 = vmul.f32 %v1246_v57, %v1219_v45  ;;  %v1236_v5 = vpop.permute.xlu0 %1235 }
 0x446   : > { %v1313_v10 = vmul.f32 %v1236_v5, %v1217_v44 }
 0x447   : > { %v1584_v55 = vpack.c.bf16 %v1315_v54, %v1315_v54 }
 0x448   : > { %v1582_v46 = vpack.c.bf16 %v1313_v10, %v1313_v10  ;;  %v1251_v59 = vpop.permute.xlu1 %1250 }
 0x449   : > { %1396 = vst.msk [vmem:[%s2010_s29 + $0x8] sm:$0xf] %vm1393_vm4, %v1584_v55  ;;  %v1316_v8 = vmul.f32 %v1251_v59, %v1220_v6  ;;  %v1241_v13 = vpop.permute.xlu0 %1240 }
 0x44a   : > { %1394 = vst.msk [vmem:[%s2010_s29] sm:$0xf] %vm1393_vm4, %v1582_v46  ;;  %v1314_v62 = vmul.f32 %v1241_v13, %v1218_v12 }
 0x44b   : > { %v1585_v56 = vpack.c.bf16 %v1316_v8, %v1316_v8 }
 0x44c   : > { %v1583_v34 = vpack.c.bf16 %v1314_v62, %v1314_v62  ;;  %v1261_v51 = vpop.permute.xlu1 %1260 }
 0x44d   : > { %1397 = vst.msk [vmem:[%s2010_s29 + $0xc] sm:$0xf] %vm1393_vm4, %v1585_v56  ;;  %v1318_v42 = vmul.f32 %v1261_v51, %v1222_v43  ;;  %v1256_v14 = vpop.permute.xlu0 %1255 }
 0x44e   : > { %1395 = vst.msk [vmem:[%s2010_s29 + $0x4] sm:$0xf] %vm1393_vm4, %v1583_v34  ;;  %v1317_v20 = vmul.f32 %v1256_v14, %v1221_v1 }
 0x44f   : > { %v1587_v35 = vpack.c.bf16 %v1318_v42, %v1318_v42 }
 0x450   : > { %v1586_v3 = vpack.c.bf16 %v1317_v20, %v1317_v20  ;;  %v1271_v39 = vpop.permute.xlu1 %1270 }
 0x451   : > { %1399 = vst.msk [vmem:[%s2010_s29 + $0x14] sm:$0xf] %vm1393_vm4, %v1587_v35  ;;  %v1320_v28 = vmul.f32 %v1271_v39, %v1224_v18  ;;  %v1266_v48 = vpop.permute.xlu0 %1265 }
 0x452   : > { %1398 = vst.msk [vmem:[%s2010_s29 + $0x10] sm:$0xf] %vm1393_vm4, %v1586_v3  ;;  %v1319_v22 = vmul.f32 %v1266_v48, %v1223_v61 }
 0x453   : > { %v1589_v2 = vpack.c.bf16 %v1320_v28, %v1320_v28 }
 0x454   : > { %v1588_v53 = vpack.c.bf16 %v1319_v22, %v1319_v22  ;;  %v1281_v50 = vpop.permute.xlu1 %1280 }
 0x455   : > { %1401 = vst.msk [vmem:[%s2010_s29 + $0x1c] sm:$0xf] %vm1393_vm4, %v1589_v2  ;;  %v1322_v63 = vmul.f32 %v1281_v50, %v1226_v36  ;;  %v1276_v21 = vpop.permute.xlu0 %1275 }
 0x456   : > { %1400 = vst.msk [vmem:[%s2010_s29 + $0x18] sm:$0xf] %vm1393_vm4, %v1588_v53  ;;  %v1321_v9 = vmul.f32 %v1276_v21, %v1225_v7 }
 0x457   : > { %v1591_v58 = vpack.c.bf16 %v1322_v63, %v1322_v63 }
 0x458   : > { %v1590_v11 = vpack.c.bf16 %v1321_v9, %v1321_v9  ;;  %v1291_v37 = vpop.permute.xlu1 %1290 }
 0x459   : > { %1403 = vst.msk [vmem:[%s2010_s29 + $0x24] sm:$0xf] %vm1393_vm4, %v1591_v58  ;;  %v1324_v19 = vmul.f32 %v1291_v37, %v1228_v15  ;;  %v1286_v41 = vpop.permute.xlu0 %1285 }
 0x45a   : > { %1402 = vst.msk [vmem:[%s2010_s29 + $0x20] sm:$0xf] %vm1393_vm4, %v1590_v11  ;;  %v1323_v24 = vmul.f32 %v1286_v41, %v1227_v47 }
 0x45b   : > { %v1593_v32 = vpack.c.bf16 %v1324_v19, %v1324_v19 }
 0x45c   : > { %v1592_v25 = vpack.c.bf16 %v1323_v24, %v1323_v24  ;;  %v1301_v29 = vpop.permute.xlu1 %1300 }
 0x45d   : > { %1405 = vst.msk [vmem:[%s2010_s29 + $0x2c] sm:$0xf] %vm1393_vm4, %v1593_v32  ;;  %v1326_v49 = vmul.f32 %v1301_v29, %v1230_v38  ;;  %v1296_v33 = vpop.permute.xlu0 %1295 }
 0x45e   : > { %1404 = vst.msk [vmem:[%s2010_s29 + $0x28] sm:$0xf] %vm1393_vm4, %v1592_v25  ;;  %v1325_v16 = vmul.f32 %v1296_v33, %v1229_v30 }
 0x45f   : > { %v1595_v40 = vpack.c.bf16 %v1326_v49, %v1326_v49 }
 0x460   : > { %v1594_v31 = vpack.c.bf16 %v1325_v16, %v1325_v16  ;;  %v1311_v60 = vpop.permute.xlu1 %1310 }
 0x461   : > { %1407 = vst.msk [vmem:[%s2010_s29 + $0x34] sm:$0xf] %vm1393_vm4, %v1595_v40  ;;  %v1328_v17 = vmul.f32 %v1311_v60, %v1232_v23  ;;  %v1306_v27 = vpop.permute.xlu0 %1305 }
 0x462   : > { %1406 = vst.msk [vmem:[%s2010_s29 + $0x30] sm:$0xf] %vm1393_vm4, %v1594_v31  ;;  %v1327_v0 = vmul.f32 %v1306_v27, %v1231_v26 }
 0x463   : > { %v1597_v4 = vpack.c.bf16 %v1328_v17, %v1328_v17 }
 0x464   : > { %v1596_v52 = vpack.c.bf16 %v1327_v0, %v1327_v0 }
 0x465   : > { %1409 = vst.msk [vmem:[%s2010_s29 + $0x3c] sm:$0xf] %vm1393_vm4, %v1597_v4 }
 0x466   : > { %1408 = vst.msk [vmem:[%s2010_s29 + $0x38] sm:$0xf] %vm1393_vm4, %v1596_v52 }
 0x467 PF: > { %s12_s15 = sadd.s32 1, %s1934_s15   ;;  %s2566_s9 = smov %s1922_s12 }
 0x468   : > { %p9_p11 = scmp.ge.s32.totalorder %s12_s15, 10   ;;  %s2567_s10 = smov %s1926_s13 }
 0x469   : > { %s2568_s11 = smov %s1930_s14  ;;  %s2569_s12 = smov %s2573_s16 }
 0x46a   : > { %s2570_s13 = smov %s2577_s17  ;;  %s2571_s14 = smov %s2581_s18 }
 0x46b   :  { %11 = sbr.rel (!%p9_p11) target bundleno = 4 (0x4), region = 69 }

// kernel: aspp_forward.17
= control target key start
LH: loop header
LB: loop body
LE: loop exit
PB: predicated region body
PF: predicated region fallthrough
CT: control target
= control target key end

     0   :  { %vm341_vm0 = vcmask 1041408   ;;  %vm244_vm1 = vcmask 31744   ;;  %vm896_vm2 = vcmask 64512   ;;  %s1901_s1 = inlined_call_operand.vmem [shape: bf16[1,4,8], index: 1, kind: input, shape index: {}]   ;;  %s1902_s0 = inlined_call_operand.vmem [shape: bf16[512,4], index: 0, kind: input, shape index: {}]   ;;  %s1903_s3 = inlined_call_operand.vmem [shape: bf16[512,8], index: 3, kind: input, shape index: {}]   ;;  %s1904_s2 = inlined_call_operand.vmem [shape: f32[1,8], index: 2, kind: input, shape index: {}]   ;;  %s1905_s4 = inlined_call_operand.vmem [shape: f32[512,8], index: 4, kind: output, shape index: {}]  }
   0x1   :  { %v83_v0 = vld [vmem:[%s1901_s1] sm:$0x3]  ;;  %v1294_v4 = vld [vmem:[%s1902_s0 + $0x8] sm:$0xff]   ;;  %v1296_v6 = vld [vmem:[%s1902_s0 + $0x10] sm:$0xff]  }
   0x2   :  { %1290 = vmatprep.subr.msk.bf16.mxu0 %vm341_vm0, %v83_v0  ;;  %1291 = vmatprep.subr.msk.bf16.mxu1 %vm341_vm0, %v83_v0  ;;  %v343_v1 = vsel %vm341_vm0, %v83_v0, 0  ;;  %v1292_v2 = vld [vmem:[%s1902_s0] sm:$0xff]   ;;  %v1295_v5 = vld [vmem:[%s1902_s0 + $0x88] sm:$0xff]   ;;  %v1297_v7 = vld [vmem:[%s1902_s0 + $0x90] sm:$0xff]  }
   0x3   :  { %1223 = vmatpush3.bf16.msra.mxu0 %v343_v1  ;;  %1289 = vmatpush3.bf16.msra.mxu1 %v343_v1  ;;  %v1293_v3 = vld [vmem:[%s1902_s0 + $0x80] sm:$0xff]   ;;  %v1298_v8 = vld [vmem:[%s1902_s0 + $0x18] sm:$0xff]   ;;  %v1302_v12 = vld [vmem:[%s1902_s0 + $0x28] sm:$0xff]  }
   0x4   :  { %1224 = vmatprep.mubr.msk.bf16.mxu0 %vm244_vm1, %v1292_v2  ;;  %1256 = vmatprep.mubr.msk.bf16.mxu1 %vm244_vm1, %v1293_v3  ;;  %v1299_v9 = vld [vmem:[%s1902_s0 + $0x98] sm:$0xff]   ;;  %v1300_v10 = vld [vmem:[%s1902_s0 + $0x20] sm:$0xff]   ;;  %v1303_v13 = vld [vmem:[%s1902_s0 + $0xa8] sm:$0xff]  }
   0x5   :  { %v1301_v11 = vld [vmem:[%s1902_s0 + $0xa0] sm:$0xff]   ;;  %v1304_v14 = vld [vmem:[%s1902_s0 + $0x30] sm:$0xff]   ;;  %v1306_v16 = vld [vmem:[%s1902_s0 + $0x38] sm:$0xff]  }
   0x6   :  { %1225 = vmatmul.mubr.msk.bf16.vlgmr.msra.gmra.mxu0 %vm244_vm1, %v1294_v4  ;;  %1257 = vmatmul.mubr.msk.bf16.vlgmr.msra.gmra.mxu1 %vm244_vm1, %v1295_v5  ;;  %v1305_v15 = vld [vmem:[%s1902_s0 + $0xb0] sm:$0xff]   ;;  %v1307_v17 = vld [vmem:[%s1902_s0 + $0xb8] sm:$0xff]   ;;  %v1308_v18 = vld [vmem:[%s1902_s0 + $0x40] sm:$0xff]  }
   0x7   :  { %1228 = vmatprep.mubr.msk.bf16.mxu0 %vm244_vm1, %v1296_v6  ;;  %1260 = vmatprep.mubr.msk.bf16.mxu1 %vm244_vm1, %v1297_v7  ;;  %v1309_v19 = vld [vmem:[%s1902_s0 + $0xc0] sm:$0xff]   ;;  %v1310_v20 = vld [vmem:[%s1902_s0 + $0x48] sm:$0xff]   ;;  %v1312_v22 = vld [vmem:[%s1902_s0 + $0x50] sm:$0xff]  }
   0x8   :  { %v1311_v21 = vld [vmem:[%s1902_s0 + $0xc8] sm:$0xff]   ;;  %v1313_v23 = vld [vmem:[%s1902_s0 + $0xd0] sm:$0xff]   ;;  %v1314_v24 = vld [vmem:[%s1902_s0 + $0x58] sm:$0xff]  }
   0x9   :  { %v1315_v25 = vld [vmem:[%s1902_s0 + $0xd8] sm:$0xff]   ;;  %v1316_v26 = vld [vmem:[%s1902_s0 + $0x60] sm:$0xff]   ;;  %v1318_v28 = vld [vmem:[%s1902_s0 + $0x68] sm:$0xff]  }
   0xa   :  { %v1317_v27 = vld [vmem:[%s1902_s0 + $0xe0] sm:$0xff]   ;;  %v1319_v29 = vld [vmem:[%s1902_s0 + $0xe8] sm:$0xff]   ;;  %v1320_v30 = vld [vmem:[%s1902_s0 + $0x70] sm:$0xff]  }
   0xb   :  { %v1321_v31 = vld [vmem:[%s1902_s0 + $0xf0] sm:$0xff]   ;;  %v1322_v32 = vld [vmem:[%s1902_s0 + $0x78] sm:$0xff]   ;;  %v1158_v34 = vld [vmem:[%s1903_s3 + $0x8] sm:$0xff]  }
   0xc   :  { %v1323_v33 = vld [vmem:[%s1902_s0 + $0xf8] sm:$0xff]   ;;  %v1174_v35 = vld [vmem:[%s1903_s3 + $0x88] sm:$0xff]   ;;  %v1489_v36 = vld [vmem:[%s1904_s2] ss:$0 sm:$0xff]  ;;  %v1036_v38 = vunpack.c.l.bf16 %v1158_v34  ;;  %v1037_v51 = vunpack.c.h.bf16 %v1158_v34 }
   0xd   :  { %v1031_v37 = vld [vmem:[%s1903_s3] sm:$0xff]   ;;  %v1100_v41 = vunpack.c.l.bf16 %v1174_v35  ;;  %v1101_v55 = vunpack.c.h.bf16 %v1174_v35  ;;  %v1160_v56 = vld [vmem:[%s1903_s3 + $0x18] sm:$0xff]   ;;  %v1159_v2 = vld [vmem:[%s1903_s3 + $0x10] sm:$0xff]  }
   0xe   :  { %1229 = vmatmul.mubr.msk.bf16.gmra.mxu0 %vm244_vm1, %v1298_v8  ;;  %1261 = vmatmul.mubr.msk.bf16.gmra.mxu1 %vm244_vm1, %v1299_v9  ;;  %v1173_v39 = vld [vmem:[%s1903_s3 + $0x80] sm:$0xff]   ;;  %v1032_v44 = vunpack.c.l.bf16 %v1031_v37  ;;  %v1033_v60 = vunpack.c.h.bf16 %v1031_v37  ;;  %v1176_v61 = vld [vmem:[%s1903_s3 + $0x98] sm:$0xff]   ;;  %v1044_v6 = vunpack.c.l.bf16 %v1160_v56  ;;  %v1175_v7 = vld [vmem:[%s1903_s3 + $0x90] sm:$0xff]  }
   0xf   :  { %1232 = vmatprep.mubr.msk.bf16.mxu0 %vm244_vm1, %v1300_v10  ;;  %1264 = vmatprep.mubr.msk.bf16.mxu1 %vm244_vm1, %v1301_v11  ;;  %v1096_v47 = vunpack.c.l.bf16 %v1173_v39  ;;  %v1097_v1 = vunpack.c.h.bf16 %v1173_v39  ;;  %v1108_v11 = vunpack.c.l.bf16 %v1176_v61  ;;  %v1161_v39 = vld [vmem:[%s1903_s3 + $0x20] sm:$0xff]  }
  0x16   :  { %1233 = vmatmul.mubr.msk.bf16.gmra.mxu0 %vm244_vm1, %v1302_v12  ;;  %1265 = vmatmul.mubr.msk.bf16.gmra.mxu1 %vm244_vm1, %v1303_v13 }
  0x17   :  { %1236 = vmatprep.mubr.msk.bf16.mxu0 %vm244_vm1, %v1304_v14  ;;  %1268 = vmatprep.mubr.msk.bf16.mxu1 %vm244_vm1, %v1305_v15  ;;  %v1040_v15 = vunpack.c.l.bf16 %v1159_v2 }
  0x1e   :  { %1237 = vmatmul.mubr.msk.bf16.gmra.mxu0 %vm244_vm1, %v1306_v16  ;;  %1269 = vmatmul.mubr.msk.bf16.gmra.mxu1 %vm244_vm1, %v1307_v17 }
  0x1f   :  { %1240 = vmatprep.mubr.msk.bf16.mxu0 %vm244_vm1, %v1308_v18  ;;  %1272 = vmatprep.mubr.msk.bf16.mxu1 %vm244_vm1, %v1309_v19  ;;  %v1104_v19 = vunpack.c.l.bf16 %v1175_v7 }
  0x26   :  { %1241 = vmatmul.mubr.msk.bf16.gmra.mxu0 %vm244_vm1, %v1310_v20  ;;  %1273 = vmatmul.mubr.msk.bf16.gmra.mxu1 %vm244_vm1, %v1311_v21 }
  0x27   :  { %1244 = vmatprep.mubr.msk.bf16.mxu0 %vm244_vm1, %v1312_v22  ;;  %1276 = vmatprep.mubr.msk.bf16.mxu1 %vm244_vm1, %v1313_v23  ;;  %v1045_v23 = vunpack.c.h.bf16 %v1160_v56 }
  0x2e   :  { %1245 = vmatmul.mubr.msk.bf16.gmra.mxu0 %vm244_vm1, %v1314_v24  ;;  %1277 = vmatmul.mubr.msk.bf16.gmra.mxu1 %vm244_vm1, %v1315_v25 }
  0x2f   :  { %1248 = vmatprep.mubr.msk.bf16.mxu0 %vm244_vm1, %v1316_v26  ;;  %1280 = vmatprep.mubr.msk.bf16.mxu1 %vm244_vm1, %v1317_v27  ;;  %v1109_v27 = vunpack.c.h.bf16 %v1176_v61 }
  0x36   :  { %1249 = vmatmul.mubr.msk.bf16.gmra.mxu0 %vm244_vm1, %v1318_v28  ;;  %1281 = vmatmul.mubr.msk.bf16.gmra.mxu1 %vm244_vm1, %v1319_v29  ;;  %v1162_v28 = vld [vmem:[%s1903_s3 + $0x28] sm:$0xff]  }
  0x37   :  { %1252 = vmatprep.mubr.msk.bf16.mxu0 %vm244_vm1, %v1320_v30  ;;  %1284 = vmatprep.mubr.msk.bf16.mxu1 %vm244_vm1, %v1321_v31 }
  0x3e   :  { %1253 = vmatmul.mubr.msk.bf16.gmra.mxu0 %vm244_vm1, %v1322_v32  ;;  %1285 = vmatmul.mubr.msk.bf16.gmra.mxu1 %vm244_vm1, %v1323_v33  ;;  %v1041_v32 = vunpack.c.h.bf16 %v1159_v2  ;;  %v1178_v33 = vld [vmem:[%s1903_s3 + $0xa8] sm:$0xff]  }
  0xc6   :  { %v1226_v40 = vpop.f32.mrf.mxu0  ;;  %v1258_v43 = vpop.f32.mrf.mxu1 }
  0xc7   :  { %v642_v42 = vadd.f32 %v1226_v40, %v1489_v36  ;;  %v674_v45 = vadd.f32 %v1258_v43, %v1489_v36  ;;  %v1052_v43 = vunpack.c.l.bf16 %v1162_v28 }
  0xc8   :  { %v379_v46 = vpop.f32.mrf.mxu0  ;;  %v507_v50 = vpop.f32.mrf.mxu1 }
  0xc9   :  { %v834_v48 = vadd.f32 %v1036_v38, %v642_v42  ;;  %v640_v49 = vadd.f32 %v1489_v36, %v379_v46  ;;  %v866_v52 = vadd.f32 %v1100_v41, %v674_v45  ;;  %v672_v53 = vadd.f32 %v1489_v36, %v507_v50 }
  0xca   :  { %v1227_v54 = vpop.f32.mrf.mxu0  ;;  %v1259_v59 = vpop.f32.mrf.mxu1  ;;  %v1105_v38 = vunpack.c.h.bf16 %v1175_v7 }
  0xcb   :  { %899 = vst.msk [vmem:[%s1905_s4 + $0x10] sm:$0xff] %vm896_vm2, %v834_v48  ;;  %v832_v57 = vadd.f32 %v1032_v44, %v640_v49  ;;  %v643_v58 = vadd.f32 %v1227_v54, %v1489_v36  ;;  %931 = vst.msk [vmem:[%s1905_s4 + $0x110] sm:$0xff] %vm896_vm2, %v866_v52  ;;  %v864_v62 = vadd.f32 %v1096_v47, %v672_v53  ;;  %v1177_v44 = vld [vmem:[%s1903_s3 + $0xa0] sm:$0xff]   ;;  %v1116_v48 = vunpack.c.l.bf16 %v1178_v33 }
  0xcc   :  { %v675_v63 = vadd.f32 %v1259_v59, %v1489_v36  ;;  %v382_v0 = vpop.f32.mrf.mxu0  ;;  %v510_v5 = vpop.f32.mrf.mxu1  ;;  %v1048_v52 = vunpack.c.l.bf16 %v1161_v39  ;;  %v1112_v56 = vunpack.c.l.bf16 %v1177_v44 }
  0xcd   :  { %897 = vst.msk [vmem:[%s1905_s4] sm:$0xff] %vm896_vm2, %v832_v57  ;;  %v835_v3 = vadd.f32 %v1037_v51, %v643_v58  ;;  %v641_v4 = vadd.f32 %v1489_v36, %v382_v0  ;;  %929 = vst.msk [vmem:[%s1905_s4 + $0x100] sm:$0xff] %vm896_vm2, %v864_v62  ;;  %v673_v9 = vadd.f32 %v1489_v36, %v510_v5  ;;  %v1117_v0 = vunpack.c.h.bf16 %v1178_v33 }
  0xce   :  { %v867_v8 = vadd.f32 %v1101_v55, %v675_v63  ;;  %v1230_v10 = vpop.f32.mrf.mxu0  ;;  %v1262_v14 = vpop.f32.mrf.mxu1  ;;  %v1049_v5 = vunpack.c.h.bf16 %v1161_v39 }
  0xcf   :  { %900 = vst.msk [vmem:[%s1905_s4 + $0x18] sm:$0xff] %vm896_vm2, %v835_v3  ;;  %v833_v12 = vadd.f32 %v1033_v60, %v641_v4  ;;  %v646_v13 = vadd.f32 %v1230_v10, %v1489_v36  ;;  %v865_v16 = vadd.f32 %v1097_v1, %v673_v9  ;;  %v678_v17 = vadd.f32 %v1262_v14, %v1489_v36  ;;  %v1164_v1 = vld [vmem:[%s1903_s3 + $0x38] sm:$0xff]  }
  0xd0   :  { %932 = vst.msk [vmem:[%s1905_s4 + $0x118] sm:$0xff] %vm896_vm2, %v867_v8  ;;  %v395_v18 = vpop.f32.mrf.mxu0  ;;  %v523_v22 = vpop.f32.mrf.mxu1  ;;  %v1053_v60 = vunpack.c.h.bf16 %v1162_v28  ;;  %v1113_v10 = vunpack.c.h.bf16 %v1177_v44 }
  0xd1   :  { %898 = vst.msk [vmem:[%s1905_s4 + $0x8] sm:$0xff] %vm896_vm2, %v833_v12  ;;  %v838_v20 = vadd.f32 %v1044_v6, %v646_v13  ;;  %v644_v21 = vadd.f32 %v1489_v36, %v395_v18  ;;  %930 = vst.msk [vmem:[%s1905_s4 + $0x108] sm:$0xff] %vm896_vm2, %v865_v16  ;;  %v870_v24 = vadd.f32 %v1108_v11, %v678_v17  ;;  %v1180_v6 = vld [vmem:[%s1903_s3 + $0xb8] sm:$0xff]   ;;  %v1163_v11 = vld [vmem:[%s1903_s3 + $0x30] sm:$0xff]  }
  0xd2   :  { %v676_v25 = vadd.f32 %v1489_v36, %v523_v22  ;;  %v1231_v26 = vpop.f32.mrf.mxu0  ;;  %v1263_v31 = vpop.f32.mrf.mxu1  ;;  %v1179_v16 = vld [vmem:[%s1903_s3 + $0xb0] sm:$0xff]  }
  0xd3   :  { %903 = vst.msk [vmem:[%s1905_s4 + $0x30] sm:$0xff] %vm896_vm2, %v838_v20  ;;  %v836_v29 = vadd.f32 %v1040_v15, %v644_v21  ;;  %v647_v30 = vadd.f32 %v1231_v26, %v1489_v36  ;;  %935 = vst.msk [vmem:[%s1905_s4 + $0x130] sm:$0xff] %vm896_vm2, %v870_v24  ;;  %v679_v35 = vadd.f32 %v1263_v31, %v1489_v36  ;;  %v1060_v15 = vunpack.c.l.bf16 %v1164_v1 }
  0xd4   :  { %v868_v34 = vadd.f32 %v1104_v19, %v676_v25  ;;  %v398_v37 = vpop.f32.mrf.mxu0  ;;  %v526_v42 = vpop.f32.mrf.mxu1  ;;  %v1124_v20 = vunpack.c.l.bf16 %v1180_v6  ;;  %v1056_v24 = vunpack.c.l.bf16 %v1163_v11  ;;  %v1120_v28 = vunpack.c.l.bf16 %v1179_v16 }
  0xd5   :  { %901 = vst.msk [vmem:[%s1905_s4 + $0x20] sm:$0xff] %vm896_vm2, %v836_v29  ;;  %v839_v40 = vadd.f32 %v1045_v23, %v647_v30  ;;  %v645_v41 = vadd.f32 %v1489_v36, %v398_v37  ;;  %v871_v45 = vadd.f32 %v1109_v27, %v679_v35  ;;  %v677_v46 = vadd.f32 %v1489_v36, %v526_v42 }
  0xd6   :  { %933 = vst.msk [vmem:[%s1905_s4 + $0x120] sm:$0xff] %vm896_vm2, %v868_v34  ;;  %v1234_v47 = vpop.f32.mrf.mxu0  ;;  %v1266_v51 = vpop.f32.mrf.mxu1  ;;  %v1125_v37 = vunpack.c.h.bf16 %v1180_v6  ;;  %v1057_v42 = vunpack.c.h.bf16 %v1163_v11 }
  0xd7   :  { %904 = vst.msk [vmem:[%s1905_s4 + $0x38] sm:$0xff] %vm896_vm2, %v839_v40  ;;  %v837_v49 = vadd.f32 %v1041_v32, %v645_v41  ;;  %v650_v50 = vadd.f32 %v1234_v47, %v1489_v36  ;;  %936 = vst.msk [vmem:[%s1905_s4 + $0x138] sm:$0xff] %vm896_vm2, %v871_v45  ;;  %v869_v53 = vadd.f32 %v1105_v38, %v677_v46  ;;  %v1061_v32 = vunpack.c.h.bf16 %v1164_v1  ;;  %v1166_v38 = vld [vmem:[%s1903_s3 + $0x48] sm:$0xff]  }
  0xd8   :  { %v682_v54 = vadd.f32 %v1266_v51, %v1489_v36  ;;  %v411_v55 = vpop.f32.mrf.mxu0  ;;  %v539_v59 = vpop.f32.mrf.mxu1  ;;  %v1121_v47 = vunpack.c.h.bf16 %v1179_v16 }
  0xd9   :  { %902 = vst.msk [vmem:[%s1905_s4 + $0x28] sm:$0xff] %vm896_vm2, %v837_v49  ;;  %v842_v57 = vadd.f32 %v1052_v43, %v650_v50  ;;  %v648_v58 = vadd.f32 %v1489_v36, %v411_v55  ;;  %934 = vst.msk [vmem:[%s1905_s4 + $0x128] sm:$0xff] %vm896_vm2, %v869_v53  ;;  %v680_v62 = vadd.f32 %v1489_v36, %v539_v59  ;;  %v1182_v43 = vld [vmem:[%s1903_s3 + $0xc8] sm:$0xff]   ;;  %v1181_v53 = vld [vmem:[%s1903_s3 + $0xc0] sm:$0xff]  }
  0xda   :  { %v874_v61 = vadd.f32 %v1116_v48, %v682_v54  ;;  %v1235_v63 = vpop.f32.mrf.mxu0  ;;  %v1267_v4 = vpop.f32.mrf.mxu1  ;;  %v1165_v48 = vld [vmem:[%s1903_s3 + $0x40] sm:$0xff]   ;;  %v1128_v1 = vunpack.c.l.bf16 %v1181_v53 }
  0xdb   :  { %907 = vst.msk [vmem:[%s1905_s4 + $0x50] sm:$0xff] %vm896_vm2, %v842_v57  ;;  %v840_v2 = vadd.f32 %v1048_v52, %v648_v58  ;;  %v651_v3 = vadd.f32 %v1235_v63, %v1489_v36  ;;  %v872_v7 = vadd.f32 %v1112_v56, %v680_v62  ;;  %v683_v8 = vadd.f32 %v1267_v4, %v1489_v36 }
  0xdc   :  { %939 = vst.msk [vmem:[%s1905_s4 + $0x150] sm:$0xff] %vm896_vm2, %v874_v61  ;;  %v414_v9 = vpop.f32.mrf.mxu0  ;;  %v542_v14 = vpop.f32.mrf.mxu1  ;;  %v1068_v52 = vunpack.c.l.bf16 %v1166_v38  ;;  %v1132_v57 = vunpack.c.l.bf16 %v1182_v43  ;;  %v1064_v61 = vunpack.c.l.bf16 %v1165_v48 }
  0xdd   :  { %905 = vst.msk [vmem:[%s1905_s4 + $0x40] sm:$0xff] %vm896_vm2, %v840_v2  ;;  %v843_v12 = vadd.f32 %v1053_v60, %v651_v3  ;;  %v649_v13 = vadd.f32 %v1489_v36, %v414_v9  ;;  %937 = vst.msk [vmem:[%s1905_s4 + $0x140] sm:$0xff] %vm896_vm2, %v872_v7  ;;  %v875_v17 = vadd.f32 %v1117_v0, %v683_v8  ;;  %v1133_v9 = vunpack.c.h.bf16 %v1182_v43 }
  0xde   :  { %v681_v18 = vadd.f32 %v1489_v36, %v542_v14  ;;  %v1238_v19 = vpop.f32.mrf.mxu0  ;;  %v1270_v23 = vpop.f32.mrf.mxu1  ;;  %v1065_v14 = vunpack.c.h.bf16 %v1165_v48 }
  0xdf   :  { %908 = vst.msk [vmem:[%s1905_s4 + $0x58] sm:$0xff] %vm896_vm2, %v843_v12  ;;  %v841_v21 = vadd.f32 %v1049_v5, %v649_v13  ;;  %v654_v22 = vadd.f32 %v1238_v19, %v1489_v36  ;;  %940 = vst.msk [vmem:[%s1905_s4 + $0x158] sm:$0xff] %vm896_vm2, %v875_v17  ;;  %v686_v26 = vadd.f32 %v1270_v23, %v1489_v36  ;;  %v1069_v5 = vunpack.c.h.bf16 %v1166_v38 }
  0xe0   :  { %v873_v25 = vadd.f32 %v1113_v10, %v681_v18  ;;  %v427_v27 = vpop.f32.mrf.mxu0  ;;  %v555_v31 = vpop.f32.mrf.mxu1  ;;  %v1168_v10 = vld [vmem:[%s1903_s3 + $0x58] sm:$0xff]   ;;  %v1129_v19 = vunpack.c.h.bf16 %v1181_v53 }
  0xe1   :  { %906 = vst.msk [vmem:[%s1905_s4 + $0x48] sm:$0xff] %vm896_vm2, %v841_v21  ;;  %v846_v29 = vadd.f32 %v1060_v15, %v654_v22  ;;  %v652_v30 = vadd.f32 %v1489_v36, %v427_v27  ;;  %v878_v33 = vadd.f32 %v1124_v20, %v686_v26  ;;  %v684_v34 = vadd.f32 %v1489_v36, %v555_v31  ;;  %v1184_v15 = vld [vmem:[%s1903_s3 + $0xd8] sm:$0xff]   ;;  %v1167_v20 = vld [vmem:[%s1903_s3 + $0x50] sm:$0xff]  }
  0xe2   :  { %938 = vst.msk [vmem:[%s1905_s4 + $0x148] sm:$0xff] %vm896_vm2, %v873_v25  ;;  %v1239_v35 = vpop.f32.mrf.mxu0  ;;  %v1271_v41 = vpop.f32.mrf.mxu1  ;;  %v1183_v25 = vld [vmem:[%s1903_s3 + $0xd0] sm:$0xff]  }
  0xe3   :  { %911 = vst.msk [vmem:[%s1905_s4 + $0x70] sm:$0xff] %vm896_vm2, %v846_v29  ;;  %v844_v39 = vadd.f32 %v1056_v24, %v652_v30  ;;  %v655_v40 = vadd.f32 %v1239_v35, %v1489_v36  ;;  %943 = vst.msk [vmem:[%s1905_s4 + $0x170] sm:$0xff] %vm896_vm2, %v878_v33  ;;  %v876_v44 = vadd.f32 %v1120_v28, %v684_v34  ;;  %v1076_v24 = vunpack.c.l.bf16 %v1168_v10 }
  0xe4   :  { %v687_v45 = vadd.f32 %v1271_v41, %v1489_v36  ;;  %v430_v46 = vpop.f32.mrf.mxu0  ;;  %v558_v51 = vpop.f32.mrf.mxu1  ;;  %v1140_v29 = vunpack.c.l.bf16 %v1184_v15  ;;  %v1072_v33 = vunpack.c.l.bf16 %v1167_v20  ;;  %v1136_v38 = vunpack.c.l.bf16 %v1183_v25 }
  0xe5   :  { %909 = vst.msk [vmem:[%s1905_s4 + $0x60] sm:$0xff] %vm896_vm2, %v844_v39  ;;  %v847_v49 = vadd.f32 %v1061_v32, %v655_v40  ;;  %v653_v50 = vadd.f32 %v1489_v36, %v430_v46  ;;  %941 = vst.msk [vmem:[%s1905_s4 + $0x160] sm:$0xff] %vm896_vm2, %v876_v44  ;;  %v685_v55 = vadd.f32 %v1489_v36, %v558_v51  ;;  %v1141_v46 = vunpack.c.h.bf16 %v1184_v15 }
  0xe6   :  { %v879_v54 = vadd.f32 %v1125_v37, %v687_v45  ;;  %v1242_v56 = vpop.f32.mrf.mxu0  ;;  %v1274_v60 = vpop.f32.mrf.mxu1  ;;  %v1073_v51 = vunpack.c.h.bf16 %v1167_v20 }
  0xe7   :  { %912 = vst.msk [vmem:[%s1905_s4 + $0x78] sm:$0xff] %vm896_vm2, %v847_v49  ;;  %v845_v58 = vadd.f32 %v1057_v42, %v653_v50  ;;  %v658_v59 = vadd.f32 %v1242_v56, %v1489_v36  ;;  %v877_v62 = vadd.f32 %v1121_v47, %v685_v55  ;;  %v690_v63 = vadd.f32 %v1274_v60, %v1489_v36  ;;  %v1170_v47 = vld [vmem:[%s1903_s3 + $0x68] sm:$0xff]  }
  0xe8   :  { %944 = vst.msk [vmem:[%s1905_s4 + $0x178] sm:$0xff] %vm896_vm2, %v879_v54  ;;  %v443_v0 = vpop.f32.mrf.mxu0  ;;  %v571_v4 = vpop.f32.mrf.mxu1  ;;  %v1077_v42 = vunpack.c.h.bf16 %v1168_v10  ;;  %v1137_v56 = vunpack.c.h.bf16 %v1183_v25 }
  0xe9   :  { %910 = vst.msk [vmem:[%s1905_s4 + $0x68] sm:$0xff] %vm896_vm2, %v845_v58  ;;  %v850_v2 = vadd.f32 %v1068_v52, %v658_v59  ;;  %v656_v3 = vadd.f32 %v1489_v36, %v443_v0  ;;  %942 = vst.msk [vmem:[%s1905_s4 + $0x168] sm:$0xff] %vm896_vm2, %v877_v62  ;;  %v882_v6 = vadd.f32 %v1132_v57, %v690_v63  ;;  %v1186_v52 = vld [vmem:[%s1903_s3 + $0xe8] sm:$0xff]   ;;  %v1169_v57 = vld [vmem:[%s1903_s3 + $0x60] sm:$0xff]  }
  0xea   :  { %v688_v7 = vadd.f32 %v1489_v36, %v571_v4  ;;  %v1243_v8 = vpop.f32.mrf.mxu0  ;;  %v1275_v13 = vpop.f32.mrf.mxu1  ;;  %v1185_v62 = vld [vmem:[%s1903_s3 + $0xe0] sm:$0xff]  }
  0xeb   :  { %915 = vst.msk [vmem:[%s1905_s4 + $0x90] sm:$0xff] %vm896_vm2, %v850_v2  ;;  %v848_v11 = vadd.f32 %v1064_v61, %v656_v3  ;;  %v659_v12 = vadd.f32 %v1243_v8, %v1489_v36  ;;  %947 = vst.msk [vmem:[%s1905_s4 + $0x190] sm:$0xff] %vm896_vm2, %v882_v6  ;;  %v691_v17 = vadd.f32 %v1275_v13, %v1489_v36  ;;  %v1084_v61 = vunpack.c.l.bf16 %v1170_v47 }
  0xec   :  { %v880_v16 = vadd.f32 %v1128_v1, %v688_v7  ;;  %v446_v18 = vpop.f32.mrf.mxu0  ;;  %v574_v23 = vpop.f32.mrf.mxu1  ;;  %v1148_v2 = vunpack.c.l.bf16 %v1186_v52  ;;  %v1080_v6 = vunpack.c.l.bf16 %v1169_v57  ;;  %v1144_v10 = vunpack.c.l.bf16 %v1185_v62 }
  0xed   :  { %913 = vst.msk [vmem:[%s1905_s4 + $0x80] sm:$0xff] %vm896_vm2, %v848_v11  ;;  %v851_v21 = vadd.f32 %v1069_v5, %v659_v12  ;;  %v657_v22 = vadd.f32 %v1489_v36, %v446_v18  ;;  %v883_v26 = vadd.f32 %v1133_v9, %v691_v17  ;;  %v689_v27 = vadd.f32 %v1489_v36, %v574_v23 }
  0xee   :  { %945 = vst.msk [vmem:[%s1905_s4 + $0x180] sm:$0xff] %vm896_vm2, %v880_v16  ;;  %v1246_v28 = vpop.f32.mrf.mxu0  ;;  %v1278_v32 = vpop.f32.mrf.mxu1  ;;  %v1149_v18 = vunpack.c.h.bf16 %v1186_v52  ;;  %v1081_v23 = vunpack.c.h.bf16 %v1169_v57 }
  0xef   :  { %916 = vst.msk [vmem:[%s1905_s4 + $0x98] sm:$0xff] %vm896_vm2, %v851_v21  ;;  %v849_v30 = vadd.f32 %v1065_v14, %v657_v22  ;;  %v662_v31 = vadd.f32 %v1246_v28, %v1489_v36  ;;  %948 = vst.msk [vmem:[%s1905_s4 + $0x198] sm:$0xff] %vm896_vm2, %v883_v26  ;;  %v881_v34 = vadd.f32 %v1129_v19, %v689_v27  ;;  %v1085_v14 = vunpack.c.h.bf16 %v1170_v47  ;;  %v1172_v19 = vld [vmem:[%s1903_s3 + $0x78] sm:$0xff]  }
  0xf0   :  { %v694_v35 = vadd.f32 %v1278_v32, %v1489_v36  ;;  %v459_v37 = vpop.f32.mrf.mxu0  ;;  %v587_v41 = vpop.f32.mrf.mxu1  ;;  %v1145_v28 = vunpack.c.h.bf16 %v1185_v62 }
  0xf1   :  { %914 = vst.msk [vmem:[%s1905_s4 + $0x88] sm:$0xff] %vm896_vm2, %v849_v30  ;;  %v854_v39 = vadd.f32 %v1076_v24, %v662_v31  ;;  %v660_v40 = vadd.f32 %v1489_v36, %v459_v37  ;;  %946 = vst.msk [vmem:[%s1905_s4 + $0x188] sm:$0xff] %vm896_vm2, %v881_v34  ;;  %v692_v44 = vadd.f32 %v1489_v36, %v587_v41  ;;  %v1188_v24 = vld [vmem:[%s1903_s3 + $0xf8] sm:$0xff]   ;;  %v1187_v34 = vld [vmem:[%s1903_s3 + $0xf0] sm:$0xff]  }
  0xf2   :  { %v886_v43 = vadd.f32 %v1140_v29, %v694_v35  ;;  %v1247_v45 = vpop.f32.mrf.mxu0  ;;  %v1279_v50 = vpop.f32.mrf.mxu1  ;;  %v1171_v29 = vld [vmem:[%s1903_s3 + $0x70] sm:$0xff]   ;;  %v1152_v47 = vunpack.c.l.bf16 %v1187_v34 }
  0xf3   :  { %919 = vst.msk [vmem:[%s1905_s4 + $0xb0] sm:$0xff] %vm896_vm2, %v854_v39  ;;  %v852_v48 = vadd.f32 %v1072_v33, %v660_v40  ;;  %v663_v49 = vadd.f32 %v1247_v45, %v1489_v36  ;;  %v884_v53 = vadd.f32 %v1136_v38, %v692_v44  ;;  %v695_v54 = vadd.f32 %v1279_v50, %v1489_v36 }
  0xf4   :  { %951 = vst.msk [vmem:[%s1905_s4 + $0x1b0] sm:$0xff] %vm896_vm2, %v886_v43  ;;  %v462_v55 = vpop.f32.mrf.mxu0  ;;  %v590_v60 = vpop.f32.mrf.mxu1  ;;  %v1092_v33 = vunpack.c.l.bf16 %v1172_v19  ;;  %v1156_v39 = vunpack.c.l.bf16 %v1188_v24  ;;  %v1088_v43 = vunpack.c.l.bf16 %v1171_v29 }
  0xf5   :  { %917 = vst.msk [vmem:[%s1905_s4 + $0xa0] sm:$0xff] %vm896_vm2, %v852_v48  ;;  %v855_v58 = vadd.f32 %v1077_v42, %v663_v49  ;;  %v661_v59 = vadd.f32 %v1489_v36, %v462_v55  ;;  %949 = vst.msk [vmem:[%s1905_s4 + $0x1a0] sm:$0xff] %vm896_vm2, %v884_v53  ;;  %v887_v63 = vadd.f32 %v1141_v46, %v695_v54  ;;  %v1157_v55 = vunpack.c.h.bf16 %v1188_v24 }
  0xf6   :  { %v693_v0 = vadd.f32 %v1489_v36, %v590_v60  ;;  %v1250_v1 = vpop.f32.mrf.mxu0  ;;  %v1282_v5 = vpop.f32.mrf.mxu1 }
  0xf7   :  { %920 = vst.msk [vmem:[%s1905_s4 + $0xb8] sm:$0xff] %vm896_vm2, %v855_v58  ;;  %v853_v3 = vadd.f32 %v1073_v51, %v661_v59  ;;  %v666_v4 = vadd.f32 %v1250_v1, %v1489_v36  ;;  %952 = vst.msk [vmem:[%s1905_s4 + $0x1b8] sm:$0xff] %vm896_vm2, %v887_v63  ;;  %v698_v8 = vadd.f32 %v1282_v5, %v1489_v36  ;;  %v1093_v51 = vunpack.c.h.bf16 %v1172_v19 }
  0xf8   :  { %v885_v7 = vadd.f32 %v1137_v56, %v693_v0  ;;  %v475_v9 = vpop.f32.mrf.mxu0  ;;  %v603_v13 = vpop.f32.mrf.mxu1  ;;  %v1089_v59 = vunpack.c.h.bf16 %v1171_v29  ;;  %v1153_v63 = vunpack.c.h.bf16 %v1187_v34 }
  0xf9   :  { %918 = vst.msk [vmem:[%s1905_s4 + $0xa8] sm:$0xff] %vm896_vm2, %v853_v3  ;;  %v858_v11 = vadd.f32 %v1084_v61, %v666_v4  ;;  %v664_v12 = vadd.f32 %v1489_v36, %v475_v9  ;;  %v890_v15 = vadd.f32 %v1148_v2, %v698_v8  ;;  %v696_v16 = vadd.f32 %v1489_v36, %v603_v13 }
  0xfa   :  { %950 = vst.msk [vmem:[%s1905_s4 + $0x1a8] sm:$0xff] %vm896_vm2, %v885_v7  ;;  %v1251_v17 = vpop.f32.mrf.mxu0  ;;  %v1283_v22 = vpop.f32.mrf.mxu1 }
  0xfb   :  { %923 = vst.msk [vmem:[%s1905_s4 + $0xd0] sm:$0xff] %vm896_vm2, %v858_v11  ;;  %v856_v20 = vadd.f32 %v1080_v6, %v664_v12  ;;  %v667_v21 = vadd.f32 %v1251_v17, %v1489_v36  ;;  %955 = vst.msk [vmem:[%s1905_s4 + $0x1d0] sm:$0xff] %vm896_vm2, %v890_v15  ;;  %v888_v25 = vadd.f32 %v1144_v10, %v696_v16 }
  0xfc   :  { %v699_v26 = vadd.f32 %v1283_v22, %v1489_v36  ;;  %v478_v27 = vpop.f32.mrf.mxu0  ;;  %v606_v32 = vpop.f32.mrf.mxu1 }
  0xfd   :  { %921 = vst.msk [vmem:[%s1905_s4 + $0xc0] sm:$0xff] %vm896_vm2, %v856_v20  ;;  %v859_v30 = vadd.f32 %v1085_v14, %v667_v21  ;;  %v665_v31 = vadd.f32 %v1489_v36, %v478_v27  ;;  %953 = vst.msk [vmem:[%s1905_s4 + $0x1c0] sm:$0xff] %vm896_vm2, %v888_v25  ;;  %v697_v37 = vadd.f32 %v1489_v36, %v606_v32 }
  0xfe   :  { %v891_v35 = vadd.f32 %v1149_v18, %v699_v26  ;;  %v1254_v38 = vpop.f32.mrf.mxu0  ;;  %v1286_v42 = vpop.f32.mrf.mxu1 }
  0xff   :  { %924 = vst.msk [vmem:[%s1905_s4 + $0xd8] sm:$0xff] %vm896_vm2, %v859_v30  ;;  %v857_v40 = vadd.f32 %v1081_v23, %v665_v31  ;;  %v670_v41 = vadd.f32 %v1254_v38, %v1489_v36  ;;  %v889_v44 = vadd.f32 %v1145_v28, %v697_v37  ;;  %v702_v45 = vadd.f32 %v1286_v42, %v1489_v36 }
 0x100   :  { %956 = vst.msk [vmem:[%s1905_s4 + $0x1d8] sm:$0xff] %vm896_vm2, %v891_v35  ;;  %v491_v46 = vpop.f32.mrf.mxu0  ;;  %v619_v50 = vpop.f32.mrf.mxu1 }
 0x101   :  { %922 = vst.msk [vmem:[%s1905_s4 + $0xc8] sm:$0xff] %vm896_vm2, %v857_v40  ;;  %v862_v48 = vadd.f32 %v1092_v33, %v670_v41  ;;  %v668_v49 = vadd.f32 %v1489_v36, %v491_v46  ;;  %954 = vst.msk [vmem:[%s1905_s4 + $0x1c8] sm:$0xff] %vm896_vm2, %v889_v44  ;;  %v894_v52 = vadd.f32 %v1156_v39, %v702_v45 }
 0x102   :  { %v700_v53 = vadd.f32 %v1489_v36, %v619_v50  ;;  %v1255_v54 = vpop.f32.mrf.mxu0  ;;  %v1287_v58 = vpop.f32.mrf.mxu1 }
 0x103   :  { %927 = vst.msk [vmem:[%s1905_s4 + $0xf0] sm:$0xff] %vm896_vm2, %v862_v48  ;;  %v860_v56 = vadd.f32 %v1088_v43, %v668_v49  ;;  %v671_v57 = vadd.f32 %v1255_v54, %v1489_v36  ;;  %959 = vst.msk [vmem:[%s1905_s4 + $0x1f0] sm:$0xff] %vm896_vm2, %v894_v52  ;;  %v703_v61 = vadd.f32 %v1287_v58, %v1489_v36 }
 0x104   :  { %v892_v60 = vadd.f32 %v1152_v47, %v700_v53  ;;  %v494_v62 = vpop.f32.mrf.mxu0  ;;  %v622_v2 = vpop.f32.mrf.mxu1 }
 0x105   :  { %925 = vst.msk [vmem:[%s1905_s4 + $0xe0] sm:$0xff] %vm896_vm2, %v860_v56  ;;  %v863_v0 = vadd.f32 %v1093_v51, %v671_v57  ;;  %v669_v1 = vadd.f32 %v1489_v36, %v494_v62  ;;  %v895_v3 = vadd.f32 %v1157_v55, %v703_v61  ;;  %v701_v4 = vadd.f32 %v1489_v36, %v622_v2 }
 0x106   :  { %957 = vst.msk [vmem:[%s1905_s4 + $0x1e0] sm:$0xff] %vm896_vm2, %v892_v60 }
 0x107   :  { %928 = vst.msk [vmem:[%s1905_s4 + $0xf8] sm:$0xff] %vm896_vm2, %v863_v0  ;;  %v861_v5 = vadd.f32 %v1089_v59, %v669_v1  ;;  %960 = vst.msk [vmem:[%s1905_s4 + $0x1f8] sm:$0xff] %vm896_vm2, %v895_v3  ;;  %v893_v6 = vadd.f32 %v1153_v63, %v701_v4 }
 0x109   :  { %926 = vst.msk [vmem:[%s1905_s4 + $0xe8] sm:$0xff] %vm896_vm2, %v861_v5  ;;  %958 = vst.msk [vmem:[%s1905_s4 + $0x1e8] sm:$0xff] %vm896_vm2, %v893_v6 }

// kernel: aspp_forward.14
= control target key start
LH: loop header
LB: loop body
LE: loop exit
PB: predicated region body
PF: predicated region fallthrough
CT: control target
= control target key end

     0   :  { %vm350_vm0 = vcmask 1043456   ;;  %vm253_vm1 = vcmask 64512   ;;  %vm3745_vm2 = vcmask 60416   ;;  %s6345_s5 = inlined_call_operand.vmem [shape: bf16[5,8,8], index: 5, kind: input, shape index: {}]   ;;  %s6346_s0 = inlined_call_operand.vmem [shape: bf16[512,8], index: 0, kind: input, shape index: {}]   ;;  %s6347_s1 = inlined_call_operand.vmem [shape: bf16[512,8], index: 1, kind: input, shape index: {}]   ;;  %s6348_s2 = inlined_call_operand.vmem [shape: bf16[512,8], index: 2, kind: input, shape index: {}]   ;;  %s6349_s3 = inlined_call_operand.vmem [shape: bf16[512,8], index: 3, kind: input, shape index: {}]   ;;  %s6350_s4 = inlined_call_operand.vmem [shape: bf16[512,8], index: 4, kind: input, shape index: {}]   ;;  %s6351_s6 = inlined_call_operand.vmem [shape: f32[1,8], index: 6, kind: input, shape index: {}]   ;;  %s6352_s7 = inlined_call_operand.vmem [shape: bf16[512,8], index: 7, kind: output, shape index: {}]  }
   0x1   :  { %v92_v0 = vld [vmem:[%s6345_s5] sm:$0xf]  ;;  %v4772_v4 = vld [vmem:[%s6346_s0 + $0x8] sm:$0xff]   ;;  %v3879_v6 = vld [vmem:[%s6345_s5 + $0x4] sm:$0xf] }
   0x2   :  { %4764 = vmatprep.subr.msk.bf16.mxu0 %vm350_vm0, %v92_v0  ;;  %4765 = vmatprep.subr.msk.bf16.mxu1 %vm350_vm0, %v92_v0  ;;  %v352_v1 = vsel %vm350_vm0, %v92_v0, 0  ;;  %v4770_v2 = vld [vmem:[%s6346_s0] sm:$0xff]   ;;  %v4773_v5 = vld [vmem:[%s6346_s0 + $0x88] sm:$0xff]   ;;  %v1036_v8 = vsel %vm350_vm0, %v3879_v6, 0  ;;  %v4774_v10 = vld [vmem:[%s6346_s0 + $0x10] sm:$0xff]  }
   0x3   :  { %4433 = vmatpush3.bf16.msra.mxu0 %v352_v1  ;;  %4763 = vmatpush3.bf16.msra.mxu1 %v352_v1  ;;  %v4771_v3 = vld [vmem:[%s6346_s0 + $0x80] sm:$0xff]   ;;  %v3944_v7 = vld [vmem:[%s6345_s5 + $0x8] sm:$0xf]  ;;  %v4775_v11 = vld [vmem:[%s6346_s0 + $0x90] sm:$0xff]  }
   0x4   :  { %4434 = vmatprep.mubr.msk.bf16.mxu0 %vm253_vm1, %v4770_v2  ;;  %4466 = vmatprep.mubr.msk.bf16.mxu1 %vm253_vm1, %v4771_v3  ;;  %v1714_v9 = vsel %vm350_vm0, %v3944_v7, 0  ;;  %v4776_v12 = vld [vmem:[%s6346_s0 + $0x18] sm:$0xff]   ;;  %v4778_v14 = vld [vmem:[%s6346_s0 + $0x20] sm:$0xff]   ;;  %v4780_v16 = vld [vmem:[%s6346_s0 + $0x28] sm:$0xff]  }
   0x5   :  { %4766 = vmatprep.subr.msk.bf16.mxu1 %vm350_vm0, %v3879_v6  ;;  %4767 = vmatprep.subr.msk.bf16.mxu0 %vm350_vm0, %v3944_v7  ;;  %v4777_v13 = vld [vmem:[%s6346_s0 + $0x98] sm:$0xff]   ;;  %v4779_v15 = vld [vmem:[%s6346_s0 + $0xa0] sm:$0xff]   ;;  %v4781_v17 = vld [vmem:[%s6346_s0 + $0xa8] sm:$0xff]  }
   0x6   :  { %4435 = vmatmul.mubr.msk.bf16.vlgmr.msra.gmra.mxu0 %vm253_vm1, %v4772_v4  ;;  %4467 = vmatmul.mubr.msk.bf16.vlgmr.msra.gmra.mxu1 %vm253_vm1, %v4773_v5  ;;  %v4782_v18 = vld [vmem:[%s6346_s0 + $0x30] sm:$0xff]   ;;  %v4784_v20 = vld [vmem:[%s6346_s0 + $0x38] sm:$0xff]   ;;  %v4786_v22 = vld [vmem:[%s6346_s0 + $0x40] sm:$0xff]  }
   0x7   :  { %4499 = vmatpush3.bf16.msra.mxu1 %v1036_v8  ;;  %4565 = vmatpush3.bf16.msra.mxu0 %v1714_v9  ;;  %v4783_v19 = vld [vmem:[%s6346_s0 + $0xb0] sm:$0xff]   ;;  %v4785_v21 = vld [vmem:[%s6346_s0 + $0xb8] sm:$0xff]   ;;  %v4787_v23 = vld [vmem:[%s6346_s0 + $0xc0] sm:$0xff]  }
   0x8   :  { %4438 = vmatprep.mubr.msk.bf16.mxu0 %vm253_vm1, %v4774_v10  ;;  %4470 = vmatprep.mubr.msk.bf16.mxu1 %vm253_vm1, %v4775_v11  ;;  %v4788_v24 = vld [vmem:[%s6346_s0 + $0x48] sm:$0xff]   ;;  %v4790_v26 = vld [vmem:[%s6346_s0 + $0x50] sm:$0xff]   ;;  %v4792_v30 = vld [vmem:[%s6346_s0 + $0x58] sm:$0xff]  }
   0x9   :  { %v4789_v25 = vld [vmem:[%s6346_s0 + $0xc8] sm:$0xff]   ;;  %v4791_v27 = vld [vmem:[%s6346_s0 + $0xd0] sm:$0xff]   ;;  %v4793_v31 = vld [vmem:[%s6346_s0 + $0xd8] sm:$0xff]  }
   0xa   :  { %v4009_v28 = vld [vmem:[%s6345_s5 + $0xc] sm:$0xf]  ;;  %v4074_v29 = vld [vmem:[%s6345_s5 + $0x10] sm:$0xf]  ;;  %v4794_v32 = vld [vmem:[%s6346_s0 + $0x60] sm:$0xff]  }
   0xb   :  { %4768 = vmatprep.subr.msk.bf16.mxu1 %vm350_vm0, %v4009_v28  ;;  %4769 = vmatprep.subr.msk.bf16.mxu0 %vm350_vm0, %v4074_v29  ;;  %v4795_v33 = vld [vmem:[%s6346_s0 + $0xe0] sm:$0xff]   ;;  %v4796_v34 = vld [vmem:[%s6346_s0 + $0x68] sm:$0xff]   ;;  %v4798_v36 = vld [vmem:[%s6346_s0 + $0x70] sm:$0xff]   ;;  %v3070_v44 = vsel %vm350_vm0, %v4074_v29, 0  ;;  %v2392_v46 = vsel %vm350_vm0, %v4009_v28, 0 }
   0xc   :  { %v4797_v35 = vld [vmem:[%s6346_s0 + $0xe8] sm:$0xff]   ;;  %v4799_v37 = vld [vmem:[%s6346_s0 + $0xf0] sm:$0xff]   ;;  %v4800_v38 = vld [vmem:[%s6346_s0 + $0x78] sm:$0xff]  }
   0xd   :  { %v4801_v39 = vld [vmem:[%s6346_s0 + $0xf8] sm:$0xff]   ;;  %v4803_v40 = vld [vmem:[%s6348_s2] sm:$0xff]   ;;  %v4805_v42 = vld [vmem:[%s6348_s2 + $0x8] sm:$0xff]  }
   0xe   :  { %4439 = vmatmul.mubr.msk.bf16.gmra.mxu0 %vm253_vm1, %v4776_v12  ;;  %4471 = vmatmul.mubr.msk.bf16.gmra.mxu1 %vm253_vm1, %v4777_v13  ;;  %v4802_v41 = vld [vmem:[%s6347_s1] sm:$0xff]   ;;  %v4804_v43 = vld [vmem:[%s6347_s1 + $0x8] sm:$0xff]   ;;  %v4806_v45 = vld [vmem:[%s6347_s1 + $0x10] sm:$0xff]  }
   0xf   :  { %4442 = vmatprep.mubr.msk.bf16.mxu0 %vm253_vm1, %v4778_v14  ;;  %4474 = vmatprep.mubr.msk.bf16.mxu1 %vm253_vm1, %v4779_v15  ;;  %v4807_v47 = vld [vmem:[%s6348_s2 + $0x10] sm:$0xff]   ;;  %v4808_v48 = vld [vmem:[%s6347_s1 + $0x18] sm:$0xff]   ;;  %v4811_v50 = vld [vmem:[%s6348_s2 + $0x20] sm:$0xff]  }
  0x10   :  { %v4809_v49 = vld [vmem:[%s6348_s2 + $0x18] sm:$0xff]   ;;  %v4810_v51 = vld [vmem:[%s6347_s1 + $0x20] sm:$0xff]   ;;  %v4812_v52 = vld [vmem:[%s6347_s1 + $0x28] sm:$0xff]  }
  0x11   :  { %v4813_v53 = vld [vmem:[%s6348_s2 + $0x28] sm:$0xff]   ;;  %v4815_v54 = vld [vmem:[%s6348_s2 + $0x30] sm:$0xff]   ;;  %v4816_v56 = vld [vmem:[%s6347_s1 + $0x38] sm:$0xff]  }
  0x12   :  { %v4814_v55 = vld [vmem:[%s6347_s1 + $0x30] sm:$0xff]   ;;  %v4817_v57 = vld [vmem:[%s6348_s2 + $0x38] sm:$0xff]   ;;  %v4819_v58 = vld [vmem:[%s6348_s2 + $0x40] sm:$0xff]  }
  0x13   :  { %v4818_v59 = vld [vmem:[%s6347_s1 + $0x40] sm:$0xff]   ;;  %v4820_v60 = vld [vmem:[%s6347_s1 + $0x48] sm:$0xff]   ;;  %v4823_v62 = vld [vmem:[%s6348_s2 + $0x50] sm:$0xff]  }
  0x14   :  { %v4821_v61 = vld [vmem:[%s6348_s2 + $0x48] sm:$0xff]   ;;  %v4822_v63 = vld [vmem:[%s6347_s1 + $0x50] sm:$0xff]   ;;  %v4824_v0 = vld [vmem:[%s6347_s1 + $0x58] sm:$0xff]  }
  0x15   :  { %v4825_v1 = vld [vmem:[%s6348_s2 + $0x58] sm:$0xff]   ;;  %v4827_v2 = vld [vmem:[%s6348_s2 + $0x60] sm:$0xff]   ;;  %v4828_v4 = vld [vmem:[%s6347_s1 + $0x68] sm:$0xff]  }
  0x16   :  { %4443 = vmatmul.mubr.msk.bf16.gmra.mxu0 %vm253_vm1, %v4780_v16  ;;  %4475 = vmatmul.mubr.msk.bf16.gmra.mxu1 %vm253_vm1, %v4781_v17  ;;  %v4826_v3 = vld [vmem:[%s6347_s1 + $0x60] sm:$0xff]   ;;  %v4829_v5 = vld [vmem:[%s6348_s2 + $0x68] sm:$0xff]   ;;  %v4831_v6 = vld [vmem:[%s6348_s2 + $0x70] sm:$0xff]  }
  0x17   :  { %4446 = vmatprep.mubr.msk.bf16.mxu0 %vm253_vm1, %v4782_v18  ;;  %4478 = vmatprep.mubr.msk.bf16.mxu1 %vm253_vm1, %v4783_v19  ;;  %v4830_v7 = vld [vmem:[%s6347_s1 + $0x70] sm:$0xff]   ;;  %v4832_v8 = vld [vmem:[%s6347_s1 + $0x78] sm:$0xff]   ;;  %v4835_v10 = vld [vmem:[%s6348_s2 + $0x80] sm:$0xff]  }
  0x18   :  { %v4833_v9 = vld [vmem:[%s6348_s2 + $0x78] sm:$0xff]   ;;  %v4834_v11 = vld [vmem:[%s6347_s1 + $0x80] sm:$0xff]   ;;  %v4836_v12 = vld [vmem:[%s6347_s1 + $0x88] sm:$0xff]  }
  0x19   :  { %v4837_v13 = vld [vmem:[%s6348_s2 + $0x88] sm:$0xff]   ;;  %v4839_v14 = vld [vmem:[%s6348_s2 + $0x90] sm:$0xff]   ;;  %v4841_v16 = vld [vmem:[%s6348_s2 + $0x98] sm:$0xff]  }
  0x1a   :  { %v4838_v15 = vld [vmem:[%s6347_s1 + $0x90] sm:$0xff]   ;;  %v4840_v17 = vld [vmem:[%s6347_s1 + $0x98] sm:$0xff]   ;;  %v4843_v18 = vld [vmem:[%s6348_s2 + $0xa0] sm:$0xff]  }
  0x1b   :  { %v4842_v19 = vld [vmem:[%s6347_s1 + $0xa0] sm:$0xff]   ;;  %v4853_v28 = vld [vmem:[%s6348_s2 + $0xc8] sm:$0xff]  }
  0x1c   :  { %v4852_v29 = vld [vmem:[%s6347_s1 + $0xc8] sm:$0xff]  }
  0x1e   :  { %4447 = vmatmul.mubr.msk.bf16.gmra.mxu0 %vm253_vm1, %v4784_v20  ;;  %4479 = vmatmul.mubr.msk.bf16.gmra.mxu1 %vm253_vm1, %v4785_v21  ;;  %v4845_v20 = vld [vmem:[%s6348_s2 + $0xa8] sm:$0xff]  }
  0x1f   :  { %4450 = vmatprep.mubr.msk.bf16.mxu0 %vm253_vm1, %v4786_v22  ;;  %4482 = vmatprep.mubr.msk.bf16.mxu1 %vm253_vm1, %v4787_v23  ;;  %v4844_v21 = vld [vmem:[%s6347_s1 + $0xa8] sm:$0xff]   ;;  %v4847_v22 = vld [vmem:[%s6348_s2 + $0xb0] sm:$0xff]  }
  0x20   :  { %v4846_v23 = vld [vmem:[%s6347_s1 + $0xb0] sm:$0xff]  }
  0x26   :  { %4451 = vmatmul.mubr.msk.bf16.gmra.mxu0 %vm253_vm1, %v4788_v24  ;;  %4483 = vmatmul.mubr.msk.bf16.gmra.mxu1 %vm253_vm1, %v4789_v25  ;;  %v4849_v24 = vld [vmem:[%s6348_s2 + $0xb8] sm:$0xff]  }
  0x27   :  { %4454 = vmatprep.mubr.msk.bf16.mxu0 %vm253_vm1, %v4790_v26  ;;  %4486 = vmatprep.mubr.msk.bf16.mxu1 %vm253_vm1, %v4791_v27  ;;  %v4848_v25 = vld [vmem:[%s6347_s1 + $0xb8] sm:$0xff]   ;;  %v4851_v26 = vld [vmem:[%s6348_s2 + $0xc0] sm:$0xff]  }
  0x28   :  { %v4850_v27 = vld [vmem:[%s6347_s1 + $0xc0] sm:$0xff]  }
  0x2e   :  { %4455 = vmatmul.mubr.msk.bf16.gmra.mxu0 %vm253_vm1, %v4792_v30  ;;  %4487 = vmatmul.mubr.msk.bf16.gmra.mxu1 %vm253_vm1, %v4793_v31  ;;  %v4855_v30 = vld [vmem:[%s6348_s2 + $0xd0] sm:$0xff]  }
  0x2f   :  { %4458 = vmatprep.mubr.msk.bf16.mxu0 %vm253_vm1, %v4794_v32  ;;  %4490 = vmatprep.mubr.msk.bf16.mxu1 %vm253_vm1, %v4795_v33  ;;  %v4854_v31 = vld [vmem:[%s6347_s1 + $0xd0] sm:$0xff]   ;;  %v4857_v32 = vld [vmem:[%s6348_s2 + $0xd8] sm:$0xff]  }
  0x30   :  { %v4856_v33 = vld [vmem:[%s6347_s1 + $0xd8] sm:$0xff]  }
  0x36   :  { %4459 = vmatmul.mubr.msk.bf16.gmra.mxu0 %vm253_vm1, %v4796_v34  ;;  %4491 = vmatmul.mubr.msk.bf16.gmra.mxu1 %vm253_vm1, %v4797_v35  ;;  %v4859_v34 = vld [vmem:[%s6348_s2 + $0xe0] sm:$0xff]  }
  0x37   :  { %4462 = vmatprep.mubr.msk.bf16.mxu0 %vm253_vm1, %v4798_v36  ;;  %4494 = vmatprep.mubr.msk.bf16.mxu1 %vm253_vm1, %v4799_v37  ;;  %v4858_v35 = vld [vmem:[%s6347_s1 + $0xe0] sm:$0xff]   ;;  %v4861_v36 = vld [vmem:[%s6348_s2 + $0xe8] sm:$0xff]  }
  0x38   :  { %v4860_v37 = vld [vmem:[%s6347_s1 + $0xe8] sm:$0xff]  }
  0x3e   :  { %4463 = vmatmul.mubr.msk.bf16.gmra.mxu0 %vm253_vm1, %v4800_v38  ;;  %4495 = vmatmul.mubr.msk.bf16.gmra.mxu1 %vm253_vm1, %v4801_v39  ;;  %v4863_v38 = vld [vmem:[%s6348_s2 + $0xf0] sm:$0xff]  }
  0x3f   :  { %4566 = vmatprep.mubr.msk.bf16.mxu0 %vm253_vm1, %v4803_v40  ;;  %4500 = vmatprep.mubr.msk.bf16.mxu1 %vm253_vm1, %v4802_v41  ;;  %v4862_v39 = vld [vmem:[%s6347_s1 + $0xf0] sm:$0xff]   ;;  %v4865_v40 = vld [vmem:[%s6348_s2 + $0xf8] sm:$0xff]  }
  0x40   :  { %v4864_v41 = vld [vmem:[%s6347_s1 + $0xf8] sm:$0xff]  }
  0x46   :  { %4567 = vmatmul.mubr.msk.bf16.vlgmr.msra.gmra.mxu0 %vm253_vm1, %v4805_v42  ;;  %4501 = vmatmul.mubr.msk.bf16.vlgmr.msra.gmra.mxu1 %vm253_vm1, %v4804_v43  ;;  %v4867_v42 = vld [vmem:[%s6350_s4] sm:$0xff]  }
  0x47   :  { %4697 = vmatpush3.bf16.msra.mxu0 %v3070_v44  ;;  %4631 = vmatpush3.bf16.msra.mxu1 %v2392_v46  ;;  %v4866_v43 = vld [vmem:[%s6349_s3] sm:$0xff]   ;;  %v4869_v44 = vld [vmem:[%s6350_s4 + $0x8] sm:$0xff]   ;;  %v4871_v46 = vld [vmem:[%s6350_s4 + $0x10] sm:$0xff]  }
  0x48   :  { %4504 = vmatprep.mubr.msk.bf16.mxu1 %vm253_vm1, %v4806_v45  ;;  %4570 = vmatprep.mubr.msk.bf16.mxu0 %vm253_vm1, %v4807_v47  ;;  %v4868_v45 = vld [vmem:[%s6349_s3 + $0x8] sm:$0xff]   ;;  %v4870_v47 = vld [vmem:[%s6349_s3 + $0x10] sm:$0xff]  }
  0x4e   :  { %4571 = vmatmul.mubr.msk.bf16.gmra.mxu0 %vm253_vm1, %v4809_v49  ;;  %4505 = vmatmul.mubr.msk.bf16.gmra.mxu1 %vm253_vm1, %v4808_v48  ;;  %v5403_v48 = vld [vmem:[%s6351_s6] ss:$0 sm:$0xff] }
  0x4f   :  { %4574 = vmatprep.mubr.msk.bf16.mxu0 %vm253_vm1, %v4811_v50  ;;  %4508 = vmatprep.mubr.msk.bf16.mxu1 %vm253_vm1, %v4810_v51 }
  0x56   :  { %4575 = vmatmul.mubr.msk.bf16.gmra.mxu0 %vm253_vm1, %v4813_v53  ;;  %4509 = vmatmul.mubr.msk.bf16.gmra.mxu1 %vm253_vm1, %v4812_v52 }
  0x57   :  { %4578 = vmatprep.mubr.msk.bf16.mxu0 %vm253_vm1, %v4815_v54  ;;  %4512 = vmatprep.mubr.msk.bf16.mxu1 %vm253_vm1, %v4814_v55 }
  0x5e   :  { %4579 = vmatmul.mubr.msk.bf16.gmra.mxu0 %vm253_vm1, %v4817_v57  ;;  %4513 = vmatmul.mubr.msk.bf16.gmra.mxu1 %vm253_vm1, %v4816_v56  ;;  %v4873_v56 = vld [vmem:[%s6350_s4 + $0x18] sm:$0xff]  }
  0x5f   :  { %4582 = vmatprep.mubr.msk.bf16.mxu0 %vm253_vm1, %v4819_v58  ;;  %4516 = vmatprep.mubr.msk.bf16.mxu1 %vm253_vm1, %v4818_v59  ;;  %v4872_v58 = vld [vmem:[%s6349_s3 + $0x18] sm:$0xff]   ;;  %v4875_v59 = vld [vmem:[%s6350_s4 + $0x20] sm:$0xff]  }
  0x66   :  { %4583 = vmatmul.mubr.msk.bf16.gmra.mxu0 %vm253_vm1, %v4821_v61  ;;  %4517 = vmatmul.mubr.msk.bf16.gmra.mxu1 %vm253_vm1, %v4820_v60 }
  0x67   :  { %4586 = vmatprep.mubr.msk.bf16.mxu0 %vm253_vm1, %v4823_v62  ;;  %4520 = vmatprep.mubr.msk.bf16.mxu1 %vm253_vm1, %v4822_v63  ;;  %v4874_v62 = vld [vmem:[%s6349_s3 + $0x20] sm:$0xff]  }
  0x6e   :  { %4587 = vmatmul.mubr.msk.bf16.gmra.mxu0 %vm253_vm1, %v4825_v1  ;;  %4521 = vmatmul.mubr.msk.bf16.gmra.mxu1 %vm253_vm1, %v4824_v0 }
  0x6f   :  { %4590 = vmatprep.mubr.msk.bf16.mxu0 %vm253_vm1, %v4827_v2  ;;  %4524 = vmatprep.mubr.msk.bf16.mxu1 %vm253_vm1, %v4826_v3 }
  0x76   :  { %4591 = vmatmul.mubr.msk.bf16.gmra.mxu0 %vm253_vm1, %v4829_v5  ;;  %4525 = vmatmul.mubr.msk.bf16.gmra.mxu1 %vm253_vm1, %v4828_v4 }
  0x77   :  { %4594 = vmatprep.mubr.msk.bf16.mxu0 %vm253_vm1, %v4831_v6  ;;  %4528 = vmatprep.mubr.msk.bf16.mxu1 %vm253_vm1, %v4830_v7 }
  0x7e   :  { %4595 = vmatmul.mubr.msk.bf16.gmra.mxu0 %vm253_vm1, %v4833_v9  ;;  %4529 = vmatmul.mubr.msk.bf16.gmra.mxu1 %vm253_vm1, %v4832_v8  ;;  %v4877_v8 = vld [vmem:[%s6350_s4 + $0x28] sm:$0xff]  }
  0x7f   :  { %4598 = vmatprep.mubr.msk.bf16.mxu0 %vm253_vm1, %v4835_v10  ;;  %4532 = vmatprep.mubr.msk.bf16.mxu1 %vm253_vm1, %v4834_v11  ;;  %v4876_v10 = vld [vmem:[%s6349_s3 + $0x28] sm:$0xff]   ;;  %v4879_v11 = vld [vmem:[%s6350_s4 + $0x30] sm:$0xff]  }
  0x86   :  { %4599 = vmatmul.mubr.msk.bf16.gmra.mxu0 %vm253_vm1, %v4837_v13  ;;  %4533 = vmatmul.mubr.msk.bf16.gmra.mxu1 %vm253_vm1, %v4836_v12 }
  0x87   :  { %4602 = vmatprep.mubr.msk.bf16.mxu0 %vm253_vm1, %v4839_v14  ;;  %4536 = vmatprep.mubr.msk.bf16.mxu1 %vm253_vm1, %v4838_v15  ;;  %v4878_v14 = vld [vmem:[%s6349_s3 + $0x30] sm:$0xff]  }
  0x8e   :  { %4603 = vmatmul.mubr.msk.bf16.gmra.mxu0 %vm253_vm1, %v4841_v16  ;;  %4537 = vmatmul.mubr.msk.bf16.gmra.mxu1 %vm253_vm1, %v4840_v17 }
  0x8f   :  { %4606 = vmatprep.mubr.msk.bf16.mxu0 %vm253_vm1, %v4843_v18  ;;  %4540 = vmatprep.mubr.msk.bf16.mxu1 %vm253_vm1, %v4842_v19 }
  0x96   :  { %4607 = vmatmul.mubr.msk.bf16.gmra.mxu0 %vm253_vm1, %v4845_v20  ;;  %4541 = vmatmul.mubr.msk.bf16.gmra.mxu1 %vm253_vm1, %v4844_v21 }
  0x97   :  { %4610 = vmatprep.mubr.msk.bf16.mxu0 %vm253_vm1, %v4847_v22  ;;  %4544 = vmatprep.mubr.msk.bf16.mxu1 %vm253_vm1, %v4846_v23 }
  0x9e   :  { %4611 = vmatmul.mubr.msk.bf16.gmra.mxu0 %vm253_vm1, %v4849_v24  ;;  %4545 = vmatmul.mubr.msk.bf16.gmra.mxu1 %vm253_vm1, %v4848_v25  ;;  %v4881_v24 = vld [vmem:[%s6350_s4 + $0x38] sm:$0xff]  }
  0x9f   :  { %4614 = vmatprep.mubr.msk.bf16.mxu0 %vm253_vm1, %v4851_v26  ;;  %4548 = vmatprep.mubr.msk.bf16.mxu1 %vm253_vm1, %v4850_v27  ;;  %v4880_v26 = vld [vmem:[%s6349_s3 + $0x38] sm:$0xff]   ;;  %v4883_v27 = vld [vmem:[%s6350_s4 + $0x40] sm:$0xff]  }
  0xa6   :  { %4615 = vmatmul.mubr.msk.bf16.gmra.mxu0 %vm253_vm1, %v4853_v28  ;;  %4549 = vmatmul.mubr.msk.bf16.gmra.mxu1 %vm253_vm1, %v4852_v29 }
  0xa7   :  { %4618 = vmatprep.mubr.msk.bf16.mxu0 %vm253_vm1, %v4855_v30  ;;  %4552 = vmatprep.mubr.msk.bf16.mxu1 %vm253_vm1, %v4854_v31  ;;  %v4882_v30 = vld [vmem:[%s6349_s3 + $0x40] sm:$0xff]  }
  0xae   :  { %4619 = vmatmul.mubr.msk.bf16.gmra.mxu0 %vm253_vm1, %v4857_v32  ;;  %4553 = vmatmul.mubr.msk.bf16.gmra.mxu1 %vm253_vm1, %v4856_v33 }
  0xaf   :  { %4622 = vmatprep.mubr.msk.bf16.mxu0 %vm253_vm1, %v4859_v34  ;;  %4556 = vmatprep.mubr.msk.bf16.mxu1 %vm253_vm1, %v4858_v35 }
  0xb6   :  { %4623 = vmatmul.mubr.msk.bf16.gmra.mxu0 %vm253_vm1, %v4861_v36  ;;  %4557 = vmatmul.mubr.msk.bf16.gmra.mxu1 %vm253_vm1, %v4860_v37 }
  0xb7   :  { %4626 = vmatprep.mubr.msk.bf16.mxu0 %vm253_vm1, %v4863_v38  ;;  %4560 = vmatprep.mubr.msk.bf16.mxu1 %vm253_vm1, %v4862_v39 }
  0xbe   :  { %4627 = vmatmul.mubr.msk.bf16.gmra.mxu0 %vm253_vm1, %v4865_v40  ;;  %4561 = vmatmul.mubr.msk.bf16.gmra.mxu1 %vm253_vm1, %v4864_v41  ;;  %v4885_v40 = vld [vmem:[%s6350_s4 + $0x48] sm:$0xff]  }
  0xbf   :  { %4698 = vmatprep.mubr.msk.bf16.mxu0 %vm253_vm1, %v4867_v42  ;;  %4632 = vmatprep.mubr.msk.bf16.mxu1 %vm253_vm1, %v4866_v43  ;;  %v4884_v42 = vld [vmem:[%s6349_s3 + $0x48] sm:$0xff]   ;;  %v4887_v43 = vld [vmem:[%s6350_s4 + $0x50] sm:$0xff]  }
  0xc6   :  { %v5405_v49 = vpop.f32.mrf.mxu0  ;;  %4699 = vmatmul.mubr.msk.bf16.vlgmr.msra.gmra.mxu0 %vm253_vm1, %v4869_v44  ;;  %v4468_v50 = vpop.f32.mrf.mxu1  ;;  %4633 = vmatmul.mubr.msk.bf16.vlgmr.msra.gmra.mxu1 %vm253_vm1, %v4868_v45 }
  0xc7   :  { %4702 = vmatprep.mubr.msk.bf16.mxu0 %vm253_vm1, %v4871_v46  ;;  %v5411_v51 = vadd.f32 %v4468_v50, %v5403_v48  ;;  %4636 = vmatprep.mubr.msk.bf16.mxu1 %vm253_vm1, %v4870_v47  ;;  %v4886_v46 = vld [vmem:[%s6349_s3 + $0x50] sm:$0xff]  }
  0xc8   :  { %v5413_v52 = vpop.f32.mrf.mxu0  ;;  %v516_v53 = vpop.f32.mrf.mxu1 }
  0xc9   :  { %v5417_v54 = vadd.f32 %v5403_v48, %v516_v53 }
  0xca   :  { %v5419_v55 = vpop.f32.mrf.mxu0  ;;  %v4469_v57 = vpop.f32.mrf.mxu1 }
  0xcb   :  { %v5431_v60 = vadd.f32 %v4469_v57, %v5403_v48 }
  0xcc   :  { %v5433_v61 = vpop.f32.mrf.mxu0  ;;  %v519_v63 = vpop.f32.mrf.mxu1 }
  0xcd   :  { %v5439_v0 = vadd.f32 %v5403_v48, %v519_v63 }
  0xce   :  { %v5441_v1 = vpop.f32.mrf.mxu0  ;;  %4703 = vmatmul.mubr.msk.bf16.gmra.mxu0 %vm253_vm1, %v4873_v56  ;;  %v4472_v2 = vpop.f32.mrf.mxu1  ;;  %4637 = vmatmul.mubr.msk.bf16.gmra.mxu1 %vm253_vm1, %v4872_v58 }
  0xcf   :  { %4706 = vmatprep.mubr.msk.bf16.mxu0 %vm253_vm1, %v4875_v59  ;;  %v5447_v3 = vadd.f32 %v4472_v2, %v5403_v48  ;;  %4640 = vmatprep.mubr.msk.bf16.mxu1 %vm253_vm1, %v4874_v62  ;;  %v4889_v2 = vld [vmem:[%s6350_s4 + $0x58] sm:$0xff]  }
  0xd0   :  { %v5449_v4 = vpop.f32.mrf.mxu0  ;;  %v532_v5 = vpop.f32.mrf.mxu1 }
  0xd1   :  { %v5453_v6 = vadd.f32 %v5403_v48, %v532_v5 }
  0xd2   :  { %v5455_v7 = vpop.f32.mrf.mxu0  ;;  %v4473_v9 = vpop.f32.mrf.mxu1 }
  0xd3   :  { %v5467_v12 = vadd.f32 %v4473_v9, %v5403_v48  ;;  %v4891_v9 = vld [vmem:[%s6350_s4 + $0x60] sm:$0xff]  }
  0xd4   :  { %v5469_v13 = vpop.f32.mrf.mxu0  ;;  %v535_v15 = vpop.f32.mrf.mxu1 }
  0xd5   :  { %v5475_v16 = vadd.f32 %v5403_v48, %v535_v15 }
  0xd6   :  { %v5477_v17 = vpop.f32.mrf.mxu0  ;;  %4707 = vmatmul.mubr.msk.bf16.gmra.mxu0 %vm253_vm1, %v4877_v8  ;;  %v4476_v18 = vpop.f32.mrf.mxu1  ;;  %4641 = vmatmul.mubr.msk.bf16.gmra.mxu1 %vm253_vm1, %v4876_v10  ;;  %v4888_v8 = vld [vmem:[%s6349_s3 + $0x58] sm:$0xff]  }
  0xd7   :  { %4710 = vmatprep.mubr.msk.bf16.mxu0 %vm253_vm1, %v4879_v11  ;;  %v5483_v19 = vadd.f32 %v4476_v18, %v5403_v48  ;;  %4644 = vmatprep.mubr.msk.bf16.mxu1 %vm253_vm1, %v4878_v14  ;;  %v4890_v14 = vld [vmem:[%s6349_s3 + $0x60] sm:$0xff]  }
  0xd8   :  { %v5485_v20 = vpop.f32.mrf.mxu0  ;;  %v548_v21 = vpop.f32.mrf.mxu1 }
  0xd9   :  { %v5489_v22 = vadd.f32 %v5403_v48, %v548_v21 }
  0xda   :  { %v5491_v23 = vpop.f32.mrf.mxu0  ;;  %v4477_v25 = vpop.f32.mrf.mxu1 }
  0xdb   :  { %v5503_v28 = vadd.f32 %v4477_v25, %v5403_v48 }
  0xdc   :  { %v5505_v29 = vpop.f32.mrf.mxu0  ;;  %v551_v31 = vpop.f32.mrf.mxu1 }
  0xdd   :  { %v5511_v32 = vadd.f32 %v5403_v48, %v551_v31 }
  0xde   :  { %v5513_v33 = vpop.f32.mrf.mxu0  ;;  %4711 = vmatmul.mubr.msk.bf16.gmra.mxu0 %vm253_vm1, %v4881_v24  ;;  %v4480_v34 = vpop.f32.mrf.mxu1  ;;  %4645 = vmatmul.mubr.msk.bf16.gmra.mxu1 %vm253_vm1, %v4880_v26 }
  0xdf   :  { %4714 = vmatprep.mubr.msk.bf16.mxu0 %vm253_vm1, %v4883_v27  ;;  %v5519_v35 = vadd.f32 %v4480_v34, %v5403_v48  ;;  %4648 = vmatprep.mubr.msk.bf16.mxu1 %vm253_vm1, %v4882_v30  ;;  %v4893_v34 = vld [vmem:[%s6350_s4 + $0x68] sm:$0xff]  }
  0xe0   :  { %v5521_v36 = vpop.f32.mrf.mxu0  ;;  %v564_v37 = vpop.f32.mrf.mxu1 }
  0xe1   :  { %v5525_v38 = vadd.f32 %v5403_v48, %v564_v37 }
  0xe2   :  { %v5527_v39 = vpop.f32.mrf.mxu0  ;;  %v4481_v41 = vpop.f32.mrf.mxu1 }
  0xe3   :  { %v5539_v44 = vadd.f32 %v4481_v41, %v5403_v48  ;;  %v4895_v41 = vld [vmem:[%s6350_s4 + $0x70] sm:$0xff]  }
  0xe4   :  { %v5541_v45 = vpop.f32.mrf.mxu0  ;;  %v567_v47 = vpop.f32.mrf.mxu1 }
  0xe5   :  { %v5547_v50 = vadd.f32 %v5403_v48, %v567_v47 }
  0xe6   :  { %v5549_v53 = vpop.f32.mrf.mxu0  ;;  %4715 = vmatmul.mubr.msk.bf16.gmra.mxu0 %vm253_vm1, %v4885_v40  ;;  %v4484_v56 = vpop.f32.mrf.mxu1  ;;  %4649 = vmatmul.mubr.msk.bf16.gmra.mxu1 %vm253_vm1, %v4884_v42  ;;  %v4892_v40 = vld [vmem:[%s6349_s3 + $0x68] sm:$0xff]  }
  0xe7   :  { %6353 = vst [vmem:[#allocation2_spill] sm:$0xff] %v5547_v50  ;;  %4718 = vmatprep.mubr.msk.bf16.mxu0 %vm253_vm1, %v4887_v43  ;;  %v5555_v57 = vadd.f32 %v4484_v56, %v5403_v48  ;;  %4652 = vmatprep.mubr.msk.bf16.mxu1 %vm253_vm1, %v4886_v46  ;;  %v4894_v46 = vld [vmem:[%s6349_s3 + $0x70] sm:$0xff]  }
  0xe8   :  { %v5557_v58 = vpop.f32.mrf.mxu0  ;;  %v580_v59 = vpop.f32.mrf.mxu1 }
  0xe9   :  { %6354 = vst [vmem:[#allocation3_spill] sm:$0xff] %v5555_v57  ;;  %v5561_v62 = vadd.f32 %v5403_v48, %v580_v59 }
  0xea   :  { %v5563_v63 = vpop.f32.mrf.mxu0  ;;  %v4485_v5 = vpop.f32.mrf.mxu1 }
  0xeb   :  { %6355 = vst [vmem:[#allocation4_spill] sm:$0xff] %v5561_v62  ;;  %v5575_v10 = vadd.f32 %v4485_v5, %v5403_v48 }
  0xec   :  { %v5577_v11 = vpop.f32.mrf.mxu0  ;;  %v583_v15 = vpop.f32.mrf.mxu1 }
  0xed   :  { %6356 = vst [vmem:[#allocation5_spill] sm:$0xff] %v5575_v10  ;;  %v5583_v18 = vadd.f32 %v5403_v48, %v583_v15 }
  0xee   :  { %v5585_v21 = vpop.f32.mrf.mxu0  ;;  %4719 = vmatmul.mubr.msk.bf16.gmra.mxu0 %vm253_vm1, %v4889_v2  ;;  %v4488_v24 = vpop.f32.mrf.mxu1  ;;  %4653 = vmatmul.mubr.msk.bf16.gmra.mxu1 %vm253_vm1, %v4888_v8 }
  0xef   :  { %6357 = vst [vmem:[#allocation6_spill] sm:$0xff] %v5583_v18  ;;  %4722 = vmatprep.mubr.msk.bf16.mxu0 %vm253_vm1, %v4891_v9  ;;  %v5591_v25 = vadd.f32 %v4488_v24, %v5403_v48  ;;  %4656 = vmatprep.mubr.msk.bf16.mxu1 %vm253_vm1, %v4890_v14  ;;  %v4897_v24 = vld [vmem:[%s6350_s4 + $0x78] sm:$0xff]  }
  0xf0   :  { %v5593_v26 = vpop.f32.mrf.mxu0  ;;  %v596_v27 = vpop.f32.mrf.mxu1 }
  0xf1   :  { %6358 = vst [vmem:[#allocation7_spill] sm:$0xff] %v5591_v25  ;;  %v5597_v30 = vadd.f32 %v5403_v48, %v596_v27 }
  0xf2   :  { %v5599_v31 = vpop.f32.mrf.mxu0  ;;  %v4489_v37 = vpop.f32.mrf.mxu1 }
  0xf3   :  { %6359 = vst [vmem:[#allocation8_spill] sm:$0xff] %v5597_v30  ;;  %v5611_v42 = vadd.f32 %v4489_v37, %v5403_v48  ;;  %v4899_v37 = vld [vmem:[%s6350_s4 + $0x80] sm:$0xff]  }
  0xf4   :  { %v5613_v43 = vpop.f32.mrf.mxu0  ;;  %v599_v47 = vpop.f32.mrf.mxu1 }
  0xf5   :  { %6360 = vst [vmem:[#allocation9_spill] sm:$0xff] %v5611_v42  ;;  %v5619_v56 = vadd.f32 %v5403_v48, %v599_v47 }
  0xf6   :  { %v5621_v59 = vpop.f32.mrf.mxu0  ;;  %4723 = vmatmul.mubr.msk.bf16.gmra.mxu0 %vm253_vm1, %v4893_v34  ;;  %v4492_v2 = vpop.f32.mrf.mxu1  ;;  %4657 = vmatmul.mubr.msk.bf16.gmra.mxu1 %vm253_vm1, %v4892_v40  ;;  %v4896_v34 = vld [vmem:[%s6349_s3 + $0x78] sm:$0xff]  }
  0xf7   :  { %6361 = vst [vmem:[#allocation10_spill] sm:$0xff] %v5619_v56  ;;  %4726 = vmatprep.mubr.msk.bf16.mxu0 %vm253_vm1, %v4895_v41  ;;  %v5627_v5 = vadd.f32 %v4492_v2, %v5403_v48  ;;  %4660 = vmatprep.mubr.msk.bf16.mxu1 %vm253_vm1, %v4894_v46  ;;  %v4898_v46 = vld [vmem:[%s6349_s3 + $0x80] sm:$0xff]   ;;  %v651_v56 = vadd.f32 %v5405_v49, %v5403_v48 }
  0xf8   :  { %v5629_v8 = vpop.f32.mrf.mxu0  ;;  %v612_v9 = vpop.f32.mrf.mxu1  ;;  %v652_v49 = vadd.f32 %v5419_v55, %v5403_v48  ;;  %v650_v55 = vadd.f32 %v5403_v48, %v5433_v61  ;;  %v653_v61 = vadd.f32 %v5403_v48, %v5449_v4  ;;  %v4908_v4 = vld [vmem:[%s6349_s3 + $0xa8] sm:$0xff]  }
  0xf9   :  { %6362 = vst [vmem:[#allocation11_spill] sm:$0xff] %v5627_v5  ;;  %v5633_v14 = vadd.f32 %v5403_v48, %v612_v9 }
  0xfa   :  { %v5635_v15 = vpop.f32.mrf.mxu0  ;;  %v4493_v27 = vpop.f32.mrf.mxu1 }
  0xfb   :  { %6363 = vst [vmem:[#allocation12_spill] sm:$0xff] %v5633_v14  ;;  %v5647_v40 = vadd.f32 %v4493_v27, %v5403_v48 }
  0xfc   :  { %v5649_v41 = vpop.f32.mrf.mxu0  ;;  %v615_v47 = vpop.f32.mrf.mxu1 }
  0xfd   :  { %6364 = vst [vmem:[#allocation13_spill] sm:$0xff] %v5647_v40  ;;  %v5655_v2 = vadd.f32 %v5403_v48, %v615_v47 }
  0xfe   :  { %v5657_v9 = vpop.f32.mrf.mxu0  ;;  %4727 = vmatmul.mubr.msk.bf16.gmra.mxu0 %vm253_vm1, %v4897_v24  ;;  %v4496_v14 = vpop.f32.mrf.mxu1  ;;  %4661 = vmatmul.mubr.msk.bf16.gmra.mxu1 %vm253_vm1, %v4896_v34  ;;  %v4901_v24 = vld [vmem:[%s6350_s4 + $0x88] sm:$0xff]  }
  0xff   :  { %6365 = vst [vmem:[#allocation14_spill] sm:$0xff] %v5655_v2  ;;  %4730 = vmatprep.mubr.msk.bf16.mxu0 %vm253_vm1, %v4899_v37  ;;  %v5663_v27 = vadd.f32 %v4496_v14, %v5403_v48  ;;  %4664 = vmatprep.mubr.msk.bf16.mxu1 %vm253_vm1, %v4898_v46  ;;  %v4900_v14 = vld [vmem:[%s6349_s3 + $0x88] sm:$0xff]   ;;  %v4903_v37 = vld [vmem:[%s6350_s4 + $0x90] sm:$0xff]  }
 0x100   :  { %v5665_v40 = vpop.f32.mrf.mxu0  ;;  %v628_v5 = vpop.f32.mrf.mxu1 }
 0x101   :  { %6366 = vst [vmem:[#allocation15_spill] sm:$0xff] %v5663_v27  ;;  %v5669_v47 = vadd.f32 %v5403_v48, %v628_v5 }
 0x102   :  { %v5671_v2 = vpop.f32.mrf.mxu0  ;;  %v4497_v34 = vpop.f32.mrf.mxu1 }
 0x103   :  { %6367 = vst [vmem:[#allocation16_spill] sm:$0xff] %v5669_v47  ;;  %v5683_v46 = vadd.f32 %v4497_v34, %v5403_v48  ;;  %v4902_v47 = vld [vmem:[%s6349_s3 + $0x90] sm:$0xff]   ;;  %v649_v34 = vadd.f32 %v5403_v48, %v5413_v52  ;;  %v4904_v52 = vld [vmem:[%s6349_s3 + $0x98] sm:$0xff]  }
 0x104   :  { %v5685_v5 = vpop.f32.mrf.mxu0  ;;  %v631_v27 = vpop.f32.mrf.mxu1 }
 0x105   :  { %6368 = vst [vmem:[#allocation17_spill] sm:$0xff] %v5683_v46  ;;  %v5693_v42 = vadd.f32 %v5403_v48, %v631_v27 }
 0x106   :  { %v4568_v30 = vpop.f32.mrf.mxu0  ;;  %4731 = vmatmul.mubr.msk.bf16.gmra.mxu0 %vm253_vm1, %v4901_v24  ;;  %v4502_v25 = vpop.f32.mrf.mxu1  ;;  %4665 = vmatmul.mubr.msk.bf16.gmra.mxu1 %vm253_vm1, %v4900_v14  ;;  %v4905_v14 = vld [vmem:[%s6350_s4 + $0x98] sm:$0xff]  }
 0x107   :  { %6369 = vst [vmem:[#allocation18_spill] sm:$0xff] %v5693_v42  ;;  %4734 = vmatprep.mubr.msk.bf16.mxu0 %vm253_vm1, %v4903_v37  ;;  %v1329_v46 = vadd.f32 %v4502_v25, %v651_v56  ;;  %4668 = vmatprep.mubr.msk.bf16.mxu1 %vm253_vm1, %v4902_v47  ;;  %v4907_v25 = vld [vmem:[%s6350_s4 + $0xa0] sm:$0xff]  }
 0x108   :  { %v1750_v18 = vpop.f32.mrf.mxu0  ;;  %v1072_v10 = vpop.f32.mrf.mxu1  ;;  %v4906_v47 = vld [vmem:[%s6349_s3 + $0xa0] sm:$0xff]  }
 0x109   :  { %v5703_v27 = vadd.f32 %v4568_v30, %v1329_v46  ;;  %v1327_v42 = vadd.f32 %v1072_v10, %v649_v34  ;;  %v655_v34 = vadd.f32 %v5441_v1, %v5403_v48 }
 0x10a   :  { %v4569_v24 = vpop.f32.mrf.mxu0  ;;  %v4503_v37 = vpop.f32.mrf.mxu1 }
 0x10b   :  { %6370 = vst [vmem:[#allocation19_spill] sm:$0xff] %v5703_v27  ;;  %v5716_v30 = vadd.f32 %v1750_v18, %v1327_v42  ;;  %v1330_v10 = vadd.f32 %v4503_v37, %v652_v49 }
 0x10c   :  { %v1753_v56 = vpop.f32.mrf.mxu0  ;;  %v1075_v46 = vpop.f32.mrf.mxu1 }
 0x10d   :  { %v5723_v27 = vadd.f32 %v4569_v24, %v1330_v10  ;;  %v1328_v62 = vadd.f32 %v1075_v46, %v650_v55  ;;  %v656_v24 = vadd.f32 %v5455_v7, %v5403_v48  ;;  %v654_v7 = vadd.f32 %v5403_v48, %v5469_v13 }
 0x10e   :  { %v4572_v57 = vpop.f32.mrf.mxu0  ;;  %4735 = vmatmul.mubr.msk.bf16.gmra.mxu0 %vm253_vm1, %v4905_v14  ;;  %v4506_v50 = vpop.f32.mrf.mxu1  ;;  %4669 = vmatmul.mubr.msk.bf16.gmra.mxu1 %vm253_vm1, %v4904_v52  ;;  %v4909_v52 = vld [vmem:[%s6350_s4 + $0xa8] sm:$0xff]   ;;  %v659_v46 = vadd.f32 %v5477_v17, %v5403_v48  ;;  %v657_v13 = vadd.f32 %v5403_v48, %v5485_v20  ;;  %v4912_v20 = vld [vmem:[%s6349_s3 + $0xb8] sm:$0xff]  }
 0x10f   :  { %4738 = vmatprep.mubr.msk.bf16.mxu0 %vm253_vm1, %v4907_v25  ;;  %v5730_v18 = vadd.f32 %v1753_v56, %v1328_v62  ;;  %v1333_v42 = vadd.f32 %v4506_v50, %v655_v34  ;;  %4672 = vmatprep.mubr.msk.bf16.mxu1 %vm253_vm1, %v4906_v47  ;;  %v4911_v50 = vld [vmem:[%s6350_s4 + $0xb0] sm:$0xff]  }
 0x110   :  { %v1766_v49 = vpop.f32.mrf.mxu0  ;;  %v1088_v1 = vpop.f32.mrf.mxu1  ;;  %v4910_v56 = vld [vmem:[%s6349_s3 + $0xb0] sm:$0xff]  }
 0x111   :  { %v5735_v37 = vadd.f32 %v4572_v57, %v1333_v42  ;;  %v1331_v14 = vadd.f32 %v1088_v1, %v653_v61 }
 0x112   :  { %v4573_v55 = vpop.f32.mrf.mxu0  ;;  %v4507_v25 = vpop.f32.mrf.mxu1 }
 0x113   :  { %v5748_v57 = vadd.f32 %v1766_v49, %v1331_v14  ;;  %v1334_v62 = vadd.f32 %v4507_v25, %v656_v24 }
 0x114   :  { %v1769_v10 = vpop.f32.mrf.mxu0  ;;  %v1091_v47 = vpop.f32.mrf.mxu1 }
 0x115   :  { %v5755_v34 = vadd.f32 %v4573_v55, %v1334_v62  ;;  %v1332_v61 = vadd.f32 %v1091_v47, %v654_v7  ;;  %v660_v55 = vadd.f32 %v5491_v23, %v5403_v48  ;;  %v4915_v62 = vld [vmem:[%s6350_s4 + $0xc0] sm:$0xff]   ;;  %v658_v23 = vadd.f32 %v5403_v48, %v5505_v29 }
 0x116   :  { %v4576_v42 = vpop.f32.mrf.mxu0  ;;  %4739 = vmatmul.mubr.msk.bf16.gmra.mxu0 %vm253_vm1, %v4909_v52  ;;  %v4510_v1 = vpop.f32.mrf.mxu1  ;;  %4673 = vmatmul.mubr.msk.bf16.gmra.mxu1 %vm253_vm1, %v4908_v4  ;;  %v4913_v4 = vld [vmem:[%s6350_s4 + $0xb8] sm:$0xff]   ;;  %v661_v29 = vadd.f32 %v5403_v48, %v5521_v36  ;;  %v4916_v36 = vld [vmem:[%s6349_s3 + $0xc8] sm:$0xff]  }
 0x117   :  { %4742 = vmatprep.mubr.msk.bf16.mxu0 %vm253_vm1, %v4911_v50  ;;  %v5762_v49 = vadd.f32 %v1769_v10, %v1332_v61  ;;  %v1337_v24 = vadd.f32 %v4510_v1, %v659_v46  ;;  %4676 = vmatprep.mubr.msk.bf16.mxu1 %vm253_vm1, %v4910_v56  ;;  %v4914_v46 = vld [vmem:[%s6349_s3 + $0xc0] sm:$0xff]  }
 0x118   :  { %v1782_v14 = vpop.f32.mrf.mxu0  ;;  %v1104_v17 = vpop.f32.mrf.mxu1 }
 0x119   :  { %v5767_v25 = vadd.f32 %v4576_v42, %v1337_v24  ;;  %v1335_v52 = vadd.f32 %v1104_v17, %v657_v13  ;;  %v663_v42 = vadd.f32 %v5513_v33, %v5403_v48 }
 0x11a   :  { %v4577_v7 = vpop.f32.mrf.mxu0  ;;  %v4511_v50 = vpop.f32.mrf.mxu1 }
 0x11b   :  { %v5780_v10 = vadd.f32 %v1782_v14, %v1335_v52  ;;  %v1338_v56 = vadd.f32 %v4511_v50, %v660_v55 }
 0x11c   :  { %v1785_v47 = vpop.f32.mrf.mxu0  ;;  %v1107_v61 = vpop.f32.mrf.mxu1 }
 0x11d   :  { %v5787_v1 = vadd.f32 %v4577_v7, %v1338_v56  ;;  %v1336_v13 = vadd.f32 %v1107_v61, %v658_v23  ;;  %v664_v7 = vadd.f32 %v5527_v39, %v5403_v48  ;;  %v4919_v56 = vld [vmem:[%s6350_s4 + $0xd0] sm:$0xff]   ;;  %v662_v39 = vadd.f32 %v5403_v48, %v5541_v45 }
 0x11e   :  { %v4580_v24 = vpop.f32.mrf.mxu0  ;;  %4743 = vmatmul.mubr.msk.bf16.gmra.mxu0 %vm253_vm1, %v4913_v4  ;;  %v4514_v17 = vpop.f32.mrf.mxu1  ;;  %4677 = vmatmul.mubr.msk.bf16.gmra.mxu1 %vm253_vm1, %v4912_v20  ;;  %v4917_v20 = vld [vmem:[%s6350_s4 + $0xc8] sm:$0xff]   ;;  %v665_v45 = vadd.f32 %v5403_v48, %v5557_v58  ;;  %v4920_v58 = vld [vmem:[%s6349_s3 + $0xd8] sm:$0xff]  }
 0x11f   :  { %4746 = vmatprep.mubr.msk.bf16.mxu0 %vm253_vm1, %v4915_v62  ;;  %v5794_v14 = vadd.f32 %v1785_v47, %v1336_v13  ;;  %v1341_v55 = vadd.f32 %v4514_v17, %v663_v42  ;;  %4680 = vmatprep.mubr.msk.bf16.mxu1 %vm253_vm1, %v4914_v46  ;;  %v4918_v42 = vld [vmem:[%s6349_s3 + $0xd0] sm:$0xff]  }
 0x120   :  { %v1798_v52 = vpop.f32.mrf.mxu0  ;;  %v1120_v33 = vpop.f32.mrf.mxu1 }
 0x121   :  { %v5799_v50 = vadd.f32 %v4580_v24, %v1341_v55  ;;  %v1339_v4 = vadd.f32 %v1120_v33, %v661_v29  ;;  %v667_v24 = vadd.f32 %v5549_v53, %v5403_v48 }
 0x122   :  { %v4581_v23 = vpop.f32.mrf.mxu0  ;;  %v4515_v62 = vpop.f32.mrf.mxu1 }
 0x123   :  { %v5812_v47 = vadd.f32 %v1798_v52, %v1339_v4  ;;  %v1342_v46 = vadd.f32 %v4515_v62, %v664_v7 }
 0x124   :  { %v1801_v61 = vpop.f32.mrf.mxu0  ;;  %v1123_v13 = vpop.f32.mrf.mxu1 }
 0x125   :  { %v5819_v17 = vadd.f32 %v4581_v23, %v1342_v46  ;;  %v1340_v29 = vadd.f32 %v1123_v13, %v662_v39  ;;  %v668_v23 = vadd.f32 %v5563_v63, %v5403_v48  ;;  %v4923_v46 = vld [vmem:[%s6350_s4 + $0xe0] sm:$0xff]   ;;  %v666_v63 = vadd.f32 %v5403_v48, %v5577_v11 }
 0x126   :  { %v4584_v55 = vpop.f32.mrf.mxu0  ;;  %4747 = vmatmul.mubr.msk.bf16.gmra.mxu0 %vm253_vm1, %v4917_v20  ;;  %v4518_v33 = vpop.f32.mrf.mxu1  ;;  %4681 = vmatmul.mubr.msk.bf16.gmra.mxu1 %vm253_vm1, %v4916_v36  ;;  %v4921_v36 = vld [vmem:[%s6350_s4 + $0xd8] sm:$0xff]   ;;  %v669_v11 = vadd.f32 %v5403_v48, %v5593_v26  ;;  %v4924_v26 = vld [vmem:[%s6349_s3 + $0xe8] sm:$0xff]  }
 0x127   :  { %4750 = vmatprep.mubr.msk.bf16.mxu0 %vm253_vm1, %v4919_v56  ;;  %v5826_v52 = vadd.f32 %v1801_v61, %v1340_v29  ;;  %v1345_v7 = vadd.f32 %v4518_v33, %v667_v24  ;;  %4684 = vmatprep.mubr.msk.bf16.mxu1 %vm253_vm1, %v4918_v42  ;;  %v4922_v24 = vld [vmem:[%s6349_s3 + $0xe0] sm:$0xff]  }
 0x128   :  { %v1814_v4 = vpop.f32.mrf.mxu0  ;;  %v1136_v53 = vpop.f32.mrf.mxu1 }
 0x129   :  { %v5831_v62 = vadd.f32 %v4584_v55, %v1345_v7  ;;  %v1343_v20 = vadd.f32 %v1136_v53, %v665_v45  ;;  %v671_v55 = vadd.f32 %v5585_v21, %v5403_v48 }
 0x12a   :  { %v4585_v39 = vpop.f32.mrf.mxu0  ;;  %v4519_v56 = vpop.f32.mrf.mxu1 }
 0x12b   :  { %v5844_v61 = vadd.f32 %v1814_v4, %v1343_v20  ;;  %v1346_v42 = vadd.f32 %v4519_v56, %v668_v23 }
 0x12c   :  { %v1817_v13 = vpop.f32.mrf.mxu0  ;;  %v1139_v29 = vpop.f32.mrf.mxu1 }
 0x12d   :  { %v5851_v33 = vadd.f32 %v4585_v39, %v1346_v42  ;;  %v1344_v45 = vadd.f32 %v1139_v29, %v666_v63  ;;  %v672_v39 = vadd.f32 %v5599_v31, %v5403_v48  ;;  %v4927_v42 = vld [vmem:[%s6350_s4 + $0xf0] sm:$0xff]   ;;  %v670_v31 = vadd.f32 %v5403_v48, %v5613_v43 }
 0x12e   :  { %v4588_v7 = vpop.f32.mrf.mxu0  ;;  %4751 = vmatmul.mubr.msk.bf16.gmra.mxu0 %vm253_vm1, %v4921_v36  ;;  %v4522_v53 = vpop.f32.mrf.mxu1  ;;  %4685 = vmatmul.mubr.msk.bf16.gmra.mxu1 %vm253_vm1, %v4920_v58  ;;  %v4925_v58 = vld [vmem:[%s6350_s4 + $0xe8] sm:$0xff]   ;;  %v673_v43 = vadd.f32 %v5403_v48, %v5629_v8  ;;  %v4928_v8 = vld [vmem:[%s6349_s3 + $0xf8] sm:$0xff]  }
 0x12f   :  { %4754 = vmatprep.mubr.msk.bf16.mxu0 %vm253_vm1, %v4923_v46  ;;  %v5858_v4 = vadd.f32 %v1817_v13, %v1344_v45  ;;  %v1349_v23 = vadd.f32 %v4522_v53, %v671_v55  ;;  %4688 = vmatprep.mubr.msk.bf16.mxu1 %vm253_vm1, %v4922_v24  ;;  %v4926_v55 = vld [vmem:[%s6349_s3 + $0xf0] sm:$0xff]  }
 0x130   :  { %v1830_v20 = vpop.f32.mrf.mxu0  ;;  %v1152_v21 = vpop.f32.mrf.mxu1 }
 0x131   :  { %v5863_v56 = vadd.f32 %v4588_v7, %v1349_v23  ;;  %v1347_v36 = vadd.f32 %v1152_v21, %v669_v11  ;;  %v675_v7 = vadd.f32 %v5621_v59, %v5403_v48 }
 0x132   :  { %v4589_v63 = vpop.f32.mrf.mxu0  ;;  %v4523_v46 = vpop.f32.mrf.mxu1 }
 0x133   :  { %v5876_v13 = vadd.f32 %v1830_v20, %v1347_v36  ;;  %v1350_v24 = vadd.f32 %v4523_v46, %v672_v39 }
 0x134   :  { %v1833_v29 = vpop.f32.mrf.mxu0  ;;  %v1155_v45 = vpop.f32.mrf.mxu1 }
 0x135   :  { %v5883_v53 = vadd.f32 %v4589_v63, %v1350_v24  ;;  %v1348_v11 = vadd.f32 %v1155_v45, %v670_v31  ;;  %v676_v63 = vadd.f32 %v5635_v15, %v5403_v48  ;;  %v674_v24 = vadd.f32 %v5403_v48, %v5649_v41 }
 0x136   :  { %v4592_v23 = vpop.f32.mrf.mxu0  ;;  %4755 = vmatmul.mubr.msk.bf16.gmra.mxu0 %vm253_vm1, %v4925_v58  ;;  %v4526_v21 = vpop.f32.mrf.mxu1  ;;  %4689 = vmatmul.mubr.msk.bf16.gmra.mxu1 %vm253_vm1, %v4924_v26  ;;  %v4929_v26 = vld [vmem:[%s6350_s4 + $0xf8] sm:$0xff]   ;;  %v677_v41 = vadd.f32 %v5403_v48, %v5665_v40 }
 0x137   :  { %4758 = vmatprep.mubr.msk.bf16.mxu0 %vm253_vm1, %v4927_v42  ;;  %v5890_v20 = vadd.f32 %v1833_v29, %v1348_v11  ;;  %v1353_v39 = vadd.f32 %v4526_v21, %v675_v7  ;;  %4692 = vmatprep.mubr.msk.bf16.mxu1 %vm253_vm1, %v4926_v55  ;;  %v679_v7 = vadd.f32 %v5657_v9, %v5403_v48 }
 0x138   :  { %v1846_v36 = vpop.f32.mrf.mxu0  ;;  %v1168_v59 = vpop.f32.mrf.mxu1  ;;  %v680_v9 = vadd.f32 %v5671_v2, %v5403_v48 }
 0x139   :  { %v5895_v46 = vadd.f32 %v4592_v23, %v1353_v39  ;;  %v1351_v58 = vadd.f32 %v1168_v59, %v673_v43 }
 0x13a   :  { %v4593_v31 = vpop.f32.mrf.mxu0  ;;  %v4527_v42 = vpop.f32.mrf.mxu1 }
 0x13b   :  { %v5905_v29 = vadd.f32 %v1846_v36, %v1351_v58  ;;  %v1354_v55 = vadd.f32 %v4527_v42, %v676_v63 }
 0x13c   :  { %v1849_v15 = vpop.f32.mrf.mxu0  ;;  %v1171_v45 = vpop.f32.mrf.mxu1 }
 0x13d   :  { %v5909_v11 = vadd.f32 %v4593_v31, %v1354_v55  ;;  %v1352_v23 = vadd.f32 %v1171_v45, %v674_v24 }
 0x13e   :  { %v4596_v21 = vpop.f32.mrf.mxu0  ;;  %4759 = vmatmul.mubr.msk.bf16.gmra.mxu0 %vm253_vm1, %v4929_v26  ;;  %v4530_v43 = vpop.f32.mrf.mxu1  ;;  %4693 = vmatmul.mubr.msk.bf16.gmra.mxu1 %vm253_vm1, %v4928_v8  ;;  %v678_v26 = vadd.f32 %v5403_v48, %v5685_v5 }
 0x13f   :  { %v5915_v39 = vadd.f32 %v1849_v15, %v1352_v23  ;;  %v1357_v36 = vadd.f32 %v4530_v43, %v679_v7 }
 0x140   :  { %v1862_v59 = vpop.f32.mrf.mxu0  ;;  %v1184_v63 = vpop.f32.mrf.mxu1 }
 0x141   :  { %6371 = vst [vmem:[#allocation20_spill] sm:$0xff] %v5915_v39  ;;  %v5919_v58 = vadd.f32 %v4596_v21, %v1357_v36  ;;  %v1355_v31 = vadd.f32 %v1184_v63, %v677_v41 }
 0x142   :  { %v4597_v42 = vpop.f32.mrf.mxu0  ;;  %v4531_v24 = vpop.f32.mrf.mxu1 }
 0x143   :  { %v5923_v8 = vadd.f32 %v1862_v59, %v1355_v31  ;;  %v1358_v55 = vadd.f32 %v4531_v24, %v680_v9 }
 0x144   :  { %v1865_v40 = vpop.f32.mrf.mxu0  ;;  %v1187_v15 = vpop.f32.mrf.mxu1 }
 0x145   :  { %v5925_v45 = vadd.f32 %v4597_v42, %v1358_v55  ;;  %v1356_v7 = vadd.f32 %v1187_v15, %v678_v26 }
 0x146   :  { %v4600_v23 = vpop.f32.mrf.mxu0  ;;  %v4534_v43 = vpop.f32.mrf.mxu1 }
 0x147   :  { %v5927_v39 = vadd.f32 %v1865_v40, %v1356_v7  ;;  %v1361_v2 = vadd.f32 %v4534_v43, %v5411_v51 }
 0x148   :  { %v1878_v21 = vpop.f32.mrf.mxu0  ;;  %v1200_v41 = vpop.f32.mrf.mxu1 }
 0x149   :  { %v5930_v36 = vadd.f32 %v4600_v23, %v1361_v2  ;;  %v1359_v48 = vadd.f32 %v1200_v41, %v5417_v54 }
 0x14a   :  { %v4601_v5 = vpop.f32.mrf.mxu0  ;;  %v4535_v59 = vpop.f32.mrf.mxu1 }
 0x14b   :  { %v5933_v63 = vadd.f32 %v1878_v21, %v1359_v48  ;;  %v1362_v9 = vadd.f32 %v4535_v59, %v5431_v60 }
 0x14c   :  { %v1881_v31 = vpop.f32.mrf.mxu0  ;;  %v1203_v42 = vpop.f32.mrf.mxu1 }
 0x14d   :  { %v5936_v24 = vadd.f32 %v4601_v5, %v1362_v9  ;;  %v1360_v26 = vadd.f32 %v1203_v42, %v5439_v0 }
 0x14e   :  { %v4604_v55 = vpop.f32.mrf.mxu0  ;;  %v4538_v51 = vpop.f32.mrf.mxu1 }
 0x14f   :  { %v5939_v40 = vadd.f32 %v1881_v31, %v1360_v26  ;;  %v1365_v15 = vadd.f32 %v4538_v51, %v5447_v3 }
 0x150   :  { %v1894_v7 = vpop.f32.mrf.mxu0  ;;  %v1216_v54 = vpop.f32.mrf.mxu1 }
 0x151   :  { %v5942_v23 = vadd.f32 %v4604_v55, %v1365_v15  ;;  %v1363_v43 = vadd.f32 %v1216_v54, %v5453_v6 }
 0x152   :  { %v4605_v2 = vpop.f32.mrf.mxu0  ;;  %v4539_v60 = vpop.f32.mrf.mxu1 }
 0x153   :  { %v5945_v21 = vadd.f32 %v1894_v7, %v1363_v43  ;;  %v1366_v41 = vadd.f32 %v4539_v60, %v5467_v12 }
 0x154   :  { %v1897_v48 = vpop.f32.mrf.mxu0  ;;  %v1219_v0 = vpop.f32.mrf.mxu1 }
 0x155   :  { %v5948_v5 = vadd.f32 %v4605_v2, %v1366_v41  ;;  %v1364_v59 = vadd.f32 %v1219_v0, %v5475_v16 }
 0x156   :  { %v4608_v9 = vpop.f32.mrf.mxu0  ;;  %v4542_v3 = vpop.f32.mrf.mxu1 }
 0x157   :  { %v5951_v31 = vadd.f32 %v1897_v48, %v1364_v59  ;;  %v1369_v42 = vadd.f32 %v4542_v3, %v5483_v19 }
 0x158   :  { %v1910_v26 = vpop.f32.mrf.mxu0  ;;  %v1232_v6 = vpop.f32.mrf.mxu1 }
 0x159   :  { %v5954_v55 = vadd.f32 %v4608_v9, %v1369_v42  ;;  %v1367_v51 = vadd.f32 %v1232_v6, %v5489_v22 }
 0x15a   :  { %v4609_v15 = vpop.f32.mrf.mxu0  ;;  %v4543_v12 = vpop.f32.mrf.mxu1 }
 0x15b   :  { %v5957_v7 = vadd.f32 %v1910_v26, %v1367_v51  ;;  %v1370_v54 = vadd.f32 %v4543_v12, %v5503_v28  ;;  %v6373_v12 = vld [vmem:[#allocation2_spill] sm:$0xff] }
 0x15c   :  { %v1913_v43 = vpop.f32.mrf.mxu0  ;;  %v1235_v16 = vpop.f32.mrf.mxu1 }
 0x15d   :  { %v5960_v2 = vadd.f32 %v4609_v15, %v1370_v54  ;;  %v1368_v60 = vadd.f32 %v1235_v16, %v5511_v32 }
 0x15e   :  { %v4612_v41 = vpop.f32.mrf.mxu0  ;;  %v4546_v19 = vpop.f32.mrf.mxu1 }
 0x15f   :  { %v5963_v48 = vadd.f32 %v1913_v43, %v1368_v60  ;;  %v1373_v0 = vadd.f32 %v4546_v19, %v5519_v35  ;;  %v6375_v60 = vld [vmem:[#allocation3_spill] sm:$0xff] }
 0x160   :  { %v1926_v59 = vpop.f32.mrf.mxu0  ;;  %v1248_v22 = vpop.f32.mrf.mxu1 }
 0x161   :  { %v5966_v9 = vadd.f32 %v4612_v41, %v1373_v0  ;;  %v1371_v3 = vadd.f32 %v1248_v22, %v5525_v38 }
 0x162   :  { %v4613_v42 = vpop.f32.mrf.mxu0  ;;  %v4547_v28 = vpop.f32.mrf.mxu1 }
 0x163   :  { %v5969_v26 = vadd.f32 %v1926_v59, %v1371_v3  ;;  %v1374_v6 = vadd.f32 %v4547_v28, %v5539_v44  ;;  %v6377_v59 = vld [vmem:[#allocation4_spill] sm:$0xff] }
 0x164   :  { %v1929_v51 = vpop.f32.mrf.mxu0  ;;  %v1251_v32 = vpop.f32.mrf.mxu1 }
 0x165   :  { %v5972_v15 = vadd.f32 %v4613_v42, %v1374_v6  ;;  %v1372_v54 = vadd.f32 %v1251_v32, %v6373_v12  ;;  %v6379_v42 = vld [vmem:[#allocation5_spill] sm:$0xff] }
 0x166   :  { %v4616_v43 = vpop.f32.mrf.mxu0  ;;  %v4550_v35 = vpop.f32.mrf.mxu1 }
 0x167   :  { %6372 = vst [vmem:[#allocation21_spill] sm:$0xff] %v5972_v15  ;;  %v5975_v16 = vadd.f32 %v1929_v51, %v1372_v54  ;;  %v1377_v41 = vadd.f32 %v4550_v35, %v6375_v60  ;;  %v6381_v51 = vld [vmem:[#allocation6_spill] sm:$0xff] }
 0x168   :  { %v1942_v19 = vpop.f32.mrf.mxu0  ;;  %v1264_v38 = vpop.f32.mrf.mxu1 }
 0x169   :  { %6374 = vst [vmem:[#allocation2_spill] sm:$0xff] %v5975_v16  ;;  %v5978_v0 = vadd.f32 %v4616_v43, %v1377_v41  ;;  %v1375_v22 = vadd.f32 %v1264_v38, %v6377_v59  ;;  %v6383_v43 = vld [vmem:[#allocation7_spill] sm:$0xff] }
 0x16a   :  { %v4617_v3 = vpop.f32.mrf.mxu0  ;;  %v4551_v44 = vpop.f32.mrf.mxu1 }
 0x16b   :  { %6376 = vst [vmem:[#allocation3_spill] sm:$0xff] %v5978_v0  ;;  %v5981_v28 = vadd.f32 %v1942_v19, %v1375_v22  ;;  %v1378_v6 = vadd.f32 %v4551_v44, %v6379_v42  ;;  %v6385_v19 = vld [vmem:[#allocation8_spill] sm:$0xff] }
 0x16c   :  { %v1945_v15 = vpop.f32.mrf.mxu0  ;;  %v1267_v32 = vpop.f32.mrf.mxu1 }
 0x16d   :  { %6378 = vst [vmem:[#allocation4_spill] sm:$0xff] %v5981_v28  ;;  %v5984_v12 = vadd.f32 %v4617_v3, %v1378_v6  ;;  %v1376_v54 = vadd.f32 %v1267_v32, %v6381_v51  ;;  %v6387_v3 = vld [vmem:[#allocation9_spill] sm:$0xff] }
 0x16e   :  { %v4620_v16 = vpop.f32.mrf.mxu0  ;;  %v4554_v35 = vpop.f32.mrf.mxu1 }
 0x16f   :  { %6380 = vst [vmem:[#allocation5_spill] sm:$0xff] %v5984_v12  ;;  %v5987_v60 = vadd.f32 %v1945_v15, %v1376_v54  ;;  %v1381_v41 = vadd.f32 %v4554_v35, %v6383_v43  ;;  %v6389_v15 = vld [vmem:[#allocation10_spill] sm:$0xff] }
 0x170   :  { %v1958_v0 = vpop.f32.mrf.mxu0  ;;  %v1280_v38 = vpop.f32.mrf.mxu1 }
 0x171   :  { %6382 = vst [vmem:[#allocation6_spill] sm:$0xff] %v5987_v60  ;;  %v5990_v59 = vadd.f32 %v4620_v16, %v1381_v41  ;;  %v1379_v22 = vadd.f32 %v1280_v38, %v6385_v19  ;;  %v6391_v16 = vld [vmem:[#allocation11_spill] sm:$0xff] }
 0x172   :  { %v4621_v28 = vpop.f32.mrf.mxu0  ;;  %v4555_v44 = vpop.f32.mrf.mxu1 }
 0x173   :  { %6384 = vst [vmem:[#allocation7_spill] sm:$0xff] %v5990_v59  ;;  %v5993_v42 = vadd.f32 %v1958_v0, %v1379_v22  ;;  %v1382_v6 = vadd.f32 %v4555_v44, %v6387_v3  ;;  %v6393_v0 = vld [vmem:[#allocation12_spill] sm:$0xff] }
 0x174   :  { %v1961_v12 = vpop.f32.mrf.mxu0  ;;  %v1283_v32 = vpop.f32.mrf.mxu1 }
 0x175   :  { %6386 = vst [vmem:[#allocation8_spill] sm:$0xff] %v5993_v42  ;;  %v5996_v51 = vadd.f32 %v4621_v28, %v1382_v6  ;;  %v1380_v54 = vadd.f32 %v1283_v32, %v6389_v15  ;;  %v6395_v28 = vld [vmem:[#allocation13_spill] sm:$0xff] }
 0x176   :  { %v4624_v60 = vpop.f32.mrf.mxu0  ;;  %v4558_v35 = vpop.f32.mrf.mxu1 }
 0x177   :  { %6388 = vst [vmem:[#allocation9_spill] sm:$0xff] %v5996_v51  ;;  %v5999_v43 = vadd.f32 %v1961_v12, %v1380_v54  ;;  %v1385_v41 = vadd.f32 %v4558_v35, %v6391_v16  ;;  %v6397_v12 = vld [vmem:[#allocation14_spill] sm:$0xff] }
 0x178   :  { %v1974_v59 = vpop.f32.mrf.mxu0  ;;  %v1296_v38 = vpop.f32.mrf.mxu1 }
 0x179   :  { %6390 = vst [vmem:[#allocation10_spill] sm:$0xff] %v5999_v43  ;;  %v6002_v19 = vadd.f32 %v4624_v60, %v1385_v41  ;;  %v1383_v22 = vadd.f32 %v1296_v38, %v6393_v0  ;;  %v6399_v60 = vld [vmem:[#allocation15_spill] sm:$0xff] }
 0x17a   :  { %v4625_v42 = vpop.f32.mrf.mxu0  ;;  %v4559_v44 = vpop.f32.mrf.mxu1 }
 0x17b   :  { %6392 = vst [vmem:[#allocation11_spill] sm:$0xff] %v6002_v19  ;;  %v6005_v3 = vadd.f32 %v1974_v59, %v1383_v22  ;;  %v1386_v6 = vadd.f32 %v4559_v44, %v6395_v28  ;;  %v6401_v59 = vld [vmem:[#allocation16_spill] sm:$0xff] }
 0x17c   :  { %v1977_v51 = vpop.f32.mrf.mxu0  ;;  %v1299_v32 = vpop.f32.mrf.mxu1 }
 0x17d   :  { %6394 = vst [vmem:[#allocation12_spill] sm:$0xff] %v6005_v3  ;;  %v6008_v15 = vadd.f32 %v4625_v42, %v1386_v6  ;;  %v1384_v54 = vadd.f32 %v1299_v32, %v6397_v12  ;;  %v6403_v42 = vld [vmem:[#allocation17_spill] sm:$0xff] }
 0x17e   :  { %v4628_v43 = vpop.f32.mrf.mxu0  ;;  %v4562_v35 = vpop.f32.mrf.mxu1 }
 0x17f   :  { %6396 = vst [vmem:[#allocation13_spill] sm:$0xff] %v6008_v15  ;;  %v6011_v16 = vadd.f32 %v1977_v51, %v1384_v54  ;;  %v1389_v41 = vadd.f32 %v4562_v35, %v6399_v60  ;;  %v6405_v51 = vld [vmem:[#allocation18_spill] sm:$0xff] }
 0x180   :  { %v1990_v19 = vpop.f32.mrf.mxu0  ;;  %v1312_v38 = vpop.f32.mrf.mxu1 }
 0x181   :  { %6398 = vst [vmem:[#allocation14_spill] sm:$0xff] %v6011_v16  ;;  %v6014_v0 = vadd.f32 %v4628_v43, %v1389_v41  ;;  %v1387_v22 = vadd.f32 %v1312_v38, %v6401_v59  ;;  %v6406_v43 = vld [vmem:[#allocation19_spill] sm:$0xff] }
 0x182   :  { %v4629_v3 = vpop.f32.mrf.mxu0  ;;  %v4563_v44 = vpop.f32.mrf.mxu1 }
 0x183   :  { %6400 = vst [vmem:[#allocation15_spill] sm:$0xff] %v6014_v0  ;;  %v6017_v28 = vadd.f32 %v1990_v19, %v1387_v22  ;;  %v1390_v6 = vadd.f32 %v4563_v44, %v6403_v42 }
 0x184   :  { %v1993_v15 = vpop.f32.mrf.mxu0  ;;  %v1315_v32 = vpop.f32.mrf.mxu1 }
 0x185   :  { %6402 = vst [vmem:[#allocation16_spill] sm:$0xff] %v6017_v28  ;;  %v6020_v12 = vadd.f32 %v4629_v3, %v1390_v6  ;;  %v1388_v54 = vadd.f32 %v1315_v32, %v6405_v51 }
 0x186   :  { %v4700_v16 = vpop.f32.mrf.mxu0  ;;  %v4634_v35 = vpop.f32.mrf.mxu1 }
 0x187   :  { %6404 = vst [vmem:[#allocation17_spill] sm:$0xff] %v6020_v12  ;;  %v6023_v60 = vadd.f32 %v1993_v15, %v1388_v54  ;;  %v2685_v41 = vadd.f32 %v4634_v35, %v6406_v43 }
 0x188   :  { %v3106_v0 = vpop.f32.mrf.mxu0  ;;  %v2428_v38 = vpop.f32.mrf.mxu1 }
 0x189   :  { %v3363_v59 = vadd.f32 %v4700_v16, %v2685_v41  ;;  %v2683_v19 = vadd.f32 %v2428_v38, %v5716_v30 }
 0x18a   :  { %v4701_v22 = vpop.f32.mrf.mxu0  ;;  %v4635_v28 = vpop.f32.mrf.mxu1 }
 0x18b   :  { %v3427_v44 = vmax.f32 %v3363_v59, 0.0  ;;  %v3361_v42 = vadd.f32 %v3106_v0, %v2683_v19  ;;  %v2686_v3 = vadd.f32 %v4635_v28, %v5723_v27 }
 0x18c   :  { %v3109_v6 = vpop.f32.mrf.mxu0  ;;  %v2431_v32 = vpop.f32.mrf.mxu1 }
 0x18d   :  { %v4205_v51 = vpack.c.bf16 %v3427_v44, %v3427_v44  ;;  %v3425_v12 = vmax.f32 %v3361_v42, 0.0  ;;  %v3364_v15 = vadd.f32 %v4701_v22, %v2686_v3  ;;  %v2684_v54 = vadd.f32 %v2431_v32, %v5730_v18 }
 0x18e   :  { %v4704_v35 = vpop.f32.mrf.mxu0  ;;  %v4638_v43 = vpop.f32.mrf.mxu1 }
 0x18f   :  { %3748 = vst.msk [vmem:[%s6352_s7 + $0x8] sm:$0xf] %vm3745_vm2, %v4205_v51  ;;  %v4203_v30 = vpack.c.bf16 %v3425_v12, %v3425_v12  ;;  %v3428_v16 = vmax.f32 %v3364_v15, 0.0  ;;  %v3362_v0 = vadd.f32 %v3109_v6, %v2684_v54  ;;  %v2689_v27 = vadd.f32 %v4638_v43, %v5735_v37 }
 0x190   :  { %v3122_v28 = vpop.f32.mrf.mxu0  ;;  %v2444_v41 = vpop.f32.mrf.mxu1 }
 0x191   :  { %3746 = vst.msk [vmem:[%s6352_s7] sm:$0xf] %vm3745_vm2, %v4203_v30  ;;  %v4206_v18 = vpack.c.bf16 %v3428_v16, %v3428_v16  ;;  %v3426_v38 = vmax.f32 %v3362_v0, 0.0  ;;  %v3367_v59 = vadd.f32 %v4704_v35, %v2689_v27  ;;  %v2687_v19 = vadd.f32 %v2444_v41, %v5748_v57 }
 0x192   :  { %v4705_v22 = vpop.f32.mrf.mxu0  ;;  %v4639_v44 = vpop.f32.mrf.mxu1 }
 0x193   :  { %3749 = vst.msk [vmem:[%s6352_s7 + $0xc] sm:$0xf] %vm3745_vm2, %v4206_v18  ;;  %v4204_v37 = vpack.c.bf16 %v3426_v38, %v3426_v38  ;;  %v3431_v12 = vmax.f32 %v3367_v59, 0.0  ;;  %v3365_v42 = vadd.f32 %v3122_v28, %v2687_v19  ;;  %v2690_v3 = vadd.f32 %v4639_v44, %v5755_v34 }
 0x194   :  { %v3125_v6 = vpop.f32.mrf.mxu0  ;;  %v2447_v32 = vpop.f32.mrf.mxu1 }
 0x195   :  { %3747 = vst.msk [vmem:[%s6352_s7 + $0x4] sm:$0xf] %vm3745_vm2, %v4204_v37  ;;  %v4209_v57 = vpack.c.bf16 %v3431_v12, %v3431_v12  ;;  %v3429_v51 = vmax.f32 %v3365_v42, 0.0  ;;  %v3368_v15 = vadd.f32 %v4705_v22, %v2690_v3  ;;  %v2688_v54 = vadd.f32 %v2447_v32, %v5762_v49 }
 0x196   :  { %v4708_v35 = vpop.f32.mrf.mxu0  ;;  %v4642_v43 = vpop.f32.mrf.mxu1 }
 0x197   :  { %3752 = vst.msk [vmem:[%s6352_s7 + $0x18] sm:$0xf] %vm3745_vm2, %v4209_v57  ;;  %v4207_v34 = vpack.c.bf16 %v3429_v51, %v3429_v51  ;;  %v3432_v30 = vmax.f32 %v3368_v15, 0.0  ;;  %v3366_v16 = vadd.f32 %v3125_v6, %v2688_v54  ;;  %v2693_v0 = vadd.f32 %v4642_v43, %v5767_v25 }
 0x198   :  { %v3138_v27 = vpop.f32.mrf.mxu0  ;;  %v2460_v28 = vpop.f32.mrf.mxu1 }
 0x199   :  { %3750 = vst.msk [vmem:[%s6352_s7 + $0x10] sm:$0xf] %vm3745_vm2, %v4207_v34  ;;  %v4210_v49 = vpack.c.bf16 %v3432_v30, %v3432_v30  ;;  %v3430_v41 = vmax.f32 %v3366_v16, 0.0  ;;  %v3371_v18 = vadd.f32 %v4708_v35, %v2693_v0  ;;  %v2691_v38 = vadd.f32 %v2460_v28, %v5780_v10 }
 0x19a   :  { %v4709_v59 = vpop.f32.mrf.mxu0  ;;  %v4643_v19 = vpop.f32.mrf.mxu1 }
 0x19b   :  { %3753 = vst.msk [vmem:[%s6352_s7 + $0x1c] sm:$0xf] %vm3745_vm2, %v4210_v49  ;;  %v4208_v25 = vpack.c.bf16 %v3430_v41, %v3430_v41  ;;  %v3435_v22 = vmax.f32 %v3371_v18, 0.0  ;;  %v3369_v44 = vadd.f32 %v3138_v27, %v2691_v38  ;;  %v2694_v37 = vadd.f32 %v4643_v19, %v5787_v1 }
 0x19c   :  { %v3141_v12 = vpop.f32.mrf.mxu0  ;;  %v2463_v42 = vpop.f32.mrf.mxu1 }
 0x19d   :  { %3751 = vst.msk [vmem:[%s6352_s7 + $0x14] sm:$0xf] %vm3745_vm2, %v4208_v25  ;;  %v4213_v10 = vpack.c.bf16 %v3435_v22, %v3435_v22  ;;  %v3433_v3 = vmax.f32 %v3369_v44, 0.0  ;;  %v3372_v6 = vadd.f32 %v4709_v59, %v2694_v37  ;;  %v2692_v32 = vadd.f32 %v2463_v42, %v5794_v14 }
 0x19e   :  { %v4712_v57 = vpop.f32.mrf.mxu0  ;;  %v4646_v51 = vpop.f32.mrf.mxu1 }
 0x19f   :  { %3756 = vst.msk [vmem:[%s6352_s7 + $0x28] sm:$0xf] %vm3745_vm2, %v4213_v10  ;;  %v4211_v1 = vpack.c.bf16 %v3433_v3, %v3433_v3  ;;  %v3436_v15 = vmax.f32 %v3372_v6, 0.0  ;;  %v3370_v54 = vadd.f32 %v3141_v12, %v2692_v32  ;;  %v2697_v35 = vadd.f32 %v4646_v51, %v5799_v50 }
 0x1a0   :  { %v3154_v43 = vpop.f32.mrf.mxu0  ;;  %v2476_v34 = vpop.f32.mrf.mxu1 }
 0x1a1   :  { %3754 = vst.msk [vmem:[%s6352_s7 + $0x20] sm:$0xf] %vm3745_vm2, %v4211_v1  ;;  %v4214_v14 = vpack.c.bf16 %v3436_v15, %v3436_v15  ;;  %v3434_v30 = vmax.f32 %v3370_v54, 0.0  ;;  %v3375_v16 = vadd.f32 %v4712_v57, %v2697_v35  ;;  %v2695_v0 = vadd.f32 %v2476_v34, %v5812_v47 }
 0x1a2   :  { %v4713_v27 = vpop.f32.mrf.mxu0  ;;  %v4647_v28 = vpop.f32.mrf.mxu1 }
 0x1a3   :  { %3757 = vst.msk [vmem:[%s6352_s7 + $0x2c] sm:$0xf] %vm3745_vm2, %v4214_v14  ;;  %v4212_v50 = vpack.c.bf16 %v3434_v30, %v3434_v30  ;;  %v3439_v49 = vmax.f32 %v3375_v16, 0.0  ;;  %v3373_v41 = vadd.f32 %v3154_v43, %v2695_v0  ;;  %v2698_v18 = vadd.f32 %v4647_v28, %v5819_v17 }
 0x1a4   :  { %v3157_v38 = vpop.f32.mrf.mxu0  ;;  %v2479_v59 = vpop.f32.mrf.mxu1 }
 0x1a5   :  { %3755 = vst.msk [vmem:[%s6352_s7 + $0x24] sm:$0xf] %vm3745_vm2, %v4212_v50  ;;  %v4217_v47 = vpack.c.bf16 %v3439_v49, %v3439_v49  ;;  %v3437_v19 = vmax.f32 %v3373_v41, 0.0  ;;  %v3376_v25 = vadd.f32 %v4713_v27, %v2698_v18  ;;  %v2696_v22 = vadd.f32 %v2479_v59, %v5826_v52 }
 0x1a6   :  { %v4716_v44 = vpop.f32.mrf.mxu0  ;;  %v4650_v37 = vpop.f32.mrf.mxu1 }
 0x1a7   :  { %3760 = vst.msk [vmem:[%s6352_s7 + $0x38] sm:$0xf] %vm3745_vm2, %v4217_v47  ;;  %v4215_v17 = vpack.c.bf16 %v3437_v19, %v3437_v19  ;;  %v3440_v12 = vmax.f32 %v3376_v25, 0.0  ;;  %v3374_v42 = vadd.f32 %v3157_v38, %v2696_v22  ;;  %v2701_v10 = vadd.f32 %v4650_v37, %v5831_v62 }
 0x1a8   :  { %v3170_v3 = vpop.f32.mrf.mxu0  ;;  %v2492_v6 = vpop.f32.mrf.mxu1 }
 0x1a9   :  { %3758 = vst.msk [vmem:[%s6352_s7 + $0x30] sm:$0xf] %vm3745_vm2, %v4215_v17  ;;  %v4218_v52 = vpack.c.bf16 %v3440_v12, %v3440_v12  ;;  %v3438_v32 = vmax.f32 %v3374_v42, 0.0  ;;  %v3379_v57 = vadd.f32 %v4716_v44, %v2701_v10  ;;  %v2699_v51 = vadd.f32 %v2492_v6, %v5844_v61 }
 0x1aa   :  { %v4717_v1 = vpop.f32.mrf.mxu0  ;;  %v4651_v15 = vpop.f32.mrf.mxu1 }
 0x1ab   :  { %3761 = vst.msk [vmem:[%s6352_s7 + $0x3c] sm:$0xf] %vm3745_vm2, %v4218_v52  ;;  %v4216_v62 = vpack.c.bf16 %v3438_v32, %v3438_v32  ;;  %v3443_v54 = vmax.f32 %v3379_v57, 0.0  ;;  %v3377_v35 = vadd.f32 %v3170_v3, %v2699_v51  ;;  %v2702_v43 = vadd.f32 %v4651_v15, %v5851_v33 }
 0x1ac   :  { %v3173_v34 = vpop.f32.mrf.mxu0  ;;  %v2495_v14 = vpop.f32.mrf.mxu1 }
 0x1ad   :  { %3759 = vst.msk [vmem:[%s6352_s7 + $0x34] sm:$0xf] %vm3745_vm2, %v4216_v62  ;;  %v4221_v61 = vpack.c.bf16 %v3443_v54, %v3443_v54  ;;  %v3441_v30 = vmax.f32 %v3377_v35, 0.0  ;;  %v3380_v16 = vadd.f32 %v4717_v1, %v2702_v43  ;;  %v2700_v0 = vadd.f32 %v2495_v14, %v5858_v4 }
 0x1ae   :  { %v4720_v27 = vpop.f32.mrf.mxu0  ;;  %v4654_v28 = vpop.f32.mrf.mxu1 }
 0x1af   :  { %3764 = vst.msk [vmem:[%s6352_s7 + $0x48] sm:$0xf] %vm3745_vm2, %v4221_v61  ;;  %v4219_v33 = vpack.c.bf16 %v3441_v30, %v3441_v30  ;;  %v3444_v50 = vmax.f32 %v3380_v16, 0.0  ;;  %v3378_v49 = vadd.f32 %v3173_v34, %v2700_v0  ;;  %v2705_v41 = vadd.f32 %v4654_v28, %v5863_v56 }
 0x1b0   :  { %v3186_v18 = vpop.f32.mrf.mxu0  ;;  %v2508_v38 = vpop.f32.mrf.mxu1 }
 0x1b1   :  { %3762 = vst.msk [vmem:[%s6352_s7 + $0x40] sm:$0xf] %vm3745_vm2, %v4219_v33  ;;  %v4222_v4 = vpack.c.bf16 %v3444_v50, %v3444_v50  ;;  %v3442_v59 = vmax.f32 %v3378_v49, 0.0  ;;  %v3383_v47 = vadd.f32 %v4720_v27, %v2705_v41  ;;  %v2703_v19 = vadd.f32 %v2508_v38, %v5876_v13  ;;  %v6407_v50 = vld [vmem:[#allocation20_spill] sm:$0xff] }
 0x1b2   :  { %v4721_v25 = vpop.f32.mrf.mxu0  ;;  %v4655_v22 = vpop.f32.mrf.mxu1 }
 0x1b3   :  { %3765 = vst.msk [vmem:[%s6352_s7 + $0x4c] sm:$0xf] %vm3745_vm2, %v4222_v4  ;;  %v4220_v56 = vpack.c.bf16 %v3442_v59, %v3442_v59  ;;  %v3447_v44 = vmax.f32 %v3383_v47, 0.0  ;;  %v3381_v37 = vadd.f32 %v3186_v18, %v2703_v19  ;;  %v2706_v17 = vadd.f32 %v4655_v22, %v5883_v53 }
 0x1b4   :  { %v3189_v12 = vpop.f32.mrf.mxu0  ;;  %v2511_v42 = vpop.f32.mrf.mxu1 }
 0x1b5   :  { %3763 = vst.msk [vmem:[%s6352_s7 + $0x44] sm:$0xf] %vm3745_vm2, %v4220_v56  ;;  %v4225_v13 = vpack.c.bf16 %v3447_v44, %v3447_v44  ;;  %v3445_v10 = vmax.f32 %v3381_v37, 0.0  ;;  %v3384_v3 = vadd.f32 %v4721_v25, %v2706_v17  ;;  %v2704_v6 = vadd.f32 %v2511_v42, %v5890_v20 }
 0x1b6   :  { %v4724_v52 = vpop.f32.mrf.mxu0  ;;  %v4658_v32 = vpop.f32.mrf.mxu1 }
 0x1b7   :  { %3768 = vst.msk [vmem:[%s6352_s7 + $0x58] sm:$0xf] %vm3745_vm2, %v4225_v13  ;;  %v4223_v53 = vpack.c.bf16 %v3445_v10, %v3445_v10  ;;  %v3448_v57 = vmax.f32 %v3384_v3, 0.0  ;;  %v3382_v51 = vadd.f32 %v3189_v12, %v2704_v6  ;;  %v2709_v1 = vadd.f32 %v4658_v32, %v5895_v46 }
 0x1b8   :  { %v3202_v15 = vpop.f32.mrf.mxu0  ;;  %v2524_v62 = vpop.f32.mrf.mxu1 }
 0x1b9   :  { %3766 = vst.msk [vmem:[%s6352_s7 + $0x50] sm:$0xf] %vm3745_vm2, %v4223_v53  ;;  %v4226_v20 = vpack.c.bf16 %v3448_v57, %v3448_v57  ;;  %v3446_v54 = vmax.f32 %v3382_v51, 0.0  ;;  %v3387_v35 = vadd.f32 %v4724_v52, %v2709_v1  ;;  %v2707_v43 = vadd.f32 %v2524_v62, %v5905_v29 }
 0x1ba   :  { %v4725_v34 = vpop.f32.mrf.mxu0  ;;  %v4659_v14 = vpop.f32.mrf.mxu1 }
 0x1bb   :  { %3769 = vst.msk [vmem:[%s6352_s7 + $0x5c] sm:$0xf] %vm3745_vm2, %v4226_v20  ;;  %v4224_v46 = vpack.c.bf16 %v3446_v54, %v3446_v54  ;;  %v3451_v61 = vmax.f32 %v3387_v35, 0.0  ;;  %v3385_v30 = vadd.f32 %v3202_v15, %v2707_v43  ;;  %v2710_v16 = vadd.f32 %v4659_v14, %v5909_v11 }
 0x1bc   :  { %v3205_v0 = vpop.f32.mrf.mxu0  ;;  %v2527_v27 = vpop.f32.mrf.mxu1 }
 0x1bd   :  { %3767 = vst.msk [vmem:[%s6352_s7 + $0x54] sm:$0xf] %vm3745_vm2, %v4224_v46  ;;  %v4229_v29 = vpack.c.bf16 %v3451_v61, %v3451_v61  ;;  %v3449_v28 = vmax.f32 %v3385_v30, 0.0  ;;  %v3388_v33 = vadd.f32 %v4725_v34, %v2710_v16  ;;  %v2708_v49 = vadd.f32 %v2527_v27, %v6407_v50 }
 0x1be   :  { %v4728_v41 = vpop.f32.mrf.mxu0  ;;  %v4662_v18 = vpop.f32.mrf.mxu1 }
 0x1bf   :  { %3772 = vst.msk [vmem:[%s6352_s7 + $0x68] sm:$0xf] %vm3745_vm2, %v4229_v29  ;;  %v4227_v11 = vpack.c.bf16 %v3449_v28, %v3449_v28  ;;  %v3452_v38 = vmax.f32 %v3388_v33, 0.0  ;;  %v3386_v4 = vadd.f32 %v3205_v0, %v2708_v49  ;;  %v2713_v59 = vadd.f32 %v4662_v18, %v5919_v58 }
 0x1c0   :  { %v3218_v47 = vpop.f32.mrf.mxu0  ;;  %v2540_v19 = vpop.f32.mrf.mxu1 }
 0x1c1   :  { %3770 = vst.msk [vmem:[%s6352_s7 + $0x60] sm:$0xf] %vm3745_vm2, %v4227_v11  ;;  %v4230_v25 = vpack.c.bf16 %v3452_v38, %v3452_v38  ;;  %v3450_v22 = vmax.f32 %v3386_v4, 0.0  ;;  %v3391_v56 = vadd.f32 %v4728_v41, %v2713_v59  ;;  %v2711_v44 = vadd.f32 %v2540_v19, %v5923_v8 }
 0x1c2   :  { %v4729_v37 = vpop.f32.mrf.mxu0  ;;  %v4663_v17 = vpop.f32.mrf.mxu1 }
 0x1c3   :  { %3773 = vst.msk [vmem:[%s6352_s7 + $0x6c] sm:$0xf] %vm3745_vm2, %v4230_v25  ;;  %v4228_v58 = vpack.c.bf16 %v3450_v22, %v3450_v22  ;;  %v3455_v12 = vmax.f32 %v3391_v56, 0.0  ;;  %v3389_v42 = vadd.f32 %v3218_v47, %v2711_v44  ;;  %v2714_v13 = vadd.f32 %v4663_v17, %v5925_v45 }
 0x1c4   :  { %v3221_v10 = vpop.f32.mrf.mxu0  ;;  %v2543_v3 = vpop.f32.mrf.mxu1 }
 0x1c5   :  { %3771 = vst.msk [vmem:[%s6352_s7 + $0x64] sm:$0xf] %vm3745_vm2, %v4228_v58  ;;  %v4233_v8 = vpack.c.bf16 %v3455_v12, %v3455_v12  ;;  %v3453_v6 = vmax.f32 %v3389_v42, 0.0  ;;  %v3392_v52 = vadd.f32 %v4729_v37, %v2714_v13  ;;  %v2712_v32 = vadd.f32 %v2543_v3, %v5927_v39 }
 0x1c6   :  { %v4732_v53 = vpop.f32.mrf.mxu0  ;;  %v4666_v57 = vpop.f32.mrf.mxu1 }
 0x1c7   :  { %3776 = vst.msk [vmem:[%s6352_s7 + $0x78] sm:$0xf] %vm3745_vm2, %v4233_v8  ;;  %v4231_v45 = vpack.c.bf16 %v3453_v6, %v3453_v6  ;;  %v3456_v51 = vmax.f32 %v3392_v52, 0.0  ;;  %v3390_v1 = vadd.f32 %v3221_v10, %v2712_v32  ;;  %v2717_v15 = vadd.f32 %v4666_v57, %v5930_v36 }
 0x1c8   :  { %v3234_v62 = vpop.f32.mrf.mxu0  ;;  %v2556_v20 = vpop.f32.mrf.mxu1 }
 0x1c9   :  { %3774 = vst.msk [vmem:[%s6352_s7 + $0x70] sm:$0xf] %vm3745_vm2, %v4231_v45  ;;  %v4234_v39 = vpack.c.bf16 %v3456_v51, %v3456_v51  ;;  %v3454_v54 = vmax.f32 %v3390_v1, 0.0  ;;  %v3395_v35 = vadd.f32 %v4732_v53, %v2717_v15  ;;  %v2715_v43 = vadd.f32 %v2556_v20, %v5933_v63 }
 0x1ca   :  { %v4733_v34 = vpop.f32.mrf.mxu0  ;;  %v4667_v14 = vpop.f32.mrf.mxu1 }
 0x1cb   :  { %3777 = vst.msk [vmem:[%s6352_s7 + $0x7c] sm:$0xf] %vm3745_vm2, %v4234_v39  ;;  %v4232_v36 = vpack.c.bf16 %v3454_v54, %v3454_v54  ;;  %v3459_v46 = vmax.f32 %v3395_v35, 0.0  ;;  %v3393_v61 = vadd.f32 %v3234_v62, %v2715_v43  ;;  %v2718_v30 = vadd.f32 %v4667_v14, %v5936_v24 }
 0x1cc   :  { %v3237_v16 = vpop.f32.mrf.mxu0  ;;  %v2559_v0 = vpop.f32.mrf.mxu1 }
 0x1cd   :  { %3775 = vst.msk [vmem:[%s6352_s7 + $0x74] sm:$0xf] %vm3745_vm2, %v4232_v36  ;;  %v4237_v63 = vpack.c.bf16 %v3459_v46, %v3459_v46  ;;  %v3457_v27 = vmax.f32 %v3393_v61, 0.0  ;;  %v3396_v29 = vadd.f32 %v4733_v34, %v2718_v30  ;;  %v2716_v28 = vadd.f32 %v2559_v0, %v5939_v40 }
 0x1ce   :  { %v4736_v33 = vpop.f32.mrf.mxu0  ;;  %v4670_v50 = vpop.f32.mrf.mxu1 }
 0x1cf   :  { %3780 = vst.msk [vmem:[%s6352_s7 + $0x88] sm:$0xf] %vm3745_vm2, %v4237_v63  ;;  %v4235_v24 = vpack.c.bf16 %v3457_v27, %v3457_v27  ;;  %v3460_v49 = vmax.f32 %v3396_v29, 0.0  ;;  %v3394_v41 = vadd.f32 %v3237_v16, %v2716_v28  ;;  %v2721_v18 = vadd.f32 %v4670_v50, %v5942_v23 }
 0x1d0   :  { %v3250_v11 = vpop.f32.mrf.mxu0  ;;  %v2572_v38 = vpop.f32.mrf.mxu1 }
 0x1d1   :  { %3778 = vst.msk [vmem:[%s6352_s7 + $0x80] sm:$0xf] %vm3745_vm2, %v4235_v24  ;;  %v4238_v40 = vpack.c.bf16 %v3460_v49, %v3460_v49  ;;  %v3458_v4 = vmax.f32 %v3394_v41, 0.0  ;;  %v3399_v59 = vadd.f32 %v4736_v33, %v2721_v18  ;;  %v2719_v47 = vadd.f32 %v2572_v38, %v5945_v21  ;;  %v6408_v49 = vld [vmem:[#allocation21_spill] sm:$0xff] }
 0x1d2   :  { %v4737_v19 = vpop.f32.mrf.mxu0  ;;  %v4671_v25 = vpop.f32.mrf.mxu1 }
 0x1d3   :  { %3781 = vst.msk [vmem:[%s6352_s7 + $0x8c] sm:$0xf] %vm3745_vm2, %v4238_v40  ;;  %v4236_v23 = vpack.c.bf16 %v3458_v4, %v3458_v4  ;;  %v3463_v22 = vmax.f32 %v3399_v59, 0.0  ;;  %v3397_v56 = vadd.f32 %v3250_v11, %v2719_v47  ;;  %v2722_v44 = vadd.f32 %v4671_v25, %v5948_v5  ;;  %v6409_v4 = vld [vmem:[#allocation2_spill] sm:$0xff] }
 0x1d4   :  { %v3253_v37 = vpop.f32.mrf.mxu0  ;;  %v2575_v17 = vpop.f32.mrf.mxu1 }
 0x1d5   :  { %3779 = vst.msk [vmem:[%s6352_s7 + $0x84] sm:$0xf] %vm3745_vm2, %v4236_v23  ;;  %v4241_v21 = vpack.c.bf16 %v3463_v22, %v3463_v22  ;;  %v3461_v58 = vmax.f32 %v3397_v56, 0.0  ;;  %v3400_v12 = vadd.f32 %v4737_v19, %v2722_v44  ;;  %v2720_v42 = vadd.f32 %v2575_v17, %v5951_v31  ;;  %v6410_v56 = vld [vmem:[#allocation3_spill] sm:$0xff] }
 0x1d6   :  { %v4740_v13 = vpop.f32.mrf.mxu0  ;;  %v4674_v10 = vpop.f32.mrf.mxu1 }
 0x1d7   :  { %3784 = vst.msk [vmem:[%s6352_s7 + $0x98] sm:$0xf] %vm3745_vm2, %v4241_v21  ;;  %v4239_v5 = vpack.c.bf16 %v3461_v58, %v3461_v58  ;;  %v3464_v3 = vmax.f32 %v3400_v12, 0.0  ;;  %v3398_v8 = vadd.f32 %v3253_v37, %v2720_v42  ;;  %v2725_v6 = vadd.f32 %v4674_v10, %v5954_v55  ;;  %v6411_v42 = vld [vmem:[#allocation4_spill] sm:$0xff] }
 0x1d8   :  { %v3266_v52 = vpop.f32.mrf.mxu0  ;;  %v2588_v32 = vpop.f32.mrf.mxu1 }
 0x1d9   :  { %3782 = vst.msk [vmem:[%s6352_s7 + $0x90] sm:$0xf] %vm3745_vm2, %v4239_v5  ;;  %v4242_v31 = vpack.c.bf16 %v3464_v3, %v3464_v3  ;;  %v3462_v53 = vmax.f32 %v3398_v8, 0.0  ;;  %v3403_v57 = vadd.f32 %v4740_v13, %v2725_v6  ;;  %v2723_v45 = vadd.f32 %v2588_v32, %v5957_v7 }
 0x1da   :  { %v4741_v51 = vpop.f32.mrf.mxu0  ;;  %v4675_v1 = vpop.f32.mrf.mxu1 }
 0x1db   :  { %3785 = vst.msk [vmem:[%s6352_s7 + $0x9c] sm:$0xf] %vm3745_vm2, %v4242_v31  ;;  %v4240_v55 = vpack.c.bf16 %v3462_v53, %v3462_v53  ;;  %v3467_v15 = vmax.f32 %v3403_v57, 0.0  ;;  %v3401_v62 = vadd.f32 %v3266_v52, %v2723_v45  ;;  %v2726_v20 = vadd.f32 %v4675_v1, %v5960_v2  ;;  %v6412_v52 = vld [vmem:[#allocation5_spill] sm:$0xff]  ;;  %v6413_v1 = vld [vmem:[#allocation6_spill] sm:$0xff] }
 0x1dc   :  { %v3269_v39 = vpop.f32.mrf.mxu0  ;;  %v2591_v54 = vpop.f32.mrf.mxu1 }
 0x1dd   :  { %3783 = vst.msk [vmem:[%s6352_s7 + $0x94] sm:$0xf] %vm3745_vm2, %v4240_v55  ;;  %v4245_v7 = vpack.c.bf16 %v3467_v15, %v3467_v15  ;;  %v3465_v35 = vmax.f32 %v3401_v62, 0.0  ;;  %v3404_v43 = vadd.f32 %v4741_v51, %v2726_v20  ;;  %v2724_v34 = vadd.f32 %v2591_v54, %v5963_v48 }
 0x1de   :  { %v4744_v14 = vpop.f32.mrf.mxu0  ;;  %v4678_v36 = vpop.f32.mrf.mxu1 }
 0x1df   :  { %3788 = vst.msk [vmem:[%s6352_s7 + $0xa8] sm:$0xf] %vm3745_vm2, %v4245_v7  ;;  %v4243_v2 = vpack.c.bf16 %v3465_v35, %v3465_v35  ;;  %v3468_v46 = vmax.f32 %v3404_v43, 0.0  ;;  %v3402_v61 = vadd.f32 %v3269_v39, %v2724_v34  ;;  %v2729_v30 = vadd.f32 %v4678_v36, %v5966_v9  ;;  %v6414_v7 = vld [vmem:[#allocation7_spill] sm:$0xff] }
 0x1e0   :  { %v3282_v16 = vpop.f32.mrf.mxu0  ;;  %v2604_v0 = vpop.f32.mrf.mxu1 }
 0x1e1   :  { %3786 = vst.msk [vmem:[%s6352_s7 + $0xa0] sm:$0xf] %vm3745_vm2, %v4243_v2  ;;  %v4246_v48 = vpack.c.bf16 %v3468_v46, %v3468_v46  ;;  %v3466_v63 = vmax.f32 %v3402_v61, 0.0  ;;  %v3407_v27 = vadd.f32 %v4744_v14, %v2729_v30  ;;  %v2727_v29 = vadd.f32 %v2604_v0, %v5969_v26  ;;  %v6415_v46 = vld [vmem:[#allocation8_spill] sm:$0xff] }
 0x1e2   :  { %v4745_v28 = vpop.f32.mrf.mxu0  ;;  %v4679_v33 = vpop.f32.mrf.mxu1 }
 0x1e3   :  { %3789 = vst.msk [vmem:[%s6352_s7 + $0xac] sm:$0xf] %vm3745_vm2, %v4246_v48  ;;  %v4244_v9 = vpack.c.bf16 %v3466_v63, %v3466_v63  ;;  %v3471_v50 = vmax.f32 %v3407_v27, 0.0  ;;  %v3405_v24 = vadd.f32 %v3282_v16, %v2727_v29  ;;  %v2730_v41 = vadd.f32 %v4679_v33, %v6408_v49  ;;  %v6416_v27 = vld [vmem:[#allocation9_spill] sm:$0xff]  ;;  %v6417_v49 = vld [vmem:[#allocation10_spill] sm:$0xff] }
 0x1e4   :  { %v3285_v18 = vpop.f32.mrf.mxu0  ;;  %v2607_v11 = vpop.f32.mrf.mxu1 }
 0x1e5   :  { %3787 = vst.msk [vmem:[%s6352_s7 + $0xa4] sm:$0xf] %vm3745_vm2, %v4244_v9  ;;  %v4249_v26 = vpack.c.bf16 %v3471_v50, %v3471_v50  ;;  %v3469_v38 = vmax.f32 %v3405_v24, 0.0  ;;  %v3408_v40 = vadd.f32 %v4745_v28, %v2730_v41  ;;  %v2728_v59 = vadd.f32 %v2607_v11, %v6409_v4  ;;  %v6418_v4 = vld [vmem:[#allocation11_spill] sm:$0xff] }
 0x1e6   :  { %v4748_v47 = vpop.f32.mrf.mxu0  ;;  %v4682_v19 = vpop.f32.mrf.mxu1 }
 0x1e7   :  { %3792 = vst.msk [vmem:[%s6352_s7 + $0xb8] sm:$0xf] %vm3745_vm2, %v4249_v26  ;;  %v4247_v25 = vpack.c.bf16 %v3469_v38, %v3469_v38  ;;  %v3472_v23 = vmax.f32 %v3408_v40, 0.0  ;;  %v3406_v22 = vadd.f32 %v3285_v18, %v2728_v59  ;;  %v2733_v44 = vadd.f32 %v4682_v19, %v6410_v56  ;;  %v6419_v56 = vld [vmem:[#allocation12_spill] sm:$0xff] }
 0x1e8   :  { %v3298_v37 = vpop.f32.mrf.mxu0  ;;  %v2620_v17 = vpop.f32.mrf.mxu1 }
 0x1e9   :  { %3790 = vst.msk [vmem:[%s6352_s7 + $0xb0] sm:$0xf] %vm3745_vm2, %v4247_v25  ;;  %v4250_v21 = vpack.c.bf16 %v3472_v23, %v3472_v23  ;;  %v3470_v58 = vmax.f32 %v3406_v22, 0.0  ;;  %v3411_v12 = vadd.f32 %v4748_v47, %v2733_v44  ;;  %v2731_v13 = vadd.f32 %v2620_v17, %v6411_v42  ;;  %v6420_v42 = vld [vmem:[#allocation13_spill] sm:$0xff] }
 0x1ea   :  { %v4749_v10 = vpop.f32.mrf.mxu0  ;;  %v4683_v5 = vpop.f32.mrf.mxu1 }
 0x1eb   :  { %3793 = vst.msk [vmem:[%s6352_s7 + $0xbc] sm:$0xf] %vm3745_vm2, %v4250_v21  ;;  %v4248_v3 = vpack.c.bf16 %v3470_v58, %v3470_v58  ;;  %v3475_v8 = vmax.f32 %v3411_v12, 0.0  ;;  %v3409_v6 = vadd.f32 %v3298_v37, %v2731_v13  ;;  %v2734_v32 = vadd.f32 %v4683_v5, %v6412_v52  ;;  %v6421_v52 = vld [vmem:[#allocation14_spill] sm:$0xff] }
 0x1ec   :  { %v3301_v31 = vpop.f32.mrf.mxu0  ;;  %v2623_v53 = vpop.f32.mrf.mxu1 }
 0x1ed   :  { %3791 = vst.msk [vmem:[%s6352_s7 + $0xb4] sm:$0xf] %vm3745_vm2, %v4248_v3  ;;  %v4253_v57 = vpack.c.bf16 %v3475_v8, %v3475_v8  ;;  %v3473_v45 = vmax.f32 %v3409_v6, 0.0  ;;  %v3412_v51 = vadd.f32 %v4749_v10, %v2734_v32  ;;  %v2732_v55 = vadd.f32 %v2623_v53, %v6413_v1  ;;  %v6422_v1 = vld [vmem:[#allocation15_spill] sm:$0xff] }
 0x1ee   :  { %v4752_v15 = vpop.f32.mrf.mxu0  ;;  %v4686_v62 = vpop.f32.mrf.mxu1 }
 0x1ef   :  { %3796 = vst.msk [vmem:[%s6352_s7 + $0xc8] sm:$0xf] %vm3745_vm2, %v4253_v57  ;;  %v4251_v20 = vpack.c.bf16 %v3473_v45, %v3473_v45  ;;  %v3476_v39 = vmax.f32 %v3412_v51, 0.0  ;;  %v3410_v54 = vadd.f32 %v3301_v31, %v2732_v55  ;;  %v2737_v35 = vadd.f32 %v4686_v62, %v6414_v7  ;;  %v6423_v7 = vld [vmem:[#allocation16_spill] sm:$0xff] }
 0x1f0   :  { %v3314_v43 = vpop.f32.mrf.mxu0  ;;  %v2636_v34 = vpop.f32.mrf.mxu1 }
 0x1f1   :  { %3794 = vst.msk [vmem:[%s6352_s7 + $0xc0] sm:$0xf] %vm3745_vm2, %v4251_v20  ;;  %v4254_v14 = vpack.c.bf16 %v3476_v39, %v3476_v39  ;;  %v3474_v36 = vmax.f32 %v3410_v54, 0.0  ;;  %v3415_v2 = vadd.f32 %v4752_v15, %v2737_v35  ;;  %v2735_v61 = vadd.f32 %v2636_v34, %v6415_v46  ;;  %v6424_v46 = vld [vmem:[#allocation17_spill] sm:$0xff] }
 0x1f2   :  { %v4753_v30 = vpop.f32.mrf.mxu0  ;;  %v4687_v16 = vpop.f32.mrf.mxu1 }
 0x1f3   :  { %3797 = vst.msk [vmem:[%s6352_s7 + $0xcc] sm:$0xf] %vm3745_vm2, %v4254_v14  ;;  %v4252_v0 = vpack.c.bf16 %v3474_v36, %v3474_v36  ;;  %v3479_v48 = vmax.f32 %v3415_v2, 0.0  ;;  %v3413_v63 = vadd.f32 %v3314_v43, %v2735_v61  ;;  %v2738_v29 = vadd.f32 %v4687_v16, %v6416_v27 }
 0x1f4   :  { %v3317_v28 = vpop.f32.mrf.mxu0  ;;  %v2639_v33 = vpop.f32.mrf.mxu1 }
 0x1f5   :  { %3795 = vst.msk [vmem:[%s6352_s7 + $0xc4] sm:$0xf] %vm3745_vm2, %v4252_v0  ;;  %v4257_v9 = vpack.c.bf16 %v3479_v48, %v3479_v48  ;;  %v3477_v50 = vmax.f32 %v3413_v63, 0.0  ;;  %v3416_v24 = vadd.f32 %v4753_v30, %v2738_v29  ;;  %v2736_v41 = vadd.f32 %v2639_v33, %v6417_v49 }
 0x1f6   :  { %v4756_v18 = vpop.f32.mrf.mxu0  ;;  %v4690_v11 = vpop.f32.mrf.mxu1 }
 0x1f7   :  { %3800 = vst.msk [vmem:[%s6352_s7 + $0xd8] sm:$0xf] %vm3745_vm2, %v4257_v9  ;;  %v4255_v26 = vpack.c.bf16 %v3477_v50, %v3477_v50  ;;  %v3480_v38 = vmax.f32 %v3416_v24, 0.0  ;;  %v3414_v40 = vadd.f32 %v3317_v28, %v2736_v41  ;;  %v2741_v59 = vadd.f32 %v4690_v11, %v6418_v4 }
 0x1f8   :  { %v3330_v47 = vpop.f32.mrf.mxu0  ;;  %v2652_v19 = vpop.f32.mrf.mxu1 }
 0x1f9   :  { %3798 = vst.msk [vmem:[%s6352_s7 + $0xd0] sm:$0xf] %vm3745_vm2, %v4255_v26  ;;  %v4258_v25 = vpack.c.bf16 %v3480_v38, %v3480_v38  ;;  %v3478_v23 = vmax.f32 %v3414_v40, 0.0  ;;  %v3419_v22 = vadd.f32 %v4756_v18, %v2741_v59  ;;  %v2739_v44 = vadd.f32 %v2652_v19, %v6419_v56 }
 0x1fa   :  { %v4757_v37 = vpop.f32.mrf.mxu0  ;;  %v4691_v17 = vpop.f32.mrf.mxu1 }
 0x1fb   :  { %3801 = vst.msk [vmem:[%s6352_s7 + $0xdc] sm:$0xf] %vm3745_vm2, %v4258_v25  ;;  %v4256_v21 = vpack.c.bf16 %v3478_v23, %v3478_v23  ;;  %v3483_v58 = vmax.f32 %v3419_v22, 0.0  ;;  %v3417_v12 = vadd.f32 %v3330_v47, %v2739_v44  ;;  %v2742_v13 = vadd.f32 %v4691_v17, %v6420_v42 }
 0x1fc   :  { %v3333_v10 = vpop.f32.mrf.mxu0  ;;  %v2655_v5 = vpop.f32.mrf.mxu1 }
 0x1fd   :  { %3799 = vst.msk [vmem:[%s6352_s7 + $0xd4] sm:$0xf] %vm3745_vm2, %v4256_v21  ;;  %v4261_v3 = vpack.c.bf16 %v3483_v58, %v3483_v58  ;;  %v3481_v8 = vmax.f32 %v3417_v12, 0.0  ;;  %v3420_v6 = vadd.f32 %v4757_v37, %v2742_v13  ;;  %v2740_v32 = vadd.f32 %v2655_v5, %v6421_v52 }
 0x1fe   :  { %v4760_v31 = vpop.f32.mrf.mxu0  ;;  %v4694_v53 = vpop.f32.mrf.mxu1 }
 0x1ff   :  { %3804 = vst.msk [vmem:[%s6352_s7 + $0xe8] sm:$0xf] %vm3745_vm2, %v4261_v3  ;;  %v4259_v57 = vpack.c.bf16 %v3481_v8, %v3481_v8  ;;  %v3484_v45 = vmax.f32 %v3420_v6, 0.0  ;;  %v3418_v51 = vadd.f32 %v3333_v10, %v2740_v32  ;;  %v2745_v55 = vadd.f32 %v4694_v53, %v6422_v1 }
 0x200   :  { %v3346_v15 = vpop.f32.mrf.mxu0  ;;  %v2668_v62 = vpop.f32.mrf.mxu1 }
 0x201   :  { %3802 = vst.msk [vmem:[%s6352_s7 + $0xe0] sm:$0xf] %vm3745_vm2, %v4259_v57  ;;  %v4262_v20 = vpack.c.bf16 %v3484_v45, %v3484_v45  ;;  %v3482_v39 = vmax.f32 %v3418_v51, 0.0  ;;  %v3423_v54 = vadd.f32 %v4760_v31, %v2745_v55  ;;  %v2743_v35 = vadd.f32 %v2668_v62, %v6423_v7 }
 0x202   :  { %v4695_v43 = vpop.f32.mrf.mxu1  ;;  %v4761_v34 = vpop.f32.mrf.mxu0 }
 0x203   :  { %3805 = vst.msk [vmem:[%s6352_s7 + $0xec] sm:$0xf] %vm3745_vm2, %v4262_v20  ;;  %v4260_v14 = vpack.c.bf16 %v3482_v39, %v3482_v39  ;;  %v3487_v36 = vmax.f32 %v3423_v54, 0.0  ;;  %v3421_v2 = vadd.f32 %v3346_v15, %v2743_v35  ;;  %v2746_v61 = vadd.f32 %v4695_v43, %v6424_v46 }
 0x204   :  { %v2671_v30 = vpop.f32.mrf.mxu1  ;;  %v3349_v27 = vpop.f32.mrf.mxu0 }
 0x205   :  { %3803 = vst.msk [vmem:[%s6352_s7 + $0xe4] sm:$0xf] %vm3745_vm2, %v4260_v14  ;;  %v4265_v16 = vpack.c.bf16 %v3487_v36, %v3487_v36  ;;  %v3485_v0 = vmax.f32 %v3421_v2, 0.0  ;;  %v3424_v48 = vadd.f32 %v4761_v34, %v2746_v61  ;;  %v2744_v63 = vadd.f32 %v2671_v30, %v6023_v60 }
 0x207   :  { %3808 = vst.msk [vmem:[%s6352_s7 + $0xf8] sm:$0xf] %vm3745_vm2, %v4265_v16  ;;  %v4263_v29 = vpack.c.bf16 %v3485_v0, %v3485_v0  ;;  %v3488_v28 = vmax.f32 %v3424_v48, 0.0  ;;  %v3422_v33 = vadd.f32 %v3349_v27, %v2744_v63 }
 0x209   :  { %3806 = vst.msk [vmem:[%s6352_s7 + $0xf0] sm:$0xf] %vm3745_vm2, %v4263_v29  ;;  %v4266_v9 = vpack.c.bf16 %v3488_v28, %v3488_v28  ;;  %v3486_v50 = vmax.f32 %v3422_v33, 0.0 }
 0x20b   :  { %3809 = vst.msk [vmem:[%s6352_s7 + $0xfc] sm:$0xf] %vm3745_vm2, %v4266_v9  ;;  %v4264_v60 = vpack.c.bf16 %v3486_v50, %v3486_v50 }
 0x20d   :  { %3807 = vst.msk [vmem:[%s6352_s7 + $0xf4] sm:$0xf] %vm3745_vm2, %v4264_v60 }

</bundles_post_ra>
